<compile_context>
chip_gen: v5e
topology: v5e:2x2
jax: 0.10.0
libtpu: 0.0.40
codegen_flags: <defaults>
</compile_context>

<pallas_src>
import math
import functools

import jax
import jax.numpy as jnp
from jax.experimental import pallas as pl
from jax.experimental.pallas import tpu as pltpu


# ---------------------------------------------------------------------------
# Fused decoder-layer kernel (one block of batch elements per grid step)
# ---------------------------------------------------------------------------
def _decoder_layer_kernel(
        tgt_ref, mem_ref, qpos_ref, pos_ref,
        w_sqk_ref, w_sv_ref, w_so_ref,
        w_cq_ref, w_ck_ref, w_cv_ref, w_co_ref,
        w_f1_ref, w_f2_ref,
        bvec_ref, bff1_ref,
        out_ref, *, num_heads, head_dim, bblk):
    f32, bf16 = jnp.float32, jnp.bfloat16
    nH, d, Bblk = num_heads, head_dim, bblk
    H = nH * d
    St = tgt_ref.shape[1]
    Sm = mem_ref.shape[1]
    M = Bblk * St            # query rows per step
    Mk = Bblk * Sm           # key rows per step
    HB = nH * Bblk           # merged (head, batch) batch dim for attention einsums

    # bf16 activation streams -> f32 for residual / LayerNorm math.
    x = tgt_ref[...].astype(f32).reshape(M, H)
    qp = qpos_ref[...].astype(f32).reshape(M, H)
    mem = mem_ref[...].astype(f32).reshape(Mk, H)
    pp = pos_ref[...].astype(f32).reshape(Mk, H)

    bvt = bvec_ref[...]                                   # (16, H) packed biases / LN params

    def mm(a, w_ref, b):
        # Big-M matmul: bf16 operands, f32 accumulation, f32 bias add.
        return jnp.dot(a.astype(bf16), w_ref[...], preferred_element_type=f32) + b

    def heads(z2d, n_heads, seq):
        # (rows, n_heads*d) -> (n_heads*Bblk, seq, d); merged batch index = h*Bblk + b.
        z3 = pltpu.einshape("mhd->hmd", z2d.reshape(z2d.shape[0], n_heads, d))
        return z3.reshape(n_heads * Bblk, seq, d)

    def attention(q_hb, k_hb, v_hb):
        # Scale already folded into the Q projection weights in the wrapper.
        s = jnp.einsum("bqd,bkd->bqk", q_hb.astype(bf16), k_hb.astype(bf16),
                       preferred_element_type=f32)
        m_ = jnp.max(s, axis=-1, keepdims=True)
        e = jnp.exp(s - m_)
        p = e * pl.reciprocal(jnp.sum(e, axis=-1, keepdims=True), approx=True)
        # TODO(synk): attention dropout is identity in eval mode.
        return jnp.einsum("bqk,bkd->bqd", p.astype(bf16), v_hb.astype(bf16),
                          preferred_element_type=f32)

    def out_proj(ctx_hb, w_ref, b):
        # Per-head accumulating dots (K=d each) == concat-heads @ Wo, but without the
        # hqd->qhd transpose.  Leading-dim slices + 2D dots only (static unrolled loop).
        acc = jnp.zeros((M, H), f32)
        for h in range(nH):
            chunk = ctx_hb[h * Bblk:(h + 1) * Bblk].reshape(M, d).astype(bf16)
            acc += jnp.dot(chunk, w_ref[h * d:(h + 1) * d, :],
                           preferred_element_type=f32)
        return acc + b

    def layer_norm(z, g, b, eps=1e-5):
        mu = jnp.mean(z, axis=-1, keepdims=True)
        zc = z - mu
        var = jnp.mean(zc * zc, axis=-1, keepdims=True)
        return zc * jax.lax.rsqrt(var + eps) * g + b

    # -------- self attention: q = k = tgt + query_pos, v = tgt --------
    b_qk = jnp.concatenate([bvt[0:1, :], bvt[1:2, :]], axis=1)          # (1, 2H)
    qk2d = mm(x + qp, w_sqk_ref, b_qk)                                  # fused Q|K, (M, 2H)
    qk_h = heads(qk2d, 2 * nH, St)                                      # (2*HB, St, d)
    v_h = heads(mm(x, w_sv_ref, bvt[2:3, :]), nH, St)                   # (HB, St, d)
    ctx = attention(qk_h[:HB], qk_h[HB:], v_h)                          # (HB, St, d)
    x1 = layer_norm(x + out_proj(ctx, w_so_ref, bvt[3:4, :]),
                    bvt[9:10, :], bvt[10:11, :])

    # -------- cross attention: q = x1 + query_pos, k = memory + pos, v = memory --------
    cq_h = heads(mm(x1 + qp, w_cq_ref, bvt[4:5, :]), nH, St)
    ck_h = heads(mm(mem + pp, w_ck_ref, bvt[5:6, :]), nH, Sm)
    cv_h = heads(mm(mem, w_cv_ref, bvt[6:7, :]), nH, Sm)
    ctx2 = attention(cq_h, ck_h, cv_h)
    x2 = layer_norm(x1 + out_proj(ctx2, w_co_ref, bvt[7:8, :]),
                    bvt[11:12, :], bvt[12:13, :])

    # -------- feed-forward (relu) --------
    hdn = jnp.maximum(mm(x2, w_f1_ref, bff1_ref[...]), 0.0)
    x3 = layer_norm(x2 + mm(hdn, w_f2_ref, bvt[8:9, :]),
                    bvt[13:14, :], bvt[14:15, :])

    # Single (Bblk, S_t, H) store per grid step.
    # TODO(synk): for H < 128 a lane-dense (Bblk, St*H) out_spec would avoid masked stores.
    out_ref[...] = x3.reshape(Bblk, St, H)


# ---------------------------------------------------------------------------
# Wrapper helpers
# ---------------------------------------------------------------------------
def _vmem_limit_bytes():
    """Per-generation VMEM budget (v5e/v6e: up to 96 MiB, v7x: ~48 MiB)."""
    cap = 64 * 1024 * 1024
    try:
        info = pltpu.get_tpu_info()
        cap = int(getattr(info, "vmem_capacity_bytes", cap) or cap)
    except Exception:
        pass
    return int(min(cap * 3 // 4, 96 * 1024 * 1024))


def _choose_block_batch(B, St, Sm, H, F, nH):
    """Largest divisor of B whose per-step working set is comfortable and whose
    matmul M dim (Bblk*St) reaches ~256 rows."""
    def step_bytes(bb):
        m, mk = bb * St, bb * Sm
        act_in = 2 * 2 * (m + mk) * H * 2                    # bf16 inputs, double-buffered
        scores = 3 * nH * bb * St * (Sm + St) * 4            # s / exp / probs f32
        interm = 4 * m * max(F, 2 * H) * 4                   # projections, FFN hidden
        return act_in + scores + interm

    target = max(1, -(-256 // St))                           # ceil(256 / St) rows
    best = 1
    for bb in range(1, B + 1):
        if B % bb:
            continue
        if step_bytes(bb) > 20 * 1024 * 1024:
            break
        best = bb
        if bb >= target:
            break
    return best


# ---------------------------------------------------------------------------
# Wrapper
# ---------------------------------------------------------------------------
def transformer_decoder_layer(tgt, memory, params, *, num_heads,
                              query_pos=None, pos=None, block_batch=None):
    """tgt: (S_t, B, H), memory: (S_m, B, H) — returns (S_t, B, H) float32."""
    St, B, H = tgt.shape
    Sm = memory.shape[0]
    assert H % num_heads == 0
    d = H // num_heads
    F = params["w_ff1"].shape[1]
    bf16, f32 = jnp.bfloat16, jnp.float32
    inv = 1.0 / math.sqrt(d)

    if query_pos is None:
        query_pos = jnp.zeros_like(tgt)
    if pos is None:
        pos = jnp.zeros_like(memory)

    # Batch-major + bf16 activation DMA (residual/LN math stays f32 in-kernel).
    to_bm = lambda a: jnp.transpose(a, (1, 0, 2)).astype(bf16)
    tgt_b, mem_b = to_bm(tgt), to_bm(memory)
    qpos_b, pos_b = to_bm(query_pos), to_bm(pos)

    # Weights (bf16 MXU operands).  1/sqrt(d) folded into the Q halves.
    w_sqk = jnp.concatenate([params["w_sa_q"] * inv, params["w_sa_k"]], axis=1).astype(bf16)
    w_sv = params["w_sa_v"].astype(bf16)
    w_so = params["w_sa_o"].astype(bf16)
    w_cq = (params["w_ca_q"] * inv).astype(bf16)
    w_ck = params["w_ca_k"].astype(bf16)
    w_cv = params["w_ca_v"].astype(bf16)
    w_co = params["w_ca_o"].astype(bf16)
    w_f1 = params["w_ff1"].astype(bf16)
    w_f2 = params["w_ff2"].astype(bf16)

    # Packed bias / LayerNorm table: 15 used rows + 1 pad row -> (16, H) f32.
    bvec = jnp.stack([
        params["b_sa_q"] * inv, params["b_sa_k"], params["b_sa_v"], params["b_sa_o"],
        params["b_ca_q"] * inv, params["b_ca_k"], params["b_ca_v"], params["b_ca_o"],
        params["b_ff2"],
        params["ln1_g"], params["ln1_b"],
        params["ln2_g"], params["ln2_b"],
        params["ln3_g"], params["ln3_b"],
        jnp.zeros((H,), f32),
    ]).astype(f32)
    bff1 = params["b_ff1"].reshape(1, F).astype(f32)

    weights = [w_sqk, w_sv, w_so, w_cq, w_ck, w_cv, w_co, w_f1, w_f2, bvec, bff1]

    Bblk = block_batch or _choose_block_batch(B, St, Sm, H, F, num_heads)
    assert B % Bblk == 0
    grid = (B // Bblk,)

    kernel = functools.partial(_decoder_layer_kernel,
                               num_heads=num_heads, head_dim=d, bblk=Bblk)

    def act_spec(S):
        return pl.BlockSpec((Bblk, S, H), lambda b: (b, 0, 0))

    def const_spec(arr, single_buffer):
        idx = lambda b, _n=arr.ndim: (0,) * _n
        if single_buffer:
            # Grid-constant operands: no point double-buffering them.
            return pl.BlockSpec(arr.shape, idx, pipeline_mode=pl.Buffered(1))
        return pl.BlockSpec(arr.shape, idx)

    def run(single_buffer_weights):
        return pl.pallas_call(
            kernel,
            out_shape=jax.ShapeDtypeStruct((B, St, H), f32),
            grid_spec=pltpu.PrefetchScalarGridSpec(
                num_scalar_prefetch=0,
                grid=grid,
                in_specs=[act_spec(St), act_spec(Sm), act_spec(St), act_spec(Sm)]
                         + [const_spec(w, single_buffer_weights) for w in weights],
                out_specs=pl.BlockSpec((Bblk, St, H), lambda b: (b, 0, 0)),
            ),
            compiler_params=pltpu.CompilerParams(
                dimension_semantics=("parallel",),
                vmem_limit_bytes=_vmem_limit_bytes(),
            ),
        )(tgt_b, mem_b, qpos_b, pos_b, *weights)

    try:
        out_b = run(True)
    except Exception:
        # Fallback for runtimes that reject single-buffered (Buffered(1)) inputs.
        out_b = run(False)

    return jnp.transpose(out_b, (1, 0, 2))                  # back to (S_t, B, H)


# ---------------------------------------------------------------------------
# Pure-JAX reference (forward_post, eval mode).  Mirrors the kernel's numeric
# policy (bf16 activation DMA, bf16 MXU operands / f32 accumulation, scale folded
# into the Q projection) so the comparison isolates structural kernel bugs.
# The expected deviation from PyTorch's all-f32 math is the bf16 rounding.
# ---------------------------------------------------------------------------
def _reference(tgt, memory, params, *, num_heads, query_pos=None, pos=None):
    H = tgt.shape[-1]
    d = H // num_heads
    bf16, f32 = jnp.bfloat16, jnp.float32
    inv = 1.0 / math.sqrt(d)
    if query_pos is None:
        query_pos = jnp.zeros_like(tgt)
    if pos is None:
        pos = jnp.zeros_like(memory)
    cast = lambda a: a.astype(bf16).astype(f32)              # mirror bf16 activation DMA
    tgt, memory, query_pos, pos = cast(tgt), cast(memory), cast(query_pos), cast(pos)

    def mm(x, w, b):
        return jnp.dot(x.astype(bf16), w.astype(bf16),
                       preferred_element_type=f32) + b

    def ln(x, g, b, eps=1e-5):
        mu = jnp.mean(x, axis=-1, keepdims=True)
        xc = x - mu
        var = jnp.mean(xc * xc, axis=-1, keepdims=True)
        return xc * jax.lax.rsqrt(var + eps) * g + b

    def mha(q_in, k_in, v_in, pre):
        Sq, B, _ = q_in.shape
        Sk = k_in.shape[0]
        q = mm(q_in, params[f"w_{pre}_q"] * inv, params[f"b_{pre}_q"] * inv)
        k = mm(k_in, params[f"w_{pre}_k"], params[f"b_{pre}_k"])
        v = mm(v_in, params[f"w_{pre}_v"], params[f"b_{pre}_v"])
        split = lambda z, S: z.reshape(S, B, num_heads, d).transpose(1, 2, 0, 3)
        qh, kh, vh = split(q, Sq), split(k, Sk), split(v, Sk)
        s = jnp.einsum("bhqd,bhkd->bhqk", qh.astype(bf16), kh.astype(bf16),
                       preferred_element_type=f32)
        p = jax.nn.softmax(s, axis=-1)
        ctx = jnp.einsum("bhqk,bhkd->bhqd", p.astype(bf16), vh.astype(bf16),
                         preferred_element_type=f32)
        ctx = ctx.transpose(2, 0, 1, 3).reshape(Sq, B, H)
        return mm(ctx, params[f"w_{pre}_o"], params[f"b_{pre}_o"])

    x = tgt
    x = ln(x + mha(x + query_pos, x + query_pos, x, "sa"),
           params["ln1_g"], params["ln1_b"])
    x = ln(x + mha(x + query_pos, memory + pos, memory, "ca"),
           params["ln2_g"], params["ln2_b"])
    h = jnp.maximum(mm(x, params["w_ff1"], params["b_ff1"]), 0.0)
    return ln(x + mm(h, params["w_ff2"], params["b_ff2"]),
              params["ln3_g"], params["ln3_b"])


if __name__ == "__main__":
    D_MODEL, NHEAD, DIM_FF = 32, 4, 64
    S_T, S_M, B = 8, 16, 2

    keys = iter(jax.random.split(jax.random.PRNGKey(0), 40))

    def nrm(shape, scale=1.0):
        return jax.random.normal(next(keys), shape, jnp.float32) * scale

    ws = 1.0 / math.sqrt(D_MODEL)
    fs = 1.0 / math.sqrt(DIM_FF)

    params = dict(
        w_sa_q=nrm((D_MODEL, D_MODEL), ws), b_sa_q=nrm((D_MODEL,), ws),
        w_sa_k=nrm((D_MODEL, D_MODEL), ws), b_sa_k=nrm((D_MODEL,), ws),
        w_sa_v=nrm((D_MODEL, D_MODEL), ws), b_sa_v=nrm((D_MODEL,), ws),
        w_sa_o=nrm((D_MODEL, D_MODEL), ws), b_sa_o=nrm((D_MODEL,), ws),
        w_ca_q=nrm((D_MODEL, D_MODEL), ws), b_ca_q=nrm((D_MODEL,), ws),
        w_ca_k=nrm((D_MODEL, D_MODEL), ws), b_ca_k=nrm((D_MODEL,), ws),
        w_ca_v=nrm((D_MODEL, D_MODEL), ws), b_ca_v=nrm((D_MODEL,), ws),
        w_ca_o=nrm((D_MODEL, D_MODEL), ws), b_ca_o=nrm((D_MODEL,), ws),
        w_ff1=nrm((D_MODEL, DIM_FF), ws), b_ff1=nrm((DIM_FF,), ws),
        w_ff2=nrm((DIM_FF, D_MODEL), fs), b_ff2=nrm((D_MODEL,), fs),
        ln1_g=1.0 + nrm((D_MODEL,), 0.1), ln1_b=nrm((D_MODEL,), 0.1),
        ln2_g=1.0 + nrm((D_MODEL,), 0.1), ln2_b=nrm((D_MODEL,), 0.1),
        ln3_g=1.0 + nrm((D_MODEL,), 0.1), ln3_b=nrm((D_MODEL,), 0.1),
    )

    tgt = nrm((S_T, B, D_MODEL))
    memory = nrm((S_M, B, D_MODEL))
    query_pos = nrm((S_T, B, D_MODEL))
    pos = nrm((S_M, B, D_MODEL))

    out = transformer_decoder_layer(tgt, memory, params, num_heads=NHEAD,
                                    query_pos=query_pos, pos=pos)
    out = jax.block_until_ready(out)

    ref = _reference(tgt, memory, params, num_heads=NHEAD,
                     query_pos=query_pos, pos=pos)
    # Tolerance covers the approx softmax reciprocal + f32 accumulation-order deltas.
    err = float(jnp.max(jnp.abs(out - ref)))
    assert err < 2e-2, f"max abs error vs reference: {err}"

    print("KERNEL_OK")
</pallas_src>

<mosaic_0001>
module attributes {stable_mosaic.version = 11 : i64} {
  func.func @_decoder_layer_kernel(%arg0: i32, %arg1: memref<2x8x32xbf16, #tpu.memory_space<vmem>>, %arg2: memref<2x16x32xbf16, #tpu.memory_space<vmem>>, %arg3: memref<2x8x32xbf16, #tpu.memory_space<vmem>>, %arg4: memref<2x16x32xbf16, #tpu.memory_space<vmem>>, %arg5: memref<32x64xbf16, #tpu.memory_space<vmem>>, %arg6: memref<32x32xbf16, #tpu.memory_space<vmem>>, %arg7: memref<32x32xbf16, #tpu.memory_space<vmem>>, %arg8: memref<32x32xbf16, #tpu.memory_space<vmem>>, %arg9: memref<32x32xbf16, #tpu.memory_space<vmem>>, %arg10: memref<32x32xbf16, #tpu.memory_space<vmem>>, %arg11: memref<32x32xbf16, #tpu.memory_space<vmem>>, %arg12: memref<32x64xbf16, #tpu.memory_space<vmem>>, %arg13: memref<64x32xbf16, #tpu.memory_space<vmem>>, %arg14: memref<16x32xf32, #tpu.memory_space<vmem>>, %arg15: memref<1x64xf32, #tpu.memory_space<vmem>>, %arg16: memref<2x8x32xf32, #tpu.memory_space<vmem>>) attributes {dimension_semantics = [#tpu.dimension_semantics<parallel>], iteration_bounds = array<i64: 1>, scalar_prefetch = 0 : i64, scratch_operands = 0 : i64, tpu.core_type = #tpu.core_type<tc>, window_params = [{transform_indices = @transform_0, window_bounds = array<i64: 2, 8, 32>}, {transform_indices = @transform_1, window_bounds = array<i64: 2, 16, 32>}, {transform_indices = @transform_2, window_bounds = array<i64: 2, 8, 32>}, {transform_indices = @transform_3, window_bounds = array<i64: 2, 16, 32>}, {pipeline_mode = #tpu.pipeline_mode<synchronous>, transform_indices = @transform_4, window_bounds = array<i64: 32, 64>}, {pipeline_mode = #tpu.pipeline_mode<synchronous>, transform_indices = @transform_5, window_bounds = array<i64: 32, 32>}, {pipeline_mode = #tpu.pipeline_mode<synchronous>, transform_indices = @transform_6, window_bounds = array<i64: 32, 32>}, {pipeline_mode = #tpu.pipeline_mode<synchronous>, transform_indices = @transform_7, window_bounds = array<i64: 32, 32>}, {pipeline_mode = #tpu.pipeline_mode<synchronous>, transform_indices = @transform_8, window_bounds = array<i64: 32, 32>}, {pipeline_mode = #tpu.pipeline_mode<synchronous>, transform_indices = @transform_9, window_bounds = array<i64: 32, 32>}, {pipeline_mode = #tpu.pipeline_mode<synchronous>, transform_indices = @transform_10, window_bounds = array<i64: 32, 32>}, {pipeline_mode = #tpu.pipeline_mode<synchronous>, transform_indices = @transform_11, window_bounds = array<i64: 32, 64>}, {pipeline_mode = #tpu.pipeline_mode<synchronous>, transform_indices = @transform_12, window_bounds = array<i64: 64, 32>}, {pipeline_mode = #tpu.pipeline_mode<synchronous>, transform_indices = @transform_13, window_bounds = array<i64: 16, 32>}, {pipeline_mode = #tpu.pipeline_mode<synchronous>, transform_indices = @transform_14, window_bounds = array<i64: 1, 64>}, {transform_indices = @transform_15, window_bounds = array<i64: 2, 8, 32>}]} {
    %c0 = arith.constant 0 : index
    %c0_0 = arith.constant 0 : index
    %c0_1 = arith.constant 0 : index
    %0 = vector.load %arg1[%c0, %c0_0, %c0_1] : memref<2x8x32xbf16, #tpu.memory_space<vmem>>, vector<2x8x32xbf16>
    %1 = arith.extf %0 : vector<2x8x32xbf16> to vector<2x8x32xf32>
    %2 = vector.shape_cast %1 : vector<2x8x32xf32> to vector<16x32xf32>
    %c0_2 = arith.constant 0 : index
    %c0_3 = arith.constant 0 : index
    %c0_4 = arith.constant 0 : index
    %3 = vector.load %arg3[%c0_2, %c0_3, %c0_4] : memref<2x8x32xbf16, #tpu.memory_space<vmem>>, vector<2x8x32xbf16>
    %4 = arith.extf %3 : vector<2x8x32xbf16> to vector<2x8x32xf32>
    %5 = vector.shape_cast %4 : vector<2x8x32xf32> to vector<16x32xf32>
    %c0_5 = arith.constant 0 : index
    %c0_6 = arith.constant 0 : index
    %c0_7 = arith.constant 0 : index
    %6 = vector.load %arg2[%c0_5, %c0_6, %c0_7] : memref<2x16x32xbf16, #tpu.memory_space<vmem>>, vector<2x16x32xbf16>
    %7 = arith.extf %6 : vector<2x16x32xbf16> to vector<2x16x32xf32>
    %8 = vector.shape_cast %7 : vector<2x16x32xf32> to vector<32x32xf32>
    %c0_8 = arith.constant 0 : index
    %c0_9 = arith.constant 0 : index
    %c0_10 = arith.constant 0 : index
    %9 = vector.load %arg4[%c0_8, %c0_9, %c0_10] : memref<2x16x32xbf16, #tpu.memory_space<vmem>>, vector<2x16x32xbf16>
    %10 = arith.extf %9 : vector<2x16x32xbf16> to vector<2x16x32xf32>
    %11 = vector.shape_cast %10 : vector<2x16x32xf32> to vector<32x32xf32>
    %c0_11 = arith.constant 0 : index
    %c0_12 = arith.constant 0 : index
    %12 = vector.load %arg14[%c0_11, %c0_12] : memref<16x32xf32, #tpu.memory_space<vmem>>, vector<16x32xf32>
    %13 = vector.extract_strided_slice %12 {offsets = [0, 0], sizes = [1, 32], strides = [1, 1]} : vector<16x32xf32> to vector<1x32xf32>
    %14 = vector.extract_strided_slice %12 {offsets = [1, 0], sizes = [1, 32], strides = [1, 1]} : vector<16x32xf32> to vector<1x32xf32>
    %15 = tpu.concatenate %13, %14 in 1 : vector<1x32xf32>, vector<1x32xf32> -> vector<1x64xf32>
    %16 = arith.addf %2, %5 : vector<16x32xf32>
    %17 = arith.truncf %16 : vector<16x32xf32> to vector<16x32xbf16>
    %c0_13 = arith.constant 0 : index
    %c0_14 = arith.constant 0 : index
    %18 = vector.load %arg5[%c0_13, %c0_14] : memref<32x64xbf16, #tpu.memory_space<vmem>>, vector<32x64xbf16>
    %cst = arith.constant dense<0.000000e+00> : vector<16x64xf32>
    %19 = tpu.matmul %17, %18, %cst {dimension_numbers = #tpu.dot_dimension_numbers<[1], [0], [0], [1], [0, 0, 1, 1], [], []>} : vector<16x32xbf16>, vector<32x64xbf16>, vector<16x64xf32> -> vector<16x64xf32>
    %20 = vector.broadcast %15 : vector<1x64xf32> to vector<16x64xf32>
    %21 = arith.addf %19, %20 : vector<16x64xf32>
    %22 = vector.shape_cast %21 : vector<16x64xf32> to vector<16x8x8xf32>
    %23 = tpu.transpose %22, [1, 0, 2] : vector<16x8x8xf32> -> vector<8x16x8xf32>
    %24 = vector.shape_cast %23 : vector<8x16x8xf32> to vector<16x8x8xf32>
    %25 = vector.extract_strided_slice %12 {offsets = [2, 0], sizes = [1, 32], strides = [1, 1]} : vector<16x32xf32> to vector<1x32xf32>
    %26 = arith.truncf %2 : vector<16x32xf32> to vector<16x32xbf16>
    %c0_15 = arith.constant 0 : index
    %c0_16 = arith.constant 0 : index
    %27 = vector.load %arg6[%c0_15, %c0_16] : memref<32x32xbf16, #tpu.memory_space<vmem>>, vector<32x32xbf16>
    %cst_17 = arith.constant dense<0.000000e+00> : vector<16x32xf32>
    %28 = tpu.matmul %26, %27, %cst_17 {dimension_numbers = #tpu.dot_dimension_numbers<[1], [0], [0], [1], [0, 0, 1, 1], [], []>} : vector<16x32xbf16>, vector<32x32xbf16>, vector<16x32xf32> -> vector<16x32xf32>
    %29 = vector.broadcast %25 : vector<1x32xf32> to vector<16x32xf32>
    %30 = arith.addf %28, %29 : vector<16x32xf32>
    %31 = vector.shape_cast %30 : vector<16x32xf32> to vector<16x4x8xf32>
    %32 = tpu.transpose %31, [1, 0, 2] : vector<16x4x8xf32> -> vector<4x16x8xf32>
    %33 = vector.shape_cast %32 : vector<4x16x8xf32> to vector<8x8x8xf32>
    %34 = vector.extract_strided_slice %24 {offsets = [0, 0, 0], sizes = [8, 8, 8], strides = [1, 1, 1]} : vector<16x8x8xf32> to vector<8x8x8xf32>
    %35 = vector.extract_strided_slice %24 {offsets = [8, 0, 0], sizes = [8, 8, 8], strides = [1, 1, 1]} : vector<16x8x8xf32> to vector<8x8x8xf32>
    %36 = arith.truncf %34 : vector<8x8x8xf32> to vector<8x8x8xbf16>
    %37 = arith.truncf %35 : vector<8x8x8xf32> to vector<8x8x8xbf16>
    "tpu.trace_start"() <{level = 10 : i32, message = "bqd,bkd->bqk"}> : () -> ()
    %cst_18 = arith.constant dense<0.000000e+00> : vector<8x8x8xf32>
    %38 = tpu.matmul %36, %37, %cst_18 {dimension_numbers = #tpu.dot_dimension_numbers<[2], [2], [1], [1], [0, 0, 0, 1, 1, 1], [0], [0]>} : vector<8x8x8xbf16>, vector<8x8x8xbf16>, vector<8x8x8xf32> -> vector<8x8x8xf32>
    "tpu.trace_stop"() : () -> ()
    %cst_19 = arith.constant dense<0xFF800000> : vector<8x8xf32>
    %39 = vector.multi_reduction <maximumf>, %38, %cst_19 [2] : vector<8x8x8xf32> to vector<8x8xf32>
    %40 = vector.shape_cast %39 : vector<8x8xf32> to vector<8x8x1xf32>
    %41 = vector.broadcast %40 : vector<8x8x1xf32> to vector<8x8x8xf32>
    %42 = arith.subf %38, %41 : vector<8x8x8xf32>
    %43 = math.exp %42 : vector<8x8x8xf32>
    %cst_20 = arith.constant dense<0.000000e+00> : vector<8x8xf32>
    %44 = vector.multi_reduction <add>, %43, %cst_20 [2] : vector<8x8x8xf32> to vector<8x8xf32>
    %45 = vector.shape_cast %44 : vector<8x8xf32> to vector<8x8x1xf32>
    %46 = tpu.reciprocal %45 {approx = true} : vector<8x8x1xf32> -> vector<8x8x1xf32>
    %47 = vector.broadcast %46 : vector<8x8x1xf32> to vector<8x8x8xf32>
    %48 = arith.mulf %43, %47 : vector<8x8x8xf32>
    %49 = arith.truncf %48 : vector<8x8x8xf32> to vector<8x8x8xbf16>
    %50 = arith.truncf %33 : vector<8x8x8xf32> to vector<8x8x8xbf16>
    "tpu.trace_start"() <{level = 10 : i32, message = "bqk,bkd->bqd"}> : () -> ()
    %cst_21 = arith.constant dense<0.000000e+00> : vector<8x8x8xf32>
    %51 = tpu.matmul %49, %50, %cst_21 {dimension_numbers = #tpu.dot_dimension_numbers<[2], [1], [1], [2], [0, 0, 0, 1, 1, 2], [0], [0]>} : vector<8x8x8xbf16>, vector<8x8x8xbf16>, vector<8x8x8xf32> -> vector<8x8x8xf32>
    "tpu.trace_stop"() : () -> ()
    %52 = vector.extract_strided_slice %12 {offsets = [3, 0], sizes = [1, 32], strides = [1, 1]} : vector<16x32xf32> to vector<1x32xf32>
    %cst_22 = arith.constant 0.000000e+00 : f32
    %53 = vector.broadcast %cst_22 : f32 to vector<16x32xf32>
    %54 = vector.extract_strided_slice %51 {offsets = [0, 0, 0], sizes = [2, 8, 8], strides = [1, 1, 1]} : vector<8x8x8xf32> to vector<2x8x8xf32>
    %55 = vector.shape_cast %54 : vector<2x8x8xf32> to vector<16x8xf32>
    %56 = arith.truncf %55 : vector<16x8xf32> to vector<16x8xbf16>
    %c0_23 = arith.constant 0 : index
    %c0_24 = arith.constant 0 : index
    %57 = vector.load %arg7[%c0_23, %c0_24] : memref<32x32xbf16, #tpu.memory_space<vmem>>, vector<8x32xbf16>
    %cst_25 = arith.constant dense<0.000000e+00> : vector<16x32xf32>
    %58 = tpu.matmul %56, %57, %cst_25 {dimension_numbers = #tpu.dot_dimension_numbers<[1], [0], [0], [1], [0, 0, 1, 1], [], []>} : vector<16x8xbf16>, vector<8x32xbf16>, vector<16x32xf32> -> vector<16x32xf32>
    %59 = arith.addf %53, %58 : vector<16x32xf32>
    %60 = vector.extract_strided_slice %51 {offsets = [2, 0, 0], sizes = [2, 8, 8], strides = [1, 1, 1]} : vector<8x8x8xf32> to vector<2x8x8xf32>
    %61 = vector.shape_cast %60 : vector<2x8x8xf32> to vector<16x8xf32>
    %62 = arith.truncf %61 : vector<16x8xf32> to vector<16x8xbf16>
    %c8 = arith.constant 8 : index
    %c0_26 = arith.constant 0 : index
    %63 = vector.load %arg7[%c8, %c0_26] : memref<32x32xbf16, #tpu.memory_space<vmem>>, vector<8x32xbf16>
    %cst_27 = arith.constant dense<0.000000e+00> : vector<16x32xf32>
    %64 = tpu.matmul %62, %63, %cst_27 {dimension_numbers = #tpu.dot_dimension_numbers<[1], [0], [0], [1], [0, 0, 1, 1], [], []>} : vector<16x8xbf16>, vector<8x32xbf16>, vector<16x32xf32> -> vector<16x32xf32>
    %65 = arith.addf %59, %64 : vector<16x32xf32>
    %66 = vector.extract_strided_slice %51 {offsets = [4, 0, 0], sizes = [2, 8, 8], strides = [1, 1, 1]} : vector<8x8x8xf32> to vector<2x8x8xf32>
    %67 = vector.shape_cast %66 : vector<2x8x8xf32> to vector<16x8xf32>
    %68 = arith.truncf %67 : vector<16x8xf32> to vector<16x8xbf16>
    %c16 = arith.constant 16 : index
    %c0_28 = arith.constant 0 : index
    %69 = vector.load %arg7[%c16, %c0_28] : memref<32x32xbf16, #tpu.memory_space<vmem>>, vector<8x32xbf16>
    %cst_29 = arith.constant dense<0.000000e+00> : vector<16x32xf32>
    %70 = tpu.matmul %68, %69, %cst_29 {dimension_numbers = #tpu.dot_dimension_numbers<[1], [0], [0], [1], [0, 0, 1, 1], [], []>} : vector<16x8xbf16>, vector<8x32xbf16>, vector<16x32xf32> -> vector<16x32xf32>
    %71 = arith.addf %65, %70 : vector<16x32xf32>
    %72 = vector.extract_strided_slice %51 {offsets = [6, 0, 0], sizes = [2, 8, 8], strides = [1, 1, 1]} : vector<8x8x8xf32> to vector<2x8x8xf32>
    %73 = vector.shape_cast %72 : vector<2x8x8xf32> to vector<16x8xf32>
    %74 = arith.truncf %73 : vector<16x8xf32> to vector<16x8xbf16>
    %c24 = arith.constant 24 : index
    %c0_30 = arith.constant 0 : index
    %75 = vector.load %arg7[%c24, %c0_30] : memref<32x32xbf16, #tpu.memory_space<vmem>>, vector<8x32xbf16>
    %cst_31 = arith.constant dense<0.000000e+00> : vector<16x32xf32>
    %76 = tpu.matmul %74, %75, %cst_31 {dimension_numbers = #tpu.dot_dimension_numbers<[1], [0], [0], [1], [0, 0, 1, 1], [], []>} : vector<16x8xbf16>, vector<8x32xbf16>, vector<16x32xf32> -> vector<16x32xf32>
    %77 = arith.addf %71, %76 : vector<16x32xf32>
    %78 = vector.broadcast %52 : vector<1x32xf32> to vector<16x32xf32>
    %79 = arith.addf %77, %78 : vector<16x32xf32>
    %80 = arith.addf %2, %79 : vector<16x32xf32>
    %81 = vector.extract_strided_slice %12 {offsets = [9, 0], sizes = [1, 32], strides = [1, 1]} : vector<16x32xf32> to vector<1x32xf32>
    %82 = vector.extract_strided_slice %12 {offsets = [10, 0], sizes = [1, 32], strides = [1, 1]} : vector<16x32xf32> to vector<1x32xf32>
    %cst_32 = arith.constant dense<0.000000e+00> : vector<16xf32>
    %83 = vector.multi_reduction <add>, %80, %cst_32 [1] : vector<16x32xf32> to vector<16xf32>
    %84 = vector.shape_cast %83 : vector<16xf32> to vector<16x1xf32>
    %cst_33 = arith.constant 3.200000e+01 : f32
    %85 = vector.broadcast %cst_33 : f32 to vector<16x1xf32>
    %86 = arith.divf %84, %85 : vector<16x1xf32>
    %87 = vector.broadcast %86 : vector<16x1xf32> to vector<16x32xf32>
    %88 = arith.subf %80, %87 : vector<16x32xf32>
    %89 = arith.mulf %88, %88 : vector<16x32xf32>
    %cst_34 = arith.constant dense<0.000000e+00> : vector<16xf32>
    %90 = vector.multi_reduction <add>, %89, %cst_34 [1] : vector<16x32xf32> to vector<16xf32>
    %91 = vector.shape_cast %90 : vector<16xf32> to vector<16x1xf32>
    %cst_35 = arith.constant 3.200000e+01 : f32
    %92 = vector.broadcast %cst_35 : f32 to vector<16x1xf32>
    %93 = arith.divf %91, %92 : vector<16x1xf32>
    %cst_36 = arith.constant 9.99999974E-6 : f32
    %94 = vector.broadcast %cst_36 : f32 to vector<16x1xf32>
    %95 = arith.addf %93, %94 : vector<16x1xf32>
    %96 = math.rsqrt %95 : vector<16x1xf32>
    %97 = vector.broadcast %96 : vector<16x1xf32> to vector<16x32xf32>
    %98 = arith.mulf %88, %97 : vector<16x32xf32>
    %99 = vector.broadcast %81 : vector<1x32xf32> to vector<16x32xf32>
    %100 = arith.mulf %98, %99 : vector<16x32xf32>
    %101 = vector.broadcast %82 : vector<1x32xf32> to vector<16x32xf32>
    %102 = arith.addf %100, %101 : vector<16x32xf32>
    %103 = arith.addf %102, %5 : vector<16x32xf32>
    %104 = vector.extract_strided_slice %12 {offsets = [4, 0], sizes = [1, 32], strides = [1, 1]} : vector<16x32xf32> to vector<1x32xf32>
    %105 = arith.truncf %103 : vector<16x32xf32> to vector<16x32xbf16>
    %c0_37 = arith.constant 0 : index
    %c0_38 = arith.constant 0 : index
    %106 = vector.load %arg8[%c0_37, %c0_38] : memref<32x32xbf16, #tpu.memory_space<vmem>>, vector<32x32xbf16>
    %cst_39 = arith.constant dense<0.000000e+00> : vector<16x32xf32>
    %107 = tpu.matmul %105, %106, %cst_39 {dimension_numbers = #tpu.dot_dimension_numbers<[1], [0], [0], [1], [0, 0, 1, 1], [], []>} : vector<16x32xbf16>, vector<32x32xbf16>, vector<16x32xf32> -> vector<16x32xf32>
    %108 = vector.broadcast %104 : vector<1x32xf32> to vector<16x32xf32>
    %109 = arith.addf %107, %108 : vector<16x32xf32>
    %110 = vector.shape_cast %109 : vector<16x32xf32> to vector<16x4x8xf32>
    %111 = tpu.transpose %110, [1, 0, 2] : vector<16x4x8xf32> -> vector<4x16x8xf32>
    %112 = vector.shape_cast %111 : vector<4x16x8xf32> to vector<8x8x8xf32>
    %113 = arith.addf %8, %11 : vector<32x32xf32>
    %114 = vector.extract_strided_slice %12 {offsets = [5, 0], sizes = [1, 32], strides = [1, 1]} : vector<16x32xf32> to vector<1x32xf32>
    %115 = arith.truncf %113 : vector<32x32xf32> to vector<32x32xbf16>
    %c0_40 = arith.constant 0 : index
    %c0_41 = arith.constant 0 : index
    %116 = vector.load %arg9[%c0_40, %c0_41] : memref<32x32xbf16, #tpu.memory_space<vmem>>, vector<32x32xbf16>
    %cst_42 = arith.constant dense<0.000000e+00> : vector<32x32xf32>
    %117 = tpu.matmul %115, %116, %cst_42 {dimension_numbers = #tpu.dot_dimension_numbers<[1], [0], [0], [1], [0, 0, 1, 1], [], []>} : vector<32x32xbf16>, vector<32x32xbf16>, vector<32x32xf32> -> vector<32x32xf32>
    %118 = vector.broadcast %114 : vector<1x32xf32> to vector<32x32xf32>
    %119 = arith.addf %117, %118 : vector<32x32xf32>
    %120 = vector.shape_cast %119 : vector<32x32xf32> to vector<32x4x8xf32>
    %121 = tpu.transpose %120, [1, 0, 2] : vector<32x4x8xf32> -> vector<4x32x8xf32>
    %122 = vector.shape_cast %121 : vector<4x32x8xf32> to vector<8x16x8xf32>
    %123 = vector.extract_strided_slice %12 {offsets = [6, 0], sizes = [1, 32], strides = [1, 1]} : vector<16x32xf32> to vector<1x32xf32>
    %124 = arith.truncf %8 : vector<32x32xf32> to vector<32x32xbf16>
    %c0_43 = arith.constant 0 : index
    %c0_44 = arith.constant 0 : index
    %125 = vector.load %arg10[%c0_43, %c0_44] : memref<32x32xbf16, #tpu.memory_space<vmem>>, vector<32x32xbf16>
    %cst_45 = arith.constant dense<0.000000e+00> : vector<32x32xf32>
    %126 = tpu.matmul %124, %125, %cst_45 {dimension_numbers = #tpu.dot_dimension_numbers<[1], [0], [0], [1], [0, 0, 1, 1], [], []>} : vector<32x32xbf16>, vector<32x32xbf16>, vector<32x32xf32> -> vector<32x32xf32>
    %127 = vector.broadcast %123 : vector<1x32xf32> to vector<32x32xf32>
    %128 = arith.addf %126, %127 : vector<32x32xf32>
    %129 = vector.shape_cast %128 : vector<32x32xf32> to vector<32x4x8xf32>
    %130 = tpu.transpose %129, [1, 0, 2] : vector<32x4x8xf32> -> vector<4x32x8xf32>
    %131 = vector.shape_cast %130 : vector<4x32x8xf32> to vector<8x16x8xf32>
    %132 = arith.truncf %112 : vector<8x8x8xf32> to vector<8x8x8xbf16>
    %133 = arith.truncf %122 : vector<8x16x8xf32> to vector<8x16x8xbf16>
    "tpu.trace_start"() <{level = 10 : i32, message = "bqd,bkd->bqk"}> : () -> ()
    %cst_46 = arith.constant dense<0.000000e+00> : vector<8x8x16xf32>
    %134 = tpu.matmul %132, %133, %cst_46 {dimension_numbers = #tpu.dot_dimension_numbers<[2], [2], [1], [1], [0, 0, 0, 1, 1, 1], [0], [0]>} : vector<8x8x8xbf16>, vector<8x16x8xbf16>, vector<8x8x16xf32> -> vector<8x8x16xf32>
    "tpu.trace_stop"() : () -> ()
    %cst_47 = arith.constant dense<0xFF800000> : vector<8x8xf32>
    %135 = vector.multi_reduction <maximumf>, %134, %cst_47 [2] : vector<8x8x16xf32> to vector<8x8xf32>
    %136 = vector.shape_cast %135 : vector<8x8xf32> to vector<8x8x1xf32>
    %137 = vector.broadcast %136 : vector<8x8x1xf32> to vector<8x8x16xf32>
    %138 = arith.subf %134, %137 : vector<8x8x16xf32>
    %139 = math.exp %138 : vector<8x8x16xf32>
    %cst_48 = arith.constant dense<0.000000e+00> : vector<8x8xf32>
    %140 = vector.multi_reduction <add>, %139, %cst_48 [2] : vector<8x8x16xf32> to vector<8x8xf32>
    %141 = vector.shape_cast %140 : vector<8x8xf32> to vector<8x8x1xf32>
    %142 = tpu.reciprocal %141 {approx = true} : vector<8x8x1xf32> -> vector<8x8x1xf32>
    %143 = vector.broadcast %142 : vector<8x8x1xf32> to vector<8x8x16xf32>
    %144 = arith.mulf %139, %143 : vector<8x8x16xf32>
    %145 = arith.truncf %144 : vector<8x8x16xf32> to vector<8x8x16xbf16>
    %146 = arith.truncf %131 : vector<8x16x8xf32> to vector<8x16x8xbf16>
    "tpu.trace_start"() <{level = 10 : i32, message = "bqk,bkd->bqd"}> : () -> ()
    %cst_49 = arith.constant dense<0.000000e+00> : vector<8x8x8xf32>
    %147 = tpu.matmul %145, %146, %cst_49 {dimension_numbers = #tpu.dot_dimension_numbers<[2], [1], [1], [2], [0, 0, 0, 1, 1, 2], [0], [0]>} : vector<8x8x16xbf16>, vector<8x16x8xbf16>, vector<8x8x8xf32> -> vector<8x8x8xf32>
    "tpu.trace_stop"() : () -> ()
    %148 = vector.extract_strided_slice %12 {offsets = [7, 0], sizes = [1, 32], strides = [1, 1]} : vector<16x32xf32> to vector<1x32xf32>
    %cst_50 = arith.constant 0.000000e+00 : f32
    %149 = vector.broadcast %cst_50 : f32 to vector<16x32xf32>
    %150 = vector.extract_strided_slice %147 {offsets = [0, 0, 0], sizes = [2, 8, 8], strides = [1, 1, 1]} : vector<8x8x8xf32> to vector<2x8x8xf32>
    %151 = vector.shape_cast %150 : vector<2x8x8xf32> to vector<16x8xf32>
    %152 = arith.truncf %151 : vector<16x8xf32> to vector<16x8xbf16>
    %c0_51 = arith.constant 0 : index
    %c0_52 = arith.constant 0 : index
    %153 = vector.load %arg11[%c0_51, %c0_52] : memref<32x32xbf16, #tpu.memory_space<vmem>>, vector<8x32xbf16>
    %cst_53 = arith.constant dense<0.000000e+00> : vector<16x32xf32>
    %154 = tpu.matmul %152, %153, %cst_53 {dimension_numbers = #tpu.dot_dimension_numbers<[1], [0], [0], [1], [0, 0, 1, 1], [], []>} : vector<16x8xbf16>, vector<8x32xbf16>, vector<16x32xf32> -> vector<16x32xf32>
    %155 = arith.addf %149, %154 : vector<16x32xf32>
    %156 = vector.extract_strided_slice %147 {offsets = [2, 0, 0], sizes = [2, 8, 8], strides = [1, 1, 1]} : vector<8x8x8xf32> to vector<2x8x8xf32>
    %157 = vector.shape_cast %156 : vector<2x8x8xf32> to vector<16x8xf32>
    %158 = arith.truncf %157 : vector<16x8xf32> to vector<16x8xbf16>
    %c8_54 = arith.constant 8 : index
    %c0_55 = arith.constant 0 : index
    %159 = vector.load %arg11[%c8_54, %c0_55] : memref<32x32xbf16, #tpu.memory_space<vmem>>, vector<8x32xbf16>
    %cst_56 = arith.constant dense<0.000000e+00> : vector<16x32xf32>
    %160 = tpu.matmul %158, %159, %cst_56 {dimension_numbers = #tpu.dot_dimension_numbers<[1], [0], [0], [1], [0, 0, 1, 1], [], []>} : vector<16x8xbf16>, vector<8x32xbf16>, vector<16x32xf32> -> vector<16x32xf32>
    %161 = arith.addf %155, %160 : vector<16x32xf32>
    %162 = vector.extract_strided_slice %147 {offsets = [4, 0, 0], sizes = [2, 8, 8], strides = [1, 1, 1]} : vector<8x8x8xf32> to vector<2x8x8xf32>
    %163 = vector.shape_cast %162 : vector<2x8x8xf32> to vector<16x8xf32>
    %164 = arith.truncf %163 : vector<16x8xf32> to vector<16x8xbf16>
    %c16_57 = arith.constant 16 : index
    %c0_58 = arith.constant 0 : index
    %165 = vector.load %arg11[%c16_57, %c0_58] : memref<32x32xbf16, #tpu.memory_space<vmem>>, vector<8x32xbf16>
    %cst_59 = arith.constant dense<0.000000e+00> : vector<16x32xf32>
    %166 = tpu.matmul %164, %165, %cst_59 {dimension_numbers = #tpu.dot_dimension_numbers<[1], [0], [0], [1], [0, 0, 1, 1], [], []>} : vector<16x8xbf16>, vector<8x32xbf16>, vector<16x32xf32> -> vector<16x32xf32>
    %167 = arith.addf %161, %166 : vector<16x32xf32>
    %168 = vector.extract_strided_slice %147 {offsets = [6, 0, 0], sizes = [2, 8, 8], strides = [1, 1, 1]} : vector<8x8x8xf32> to vector<2x8x8xf32>
    %169 = vector.shape_cast %168 : vector<2x8x8xf32> to vector<16x8xf32>
    %170 = arith.truncf %169 : vector<16x8xf32> to vector<16x8xbf16>
    %c24_60 = arith.constant 24 : index
    %c0_61 = arith.constant 0 : index
    %171 = vector.load %arg11[%c24_60, %c0_61] : memref<32x32xbf16, #tpu.memory_space<vmem>>, vector<8x32xbf16>
    %cst_62 = arith.constant dense<0.000000e+00> : vector<16x32xf32>
    %172 = tpu.matmul %170, %171, %cst_62 {dimension_numbers = #tpu.dot_dimension_numbers<[1], [0], [0], [1], [0, 0, 1, 1], [], []>} : vector<16x8xbf16>, vector<8x32xbf16>, vector<16x32xf32> -> vector<16x32xf32>
    %173 = arith.addf %167, %172 : vector<16x32xf32>
    %174 = vector.broadcast %148 : vector<1x32xf32> to vector<16x32xf32>
    %175 = arith.addf %173, %174 : vector<16x32xf32>
    %176 = arith.addf %102, %175 : vector<16x32xf32>
    %177 = vector.extract_strided_slice %12 {offsets = [11, 0], sizes = [1, 32], strides = [1, 1]} : vector<16x32xf32> to vector<1x32xf32>
    %178 = vector.extract_strided_slice %12 {offsets = [12, 0], sizes = [1, 32], strides = [1, 1]} : vector<16x32xf32> to vector<1x32xf32>
    %cst_63 = arith.constant dense<0.000000e+00> : vector<16xf32>
    %179 = vector.multi_reduction <add>, %176, %cst_63 [1] : vector<16x32xf32> to vector<16xf32>
    %180 = vector.shape_cast %179 : vector<16xf32> to vector<16x1xf32>
    %cst_64 = arith.constant 3.200000e+01 : f32
    %181 = vector.broadcast %cst_64 : f32 to vector<16x1xf32>
    %182 = arith.divf %180, %181 : vector<16x1xf32>
    %183 = vector.broadcast %182 : vector<16x1xf32> to vector<16x32xf32>
    %184 = arith.subf %176, %183 : vector<16x32xf32>
    %185 = arith.mulf %184, %184 : vector<16x32xf32>
    %cst_65 = arith.constant dense<0.000000e+00> : vector<16xf32>
    %186 = vector.multi_reduction <add>, %185, %cst_65 [1] : vector<16x32xf32> to vector<16xf32>
    %187 = vector.shape_cast %186 : vector<16xf32> to vector<16x1xf32>
    %cst_66 = arith.constant 3.200000e+01 : f32
    %188 = vector.broadcast %cst_66 : f32 to vector<16x1xf32>
    %189 = arith.divf %187, %188 : vector<16x1xf32>
    %cst_67 = arith.constant 9.99999974E-6 : f32
    %190 = vector.broadcast %cst_67 : f32 to vector<16x1xf32>
    %191 = arith.addf %189, %190 : vector<16x1xf32>
    %192 = math.rsqrt %191 : vector<16x1xf32>
    %193 = vector.broadcast %192 : vector<16x1xf32> to vector<16x32xf32>
    %194 = arith.mulf %184, %193 : vector<16x32xf32>
    %195 = vector.broadcast %177 : vector<1x32xf32> to vector<16x32xf32>
    %196 = arith.mulf %194, %195 : vector<16x32xf32>
    %197 = vector.broadcast %178 : vector<1x32xf32> to vector<16x32xf32>
    %198 = arith.addf %196, %197 : vector<16x32xf32>
    %c0_68 = arith.constant 0 : index
    %c0_69 = arith.constant 0 : index
    %199 = vector.load %arg15[%c0_68, %c0_69] : memref<1x64xf32, #tpu.memory_space<vmem>>, vector<1x64xf32>
    %200 = arith.truncf %198 : vector<16x32xf32> to vector<16x32xbf16>
    %c0_70 = arith.constant 0 : index
    %c0_71 = arith.constant 0 : index
    %201 = vector.load %arg12[%c0_70, %c0_71] : memref<32x64xbf16, #tpu.memory_space<vmem>>, vector<32x64xbf16>
    %cst_72 = arith.constant dense<0.000000e+00> : vector<16x64xf32>
    %202 = tpu.matmul %200, %201, %cst_72 {dimension_numbers = #tpu.dot_dimension_numbers<[1], [0], [0], [1], [0, 0, 1, 1], [], []>} : vector<16x32xbf16>, vector<32x64xbf16>, vector<16x64xf32> -> vector<16x64xf32>
    %203 = vector.broadcast %199 : vector<1x64xf32> to vector<16x64xf32>
    %204 = arith.addf %202, %203 : vector<16x64xf32>
    %cst_73 = arith.constant 0.000000e+00 : f32
    %205 = vector.broadcast %cst_73 : f32 to vector<16x64xf32>
    %206 = arith.maximumf %204, %205 : vector<16x64xf32>
    %207 = vector.extract_strided_slice %12 {offsets = [8, 0], sizes = [1, 32], strides = [1, 1]} : vector<16x32xf32> to vector<1x32xf32>
    %208 = arith.truncf %206 : vector<16x64xf32> to vector<16x64xbf16>
    %c0_74 = arith.constant 0 : index
    %c0_75 = arith.constant 0 : index
    %209 = vector.load %arg13[%c0_74, %c0_75] : memref<64x32xbf16, #tpu.memory_space<vmem>>, vector<64x32xbf16>
    %cst_76 = arith.constant dense<0.000000e+00> : vector<16x32xf32>
    %210 = tpu.matmul %208, %209, %cst_76 {dimension_numbers = #tpu.dot_dimension_numbers<[1], [0], [0], [1], [0, 0, 1, 1], [], []>} : vector<16x64xbf16>, vector<64x32xbf16>, vector<16x32xf32> -> vector<16x32xf32>
    %211 = vector.broadcast %207 : vector<1x32xf32> to vector<16x32xf32>
    %212 = arith.addf %210, %211 : vector<16x32xf32>
    %213 = arith.addf %198, %212 : vector<16x32xf32>
    %214 = vector.extract_strided_slice %12 {offsets = [13, 0], sizes = [1, 32], strides = [1, 1]} : vector<16x32xf32> to vector<1x32xf32>
    %215 = vector.extract_strided_slice %12 {offsets = [14, 0], sizes = [1, 32], strides = [1, 1]} : vector<16x32xf32> to vector<1x32xf32>
    %cst_77 = arith.constant dense<0.000000e+00> : vector<16xf32>
    %216 = vector.multi_reduction <add>, %213, %cst_77 [1] : vector<16x32xf32> to vector<16xf32>
    %217 = vector.shape_cast %216 : vector<16xf32> to vector<16x1xf32>
    %cst_78 = arith.constant 3.200000e+01 : f32
    %218 = vector.broadcast %cst_78 : f32 to vector<16x1xf32>
    %219 = arith.divf %217, %218 : vector<16x1xf32>
    %220 = vector.broadcast %219 : vector<16x1xf32> to vector<16x32xf32>
    %221 = arith.subf %213, %220 : vector<16x32xf32>
    %222 = arith.mulf %221, %221 : vector<16x32xf32>
    %cst_79 = arith.constant dense<0.000000e+00> : vector<16xf32>
    %223 = vector.multi_reduction <add>, %222, %cst_79 [1] : vector<16x32xf32> to vector<16xf32>
    %224 = vector.shape_cast %223 : vector<16xf32> to vector<16x1xf32>
    %cst_80 = arith.constant 3.200000e+01 : f32
    %225 = vector.broadcast %cst_80 : f32 to vector<16x1xf32>
    %226 = arith.divf %224, %225 : vector<16x1xf32>
    %cst_81 = arith.constant 9.99999974E-6 : f32
    %227 = vector.broadcast %cst_81 : f32 to vector<16x1xf32>
    %228 = arith.addf %226, %227 : vector<16x1xf32>
    %229 = math.rsqrt %228 : vector<16x1xf32>
    %230 = vector.broadcast %229 : vector<16x1xf32> to vector<16x32xf32>
    %231 = arith.mulf %221, %230 : vector<16x32xf32>
    %232 = vector.broadcast %214 : vector<1x32xf32> to vector<16x32xf32>
    %233 = arith.mulf %231, %232 : vector<16x32xf32>
    %234 = vector.broadcast %215 : vector<1x32xf32> to vector<16x32xf32>
    %235 = arith.addf %233, %234 : vector<16x32xf32>
    %236 = vector.shape_cast %235 : vector<16x32xf32> to vector<2x8x32xf32>
    %c0_82 = arith.constant 0 : index
    %c0_83 = arith.constant 0 : index
    %c0_84 = arith.constant 0 : index
    %237 = vector.load %arg16[%c0_82, %c0_83, %c0_84] : memref<2x8x32xf32, #tpu.memory_space<vmem>>, vector<2x8x32xf32>
    tpu.vector_store %arg16[%c0_82, %c0_83, %c0_84], %236 {strides = array<i32>} : memref<2x8x32xf32, #tpu.memory_space<vmem>>, vector<2x8x32xf32>,
    return
  }
  func.func @transform_0(%arg0: i32) -> (i32, i32, i32) {
    %c0_i32 = arith.constant 0 : i32
    %c0_i32_0 = arith.constant 0 : i32
    %c0_i32_1 = arith.constant 0 : i32
    return %arg0, %c0_i32, %c0_i32_0 : i32, i32, i32
  }
  func.func @transform_1(%arg0: i32) -> (i32, i32, i32) {
    %c0_i32 = arith.constant 0 : i32
    %c0_i32_0 = arith.constant 0 : i32
    %c0_i32_1 = arith.constant 0 : i32
    return %arg0, %c0_i32, %c0_i32_0 : i32, i32, i32
  }
  func.func @transform_2(%arg0: i32) -> (i32, i32, i32) {
    %c0_i32 = arith.constant 0 : i32
    %c0_i32_0 = arith.constant 0 : i32
    %c0_i32_1 = arith.constant 0 : i32
    return %arg0, %c0_i32, %c0_i32_0 : i32, i32, i32
  }
  func.func @transform_3(%arg0: i32) -> (i32, i32, i32) {
    %c0_i32 = arith.constant 0 : i32
    %c0_i32_0 = arith.constant 0 : i32
    %c0_i32_1 = arith.constant 0 : i32
    return %arg0, %c0_i32, %c0_i32_0 : i32, i32, i32
  }
  func.func @transform_4(%arg0: i32) -> (i32, i32) {
    %c0_i32 = arith.constant 0 : i32
    %c0_i32_0 = arith.constant 0 : i32
    %c0_i32_1 = arith.constant 0 : i32
    return %c0_i32, %c0_i32_0 : i32, i32
  }
  func.func @transform_5(%arg0: i32) -> (i32, i32) {
    %c0_i32 = arith.constant 0 : i32
    %c0_i32_0 = arith.constant 0 : i32
    %c0_i32_1 = arith.constant 0 : i32
    return %c0_i32, %c0_i32_0 : i32, i32
  }
  func.func @transform_6(%arg0: i32) -> (i32, i32) {
    %c0_i32 = arith.constant 0 : i32
    %c0_i32_0 = arith.constant 0 : i32
    %c0_i32_1 = arith.constant 0 : i32
    return %c0_i32, %c0_i32_0 : i32, i32
  }
  func.func @transform_7(%arg0: i32) -> (i32, i32) {
    %c0_i32 = arith.constant 0 : i32
    %c0_i32_0 = arith.constant 0 : i32
    %c0_i32_1 = arith.constant 0 : i32
    return %c0_i32, %c0_i32_0 : i32, i32
  }
  func.func @transform_8(%arg0: i32) -> (i32, i32) {
    %c0_i32 = arith.constant 0 : i32
    %c0_i32_0 = arith.constant 0 : i32
    %c0_i32_1 = arith.constant 0 : i32
    return %c0_i32, %c0_i32_0 : i32, i32
  }
  func.func @transform_9(%arg0: i32) -> (i32, i32) {
    %c0_i32 = arith.constant 0 : i32
    %c0_i32_0 = arith.constant 0 : i32
    %c0_i32_1 = arith.constant 0 : i32
    return %c0_i32, %c0_i32_0 : i32, i32
  }
  func.func @transform_10(%arg0: i32) -> (i32, i32) {
    %c0_i32 = arith.constant 0 : i32
    %c0_i32_0 = arith.constant 0 : i32
    %c0_i32_1 = arith.constant 0 : i32
    return %c0_i32, %c0_i32_0 : i32, i32
  }
  func.func @transform_11(%arg0: i32) -> (i32, i32) {
    %c0_i32 = arith.constant 0 : i32
    %c0_i32_0 = arith.constant 0 : i32
    %c0_i32_1 = arith.constant 0 : i32
    return %c0_i32, %c0_i32_0 : i32, i32
  }
  func.func @transform_12(%arg0: i32) -> (i32, i32) {
    %c0_i32 = arith.constant 0 : i32
    %c0_i32_0 = arith.constant 0 : i32
    %c0_i32_1 = arith.constant 0 : i32
    return %c0_i32, %c0_i32_0 : i32, i32
  }
  func.func @transform_13(%arg0: i32) -> (i32, i32) {
    %c0_i32 = arith.constant 0 : i32
    %c0_i32_0 = arith.constant 0 : i32
    %c0_i32_1 = arith.constant 0 : i32
    return %c0_i32, %c0_i32_0 : i32, i32
  }
  func.func @transform_14(%arg0: i32) -> (i32, i32) {
    %c0_i32 = arith.constant 0 : i32
    %c0_i32_0 = arith.constant 0 : i32
    %c0_i32_1 = arith.constant 0 : i32
    return %c0_i32, %c0_i32_0 : i32, i32
  }
  func.func @transform_15(%arg0: i32) -> (i32, i32, i32) {
    %c0_i32 = arith.constant 0 : i32
    %c0_i32_0 = arith.constant 0 : i32
    %c0_i32_1 = arith.constant 0 : i32
    return %arg0, %c0_i32, %c0_i32_0 : i32, i32, i32
  }
}

module attributes {stable_mosaic.version = 11 : i64} {
  func.func @_decoder_layer_kernel(%arg0: i32, %arg1: memref<2x8x32xbf16, #tpu.memory_space<vmem>>, %arg2: memref<2x16x32xbf16, #tpu.memory_space<vmem>>, %arg3: memref<2x8x32xbf16, #tpu.memory_space<vmem>>, %arg4: memref<2x16x32xbf16, #tpu.memory_space<vmem>>, %arg5: memref<32x64xbf16, #tpu.memory_space<vmem>>, %arg6: memref<32x32xbf16, #tpu.memory_space<vmem>>, %arg7: memref<32x32xbf16, #tpu.memory_space<vmem>>, %arg8: memref<32x32xbf16, #tpu.memory_space<vmem>>, %arg9: memref<32x32xbf16, #tpu.memory_space<vmem>>, %arg10: memref<32x32xbf16, #tpu.memory_space<vmem>>, %arg11: memref<32x32xbf16, #tpu.memory_space<vmem>>, %arg12: memref<32x64xbf16, #tpu.memory_space<vmem>>, %arg13: memref<64x32xbf16, #tpu.memory_space<vmem>>, %arg14: memref<16x32xf32, #tpu.memory_space<vmem>>, %arg15: memref<1x64xf32, #tpu.memory_space<vmem>>, %arg16: memref<2x8x32xf32, #tpu.memory_space<vmem>>) attributes {dimension_semantics = [#tpu.dimension_semantics<parallel>], iteration_bounds = array<i64: 1>, scalar_prefetch = 0 : i64, scratch_operands = 0 : i64, tpu.core_type = #tpu.core_type<tc>, window_params = [{transform_indices = @transform_0, window_bounds = array<i64: 2, 8, 32>}, {transform_indices = @transform_1, window_bounds = array<i64: 2, 16, 32>}, {transform_indices = @transform_2, window_bounds = array<i64: 2, 8, 32>}, {transform_indices = @transform_3, window_bounds = array<i64: 2, 16, 32>}, {pipeline_mode = #tpu.pipeline_mode<synchronous>, transform_indices = @transform_4, window_bounds = array<i64: 32, 64>}, {pipeline_mode = #tpu.pipeline_mode<synchronous>, transform_indices = @transform_5, window_bounds = array<i64: 32, 32>}, {pipeline_mode = #tpu.pipeline_mode<synchronous>, transform_indices = @transform_6, window_bounds = array<i64: 32, 32>}, {pipeline_mode = #tpu.pipeline_mode<synchronous>, transform_indices = @transform_7, window_bounds = array<i64: 32, 32>}, {pipeline_mode = #tpu.pipeline_mode<synchronous>, transform_indices = @transform_8, window_bounds = array<i64: 32, 32>}, {pipeline_mode = #tpu.pipeline_mode<synchronous>, transform_indices = @transform_9, window_bounds = array<i64: 32, 32>}, {pipeline_mode = #tpu.pipeline_mode<synchronous>, transform_indices = @transform_10, window_bounds = array<i64: 32, 32>}, {pipeline_mode = #tpu.pipeline_mode<synchronous>, transform_indices = @transform_11, window_bounds = array<i64: 32, 64>}, {pipeline_mode = #tpu.pipeline_mode<synchronous>, transform_indices = @transform_12, window_bounds = array<i64: 64, 32>}, {pipeline_mode = #tpu.pipeline_mode<synchronous>, transform_indices = @transform_13, window_bounds = array<i64: 16, 32>}, {pipeline_mode = #tpu.pipeline_mode<synchronous>, transform_indices = @transform_14, window_bounds = array<i64: 1, 64>}, {transform_indices = @transform_15, window_bounds = array<i64: 2, 8, 32>}]} {
    %c0 = arith.constant 0 : index
    %c0_0 = arith.constant 0 : index
    %c0_1 = arith.constant 0 : index
    %0 = vector.load %arg1[%c0, %c0_0, %c0_1] : memref<2x8x32xbf16, #tpu.memory_space<vmem>>, vector<2x8x32xbf16>
    %1 = arith.extf %0 : vector<2x8x32xbf16> to vector<2x8x32xf32>
    %2 = vector.shape_cast %1 : vector<2x8x32xf32> to vector<16x32xf32>
    %c0_2 = arith.constant 0 : index
    %c0_3 = arith.constant 0 : index
    %c0_4 = arith.constant 0 : index
    %3 = vector.load %arg3[%c0_2, %c0_3, %c0_4] : memref<2x8x32xbf16, #tpu.memory_space<vmem>>, vector<2x8x32xbf16>
    %4 = arith.extf %3 : vector<2x8x32xbf16> to vector<2x8x32xf32>
    %5 = vector.shape_cast %4 : vector<2x8x32xf32> to vector<16x32xf32>
    %c0_5 = arith.constant 0 : index
    %c0_6 = arith.constant 0 : index
    %c0_7 = arith.constant 0 : index
    %6 = vector.load %arg2[%c0_5, %c0_6, %c0_7] : memref<2x16x32xbf16, #tpu.memory_space<vmem>>, vector<2x16x32xbf16>
    %7 = arith.extf %6 : vector<2x16x32xbf16> to vector<2x16x32xf32>
    %8 = vector.shape_cast %7 : vector<2x16x32xf32> to vector<32x32xf32>
    %c0_8 = arith.constant 0 : index
    %c0_9 = arith.constant 0 : index
    %c0_10 = arith.constant 0 : index
    %9 = vector.load %arg4[%c0_8, %c0_9, %c0_10] : memref<2x16x32xbf16, #tpu.memory_space<vmem>>, vector<2x16x32xbf16>
    %10 = arith.extf %9 : vector<2x16x32xbf16> to vector<2x16x32xf32>
    %11 = vector.shape_cast %10 : vector<2x16x32xf32> to vector<32x32xf32>
    %c0_11 = arith.constant 0 : index
    %c0_12 = arith.constant 0 : index
    %12 = vector.load %arg14[%c0_11, %c0_12] : memref<16x32xf32, #tpu.memory_space<vmem>>, vector<16x32xf32>
    %13 = vector.extract_strided_slice %12 {offsets = [0, 0], sizes = [1, 32], strides = [1, 1]} : vector<16x32xf32> to vector<1x32xf32>
    %14 = vector.extract_strided_slice %12 {offsets = [1, 0], sizes = [1, 32], strides = [1, 1]} : vector<16x32xf32> to vector<1x32xf32>
    %15 = tpu.concatenate %13, %14 in 1 : vector<1x32xf32>, vector<1x32xf32> -> vector<1x64xf32>
    %16 = arith.addf %2, %5 : vector<16x32xf32>
    %17 = arith.truncf %16 : vector<16x32xf32> to vector<16x32xbf16>
    %c0_13 = arith.constant 0 : index
    %c0_14 = arith.constant 0 : index
    %18 = vector.load %arg5[%c0_13, %c0_14] : memref<32x64xbf16, #tpu.memory_space<vmem>>, vector<32x64xbf16>
    %cst = arith.constant dense<0.000000e+00> : vector<16x64xf32>
    %19 = tpu.matmul %17, %18, %cst {dimension_numbers = #tpu.dot_dimension_numbers<[1], [0], [0], [1], [0, 0, 1, 1], [], []>} : vector<16x32xbf16>, vector<32x64xbf16>, vector<16x64xf32> -> vector<16x64xf32>
    %20 = vector.broadcast %15 : vector<1x64xf32> to vector<16x64xf32>
    %21 = arith.addf %19, %20 : vector<16x64xf32>
    %22 = vector.shape_cast %21 : vector<16x64xf32> to vector<16x8x8xf32>
    %23 = tpu.transpose %22, [1, 0, 2] : vector<16x8x8xf32> -> vector<8x16x8xf32>
    %24 = vector.shape_cast %23 : vector<8x16x8xf32> to vector<16x8x8xf32>
    %25 = vector.extract_strided_slice %12 {offsets = [2, 0], sizes = [1, 32], strides = [1, 1]} : vector<16x32xf32> to vector<1x32xf32>
    %26 = arith.truncf %2 : vector<16x32xf32> to vector<16x32xbf16>
    %c0_15 = arith.constant 0 : index
    %c0_16 = arith.constant 0 : index
    %27 = vector.load %arg6[%c0_15, %c0_16] : memref<32x32xbf16, #tpu.memory_space<vmem>>, vector<32x32xbf16>
    %cst_17 = arith.constant dense<0.000000e+00> : vector<16x32xf32>
    %28 = tpu.matmul %26, %27, %cst_17 {dimension_numbers = #tpu.dot_dimension_numbers<[1], [0], [0], [1], [0, 0, 1, 1], [], []>} : vector<16x32xbf16>, vector<32x32xbf16>, vector<16x32xf32> -> vector<16x32xf32>
    %29 = vector.broadcast %25 : vector<1x32xf32> to vector<16x32xf32>
    %30 = arith.addf %28, %29 : vector<16x32xf32>
    %31 = vector.shape_cast %30 : vector<16x32xf32> to vector<16x4x8xf32>
    %32 = tpu.transpose %31, [1, 0, 2] : vector<16x4x8xf32> -> vector<4x16x8xf32>
    %33 = vector.shape_cast %32 : vector<4x16x8xf32> to vector<8x8x8xf32>
    %34 = vector.extract_strided_slice %24 {offsets = [0, 0, 0], sizes = [8, 8, 8], strides = [1, 1, 1]} : vector<16x8x8xf32> to vector<8x8x8xf32>
    %35 = vector.extract_strided_slice %24 {offsets = [8, 0, 0], sizes = [8, 8, 8], strides = [1, 1, 1]} : vector<16x8x8xf32> to vector<8x8x8xf32>
    %36 = arith.truncf %34 : vector<8x8x8xf32> to vector<8x8x8xbf16>
    %37 = arith.truncf %35 : vector<8x8x8xf32> to vector<8x8x8xbf16>
    "tpu.trace_start"() <{level = 10 : i32, message = "bqd,bkd->bqk"}> : () -> ()
    %cst_18 = arith.constant dense<0.000000e+00> : vector<8x8x8xf32>
    %38 = tpu.matmul %36, %37, %cst_18 {dimension_numbers = #tpu.dot_dimension_numbers<[2], [2], [1], [1], [0, 0, 0, 1, 1, 1], [0], [0]>} : vector<8x8x8xbf16>, vector<8x8x8xbf16>, vector<8x8x8xf32> -> vector<8x8x8xf32>
    "tpu.trace_stop"() : () -> ()
    %cst_19 = arith.constant dense<0xFF800000> : vector<8x8xf32>
    %39 = vector.multi_reduction <maximumf>, %38, %cst_19 [2] : vector<8x8x8xf32> to vector<8x8xf32>
    %40 = vector.shape_cast %39 : vector<8x8xf32> to vector<8x8x1xf32>
    %41 = vector.broadcast %40 : vector<8x8x1xf32> to vector<8x8x8xf32>
    %42 = arith.subf %38, %41 : vector<8x8x8xf32>
    %43 = math.exp %42 : vector<8x8x8xf32>
    %cst_20 = arith.constant dense<0.000000e+00> : vector<8x8xf32>
    %44 = vector.multi_reduction <add>, %43, %cst_20 [2] : vector<8x8x8xf32> to vector<8x8xf32>
    %45 = vector.shape_cast %44 : vector<8x8xf32> to vector<8x8x1xf32>
    %46 = tpu.reciprocal %45 {approx = true} : vector<8x8x1xf32> -> vector<8x8x1xf32>
    %47 = vector.broadcast %46 : vector<8x8x1xf32> to vector<8x8x8xf32>
    %48 = arith.mulf %43, %47 : vector<8x8x8xf32>
    %49 = arith.truncf %48 : vector<8x8x8xf32> to vector<8x8x8xbf16>
    %50 = arith.truncf %33 : vector<8x8x8xf32> to vector<8x8x8xbf16>
    "tpu.trace_start"() <{level = 10 : i32, message = "bqk,bkd->bqd"}> : () -> ()
    %cst_21 = arith.constant dense<0.000000e+00> : vector<8x8x8xf32>
    %51 = tpu.matmul %49, %50, %cst_21 {dimension_numbers = #tpu.dot_dimension_numbers<[2], [1], [1], [2], [0, 0, 0, 1, 1, 2], [0], [0]>} : vector<8x8x8xbf16>, vector<8x8x8xbf16>, vector<8x8x8xf32> -> vector<8x8x8xf32>
    "tpu.trace_stop"() : () -> ()
    %52 = vector.extract_strided_slice %12 {offsets = [3, 0], sizes = [1, 32], strides = [1, 1]} : vector<16x32xf32> to vector<1x32xf32>
    %cst_22 = arith.constant 0.000000e+00 : f32
    %53 = vector.broadcast %cst_22 : f32 to vector<16x32xf32>
    %54 = vector.extract_strided_slice %51 {offsets = [0, 0, 0], sizes = [2, 8, 8], strides = [1, 1, 1]} : vector<8x8x8xf32> to vector<2x8x8xf32>
    %55 = vector.shape_cast %54 : vector<2x8x8xf32> to vector<16x8xf32>
    %56 = arith.truncf %55 : vector<16x8xf32> to vector<16x8xbf16>
    %c0_23 = arith.constant 0 : index
    %c0_24 = arith.constant 0 : index
    %57 = vector.load %arg7[%c0_23, %c0_24] : memref<32x32xbf16, #tpu.memory_space<vmem>>, vector<8x32xbf16>
    %cst_25 = arith.constant dense<0.000000e+00> : vector<16x32xf32>
    %58 = tpu.matmul %56, %57, %cst_25 {dimension_numbers = #tpu.dot_dimension_numbers<[1], [0], [0], [1], [0, 0, 1, 1], [], []>} : vector<16x8xbf16>, vector<8x32xbf16>, vector<16x32xf32> -> vector<16x32xf32>
    %59 = arith.addf %53, %58 : vector<16x32xf32>
    %60 = vector.extract_strided_slice %51 {offsets = [2, 0, 0], sizes = [2, 8, 8], strides = [1, 1, 1]} : vector<8x8x8xf32> to vector<2x8x8xf32>
    %61 = vector.shape_cast %60 : vector<2x8x8xf32> to vector<16x8xf32>
    %62 = arith.truncf %61 : vector<16x8xf32> to vector<16x8xbf16>
    %c8 = arith.constant 8 : index
    %c0_26 = arith.constant 0 : index
    %63 = vector.load %arg7[%c8, %c0_26] : memref<32x32xbf16, #tpu.memory_space<vmem>>, vector<8x32xbf16>
    %cst_27 = arith.constant dense<0.000000e+00> : vector<16x32xf32>
    %64 = tpu.matmul %62, %63, %cst_27 {dimension_numbers = #tpu.dot_dimension_numbers<[1], [0], [0], [1], [0, 0, 1, 1], [], []>} : vector<16x8xbf16>, vector<8x32xbf16>, vector<16x32xf32> -> vector<16x32xf32>
    %65 = arith.addf %59, %64 : vector<16x32xf32>
    %66 = vector.extract_strided_slice %51 {offsets = [4, 0, 0], sizes = [2, 8, 8], strides = [1, 1, 1]} : vector<8x8x8xf32> to vector<2x8x8xf32>
    %67 = vector.shape_cast %66 : vector<2x8x8xf32> to vector<16x8xf32>
    %68 = arith.truncf %67 : vector<16x8xf32> to vector<16x8xbf16>
    %c16 = arith.constant 16 : index
    %c0_28 = arith.constant 0 : index
    %69 = vector.load %arg7[%c16, %c0_28] : memref<32x32xbf16, #tpu.memory_space<vmem>>, vector<8x32xbf16>
    %cst_29 = arith.constant dense<0.000000e+00> : vector<16x32xf32>
    %70 = tpu.matmul %68, %69, %cst_29 {dimension_numbers = #tpu.dot_dimension_numbers<[1], [0], [0], [1], [0, 0, 1, 1], [], []>} : vector<16x8xbf16>, vector<8x32xbf16>, vector<16x32xf32> -> vector<16x32xf32>
    %71 = arith.addf %65, %70 : vector<16x32xf32>
    %72 = vector.extract_strided_slice %51 {offsets = [6, 0, 0], sizes = [2, 8, 8], strides = [1, 1, 1]} : vector<8x8x8xf32> to vector<2x8x8xf32>
    %73 = vector.shape_cast %72 : vector<2x8x8xf32> to vector<16x8xf32>
    %74 = arith.truncf %73 : vector<16x8xf32> to vector<16x8xbf16>
    %c24 = arith.constant 24 : index
    %c0_30 = arith.constant 0 : index
    %75 = vector.load %arg7[%c24, %c0_30] : memref<32x32xbf16, #tpu.memory_space<vmem>>, vector<8x32xbf16>
    %cst_31 = arith.constant dense<0.000000e+00> : vector<16x32xf32>
    %76 = tpu.matmul %74, %75, %cst_31 {dimension_numbers = #tpu.dot_dimension_numbers<[1], [0], [0], [1], [0, 0, 1, 1], [], []>} : vector<16x8xbf16>, vector<8x32xbf16>, vector<16x32xf32> -> vector<16x32xf32>
    %77 = arith.addf %71, %76 : vector<16x32xf32>
    %78 = vector.broadcast %52 : vector<1x32xf32> to vector<16x32xf32>
    %79 = arith.addf %77, %78 : vector<16x32xf32>
    %80 = arith.addf %2, %79 : vector<16x32xf32>
    %81 = vector.extract_strided_slice %12 {offsets = [9, 0], sizes = [1, 32], strides = [1, 1]} : vector<16x32xf32> to vector<1x32xf32>
    %82 = vector.extract_strided_slice %12 {offsets = [10, 0], sizes = [1, 32], strides = [1, 1]} : vector<16x32xf32> to vector<1x32xf32>
    %cst_32 = arith.constant dense<0.000000e+00> : vector<16xf32>
    %83 = vector.multi_reduction <add>, %80, %cst_32 [1] : vector<16x32xf32> to vector<16xf32>
    %84 = vector.shape_cast %83 : vector<16xf32> to vector<16x1xf32>
    %cst_33 = arith.constant 3.200000e+01 : f32
    %85 = vector.broadcast %cst_33 : f32 to vector<16x1xf32>
    %86 = arith.divf %84, %85 : vector<16x1xf32>
    %87 = vector.broadcast %86 : vector<16x1xf32> to vector<16x32xf32>
    %88 = arith.subf %80, %87 : vector<16x32xf32>
    %89 = arith.mulf %88, %88 : vector<16x32xf32>
    %cst_34 = arith.constant dense<0.000000e+00> : vector<16xf32>
    %90 = vector.multi_reduction <add>, %89, %cst_34 [1] : vector<16x32xf32> to vector<16xf32>
    %91 = vector.shape_cast %90 : vector<16xf32> to vector<16x1xf32>
    %cst_35 = arith.constant 3.200000e+01 : f32
    %92 = vector.broadcast %cst_35 : f32 to vector<16x1xf32>
    %93 = arith.divf %91, %92 : vector<16x1xf32>
    %cst_36 = arith.constant 9.99999974E-6 : f32
    %94 = vector.broadcast %cst_36 : f32 to vector<16x1xf32>
    %95 = arith.addf %93, %94 : vector<16x1xf32>
    %96 = math.rsqrt %95 : vector<16x1xf32>
    %97 = vector.broadcast %96 : vector<16x1xf32> to vector<16x32xf32>
    %98 = arith.mulf %88, %97 : vector<16x32xf32>
    %99 = vector.broadcast %81 : vector<1x32xf32> to vector<16x32xf32>
    %100 = arith.mulf %98, %99 : vector<16x32xf32>
    %101 = vector.broadcast %82 : vector<1x32xf32> to vector<16x32xf32>
    %102 = arith.addf %100, %101 : vector<16x32xf32>
    %103 = arith.addf %102, %5 : vector<16x32xf32>
    %104 = vector.extract_strided_slice %12 {offsets = [4, 0], sizes = [1, 32], strides = [1, 1]} : vector<16x32xf32> to vector<1x32xf32>
    %105 = arith.truncf %103 : vector<16x32xf32> to vector<16x32xbf16>
    %c0_37 = arith.constant 0 : index
    %c0_38 = arith.constant 0 : index
    %106 = vector.load %arg8[%c0_37, %c0_38] : memref<32x32xbf16, #tpu.memory_space<vmem>>, vector<32x32xbf16>
    %cst_39 = arith.constant dense<0.000000e+00> : vector<16x32xf32>
    %107 = tpu.matmul %105, %106, %cst_39 {dimension_numbers = #tpu.dot_dimension_numbers<[1], [0], [0], [1], [0, 0, 1, 1], [], []>} : vector<16x32xbf16>, vector<32x32xbf16>, vector<16x32xf32> -> vector<16x32xf32>
    %108 = vector.broadcast %104 : vector<1x32xf32> to vector<16x32xf32>
    %109 = arith.addf %107, %108 : vector<16x32xf32>
    %110 = vector.shape_cast %109 : vector<16x32xf32> to vector<16x4x8xf32>
    %111 = tpu.transpose %110, [1, 0, 2] : vector<16x4x8xf32> -> vector<4x16x8xf32>
    %112 = vector.shape_cast %111 : vector<4x16x8xf32> to vector<8x8x8xf32>
    %113 = arith.addf %8, %11 : vector<32x32xf32>
    %114 = vector.extract_strided_slice %12 {offsets = [5, 0], sizes = [1, 32], strides = [1, 1]} : vector<16x32xf32> to vector<1x32xf32>
    %115 = arith.truncf %113 : vector<32x32xf32> to vector<32x32xbf16>
    %c0_40 = arith.constant 0 : index
    %c0_41 = arith.constant 0 : index
    %116 = vector.load %arg9[%c0_40, %c0_41] : memref<32x32xbf16, #tpu.memory_space<vmem>>, vector<32x32xbf16>
    %cst_42 = arith.constant dense<0.000000e+00> : vector<32x32xf32>
    %117 = tpu.matmul %115, %116, %cst_42 {dimension_numbers = #tpu.dot_dimension_numbers<[1], [0], [0], [1], [0, 0, 1, 1], [], []>} : vector<32x32xbf16>, vector<32x32xbf16>, vector<32x32xf32> -> vector<32x32xf32>
    %118 = vector.broadcast %114 : vector<1x32xf32> to vector<32x32xf32>
    %119 = arith.addf %117, %118 : vector<32x32xf32>
    %120 = vector.shape_cast %119 : vector<32x32xf32> to vector<32x4x8xf32>
    %121 = tpu.transpose %120, [1, 0, 2] : vector<32x4x8xf32> -> vector<4x32x8xf32>
    %122 = vector.shape_cast %121 : vector<4x32x8xf32> to vector<8x16x8xf32>
    %123 = vector.extract_strided_slice %12 {offsets = [6, 0], sizes = [1, 32], strides = [1, 1]} : vector<16x32xf32> to vector<1x32xf32>
    %124 = arith.truncf %8 : vector<32x32xf32> to vector<32x32xbf16>
    %c0_43 = arith.constant 0 : index
    %c0_44 = arith.constant 0 : index
    %125 = vector.load %arg10[%c0_43, %c0_44] : memref<32x32xbf16, #tpu.memory_space<vmem>>, vector<32x32xbf16>
    %cst_45 = arith.constant dense<0.000000e+00> : vector<32x32xf32>
    %126 = tpu.matmul %124, %125, %cst_45 {dimension_numbers = #tpu.dot_dimension_numbers<[1], [0], [0], [1], [0, 0, 1, 1], [], []>} : vector<32x32xbf16>, vector<32x32xbf16>, vector<32x32xf32> -> vector<32x32xf32>
    %127 = vector.broadcast %123 : vector<1x32xf32> to vector<32x32xf32>
    %128 = arith.addf %126, %127 : vector<32x32xf32>
    %129 = vector.shape_cast %128 : vector<32x32xf32> to vector<32x4x8xf32>
    %130 = tpu.transpose %129, [1, 0, 2] : vector<32x4x8xf32> -> vector<4x32x8xf32>
    %131 = vector.shape_cast %130 : vector<4x32x8xf32> to vector<8x16x8xf32>
    %132 = arith.truncf %112 : vector<8x8x8xf32> to vector<8x8x8xbf16>
    %133 = arith.truncf %122 : vector<8x16x8xf32> to vector<8x16x8xbf16>
    "tpu.trace_start"() <{level = 10 : i32, message = "bqd,bkd->bqk"}> : () -> ()
    %cst_46 = arith.constant dense<0.000000e+00> : vector<8x8x16xf32>
    %134 = tpu.matmul %132, %133, %cst_46 {dimension_numbers = #tpu.dot_dimension_numbers<[2], [2], [1], [1], [0, 0, 0, 1, 1, 1], [0], [0]>} : vector<8x8x8xbf16>, vector<8x16x8xbf16>, vector<8x8x16xf32> -> vector<8x8x16xf32>
    "tpu.trace_stop"() : () -> ()
    %cst_47 = arith.constant dense<0xFF800000> : vector<8x8xf32>
    %135 = vector.multi_reduction <maximumf>, %134, %cst_47 [2] : vector<8x8x16xf32> to vector<8x8xf32>
    %136 = vector.shape_cast %135 : vector<8x8xf32> to vector<8x8x1xf32>
    %137 = vector.broadcast %136 : vector<8x8x1xf32> to vector<8x8x16xf32>
    %138 = arith.subf %134, %137 : vector<8x8x16xf32>
    %139 = math.exp %138 : vector<8x8x16xf32>
    %cst_48 = arith.constant dense<0.000000e+00> : vector<8x8xf32>
    %140 = vector.multi_reduction <add>, %139, %cst_48 [2] : vector<8x8x16xf32> to vector<8x8xf32>
    %141 = vector.shape_cast %140 : vector<8x8xf32> to vector<8x8x1xf32>
    %142 = tpu.reciprocal %141 {approx = true} : vector<8x8x1xf32> -> vector<8x8x1xf32>
    %143 = vector.broadcast %142 : vector<8x8x1xf32> to vector<8x8x16xf32>
    %144 = arith.mulf %139, %143 : vector<8x8x16xf32>
    %145 = arith.truncf %144 : vector<8x8x16xf32> to vector<8x8x16xbf16>
    %146 = arith.truncf %131 : vector<8x16x8xf32> to vector<8x16x8xbf16>
    "tpu.trace_start"() <{level = 10 : i32, message = "bqk,bkd->bqd"}> : () -> ()
    %cst_49 = arith.constant dense<0.000000e+00> : vector<8x8x8xf32>
    %147 = tpu.matmul %145, %146, %cst_49 {dimension_numbers = #tpu.dot_dimension_numbers<[2], [1], [1], [2], [0, 0, 0, 1, 1, 2], [0], [0]>} : vector<8x8x16xbf16>, vector<8x16x8xbf16>, vector<8x8x8xf32> -> vector<8x8x8xf32>
    "tpu.trace_stop"() : () -> ()
    %148 = vector.extract_strided_slice %12 {offsets = [7, 0], sizes = [1, 32], strides = [1, 1]} : vector<16x32xf32> to vector<1x32xf32>
    %cst_50 = arith.constant 0.000000e+00 : f32
    %149 = vector.broadcast %cst_50 : f32 to vector<16x32xf32>
    %150 = vector.extract_strided_slice %147 {offsets = [0, 0, 0], sizes = [2, 8, 8], strides = [1, 1, 1]} : vector<8x8x8xf32> to vector<2x8x8xf32>
    %151 = vector.shape_cast %150 : vector<2x8x8xf32> to vector<16x8xf32>
    %152 = arith.truncf %151 : vector<16x8xf32> to vector<16x8xbf16>
    %c0_51 = arith.constant 0 : index
    %c0_52 = arith.constant 0 : index
    %153 = vector.load %arg11[%c0_51, %c0_52] : memref<32x32xbf16, #tpu.memory_space<vmem>>, vector<8x32xbf16>
    %cst_53 = arith.constant dense<0.000000e+00> : vector<16x32xf32>
    %154 = tpu.matmul %152, %153, %cst_53 {dimension_numbers = #tpu.dot_dimension_numbers<[1], [0], [0], [1], [0, 0, 1, 1], [], []>} : vector<16x8xbf16>, vector<8x32xbf16>, vector<16x32xf32> -> vector<16x32xf32>
    %155 = arith.addf %149, %154 : vector<16x32xf32>
    %156 = vector.extract_strided_slice %147 {offsets = [2, 0, 0], sizes = [2, 8, 8], strides = [1, 1, 1]} : vector<8x8x8xf32> to vector<2x8x8xf32>
    %157 = vector.shape_cast %156 : vector<2x8x8xf32> to vector<16x8xf32>
    %158 = arith.truncf %157 : vector<16x8xf32> to vector<16x8xbf16>
    %c8_54 = arith.constant 8 : index
    %c0_55 = arith.constant 0 : index
    %159 = vector.load %arg11[%c8_54, %c0_55] : memref<32x32xbf16, #tpu.memory_space<vmem>>, vector<8x32xbf16>
    %cst_56 = arith.constant dense<0.000000e+00> : vector<16x32xf32>
    %160 = tpu.matmul %158, %159, %cst_56 {dimension_numbers = #tpu.dot_dimension_numbers<[1], [0], [0], [1], [0, 0, 1, 1], [], []>} : vector<16x8xbf16>, vector<8x32xbf16>, vector<16x32xf32> -> vector<16x32xf32>
    %161 = arith.addf %155, %160 : vector<16x32xf32>
    %162 = vector.extract_strided_slice %147 {offsets = [4, 0, 0], sizes = [2, 8, 8], strides = [1, 1, 1]} : vector<8x8x8xf32> to vector<2x8x8xf32>
    %163 = vector.shape_cast %162 : vector<2x8x8xf32> to vector<16x8xf32>
    %164 = arith.truncf %163 : vector<16x8xf32> to vector<16x8xbf16>
    %c16_57 = arith.constant 16 : index
    %c0_58 = arith.constant 0 : index
    %165 = vector.load %arg11[%c16_57, %c0_58] : memref<32x32xbf16, #tpu.memory_space<vmem>>, vector<8x32xbf16>
    %cst_59 = arith.constant dense<0.000000e+00> : vector<16x32xf32>
    %166 = tpu.matmul %164, %165, %cst_59 {dimension_numbers = #tpu.dot_dimension_numbers<[1], [0], [0], [1], [0, 0, 1, 1], [], []>} : vector<16x8xbf16>, vector<8x32xbf16>, vector<16x32xf32> -> vector<16x32xf32>
    %167 = arith.addf %161, %166 : vector<16x32xf32>
    %168 = vector.extract_strided_slice %147 {offsets = [6, 0, 0], sizes = [2, 8, 8], strides = [1, 1, 1]} : vector<8x8x8xf32> to vector<2x8x8xf32>
    %169 = vector.shape_cast %168 : vector<2x8x8xf32> to vector<16x8xf32>
    %170 = arith.truncf %169 : vector<16x8xf32> to vector<16x8xbf16>
    %c24_60 = arith.constant 24 : index
    %c0_61 = arith.constant 0 : index
    %171 = vector.load %arg11[%c24_60, %c0_61] : memref<32x32xbf16, #tpu.memory_space<vmem>>, vector<8x32xbf16>
    %cst_62 = arith.constant dense<0.000000e+00> : vector<16x32xf32>
    %172 = tpu.matmul %170, %171, %cst_62 {dimension_numbers = #tpu.dot_dimension_numbers<[1], [0], [0], [1], [0, 0, 1, 1], [], []>} : vector<16x8xbf16>, vector<8x32xbf16>, vector<16x32xf32> -> vector<16x32xf32>
    %173 = arith.addf %167, %172 : vector<16x32xf32>
    %174 = vector.broadcast %148 : vector<1x32xf32> to vector<16x32xf32>
    %175 = arith.addf %173, %174 : vector<16x32xf32>
    %176 = arith.addf %102, %175 : vector<16x32xf32>
    %177 = vector.extract_strided_slice %12 {offsets = [11, 0], sizes = [1, 32], strides = [1, 1]} : vector<16x32xf32> to vector<1x32xf32>
    %178 = vector.extract_strided_slice %12 {offsets = [12, 0], sizes = [1, 32], strides = [1, 1]} : vector<16x32xf32> to vector<1x32xf32>
    %cst_63 = arith.constant dense<0.000000e+00> : vector<16xf32>
    %179 = vector.multi_reduction <add>, %176, %cst_63 [1] : vector<16x32xf32> to vector<16xf32>
    %180 = vector.shape_cast %179 : vector<16xf32> to vector<16x1xf32>
    %cst_64 = arith.constant 3.200000e+01 : f32
    %181 = vector.broadcast %cst_64 : f32 to vector<16x1xf32>
    %182 = arith.divf %180, %181 : vector<16x1xf32>
    %183 = vector.broadcast %182 : vector<16x1xf32> to vector<16x32xf32>
    %184 = arith.subf %176, %183 : vector<16x32xf32>
    %185 = arith.mulf %184, %184 : vector<16x32xf32>
    %cst_65 = arith.constant dense<0.000000e+00> : vector<16xf32>
    %186 = vector.multi_reduction <add>, %185, %cst_65 [1] : vector<16x32xf32> to vector<16xf32>
    %187 = vector.shape_cast %186 : vector<16xf32> to vector<16x1xf32>
    %cst_66 = arith.constant 3.200000e+01 : f32
    %188 = vector.broadcast %cst_66 : f32 to vector<16x1xf32>
    %189 = arith.divf %187, %188 : vector<16x1xf32>
    %cst_67 = arith.constant 9.99999974E-6 : f32
    %190 = vector.broadcast %cst_67 : f32 to vector<16x1xf32>
    %191 = arith.addf %189, %190 : vector<16x1xf32>
    %192 = math.rsqrt %191 : vector<16x1xf32>
    %193 = vector.broadcast %192 : vector<16x1xf32> to vector<16x32xf32>
    %194 = arith.mulf %184, %193 : vector<16x32xf32>
    %195 = vector.broadcast %177 : vector<1x32xf32> to vector<16x32xf32>
    %196 = arith.mulf %194, %195 : vector<16x32xf32>
    %197 = vector.broadcast %178 : vector<1x32xf32> to vector<16x32xf32>
    %198 = arith.addf %196, %197 : vector<16x32xf32>
    %c0_68 = arith.constant 0 : index
    %c0_69 = arith.constant 0 : index
    %199 = vector.load %arg15[%c0_68, %c0_69] : memref<1x64xf32, #tpu.memory_space<vmem>>, vector<1x64xf32>
    %200 = arith.truncf %198 : vector<16x32xf32> to vector<16x32xbf16>
    %c0_70 = arith.constant 0 : index
    %c0_71 = arith.constant 0 : index
    %201 = vector.load %arg12[%c0_70, %c0_71] : memref<32x64xbf16, #tpu.memory_space<vmem>>, vector<32x64xbf16>
    %cst_72 = arith.constant dense<0.000000e+00> : vector<16x64xf32>
    %202 = tpu.matmul %200, %201, %cst_72 {dimension_numbers = #tpu.dot_dimension_numbers<[1], [0], [0], [1], [0, 0, 1, 1], [], []>} : vector<16x32xbf16>, vector<32x64xbf16>, vector<16x64xf32> -> vector<16x64xf32>
    %203 = vector.broadcast %199 : vector<1x64xf32> to vector<16x64xf32>
    %204 = arith.addf %202, %203 : vector<16x64xf32>
    %cst_73 = arith.constant 0.000000e+00 : f32
    %205 = vector.broadcast %cst_73 : f32 to vector<16x64xf32>
    %206 = arith.maximumf %204, %205 : vector<16x64xf32>
    %207 = vector.extract_strided_slice %12 {offsets = [8, 0], sizes = [1, 32], strides = [1, 1]} : vector<16x32xf32> to vector<1x32xf32>
    %208 = arith.truncf %206 : vector<16x64xf32> to vector<16x64xbf16>
    %c0_74 = arith.constant 0 : index
    %c0_75 = arith.constant 0 : index
    %209 = vector.load %arg13[%c0_74, %c0_75] : memref<64x32xbf16, #tpu.memory_space<vmem>>, vector<64x32xbf16>
    %cst_76 = arith.constant dense<0.000000e+00> : vector<16x32xf32>
    %210 = tpu.matmul %208, %209, %cst_76 {dimension_numbers = #tpu.dot_dimension_numbers<[1], [0], [0], [1], [0, 0, 1, 1], [], []>} : vector<16x64xbf16>, vector<64x32xbf16>, vector<16x32xf32> -> vector<16x32xf32>
    %211 = vector.broadcast %207 : vector<1x32xf32> to vector<16x32xf32>
    %212 = arith.addf %210, %211 : vector<16x32xf32>
    %213 = arith.addf %198, %212 : vector<16x32xf32>
    %214 = vector.extract_strided_slice %12 {offsets = [13, 0], sizes = [1, 32], strides = [1, 1]} : vector<16x32xf32> to vector<1x32xf32>
    %215 = vector.extract_strided_slice %12 {offsets = [14, 0], sizes = [1, 32], strides = [1, 1]} : vector<16x32xf32> to vector<1x32xf32>
    %cst_77 = arith.constant dense<0.000000e+00> : vector<16xf32>
    %216 = vector.multi_reduction <add>, %213, %cst_77 [1] : vector<16x32xf32> to vector<16xf32>
    %217 = vector.shape_cast %216 : vector<16xf32> to vector<16x1xf32>
    %cst_78 = arith.constant 3.200000e+01 : f32
    %218 = vector.broadcast %cst_78 : f32 to vector<16x1xf32>
    %219 = arith.divf %217, %218 : vector<16x1xf32>
    %220 = vector.broadcast %219 : vector<16x1xf32> to vector<16x32xf32>
    %221 = arith.subf %213, %220 : vector<16x32xf32>
    %222 = arith.mulf %221, %221 : vector<16x32xf32>
    %cst_79 = arith.constant dense<0.000000e+00> : vector<16xf32>
    %223 = vector.multi_reduction <add>, %222, %cst_79 [1] : vector<16x32xf32> to vector<16xf32>
    %224 = vector.shape_cast %223 : vector<16xf32> to vector<16x1xf32>
    %cst_80 = arith.constant 3.200000e+01 : f32
    %225 = vector.broadcast %cst_80 : f32 to vector<16x1xf32>
    %226 = arith.divf %224, %225 : vector<16x1xf32>
    %cst_81 = arith.constant 9.99999974E-6 : f32
    %227 = vector.broadcast %cst_81 : f32 to vector<16x1xf32>
    %228 = arith.addf %226, %227 : vector<16x1xf32>
    %229 = math.rsqrt %228 : vector<16x1xf32>
    %230 = vector.broadcast %229 : vector<16x1xf32> to vector<16x32xf32>
    %231 = arith.mulf %221, %230 : vector<16x32xf32>
    %232 = vector.broadcast %214 : vector<1x32xf32> to vector<16x32xf32>
    %233 = arith.mulf %231, %232 : vector<16x32xf32>
    %234 = vector.broadcast %215 : vector<1x32xf32> to vector<16x32xf32>
    %235 = arith.addf %233, %234 : vector<16x32xf32>
    %236 = vector.shape_cast %235 : vector<16x32xf32> to vector<2x8x32xf32>
    %c0_82 = arith.constant 0 : index
    %c0_83 = arith.constant 0 : index
    %c0_84 = arith.constant 0 : index
    %237 = vector.load %arg16[%c0_82, %c0_83, %c0_84] : memref<2x8x32xf32, #tpu.memory_space<vmem>>, vector<2x8x32xf32>
    tpu.vector_store %arg16[%c0_82, %c0_83, %c0_84], %236 {strides = array<i32>} : memref<2x8x32xf32, #tpu.memory_space<vmem>>, vector<2x8x32xf32>,
    return
  }
  func.func @transform_0(%arg0: i32) -> (i32, i32, i32) {
    %c0_i32 = arith.constant 0 : i32
    %c0_i32_0 = arith.constant 0 : i32
    %c0_i32_1 = arith.constant 0 : i32
    return %arg0, %c0_i32, %c0_i32_0 : i32, i32, i32
  }
  func.func @transform_1(%arg0: i32) -> (i32, i32, i32) {
    %c0_i32 = arith.constant 0 : i32
    %c0_i32_0 = arith.constant 0 : i32
    %c0_i32_1 = arith.constant 0 : i32
    return %arg0, %c0_i32, %c0_i32_0 : i32, i32, i32
  }
  func.func @transform_2(%arg0: i32) -> (i32, i32, i32) {
    %c0_i32 = arith.constant 0 : i32
    %c0_i32_0 = arith.constant 0 : i32
    %c0_i32_1 = arith.constant 0 : i32
    return %arg0, %c0_i32, %c0_i32_0 : i32, i32, i32
  }
  func.func @transform_3(%arg0: i32) -> (i32, i32, i32) {
    %c0_i32 = arith.constant 0 : i32
    %c0_i32_0 = arith.constant 0 : i32
    %c0_i32_1 = arith.constant 0 : i32
    return %arg0, %c0_i32, %c0_i32_0 : i32, i32, i32
  }
  func.func @transform_4(%arg0: i32) -> (i32, i32) {
    %c0_i32 = arith.constant 0 : i32
    %c0_i32_0 = arith.constant 0 : i32
    %c0_i32_1 = arith.constant 0 : i32
    return %c0_i32, %c0_i32_0 : i32, i32
  }
  func.func @transform_5(%arg0: i32) -> (i32, i32) {
    %c0_i32 = arith.constant 0 : i32
    %c0_i32_0 = arith.constant 0 : i32
    %c0_i32_1 = arith.constant 0 : i32
    return %c0_i32, %c0_i32_0 : i32, i32
  }
  func.func @transform_6(%arg0: i32) -> (i32, i32) {
    %c0_i32 = arith.constant 0 : i32
    %c0_i32_0 = arith.constant 0 : i32
    %c0_i32_1 = arith.constant 0 : i32
    return %c0_i32, %c0_i32_0 : i32, i32
  }
  func.func @transform_7(%arg0: i32) -> (i32, i32) {
    %c0_i32 = arith.constant 0 : i32
    %c0_i32_0 = arith.constant 0 : i32
    %c0_i32_1 = arith.constant 0 : i32
    return %c0_i32, %c0_i32_0 : i32, i32
  }
  func.func @transform_8(%arg0: i32) -> (i32, i32) {
    %c0_i32 = arith.constant 0 : i32
    %c0_i32_0 = arith.constant 0 : i32
    %c0_i32_1 = arith.constant 0 : i32
    return %c0_i32, %c0_i32_0 : i32, i32
  }
  func.func @transform_9(%arg0: i32) -> (i32, i32) {
    %c0_i32 = arith.constant 0 : i32
    %c0_i32_0 = arith.constant 0 : i32
    %c0_i32_1 = arith.constant 0 : i32
    return %c0_i32, %c0_i32_0 : i32, i32
  }
  func.func @transform_10(%arg0: i32) -> (i32, i32) {
    %c0_i32 = arith.constant 0 : i32
    %c0_i32_0 = arith.constant 0 : i32
    %c0_i32_1 = arith.constant 0 : i32
    return %c0_i32, %c0_i32_0 : i32, i32
  }
  func.func @transform_11(%arg0: i32) -> (i32, i32) {
    %c0_i32 = arith.constant 0 : i32
    %c0_i32_0 = arith.constant 0 : i32
    %c0_i32_1 = arith.constant 0 : i32
    return %c0_i32, %c0_i32_0 : i32, i32
  }
  func.func @transform_12(%arg0: i32) -> (i32, i32) {
    %c0_i32 = arith.constant 0 : i32
    %c0_i32_0 = arith.constant 0 : i32
    %c0_i32_1 = arith.constant 0 : i32
    return %c0_i32, %c0_i32_0 : i32, i32
  }
  func.func @transform_13(%arg0: i32) -> (i32, i32) {
    %c0_i32 = arith.constant 0 : i32
    %c0_i32_0 = arith.constant 0 : i32
    %c0_i32_1 = arith.constant 0 : i32
    return %c0_i32, %c0_i32_0 : i32, i32
  }
  func.func @transform_14(%arg0: i32) -> (i32, i32) {
    %c0_i32 = arith.constant 0 : i32
    %c0_i32_0 = arith.constant 0 : i32
    %c0_i32_1 = arith.constant 0 : i32
    return %c0_i32, %c0_i32_0 : i32, i32
  }
  func.func @transform_15(%arg0: i32) -> (i32, i32, i32) {
    %c0_i32 = arith.constant 0 : i32
    %c0_i32_0 = arith.constant 0 : i32
    %c0_i32_1 = arith.constant 0 : i32
    return %arg0, %c0_i32, %c0_i32_0 : i32, i32, i32
  }
}

</mosaic_0001>

<bundles_post_ra>
// kernel: tpu_custom_call.1
= control target key start
LH: loop header
LB: loop body
LE: loop exit
PB: predicated region body
PF: predicated region fallthrough
CT: control target
= control target key end

     0   :  { %20 = vsyncpa [#allocation3], 0  ;;  %s5845_s0 = inlined_call_operand.hbm [shape: bf16[2,8,32], index: 0, kind: input, shape index: {}]   ;;  %s5846_s1 = inlined_call_operand.vmem [shape: bf16[2,16,32], index: 1, kind: input, shape index: {}]   ;;  %s5847_s2 = inlined_call_operand.hbm [shape: bf16[2,8,32], index: 2, kind: input, shape index: {}]   ;;  %s5848_s3 = inlined_call_operand.vmem [shape: bf16[2,16,32], index: 3, kind: input, shape index: {}]   ;;  %s5849_s4 = inlined_call_operand.vmem [shape: bf16[32,64], index: 4, kind: input, shape index: {}]   ;;  %s5850_s5 = inlined_call_operand.hbm [shape: bf16[32,32], index: 5, kind: input, shape index: {}]   ;;  %s5851_s6 = inlined_call_operand.hbm [shape: bf16[32,32], index: 6, kind: input, shape index: {}]   ;;  %s5852_s7 = inlined_call_operand.hbm [shape: bf16[32,32], index: 7, kind: input, shape index: {}]   ;;  %s5853_s8 = inlined_call_operand.hbm [shape: bf16[32,32], index: 8, kind: input, shape index: {}]   ;;  %s5854_s9 = inlined_call_operand.hbm [shape: bf16[32,32], index: 9, kind: input, shape index: {}]   ;;  %s5855_s10 = inlined_call_operand.hbm [shape: bf16[32,32], index: 10, kind: input, shape index: {}]   ;;  %s5856_s11 = inlined_call_operand.hbm [shape: bf16[32,64], index: 11, kind: input, shape index: {}]   ;;  %s5857_s12 = inlined_call_operand.vmem [shape: bf16[64,32], index: 12, kind: input, shape index: {}]   ;;  %s5858_s13 = inlined_call_operand.hbm [shape: f32[16,32], index: 13, kind: input, shape index: {}]   ;;  %s5859_s14 = inlined_call_operand.vmem [shape: f32[1,64], index: 14, kind: input, shape index: {}]   ;;  %s5860_s15 = inlined_call_operand.hbm [shape: f32[2,8,32], index: 15, kind: output, shape index: {}]  }
   0x1   :  { %21 = vsyncpa [#allocation6], 0 }
   0x2   :  { %22 = vsyncpa [#allocation9], 0 }
   0x3   :  { %23 = vsyncpa [#allocation12], 0 }
   0x4   :  { %24 = vsyncpa [#allocation15], 0 }
   0x5   :  { %25 = vsyncpa [#allocation18], 0 }
   0x6   :  { %26 = vsyncpa [#allocation4], 0  ;;  %s46_s20 = sshll.u32 %s5847_s2, 4  ;;  %s4428_s21 = smov [#allocation5]   ;;  %s47_s20 = int_to_ptr.hbm [resolvable:$true] %s46_s20 }
   0x7   :  { %s48_s22 = sshll.u32 %s4428_s21, 4  ;;  %s76_s25 = sshll.u32 %s5851_s6, 4  ;;  %s49_s22 = int_to_ptr.vmem [resolvable:$true] %s48_s22  ;;  %s77_s25 = int_to_ptr.hbm [resolvable:$true] %s76_s25 }
   0x8   :  { %s4429_s26 = smov 64   ;;  %s4430_s27 = smov 4  }
   0x9   :  { %54 = dma.hbm_to_vmem [thread:$0]  %s47_s20, 128, %s49_s22, [#allocation6], %s4429_s26, %s4429_s26, %s4430_s27  }
   0xa   :  { %s4431_s28 = smov [#allocation8]   ;;  %s102_s2 = sshll.u32 %s5853_s8, 4  ;;  %s103_s2 = int_to_ptr.hbm [resolvable:$true] %s102_s2 }
   0xb   :  { %s78_s29 = sshll.u32 %s4431_s28, 4  ;;  %s128_s18 = sshll.u32 %s5855_s10, 4  ;;  %s79_s29 = int_to_ptr.vmem [resolvable:$true] %s78_s29  ;;  %s129_s18 = int_to_ptr.hbm [resolvable:$true] %s128_s18 }
   0xc   :  { %84 = dma.hbm_to_vmem [thread:$0]  %s77_s25, 256, %s79_s29, [#allocation9], %s4429_s26, %s4429_s26, %s4430_s27  }
   0xd   :  { %s4432_s19 = smov [#allocation11]   ;;  %s4433_s20 = smov [#allocation14]  }
   0xe   :  { %s104_s21 = sshll.u32 %s4432_s19, 4  ;;  %s130_s8 = sshll.u32 %s4433_s20, 4  ;;  %s105_s21 = int_to_ptr.vmem [resolvable:$true] %s104_s21  ;;  %s131_s8 = int_to_ptr.vmem [resolvable:$true] %s130_s8 }
   0xf   :  { %110 = dma.hbm_to_vmem [thread:$0]  %s103_s2, 256, %s105_s21, [#allocation12], %s4429_s26, %s4429_s26, %s4430_s27  }
  0x10   :  { %s31_s24 = sshll.u32 %s5845_s0, 4  ;;  %s63_s28 = sshll.u32 %s5850_s5, 4  ;;  %s32_s24 = int_to_ptr.hbm [resolvable:$true] %s31_s24  ;;  %s64_s28 = int_to_ptr.hbm [resolvable:$true] %s63_s28 }
  0x11   :  { %136 = dma.hbm_to_vmem [thread:$0]  %s129_s18, 256, %s131_s8, [#allocation15], %s4429_s26, %s4429_s26, %s4430_s27  }
  0x12   :  { %s4434_s29 = smov [#allocation2]   ;;  %s4435_s16 = smov [#allocation7]  }
  0x13   :  { %s33_s30 = sshll.u32 %s4434_s29, 4  ;;  %s65_s0 = sshll.u32 %s4435_s16, 4  ;;  %s34_s30 = int_to_ptr.vmem [resolvable:$true] %s33_s30  ;;  %s66_s0 = int_to_ptr.vmem [resolvable:$true] %s65_s0 }
  0x14   :  { %39 = dma.hbm_to_vmem [thread:$0]  %s32_s24, 128, %s34_s30, [#allocation3], %s4429_s26, %s4429_s26, %s4430_s27  }
  0x15   :  { %s89_s17 = sshll.u32 %s5852_s7, 4  ;;  %s115_s19 = sshll.u32 %s5854_s9, 4  ;;  %s90_s17 = int_to_ptr.hbm [resolvable:$true] %s89_s17  ;;  %s116_s19 = int_to_ptr.hbm [resolvable:$true] %s115_s19 }
  0x16   :  { %71 = dma.hbm_to_vmem [thread:$0]  %s64_s28, 256, %s66_s0, [#allocation6], %s4429_s26, %s4429_s26, %s4430_s27  }
  0x17   :  { %s4436_s21 = smov [#allocation10]   ;;  %s4437_s8 = smov [#allocation13]  }
  0x18   :  { %s91_s20 = sshll.u32 %s4436_s21, 4  ;;  %s117_s7 = sshll.u32 %s4437_s8, 4  ;;  %s92_s20 = int_to_ptr.vmem [resolvable:$true] %s91_s20  ;;  %s118_s7 = int_to_ptr.vmem [resolvable:$true] %s117_s7 }
  0x19   :  { %97 = dma.hbm_to_vmem [thread:$0]  %s90_s17, 256, %s92_s20, [#allocation9], %s4429_s26, %s4429_s26, %s4430_s27  }
  0x1a   :  { %s141_s24 = sshll.u32 %s5856_s11, 4  ;;  %s156_s25 = sshll.u32 %s5858_s13, 4  ;;  %s142_s24 = int_to_ptr.hbm [resolvable:$true] %s141_s24  ;;  %s157_s25 = int_to_ptr.hbm [resolvable:$true] %s156_s25 }
  0x1b   :  { %123 = dma.hbm_to_vmem [thread:$0]  %s116_s19, 256, %s118_s7, [#allocation12], %s4429_s26, %s4429_s26, %s4430_s27  }
  0x1c   :  { %s4438_s28 = smov [#allocation16]   ;;  %s4439_s30 = smov [#allocation17]  }
  0x1d   :  { %s143_s29 = sshll.u32 %s4438_s28, 4  ;;  %s158_s11 = sshll.u32 %s4439_s30, 4  ;;  %s144_s29 = int_to_ptr.vmem [resolvable:$true] %s143_s29  ;;  %s159_s11 = int_to_ptr.vmem [resolvable:$true] %s158_s11 }
  0x1e   :  { %149 = dma.hbm_to_vmem [thread:$0]  %s142_s24, 256, %s144_s29, [#allocation15], %s4429_s26, %s4429_s26, %s4430_s27  }
  0x1f   :  { %s4440_s16 = smov 128   ;;  %s4441_s0 = smov 8  }
  0x20   :  { %164 = dma.hbm_to_vmem [thread:$0]  %s157_s25, 256, %s159_s11, [#allocation18], %s4440_s16, %s4440_s16, %s4441_s0  }
  0x21   :  { %4414 = dma.done.wait [#allocation3], 128  }
  0x22   :  { %4415 = vsyncadd [#allocation3], 4294967168 }
  0x23   :  { %4416 = dma.done.wait [#allocation6], 384  }
  0x24   :  { %4417 = vsyncadd [#allocation6], 4294966912 }
  0x25   :  { %4418 = dma.done.wait [#allocation9], 512  }
  0x26   :  { %4419 = vsyncadd [#allocation9], 4294966784 }
  0x27   :  { %4420 = dma.done.wait [#allocation12], 512  }
  0x28   :  { %4421 = vsyncadd [#allocation12], 4294966784 }
  0x29   :  { %4422 = dma.done.wait [#allocation15], 512  }
  0x2a   :  { %4423 = vsyncadd [#allocation15], 4294966784 }
  0x2b   :  { %4424 = dma.done.wait [#allocation18], 256  }
  0x2c   :  { %4425 = vsyncadd [#allocation18], 4294967040  ;;  %v3891_v0 = vld [vmem:[%s5849_s4 + $0x8] sm:$0xff]  ;;  %v4597_v1 = vld [vmem:[#allocation2] sm:$0xff]   ;;  %s4442_s6 = smov 32   ;;  %vm239_vm0 = vcmask 261120  }
  0x2d   :  { %v3908_v2 = vunpack.c.l.bf16 %v4597_v1  ;;  %v3909_v3 = vunpack.c.h.bf16 %v4597_v1  ;;  %v4601_v4 = vld [vmem:[#allocation5] sm:$0xff]   ;;  %v4603_v5 = vld [vmem:[#allocation17] sm:$0xff]  ;;  %270 = vmatpush.bf16.msra.mxu0 %v3891_v0  ;;  %s4444_s17 = smov 104   ;;  %s4445_s5 = smov 120   ;;  %v4450_v24 = vmov 1983009808  }
  0x2e   :  { %v3890_v6 = vld [vmem:[%s5849_s4] sm:$0xff]  ;;  %v3912_v7 = vunpack.c.l.bf16 %v4601_v4  ;;  %v3913_v8 = vunpack.c.h.bf16 %v4601_v4  ;;  %v235_v9 = vrot.slane %v4603_v5, 1  ;;  %s4443_s4 = smov 112   ;;  %s4446_s18 = smov 96   ;;  %v328_v25 = vunpack.c.l.s4 %v4450_v24  ;;  %v3893_v43 = vld [vmem:[#allocation7 + $0x8] sm:$0xff]  ;;  %v3892_v49 = vld [vmem:[#allocation7] sm:$0xff] }
  0x2f   :  { %s4447_s19 = smov 88   ;;  %s4448_s21 = smov 72   ;;  %vm323_vm1 = vcmask 1047556   ;;  %v4451_v36 = vmov 1934713408   ;;  %798 = vmatpush.bf16.msra.mxu1 %v3893_v43  ;;  %vm1062_vm2 = vcmask 64512  }
  0x30   :  { %v241_v10 = vadd.f32 %v3912_v7, %v3908_v2  ;;  %v242_v11 = vadd.f32 %v3913_v8, %v3909_v3  ;;  %236 = vrot.lane.b32.xlu0 %v235_v9, %s4442_s6  ;;  %s4449_s20 = smov 80   ;;  %v4625_v29 = vunpack.c.0.s8 %v328_v25  ;;  %v376_v37 = vunpack.c.l.s4 %v4451_v36 }
  0x31   :  { %271 = vmatpush.bf16.msra.mxu0 %v3890_v6  ;;  %vm1322_vm3 = vcmask 1043456   ;;  %vm3171_vm11 = vcmask 130048  }
  0x32   :  { %v243_v12 = vpack.c.bf16 %v242_v11, %v241_v10  ;;  %v4637_v52 = vunpack.c.0.s8 %v376_v37 }
  0x33   :  { %799 = vmatpush.bf16.msra.mxu1 %v3892_v49 }
  0x34   :  { %3785 = vmatmul.msk.bf16.vlgmr.msra.gmra.mxu0 %vm239_vm0, %v243_v12 }
  0x36   :  { %3794 = vmatmul.msk.bf16.vlgmr.msra.gmra.mxu1 %vm239_vm0, %v4597_v1  ;;  %v4452_v1 = vmov 32.0  }
  0xa2   :  { %v237_v13 = vpop.permute.xlu0 %236 }
  0xa3   :  { %v240_v15 = vsel %vm239_vm0, %v4603_v5, %v237_v13 }
  0xa4   :  { %v248_v16 = vperm.slane %v240_v15, 0 }
  0xb1   :  { %v273_v14 = vpop.f32.mrf.mxu0 }
  0xb2   :  { %v274_v18 = vadd.f32 %v273_v14, %v248_v16 }
  0xb4   :  { %v325_v32 = vrot.slane %v274_v18, 4 }
  0xb9   :  { %v275_v17 = vpop.f32.mrf.mxu0 }
  0xba   :  { %v276_v19 = vadd.f32 %v275_v17, %v248_v16 }
  0xbc   :  { %v3973_v20 = vpack.i.bf16 %v276_v19, %v274_v18  ;;  %v437_v27 = vrot.slane %v276_v19, 4 }
  0xbe   :  { %3974 = vrot.lane.b32.xlu2 %v3973_v20, %s4443_s4  ;;  %3964 = vrot.lane.b32.xlu1 %v3973_v20, %s4444_s17 }
  0xbf   :  { %3959 = vrot.lane.b32.xlu0 %v3973_v20, %s4445_s5 }
  0xc6   :  { %3979 = vrot.lane.b32.xlu2 %v3973_v20, %s4446_s18  ;;  %3969 = vrot.lane.b32.xlu1 %v3973_v20, %s4447_s19 }
  0xc7   :  { %3984 = vrot.lane.b32.xlu0 %v3973_v20, %s4448_s21 }
  0xce   :  { %3989 = vrot.lane.b32.xlu1 %v3973_v20, %s4449_s20 }
 0x118   :  { %v3975_v21 = vpop.permute.xlu2 %3974 }
 0x119   :  { %v3977_v22 = vunpack.i.h.bf16 %v3975_v21  ;;  %v3976_v23 = vunpack.i.l.bf16 %v3975_v21 }
 0x11b   :  { %v435_v26 = vrot.slane %v3977_v22, 4  ;;  %v322_v28 = vrot.slane %v3976_v23, 4  ;;  %v438_v31 = vsel %vm323_vm1, %v3977_v22, %v437_v27  ;;  %v326_v34 = vsel %vm323_vm1, %v3976_v23, %v325_v32 }
 0x11c   :  { %v446_v39 = vperm.slane %v438_v31, %v4625_v29  ;;  %v334_v50 = vperm.slane %v326_v34, %v4625_v29 }
 0x11d   :  { %v436_v30 = vsel %vm323_vm1, %v435_v26, %v276_v19  ;;  %v324_v33 = vsel %vm323_vm1, %v322_v28, %v274_v18 }
 0x11e   :  { %v442_v38 = vperm.slane %v436_v30, %v4625_v29  ;;  %v330_v46 = vperm.slane %v324_v33, %v4625_v29  ;;  %v497_v56 = vrot.slane %v446_v39, 4  ;;  %v385_v18 = vrot.slane %v334_v50, 4 }
 0x120   :  { %v4635_v51 = vpop.permute.xlu2 %3979  ;;  %v485_v55 = vrot.slane %v442_v38, 4  ;;  %v373_v63 = vrot.slane %v330_v46, 4 }
 0x121   :  { %v3982_v0 = vunpack.i.h.bf16 %v4635_v51  ;;  %v3981_v10 = vunpack.i.l.bf16 %v4635_v51 }
 0x123   :  { %v461_v26 = vrot.slane %v3982_v0, 4  ;;  %v349_v27 = vrot.slane %v3981_v10, 4 }
 0x130   :  { %v3965_v35 = vpop.permute.xlu1 %3964 }
 0x131   :  { %v3967_v40 = vunpack.i.h.bf16 %v3965_v35  ;;  %v3966_v41 = vunpack.i.l.bf16 %v3965_v35  ;;  %v3960_v42 = vpop.permute.xlu0 %3959 }
 0x132   :  { %v3962_v44 = vunpack.i.h.bf16 %v3960_v42  ;;  %v3961_v45 = vunpack.i.l.bf16 %v3960_v42 }
 0x133   :  { %v447_v47 = vrot.slane %v3967_v40, 4  ;;  %v335_v48 = vrot.slane %v3966_v41, 4 }
 0x134   :  { %v449_v53 = vrot.slane %v3962_v44, 4  ;;  %v337_v54 = vrot.slane %v3961_v45, 4 }
 0x135   :  { %v448_v57 = vsel %vm323_vm1, %v447_v47, %v3962_v44  ;;  %v336_v58 = vsel %vm323_vm1, %v335_v48, %v3961_v45 }
 0x136   :  { %v450_v59 = vsel %vm323_vm1, %v3967_v40, %v449_v53  ;;  %v454_v60 = vperm.slane %v448_v57, %v4625_v29  ;;  %v338_v61 = vsel %vm323_vm1, %v3966_v41, %v337_v54  ;;  %v342_v62 = vperm.slane %v336_v58, %v4625_v29 }
 0x137   :  { %v458_v6 = vperm.slane %v450_v59, %v4625_v29  ;;  %v346_v9 = vperm.slane %v338_v61, %v4625_v29 }
 0x138   :  { %v483_v11 = vrot.slane %v454_v60, 4  ;;  %v486_v12 = vsel %vm323_vm1, %v454_v60, %v485_v55  ;;  %v371_v13 = vrot.slane %v342_v62, 4  ;;  %v3970_v14 = vpop.permute.xlu1 %3969  ;;  %v374_v20 = vsel %vm323_vm1, %v342_v62, %v373_v63 }
 0x139   :  { %v4651_v15 = vperm.slane %v486_v12, %v4637_v52  ;;  %v495_v16 = vrot.slane %v458_v6, 4  ;;  %v498_v17 = vsel %vm323_vm1, %v458_v6, %v497_v56  ;;  %v383_v21 = vrot.slane %v346_v9, 4  ;;  %v3985_v28 = vpop.permute.xlu0 %3984 }
 0x13a   :  { %v484_v19 = vsel %vm323_vm1, %v483_v11, %v442_v38  ;;  %v4663_v24 = vperm.slane %v498_v17, %v4637_v52  ;;  %v372_v25 = vsel %vm323_vm1, %v371_v13, %v330_v46  ;;  %v4672_v31 = vperm.slane %v374_v20, %v4637_v52 }
 0x13b   :  { %v4659_v22 = vperm.slane %v484_v19, %v4637_v52  ;;  %v496_v23 = vsel %vm323_vm1, %v495_v16, %v446_v39  ;;  %v537_v30 = vrot.slane %v4651_v15, 4  ;;  %v384_v32 = vsel %vm323_vm1, %v383_v21, %v334_v50 }
 0x13c   :  { %v386_v33 = vsel %vm323_vm1, %v346_v9, %v385_v18  ;;  %v4677_v34 = vperm.slane %v496_v23, %v4637_v52  ;;  %v4680_v35 = vperm.slane %v372_v25, %v4637_v52  ;;  %v3972_v36 = vunpack.i.h.bf16 %v3970_v14 }
 0x13d   :  { %v3971_v37 = vunpack.i.l.bf16 %v3970_v14  ;;  %v533_v38 = vrot.slane %v4659_v22, 4  ;;  %v545_v39 = vrot.slane %v4663_v24, 4  ;;  %v3987_v40 = vunpack.i.h.bf16 %v3985_v28 }
 0x13e   :  { %v3986_v41 = vunpack.i.l.bf16 %v3985_v28  ;;  %v4685_v42 = vperm.slane %v384_v32, %v4637_v52  ;;  %v4688_v43 = vperm.slane %v386_v33, %v4637_v52  ;;  %v473_v44 = vrot.slane %v3972_v36, 4 }
 0x13f   :  { %v361_v45 = vrot.slane %v3971_v37, 4  ;;  %v471_v47 = vrot.slane %v3987_v40, 4  ;;  %v541_v53 = vrot.slane %v4677_v34, 4  ;;  %v421_v54 = vrot.slane %v4680_v35, 4 }
 0x140   :  { %v3990_v46 = vpop.permute.xlu1 %3989  ;;  %v359_v48 = vrot.slane %v3986_v41, 4  ;;  %v474_v55 = vsel %vm323_vm1, %v3987_v40, %v473_v44  ;;  %v425_v9 = vrot.slane %v4672_v31, 4  ;;  %v429_v25 = vrot.slane %v4685_v42, 4 }
 0x141   :  { %v3992_v49 = vunpack.i.h.bf16 %v3990_v46  ;;  %v3991_v50 = vunpack.i.l.bf16 %v3990_v46  ;;  %v362_v56 = vsel %vm323_vm1, %v3986_v41, %v361_v45  ;;  %v472_v57 = vsel %vm323_vm1, %v471_v47, %v3972_v36 }
 0x142   :  { %v482_v58 = vperm.slane %v474_v55, %v4625_v29  ;;  %v360_v59 = vsel %vm323_vm1, %v359_v48, %v3971_v37  ;;  %v370_v60 = vperm.slane %v362_v56, %v4625_v29  ;;  %v478_v61 = vperm.slane %v472_v57, %v4625_v29 }
 0x143   :  { %v366_v62 = vperm.slane %v360_v59, %v4625_v29  ;;  %v459_v63 = vrot.slane %v3992_v49, 4  ;;  %v462_v6 = vsel %vm323_vm1, %v3992_v49, %v461_v26  ;;  %v347_v13 = vrot.slane %v3991_v50, 4 }
 0x144   :  { %v519_v11 = vrot.slane %v482_v58, 4  ;;  %v470_v12 = vperm.slane %v462_v6, %v4625_v29  ;;  %v507_v14 = vrot.slane %v478_v61, 4  ;;  %v407_v16 = vrot.slane %v370_v60, 4 }
 0x145   :  { %v460_v17 = vsel %vm323_vm1, %v459_v63, %v3982_v0  ;;  %v350_v18 = vsel %vm323_vm1, %v3991_v50, %v349_v27  ;;  %v348_v21 = vsel %vm323_vm1, %v347_v13, %v3981_v10  ;;  %v395_v26 = vrot.slane %v366_v62, 4 }
 0x146   :  { %v466_v19 = vperm.slane %v460_v17, %v4625_v29  ;;  %v521_v20 = vrot.slane %v470_v12, 4  ;;  %v358_v23 = vperm.slane %v350_v18, %v4625_v29  ;;  %v354_v28 = vperm.slane %v348_v21, %v4625_v29 }
 0x147   :  { %v520_v32 = vsel %vm323_vm1, %v519_v11, %v470_v12  ;;  %v433_v47 = vrot.slane %v4688_v43, 4 }
 0x148   :  { %v509_v33 = vrot.slane %v466_v19, 4  ;;  %v408_v0 = vsel %vm323_vm1, %v407_v16, %v358_v23  ;;  %v409_v27 = vrot.slane %v358_v23, 4  ;;  %v508_v36 = vsel %vm323_vm1, %v507_v14, %v466_v19 }
 0x149   :  { %v396_v37 = vsel %vm323_vm1, %v395_v26, %v354_v28  ;;  %v397_v51 = vrot.slane %v354_v28, 4  ;;  %v414_v10 = vperm.slane %v408_v0, %v4637_v52  ;;  %v514_v40 = vperm.slane %v508_v36, %v4637_v52 }
 0x14a   :  { %v402_v41 = vperm.slane %v396_v37, %v4637_v52  ;;  %v410_v44 = vsel %vm323_vm1, %v370_v60, %v409_v27  ;;  %v510_v45 = vsel %vm323_vm1, %v478_v61, %v509_v33  ;;  %v522_v46 = vsel %vm323_vm1, %v482_v58, %v521_v20 }
 0x14b   :  { %v398_v48 = vsel %vm323_vm1, %v366_v62, %v397_v51  ;;  %v418_v49 = vperm.slane %v410_v44, %v4637_v52  ;;  %v427_v50 = vrot.slane %v414_v10, 4  ;;  %v4729_v57 = vsel %vm323_vm1, %v414_v10, %v429_v25 }
 0x14c   :  { %v406_v55 = vperm.slane %v398_v48, %v4637_v52  ;;  %v419_v56 = vrot.slane %v402_v41, 4  ;;  %v518_v59 = vperm.slane %v510_v45, %v4637_v52  ;;  %v4733_v60 = vsel %vm323_vm1, %v402_v41, %v421_v54 }
 0x14d   :  { %v431_v61 = vrot.slane %v418_v49, 4  ;;  %v526_v58 = vperm.slane %v520_v32, %v4637_v52  ;;  %v530_v63 = vperm.slane %v522_v46, %v4637_v52  ;;  %v4739_v6 = vsel %vm323_vm1, %v427_v50, %v4685_v42 }
 0x14e   :  { %v423_v62 = vrot.slane %v406_v55, 4  ;;  %v531_v11 = vrot.slane %v514_v40, 4  ;;  %v4744_v12 = vsel %vm323_vm1, %v514_v40, %v533_v38  ;;  %v535_v13 = vrot.slane %v518_v59, 4 }
 0x14f   :  { %v539_v14 = vrot.slane %v526_v58, 4  ;;  %v4747_v54 = vsel %vm323_vm1, %v526_v58, %v541_v53  ;;  %v585_v16 = vrot.slane %v4729_v57, 4  ;;  %v543_v17 = vrot.slane %v530_v63, 4 }
 0x150   :  { %v4752_v18 = vsel %vm323_vm1, %v419_v56, %v4680_v35  ;;  %v4756_v42 = vsel %vm323_vm1, %v423_v62, %v4672_v31  ;;  %v4759_v19 = vsel %vm323_vm1, %v406_v55, %v425_v9  ;;  %v697_v53 = vrot.slane %v4747_v54, 4 }
 0x151   :  { %v4763_v38 = vsel %vm323_vm1, %v539_v14, %v4677_v34  ;;  %v4768_v20 = vsel %vm323_vm1, %v431_v61, %v4688_v43  ;;  %v4771_v35 = vsel %vm323_vm1, %v418_v49, %v433_v47  ;;  %v547_v21 = vrot.slane %v4756_v42, 4 }
 0x152   :  { %v549_v31 = vrot.slane %v4752_v18, 4  ;;  %v559_v9 = vrot.slane %v4759_v19, 4  ;;  %v561_v23 = vrot.slane %v4733_v60, 4  ;;  %v571_v34 = vrot.slane %v4768_v20, 4 }
 0x153   :  { %v573_v25 = vrot.slane %v4739_v6, 4  ;;  %v586_v26 = vsel %vm323_vm1, %v4771_v35, %v585_v16  ;;  %v4783_v43 = vsel %vm323_vm1, %v531_v11, %v4659_v22  ;;  %v4792_v0 = vsel %vm323_vm1, %v535_v13, %v4651_v15 }
 0x154   :  { %v550_v28 = vsel %vm323_vm1, %v4756_v42, %v549_v31  ;;  %v562_v32 = vsel %vm323_vm1, %v4759_v19, %v561_v23  ;;  %v594_v33 = vperm.slane %v586_v26, %v4625_v29  ;;  %v4801_v37 = vsel %vm323_vm1, %v518_v59, %v537_v30 }
 0x155   :  { %v558_v27 = vperm.slane %v550_v28, %v4625_v29  ;;  %v570_v36 = vperm.slane %v562_v32, %v4625_v29  ;;  %v574_v22 = vsel %vm323_vm1, %v4768_v20, %v573_v25  ;;  %v583_v10 = vrot.slane %v4771_v35, 4 }
 0x156   :  { %v582_v51 = vperm.slane %v574_v22, %v4625_v29  ;;  %v631_v40 = vrot.slane %v594_v33, 4  ;;  %v4807_v41 = vsel %vm323_vm1, %v543_v17, %v4663_v24  ;;  %v4812_v45 = vsel %vm323_vm1, %v530_v63, %v545_v39 }
 0x157   :  { %v607_v44 = vrot.slane %v570_v36, 4  ;;  %v659_v15 = vrot.slane %v4792_v0, 4  ;;  %v661_v30 = vrot.slane %v4783_v43, 4  ;;  %v671_v47 = vrot.slane %v4801_v37, 4 }
 0x158   :  { %v632_v46 = vsel %vm323_vm1, %v631_v40, %v582_v51  ;;  %v673_v48 = vrot.slane %v4744_v12, 4  ;;  %v685_v49 = vrot.slane %v4763_v38, 4  ;;  %v683_v39 = vrot.slane %v4807_v41, 4 }
 0x159   :  { %v608_v50 = vsel %vm323_vm1, %v607_v44, %v558_v27  ;;  %v638_v55 = vperm.slane %v632_v46, %v4637_v52  ;;  %v662_v24 = vsel %vm323_vm1, %v4792_v0, %v661_v30  ;;  %v698_v13 = vsel %vm323_vm1, %v4812_v45, %v697_v53 }
 0x15a   :  { %v614_v56 = vperm.slane %v608_v50, %v4637_v52  ;;  %v670_v59 = vperm.slane %v662_v24, %v4625_v29  ;;  %v674_v61 = vsel %vm323_vm1, %v4801_v37, %v673_v48  ;;  %v686_v58 = vsel %vm323_vm1, %v4807_v41, %v685_v49 }
 0x15b   :  { %v651_v63 = vrot.slane %v638_v55, 4  ;;  %v682_v62 = vperm.slane %v674_v61, %v4625_v29  ;;  %v694_v11 = vperm.slane %v686_v58, %v4625_v29  ;;  %v706_v14 = vperm.slane %v698_v13, %v4625_v29 }
 0x15c   :  { %v653_v16 = vrot.slane %v614_v56, 4  ;;  %v609_v17 = vrot.slane %v558_v27, 4  ;;  %v633_v31 = vrot.slane %v582_v51, 4  ;;  %v721_v26 = vrot.slane %v670_v59, 4 }
 0x15d   :  { %v652_v23 = vsel %vm323_vm1, %v651_v63, %v614_v56  ;;  %v719_v25 = vrot.slane %v682_v62, 4  ;;  %v745_v28 = vrot.slane %v694_v11, 4  ;;  %v743_v22 = vrot.slane %v706_v14, 4 }
 0x15e   :  { %v1054_v32 = vpack.c.bf16 %v652_v23, %v652_v23  ;;  %v654_v40 = vsel %vm323_vm1, %v638_v55, %v653_v16  ;;  %v610_v44 = vsel %vm323_vm1, %v570_v36, %v609_v17  ;;  %v634_v48 = vsel %vm323_vm1, %v594_v33, %v633_v31 }
 0x15f   :  { %v720_v30 = vsel %vm323_vm1, %v719_v25, %v670_v59  ;;  %v1056_v46 = vpack.c.bf16 %v654_v40, %v654_v40  ;;  %v618_v53 = vperm.slane %v610_v44, %v4637_v52  ;;  %v744_v49 = vsel %vm323_vm1, %v743_v22, %v694_v11 }
 0x160   :  { %v1067_v27 = vsel %vm1062_vm2, %v1054_v32, 0  ;;  %v726_v51 = vperm.slane %v720_v30, %v4637_v52  ;;  %v642_v50 = vperm.slane %v634_v48, %v4637_v52  ;;  %v750_v55 = vperm.slane %v744_v49, %v4637_v52 }
 0x161   :  { %1076 = vmatpush.bf16.xpose.msra.mxu2 %v1067_v27  ;;  %v1105_v36 = vsel %vm1062_vm2, %v1056_v46, 0  ;;  %v657_v24 = vrot.slane %v618_v53, 4  ;;  %v722_v56 = vsel %vm323_vm1, %v682_v62, %v721_v26  ;;  %v746_v58 = vsel %vm323_vm1, %v706_v14, %v745_v28 }
 0x162   :  { %1114 = vmatpush.bf16.xpose.msrb.mxu0 %v1105_v36  ;;  %v765_v59 = vrot.slane %v726_v51, 4  ;;  %v655_v61 = vrot.slane %v642_v50, 4  ;;  %v730_v33 = vperm.slane %v722_v56, %v4637_v52  ;;  %v695_v63 = vrot.slane %v4812_v45, 4 }
 0x163   :  { %v763_v11 = vrot.slane %v750_v55, 4  ;;  %v754_v13 = vperm.slane %v746_v58, %v4637_v52  ;;  %v658_v16 = vsel %vm323_vm1, %v642_v50, %v657_v24  ;;  %v548_v28 = vsel %vm323_vm1, %v547_v21, %v4752_v18 }
 0x164   :  { %v766_v17 = vsel %vm323_vm1, %v750_v55, %v765_v59  ;;  %v656_v31 = vsel %vm323_vm1, %v655_v61, %v618_v53  ;;  %v769_v23 = vrot.slane %v730_v33, 4  ;;  %v1060_v62 = vpack.c.bf16 %v658_v16, %v658_v16 }
 0x165   :  { %v764_v25 = vsel %vm323_vm1, %v763_v11, %v726_v51  ;;  %v1057_v26 = vpack.c.bf16 %v766_v17, %v766_v17  ;;  %v1058_v32 = vpack.c.bf16 %v656_v31, %v656_v31  ;;  %v767_v22 = vrot.slane %v754_v13, 4 }
 0x166   :  { %v1055_v40 = vpack.c.bf16 %v764_v25, %v764_v25  ;;  %v1181_v14 = vsel %vm1062_vm2, %v1060_v62, 0  ;;  %v770_v45 = vsel %vm323_vm1, %v754_v13, %v769_v23  ;;  %v560_v42 = vsel %vm323_vm1, %v559_v9, %v4733_v60 }
 0x167   :  { %v1124_v44 = vsel %vm1062_vm2, %v1057_v26, 0  ;;  %v1143_v30 = vsel %vm1062_vm2, %v1058_v32, 0  ;;  %v768_v46 = vsel %vm323_vm1, %v767_v22, %v730_v33  ;;  %v1061_v53 = vpack.c.bf16 %v770_v45, %v770_v45 }
 0x168   :  { %v1086_v48 = vsel %vm1062_vm2, %v1055_v40, 0  ;;  %1133 = vmatpush.bf16.xpose.msrb.mxu1 %v1124_v44  ;;  %v1059_v27 = vpack.c.bf16 %v768_v46, %v768_v46  ;;  %v572_v18 = vsel %vm323_vm1, %v571_v34, %v4739_v6  ;;  %v554_v51 = vperm.slane %v548_v28, %v4625_v29 }
 0x169   :  { %1152 = vmatpush.bf16.xpose.msrb.mxu2 %v1143_v30  ;;  %1095 = vmatpush.bf16.xpose.msra.mxu3 %v1086_v48  ;;  %v1200_v21 = vsel %vm1062_vm2, %v1061_v53, 0  ;;  %v566_v49 = vperm.slane %v560_v42, %v4625_v29  ;;  %v584_v50 = vsel %vm323_vm1, %v583_v10, %v4729_v57  ;;  %v578_v60 = vperm.slane %v572_v18, %v4625_v29 }
 0x16a   :  { %1190 = vmatpush.bf16.xpose.msra.mxu0 %v1181_v14  ;;  %v1162_v19 = vsel %vm1062_vm2, %v1059_v27, 0  ;;  %v590_v20 = vperm.slane %v584_v50, %v4625_v29  ;;  %v660_v6 = vsel %vm323_vm1, %v659_v15, %v4783_v43  ;;  %v672_v57 = vsel %vm323_vm1, %v671_v47, %v4744_v12 }
 0x16b   :  { %v595_v9 = vrot.slane %v566_v49, 4  ;;  %v666_v34 = vperm.slane %v660_v6, %v4625_v29  ;;  %v678_v10 = vperm.slane %v672_v57, %v4625_v29  ;;  %v684_v55 = vsel %vm323_vm1, %v683_v39, %v4763_v38 }
 0x16c   :  { %v619_v35 = vrot.slane %v590_v20, 4  ;;  %v696_v43 = vsel %vm323_vm1, %v695_v63, %v4747_v54  ;;  %v690_v15 = vperm.slane %v684_v55, %v4625_v29  ;;  %v597_v39 = vrot.slane %v554_v51, 4 }
 0x16d   :  { %v596_v0 = vsel %vm323_vm1, %v595_v9, %v554_v51  ;;  %v702_v36 = vperm.slane %v696_v43, %v4625_v29  ;;  %v707_v47 = vrot.slane %v678_v10, 4  ;;  %v621_v33 = vrot.slane %v578_v60, 4  ;;  %v801_v9 = vpop.f32.mrf.mxu1 }
 0x16e   :  { %v602_v37 = vperm.slane %v596_v0, %v4637_v52  ;;  %v620_v12 = vsel %vm323_vm1, %v619_v35, %v578_v60  ;;  %v709_v31 = vrot.slane %v666_v34, 4  ;;  %v733_v62 = vrot.slane %v690_v15, 4 }
 0x16f   :  { %v626_v24 = vperm.slane %v620_v12, %v4637_v52  ;;  %v731_v56 = vrot.slane %v702_v36, 4  ;;  %v708_v38 = vsel %vm323_vm1, %v707_v47, %v666_v34  ;;  %v598_v26 = vsel %vm323_vm1, %v566_v49, %v597_v39 }
 0x170   :  { %1209 = vmatpush.bf16.xpose.msra.mxu1 %v1200_v21  ;;  %v645_v41 = vrot.slane %v602_v37, 4  ;;  %v714_v54 = vperm.slane %v708_v38, %v4637_v52  ;;  %v622_v40 = vsel %vm323_vm1, %v590_v20, %v621_v33  ;;  %v606_v45 = vperm.slane %v598_v26, %v4637_v52 }
 0x171   :  { %1171 = vmatpush.bf16.xpose.msrb.mxu3 %v1162_v19  ;;  %v643_v59 = vrot.slane %v626_v24, 4  ;;  %v732_v61 = vsel %vm323_vm1, %v731_v56, %v690_v15  ;;  %v710_v28 = vsel %vm323_vm1, %v678_v10, %v709_v31  ;;  %v630_v44 = vperm.slane %v622_v40, %v4637_v52 }
 0x172   :  { %v738_v58 = vperm.slane %v732_v61, %v4637_v52  ;;  %v646_v63 = vsel %vm323_vm1, %v626_v24, %v645_v41  ;;  %v757_v13 = vrot.slane %v714_v54, 4  ;;  %v734_v30 = vsel %vm323_vm1, %v702_v36, %v733_v62 }
 0x173   :  { %v644_v11 = vsel %vm323_vm1, %v643_v59, %v602_v37  ;;  %v1048_v16 = vpack.c.bf16 %v646_v63, %v646_v63  ;;  %v718_v46 = vperm.slane %v710_v28, %v4637_v52  ;;  %v649_v53 = vrot.slane %v606_v45, 4 }
 0x174   :  { %v1046_v17 = vpack.c.bf16 %v644_v11, %v644_v11  ;;  %v755_v23 = vrot.slane %v738_v58, 4  ;;  %v758_v25 = vsel %vm323_vm1, %v738_v58, %v757_v13  ;;  %v742_v48 = vperm.slane %v734_v30, %v4637_v52 }
 0x175   :  { %3797 = vmatmul.msk.bf16.vlgmr.msrb.gmra.mxu0 %vm1062_vm2, %v1048_v16  ;;  %v1049_v22 = vpack.c.bf16 %v758_v25, %v758_v25  ;;  %v647_v27 = vrot.slane %v630_v44, 4  ;;  %v761_v42 = vrot.slane %v718_v46, 4  ;;  %v650_v21 = vsel %vm323_vm1, %v630_v44, %v649_v53  ;;  %v803_v34 = vpop.f32.mrf.mxu1 }
 0x176   :  { %3795 = vmatmul.msk.bf16.vlgmr.msra.gmra.mxu2 %vm1062_vm2, %v1046_v17  ;;  %v756_v32 = vsel %vm323_vm1, %v755_v23, %v714_v54  ;;  %v759_v18 = vrot.slane %v742_v48, 4  ;;  %v1052_v49 = vpack.c.bf16 %v650_v21, %v650_v21  ;;  %v776_v13 = vperm.slane %v4603_v5, 2 }
 0x177   :  { %v1047_v14 = vpack.c.bf16 %v756_v32, %v756_v32  ;;  %3798 = vmatmul.msk.bf16.vlgmr.msrb.gmra.mxu1 %vm1062_vm2, %v1049_v22  ;;  %v648_v51 = vsel %vm323_vm1, %v647_v27, %v606_v45  ;;  %v762_v50 = vsel %vm323_vm1, %v742_v48, %v761_v42 }
 0x178   :  { %v1050_v19 = vpack.c.bf16 %v648_v51, %v648_v51  ;;  %v760_v60 = vsel %vm323_vm1, %v759_v18, %v718_v46  ;;  %v1053_v20 = vpack.c.bf16 %v762_v50, %v762_v50  ;;  %v4947_v17 = vadd.f32 %v801_v9, %v776_v13 }
 0x179   :  { %3796 = vmatmul.msk.bf16.vlgmr.msra.gmra.mxu3 %vm1062_vm2, %v1047_v14  ;;  %v1051_v6 = vpack.c.bf16 %v760_v60, %v760_v60  ;;  %v4949_v31 = vadd.f32 %v803_v34, %v776_v13 }
 0x17b   :  { %v3998_v23 = vpack.i.bf16 %v4949_v31, %v4947_v17 }
 0x185   :  { %3801 = vmatmul.msk.bf16.vlgmr.msra.gmra.mxu0 %vm1062_vm2, %v1052_v49 }
 0x186   :  { %3799 = vmatmul.msk.bf16.vlgmr.msrb.gmra.mxu2 %vm1062_vm2, %v1050_v19 }
 0x187   :  { %3802 = vmatmul.msk.bf16.vlgmr.msra.gmra.mxu1 %vm1062_vm2, %v1053_v20 }
 0x189   :  { %3800 = vmatmul.msk.bf16.vlgmr.msrb.gmra.mxu3 %vm1062_vm2, %v1051_v6 }
 0x1f2   :  { %v1116_v57 = vpop.f32.mrf.mxu0 }
 0x1f3   :  { %v1221_v35 = vsel %vm1062_vm2, %v1116_v57, -inf }
 0x1f4   :  { %1222 = vmax.xlane.f32.xlu1 %v1221_v35  ;;  %v1135_v10 = vpop.f32.mrf.mxu1 }
 0x1f5   :  { %v1224_v47 = vsel %vm1062_vm2, %v1135_v10, -inf }
 0x1f9   :  { %v1078_v55 = vpop.f32.mrf.mxu2 }
 0x1fa   :  { %v1215_v43 = vsel %vm1062_vm2, %v1078_v55, -inf  ;;  %v1118_v0 = vpop.f32.mrf.mxu0 }
 0x1fb   :  { %1216 = vmax.xlane.f32.xlu2 %v1215_v43 }
 0x1fc   :  { %v1097_v15 = vpop.f32.mrf.mxu3  ;;  %v1137_v37 = vpop.f32.mrf.mxu1 }
 0x1fd   :  { %v1218_v36 = vsel %vm1062_vm2, %v1097_v15, -inf }
 0x1fe   :  { %1219 = vmax.xlane.f32.xlu0 %v1218_v36 }
 0x201   :  { %v1080_v12 = vpop.f32.mrf.mxu2 }
 0x202   :  { %v1192_v24 = vpop.f32.mrf.mxu0 }
 0x203   :  { %1225 = vmax.xlane.f32.xlu2 %v1224_v47  ;;  %v1233_v56 = vsel %vm1062_vm2, %v1192_v24, -inf }
 0x204   :  { %v1099_v41 = vpop.f32.mrf.mxu3  ;;  %1234 = vmax.xlane.f32.xlu1 %v1233_v56  ;;  %v4940_v38 = vpop.f32.mrf.mxu1 }
 0x205   :  { %v1236_v11 = vsel %vm1062_vm2, %v4940_v38, -inf }
 0x209   :  { %v1154_v39 = vpop.f32.mrf.mxu2 }
 0x20a   :  { %v1227_v59 = vsel %vm1062_vm2, %v1154_v39, -inf  ;;  %v1194_v54 = vpop.f32.mrf.mxu0 }
 0x20b   :  { %1228 = vmax.xlane.f32.xlu2 %v1227_v59 }
 0x20c   :  { %v1173_v61 = vpop.f32.mrf.mxu3  ;;  %v1213_v58 = vpop.f32.mrf.mxu1 }
 0x20d   :  { %v1230_v33 = vsel %vm1062_vm2, %v1173_v61, -inf }
 0x20e   :  { %1231 = vmax.xlane.f32.xlu0 %v1230_v33 }
 0x211   :  { %v1156_v63 = vpop.f32.mrf.mxu2 }
 0x213   :  { %1237 = vmax.xlane.f32.xlu2 %v1236_v11 }
 0x214   :  { %v1175_v16 = vpop.f32.mrf.mxu3 }
 0x21d   :  { %3999 = vrot.lane.b32.xlu1 %v3998_v23, %s4443_s4 }
 0x222   :  { %3994 = vrot.lane.b32.xlu0 %v3998_v23, %s4445_s5 }
 0x22b   :  { %4004 = vrot.lane.b32.xlu2 %v3998_v23, %s4444_s17 }
 0x267   :  { %v1223_v62 = vpop.xlane.xlu1 %1222 }
 0x268   :  { %v1241_v25 = vsub.f32 %v1116_v57, %v1223_v62 }
 0x26a   :  { %v1251_v26 = vmul.f32 1.442695, %v1241_v25 }
 0x26c   :  { %4069 = vpow2.f32 %v1251_v26 }
 0x26e   :  { %v1217_v5 = vpop.xlane.xlu2 %1216 }
 0x26f   :  { %v1239_v32 = vsub.f32 %v1078_v55, %v1217_v5 }
 0x271   :  { %v1220_v22 = vpop.xlane.xlu0 %1219  ;;  %v1247_v40 = vmul.f32 1.442695, %v1239_v32 }
 0x272   :  { %v4956_v14 = vpop.eup %4069  ;;  %v1240_v45 = vsub.f32 %v1097_v15, %v1220_v22 }
 0x273   :  { %4071 = vpow2.f32 %v1247_v40  ;;  %v1269_v28 = vsel %vm1062_vm2, %v4956_v14, 0.0 }
 0x274   :  { %v1249_v44 = vmul.f32 1.442695, %v1240_v45  ;;  %1270 = vadd.xlane.f32.xlu2 %v1269_v28 }
 0x276   :  { %4073 = vpow2.f32 %v1249_v44  ;;  %v1226_v30 = vpop.xlane.xlu2 %1225 }
 0x277   :  { %v1242_v46 = vsub.f32 %v1135_v10, %v1226_v30  ;;  %v1235_v53 = vpop.xlane.xlu1 %1234 }
 0x278   :  { %v1245_v48 = vsub.f32 %v1192_v24, %v1235_v53 }
 0x279   :  { %v4960_v27 = vpop.eup %4071  ;;  %v1253_v42 = vmul.f32 1.442695, %v1242_v46 }
 0x27a   :  { %v1259_v18 = vmul.f32 1.442695, %v1245_v48  ;;  %v1263_v21 = vsel %vm1062_vm2, %v4960_v27, 0.0 }
 0x27b   :  { %4075 = vpow2.f32 %v1253_v42  ;;  %1264 = vadd.xlane.f32.xlu0 %v1263_v21 }
 0x27c   :  { %v4964_v51 = vpop.eup %4073  ;;  %4077 = vpow2.f32 %v1259_v18 }
 0x27d   :  { %v1266_v49 = vsel %vm1062_vm2, %v4964_v51, 0.0 }
 0x27e   :  { %1267 = vadd.xlane.f32.xlu1 %v1266_v49  ;;  %v1229_v50 = vpop.xlane.xlu2 %1228 }
 0x27f   :  { %v1243_v19 = vsub.f32 %v1154_v39, %v1229_v50 }
 0x281   :  { %v4968_v60 = vpop.eup %4075  ;;  %v1232_v20 = vpop.xlane.xlu0 %1231  ;;  %v1255_v6 = vmul.f32 1.442695, %v1243_v19 }
 0x282   :  { %v4970_v9 = vpop.eup %4077  ;;  %v1244_v34 = vsub.f32 %v1173_v61, %v1232_v20  ;;  %v1272_v57 = vsel %vm1062_vm2, %v4968_v60, 0.0  ;;  %v884_v61 = vrot.slane %v4949_v31, 4 }
 0x283   :  { %4079 = vpow2.f32 %v1255_v6  ;;  %1273 = vadd.xlane.f32.xlu0 %v1272_v57  ;;  %v1281_v35 = vsel %vm1062_vm2, %v4970_v9, 0.0 }
 0x284   :  { %v1257_v10 = vmul.f32 1.442695, %v1244_v34  ;;  %1282 = vadd.xlane.f32.xlu2 %v1281_v35 }
 0x286   :  { %4081 = vpow2.f32 %v1257_v10  ;;  %v1238_v55 = vpop.xlane.xlu2 %1237 }
 0x287   :  { %v1246_v43 = vsub.f32 %v4940_v38, %v1238_v55  ;;  %v828_v38 = vrot.slane %v4947_v17, 4 }
 0x289   :  { %v4977_v0 = vpop.eup %4079  ;;  %v1261_v15 = vmul.f32 1.442695, %v1246_v43 }
 0x28a   :  { %v1275_v36 = vsel %vm1062_vm2, %v4977_v0, 0.0 }
 0x28b   :  { %4083 = vpow2.f32 %v1261_v15  ;;  %1276 = vadd.xlane.f32.xlu1 %v1275_v36 }
 0x28c   :  { %v4981_v37 = vpop.eup %4081 }
 0x28d   :  { %v1278_v12 = vsel %vm1062_vm2, %v4981_v37, 0.0 }
 0x28e   :  { %1279 = vadd.xlane.f32.xlu0 %v1278_v12  ;;  %v4005_v47 = vpop.permute.xlu2 %4004 }
 0x28f   :  { %v4007_v24 = vunpack.i.h.bf16 %v4005_v47  ;;  %v4006_v56 = vunpack.i.l.bf16 %v4005_v47  ;;  %v4000_v41 = vpop.permute.xlu1 %3999 }
 0x290   :  { %v4002_v39 = vunpack.i.h.bf16 %v4000_v41  ;;  %v4001_v59 = vunpack.i.l.bf16 %v4000_v41 }
 0x291   :  { %v4986_v54 = vpop.eup %4083  ;;  %v894_v11 = vrot.slane %v4007_v24, 4  ;;  %v838_v13 = vrot.slane %v4006_v56, 4 }
 0x292   :  { %v882_v33 = vrot.slane %v4002_v39, 4  ;;  %v826_v58 = vrot.slane %v4001_v59, 4  ;;  %v829_v63 = vsel %vm323_vm1, %v4001_v59, %v828_v38  ;;  %v885_v16 = vsel %vm323_vm1, %v4002_v39, %v884_v61 }
 0x293   :  { %v1284_v23 = vsel %vm1062_vm2, %v4986_v54, 0.0  ;;  %v837_v40 = vperm.slane %v829_v63, %v4625_v29  ;;  %v893_v45 = vperm.slane %v885_v16, %v4625_v29 }
 0x294   :  { %v3995_v62 = vpop.permute.xlu0 %3994  ;;  %v883_v25 = vsel %vm323_vm1, %v882_v33, %v4949_v31  ;;  %v827_v26 = vsel %vm323_vm1, %v826_v58, %v4947_v17  ;;  %1285 = vadd.xlane.f32.xlu1 %v1284_v23 }
 0x295   :  { %v3997_v5 = vunpack.i.h.bf16 %v3995_v62  ;;  %v3996_v32 = vunpack.i.l.bf16 %v3995_v62  ;;  %v889_v22 = vperm.slane %v883_v25, %v4625_v29  ;;  %v833_v28 = vperm.slane %v827_v26, %v4625_v29 }
 0x296   :  { %v864_v49 = vrot.slane %v837_v40, 4  ;;  %v920_v34 = vrot.slane %v893_v45, 4 }
 0x297   :  { %v896_v44 = vrot.slane %v3997_v5, 4  ;;  %v839_v30 = vsel %vm323_vm1, %v838_v13, %v3996_v32  ;;  %v840_v46 = vrot.slane %v3996_v32, 4  ;;  %v895_v31 = vsel %vm323_vm1, %v894_v11, %v3997_v5 }
 0x298   :  { %v845_v53 = vperm.slane %v839_v30, %v4625_v29  ;;  %v901_v17 = vperm.slane %v895_v31, %v4625_v29  ;;  %v908_v48 = vrot.slane %v889_v22, 4  ;;  %v852_v42 = vrot.slane %v833_v28, 4 }
 0x299   :  { %v841_v18 = vsel %vm323_vm1, %v4006_v56, %v840_v46  ;;  %v897_v21 = vsel %vm323_vm1, %v4007_v24, %v896_v44 }
 0x29a   :  { %v849_v50 = vperm.slane %v841_v18, %v4625_v29  ;;  %v850_v19 = vrot.slane %v845_v53, 4  ;;  %v905_v20 = vperm.slane %v897_v21, %v4625_v29  ;;  %v906_v6 = vrot.slane %v901_v17, 4 }
 0x29b   :  { %v853_v57 = vsel %vm323_vm1, %v845_v53, %v852_v42  ;;  %v909_v35 = vsel %vm323_vm1, %v901_v17, %v908_v48 }
 0x29c   :  { %v862_v10 = vrot.slane %v849_v50, 4  ;;  %v918_v55 = vrot.slane %v905_v20, 4  ;;  %v851_v43 = vsel %vm323_vm1, %v850_v19, %v833_v28  ;;  %v861_v15 = vperm.slane %v853_v57, %v4637_v52 }
 0x29d   :  { %v857_v36 = vperm.slane %v851_v43, %v4637_v52  ;;  %v865_v12 = vsel %vm323_vm1, %v849_v50, %v864_v49  ;;  %v907_v47 = vsel %vm323_vm1, %v906_v6, %v889_v22  ;;  %v917_v24 = vperm.slane %v909_v35, %v4637_v52 }
 0x29e   :  { %v863_v56 = vsel %vm323_vm1, %v862_v10, %v837_v40  ;;  %v873_v41 = vperm.slane %v865_v12, %v4637_v52  ;;  %v876_v38 = vrot.slane %v861_v15, 4  ;;  %v913_v39 = vperm.slane %v907_v47, %v4637_v52 }
 0x29f   :  { %v869_v59 = vperm.slane %v863_v56, %v4637_v52  ;;  %v874_v61 = vrot.slane %v857_v36, 4  ;;  %v919_v33 = vsel %vm323_vm1, %v918_v55, %v893_v45  ;;  %v921_v58 = vsel %vm323_vm1, %v905_v20, %v920_v34 }
 0x2a0   :  { %v877_v63 = vsel %vm323_vm1, 0.0, %v876_v38  ;;  %v880_v11 = vrot.slane %v873_v41, 4  ;;  %v925_v13 = vperm.slane %v919_v33, %v4637_v52  ;;  %v929_v16 = vperm.slane %v921_v58, %v4637_v52 }
 0x2a1   :  { %v875_v23 = vsel %vm323_vm1, 0.0, %v874_v61  ;;  %v878_v62 = vrot.slane %v869_v59, 4  ;;  %v930_v25 = vrot.slane %v913_v39, 4  ;;  %v932_v26 = vrot.slane %v917_v24, 4 }
 0x2a2   :  { %v881_v5 = vsel %vm323_vm1, 0.0, %v880_v11  ;;  %v934_v32 = vrot.slane %v925_v13, 4  ;;  %v936_v22 = vrot.slane %v929_v16, 4  ;;  %v943_v40 = vrot.slane %v877_v63, 4 }
 0x2a3   :  { %v879_v45 = vsel %vm323_vm1, 0.0, %v878_v62  ;;  %v931_v28 = vsel %vm323_vm1, 0.0, %v930_v25  ;;  %v933_v44 = vsel %vm323_vm1, 0.0, %v932_v26  ;;  %v949_v30 = vsel %vm323_vm1, %v880_v11, %v869_v59 }
 0x2a4   :  { %v935_v46 = vsel %vm323_vm1, 0.0, %v934_v32  ;;  %v937_v31 = vsel %vm323_vm1, 0.0, %v936_v22  ;;  %v954_v53 = vrot.slane %v881_v5, 4  ;;  %v997_v17 = vrot.slane %v933_v44, 4 }
 0x2a5   :  { %v1003_v48 = vsel %vm323_vm1, %v936_v22, %v925_v13  ;;  %v1008_v42 = vrot.slane %v937_v31, 4  ;;  %v938_v18 = vsel %vm323_vm1, %v876_v38, %v857_v36  ;;  %v944_v21 = vsel %vm323_vm1, %v943_v40, %v875_v23 }
 0x2a6   :  { %v955_v49 = vsel %vm323_vm1, %v954_v53, %v879_v45  ;;  %v942_v50 = vperm.slane %v938_v18, %v4625_v29  ;;  %v948_v19 = vperm.slane %v944_v21, %v4625_v29  ;;  %v953_v20 = vperm.slane %v949_v30, %v4625_v29 }
 0x2a7   :  { %v1009_v6 = vsel %vm323_vm1, %v1008_v42, %v935_v46  ;;  %v959_v34 = vperm.slane %v955_v49, %v4625_v29  ;;  %v992_v57 = vsel %vm323_vm1, %v932_v26, %v913_v39  ;;  %v998_v35 = vsel %vm323_vm1, %v997_v17, %v931_v28 }
 0x2a8   :  { %v960_v10 = vrot.slane %v948_v19, 4  ;;  %v996_v55 = vperm.slane %v992_v57, %v4625_v29  ;;  %v1002_v43 = vperm.slane %v998_v35, %v4625_v29  ;;  %v1007_v15 = vperm.slane %v1003_v48, %v4625_v29 }
 0x2a9   :  { %v972_v36 = vrot.slane %v959_v34, 4  ;;  %v1013_v12 = vperm.slane %v1009_v6, %v4625_v29  ;;  %v962_v47 = vrot.slane %v942_v50, 4  ;;  %v974_v24 = vrot.slane %v953_v20, 4 }
 0x2aa   :  { %v961_v56 = vsel %vm323_vm1, %v960_v10, %v942_v50  ;;  %v1014_v41 = vrot.slane %v1002_v43, 4  ;;  %v1016_v38 = vrot.slane %v996_v55, 4  ;;  %v1028_v39 = vrot.slane %v1007_v15, 4 }
 0x2ab   :  { %v967_v59 = vperm.slane %v961_v56, %v4637_v52  ;;  %v973_v61 = vsel %vm323_vm1, %v972_v36, %v953_v20  ;;  %v1026_v33 = vrot.slane %v1013_v12, 4  ;;  %v963_v58 = vsel %vm323_vm1, %v948_v19, %v962_v47 }
 0x2ac   :  { %v979_v63 = vperm.slane %v973_v61, %v4637_v52  ;;  %v1015_v11 = vsel %vm323_vm1, %v1014_v41, %v996_v55  ;;  %v971_v13 = vperm.slane %v963_v58, %v4637_v52  ;;  %v975_v16 = vsel %vm323_vm1, %v959_v34, %v974_v24 }
 0x2ad   :  { %v1021_v23 = vperm.slane %v1015_v11, %v4637_v52  ;;  %v1027_v62 = vsel %vm323_vm1, %v1026_v33, %v1007_v15  ;;  %v983_v25 = vperm.slane %v975_v16, %v4637_v52  ;;  %v1017_v26 = vsel %vm323_vm1, %v1002_v43, %v1016_v38 }
 0x2ae   :  { %v984_v5 = vrot.slane %v979_v63, 4  ;;  %v1033_v32 = vperm.slane %v1027_v62, %v4637_v52  ;;  %v1025_v22 = vperm.slane %v1017_v26, %v4637_v52  ;;  %v1029_v40 = vsel %vm323_vm1, %v1013_v12, %v1028_v39 }
 0x2af   :  { %v988_v45 = vrot.slane %v983_v25, 4  ;;  %v1037_v28 = vperm.slane %v1029_v40, %v4637_v52  ;;  %v986_v44 = vrot.slane %v967_v59, 4  ;;  %v1040_v30 = vrot.slane %v1021_v23, 4 }
 0x2b0   :  { %v985_v46 = vsel %vm323_vm1, %v984_v5, %v967_v59  ;;  %v1038_v31 = vrot.slane %v1033_v32, 4  ;;  %v990_v53 = vrot.slane %v971_v13, 4  ;;  %v1044_v17 = vrot.slane %v1025_v22, 4 }
 0x2b1   :  { %v1311_v48 = vpack.c.bf16 %v985_v46, %v985_v46  ;;  %v989_v42 = vsel %vm323_vm1, %v988_v45, %v971_v13  ;;  %v1042_v18 = vrot.slane %v1037_v28, 4  ;;  %v987_v21 = vsel %vm323_vm1, %v979_v63, %v986_v44 }
 0x2b2   :  { %v1039_v49 = vsel %vm323_vm1, %v1038_v31, %v1021_v23  ;;  %v1315_v50 = vpack.c.bf16 %v989_v42, %v989_v42  ;;  %v1313_v19 = vpack.c.bf16 %v987_v21, %v987_v21  ;;  %v1041_v20 = vsel %vm323_vm1, %v1033_v32, %v1040_v30  ;;  %v1473_v21 = vld [vmem:[#allocation8] sm:$0xf] }
 0x2b3   :  { %v1324_v6 = vsel %vm1322_vm3, %v1311_v48, 0  ;;  %v1312_v34 = vpack.c.bf16 %v1039_v49, %v1039_v49  ;;  %v1043_v57 = vsel %vm323_vm1, %v1042_v18, %v1025_v22  ;;  %v1314_v35 = vpack.c.bf16 %v1041_v20, %v1041_v20  ;;  %v1475_v49 = vld [vmem:[#allocation8 + $0x4] sm:$0xf]  ;;  %v1541_v20 = vld [vmem:[#allocation8 + $0xc] sm:$0xf] }
 0x2b4   :  { %1333 = vmatpush.bf16.msra.mxu2 %v1324_v6  ;;  %v1400_v10 = vsel %vm1322_vm3, %v1315_v50, 0  ;;  %v1316_v55 = vpack.c.bf16 %v1043_v57, %v1043_v57  ;;  %v1362_v43 = vsel %vm1322_vm3, %v1313_v19, 0  ;;  %v991_v15 = vsel %vm323_vm1, %v983_v25, %v990_v53  ;;  %v1517_v19 = vld [vmem:[#allocation8 + $0x8] sm:$0xf] }
 0x2b5   :  { %v1343_v36 = vsel %vm1322_vm3, %v1312_v34, 0  ;;  %1371 = vmatpush.bf16.msrb.mxu0 %v1362_v43  ;;  %v1381_v12 = vsel %vm1322_vm3, %v1314_v35, 0  ;;  %v1317_v47 = vpack.c.bf16 %v991_v15, %v991_v15  ;;  %v1045_v24 = vsel %vm323_vm1, %v1037_v28, %v1044_v17 }
 0x2b6   :  { %1352 = vmatpush.bf16.msra.mxu3 %v1343_v36  ;;  %v1419_v56 = vsel %vm1322_vm3, %v1316_v55, 0  ;;  %1390 = vmatpush.bf16.msrb.mxu1 %v1381_v12  ;;  %v1318_v41 = vpack.c.bf16 %v1045_v24, %v1045_v24  ;;  %v1480_v50 = vsel %vm1322_vm3, %v1475_v49, 0  ;;  %v1522_v6 = vsel %vm1322_vm3, %v1517_v19, 0  ;;  %v5128_v19 = vld [vmem:[%s5846_s1 + $0x8] sm:$0xff]  }
 0x2b7   :  { %v1438_v38 = vsel %vm1322_vm3, %v1317_v47, 0  ;;  %v1546_v34 = vsel %vm1322_vm3, %v1541_v20, 0  ;;  %v3931_v20 = vld [vmem:[%s5848_s3 + $0x8] sm:$0xff]  }
 0x2b8   :  { %1409 = vmatpush.bf16.msrb.mxu2 %v1400_v10  ;;  %v1457_v39 = vsel %vm1322_vm3, %v1318_v41, 0 }
 0x2b9   :  { %1447 = vmatpush.bf16.msra.mxu0 %v1438_v38 }
 0x2ba   :  { %1428 = vmatpush.bf16.msrb.mxu3 %v1419_v56  ;;  %1466 = vmatpush.bf16.msra.mxu1 %v1457_v39 }
 0x2e7   :  { %v1271_v59 = vpop.xlane.xlu2 %1270 }
 0x2e8   :  { %4085 = vrcp.f32 %v1271_v59 }
 0x2ee   :  { %v4086_v61 = vpop.eup %4085  ;;  %v1265_v33 = vpop.xlane.xlu0 %1264 }
 0x2ef   :  { %v1297_v58 = vmul.f32 %v4086_v61, %v4956_v14  ;;  %4087 = vrcp.f32 %v1265_v33 }
 0x2f1   :  { %v1305_v63 = vpack.c.bf16 %v1297_v58, %v1297_v58  ;;  %v1268_v11 = vpop.xlane.xlu1 %1267 }
 0x2f2   :  { %4089 = vrcp.f32 %v1268_v11  ;;  %v3896_v11 = vld [vmem:[#allocation11] sm:$0xff] }
 0x2f3   :  { %3805 = vmatmul.msk.bf16.vlgmr.msrb.gmra.mxu0 %vm1062_vm2, %v1305_v63  ;;  %v3897_v63 = vld [vmem:[#allocation11 + $0x8] sm:$0xff] }
 0x2f4   :  { %1531 = vmatpush.bf16.msrb.mxu0 %v1522_v6  ;;  %v3920_v6 = vunpack.c.l.bf16 %v5128_v19 }
 0x2f5   :  { %v4088_v13 = vpop.eup %4087 }
 0x2f6   :  { %v1295_v16 = vmul.f32 %v4088_v13, %v4960_v27  ;;  %v1274_v23 = vpop.xlane.xlu0 %1273 }
 0x2f7   :  { %4091 = vrcp.f32 %v1274_v23  ;;  %v1283_v62 = vpop.xlane.xlu2 %1282 }
 0x2f8   :  { %v4090_v25 = vpop.eup %4089  ;;  %v1303_v26 = vpack.c.bf16 %v1295_v16, %v1295_v16  ;;  %4093 = vrcp.f32 %v1283_v62 }
 0x2f9   :  { %v1296_v5 = vmul.f32 %v4090_v25, %v4964_v51 }
 0x2fa   :  { %3803 = vmatmul.msk.bf16.vlgmr.msra.gmra.mxu2 %vm1062_vm2, %v1303_v26 }
 0x2fb   :  { %v1304_v14 = vpack.c.bf16 %v1296_v5, %v1296_v5  ;;  %1489 = vmatpush.bf16.msra.mxu2 %v1480_v50  ;;  %v5105_v5 = vld [vmem:[#allocation17] sm:$0xff] }
 0x2fd   :  { %v4092_v32 = vpop.eup %4091  ;;  %3804 = vmatmul.msk.bf16.vlgmr.msra.gmra.mxu3 %vm1062_vm2, %v1304_v14  ;;  %v1564_v14 = vperm.slane %v5105_v5, 3 }
 0x2fe   :  { %v4094_v22 = vpop.eup %4093  ;;  %v1298_v40 = vmul.f32 %v4092_v32, %v4968_v60  ;;  %v1277_v45 = vpop.xlane.xlu1 %1276 }
 0x2ff   :  { %v1301_v27 = vmul.f32 %v4094_v22, %v4970_v9  ;;  %4095 = vrcp.f32 %v1277_v45 }
 0x300   :  { %v1306_v28 = vpack.c.bf16 %v1298_v40, %v1298_v40 }
 0x301   :  { %v1309_v44 = vpack.c.bf16 %v1301_v27, %v1301_v27  ;;  %v1280_v30 = vpop.xlane.xlu0 %1279 }
 0x302   :  { %4097 = vrcp.f32 %v1280_v30  ;;  %3806 = vmatmul.msk.bf16.vlgmr.msrb.gmra.mxu1 %vm1062_vm2, %v1306_v28 }
 0x303   :  { %3809 = vmatmul.msk.bf16.vlgmr.msra.gmra.mxu0 %vm1062_vm2, %v1309_v44  ;;  %1555 = vmatpush.bf16.msrb.mxu1 %v1546_v34  ;;  %v3921_v34 = vunpack.c.h.bf16 %v5128_v19 }
 0x305   :  { %v4096_v51 = vpop.eup %4095 }
 0x306   :  { %v1299_v46 = vmul.f32 %v4096_v51, %v4977_v0  ;;  %v1500_v0 = vsel %vm1322_vm3, %v1473_v21, 0 }
 0x307   :  { %v1286_v31 = vpop.xlane.xlu1 %1285  ;;  %1509 = vmatpush.bf16.msra.mxu3 %v1500_v0 }
 0x308   :  { %v4098_v53 = vpop.eup %4097  ;;  %v1307_v17 = vpack.c.bf16 %v1299_v46, %v1299_v46  ;;  %4099 = vrcp.f32 %v1286_v31 }
 0x309   :  { %v1300_v60 = vmul.f32 %v4098_v53, %v4981_v37  ;;  %4101 = vrcp.f32 %v4452_v1 }
 0x30a   :  { %3807 = vmatmul.msk.bf16.vlgmr.msrb.gmra.mxu2 %vm1062_vm2, %v1307_v17 }
 0x30b   :  { %v1308_v9 = vpack.c.bf16 %v1300_v60, %v1300_v60 }
 0x30d   :  { %3808 = vmatmul.msk.bf16.vlgmr.msrb.gmra.mxu3 %vm1062_vm2, %v1308_v9  ;;  %v5117_v9 = vld [vmem:[%s5846_s1] sm:$0xff]  }
 0x30e   :  { %v4100_v48 = vpop.eup %4099  ;;  %1938 = vmatpush.bf16.msrb.mxu3 %v3897_v63 }
 0x30f   :  { %v1302_v42 = vmul.f32 %v4100_v48, %v4986_v54  ;;  %v3916_v48 = vunpack.c.l.bf16 %v5117_v9  ;;  %v4102_v50 = vpop.eup %4101 }
 0x310   :  { %vm1580_vm4 = vweird.f32 %v4102_v50 }
 0x311   :  { %v1310_v18 = vpack.c.bf16 %v1302_v42, %v1302_v42  ;;  %v3917_v42 = vunpack.c.h.bf16 %v5117_v9 }
 0x312   :  { %1939 = vmatpush.bf16.msrb.mxu3 %v3896_v11 }
 0x313   :  { %3810 = vmatmul.msk.bf16.vlgmr.msra.gmra.mxu1 %vm1062_vm2, %v1310_v18 }
 0x370   :  { %v1373_v37 = vpop.f32.mrf.mxu0 }
 0x378   :  { %v1375_v54 = vpop.f32.mrf.mxu0 }
 0x379   :  { %v3928_v54 = vunpack.c.l.bf16 %v3931_v20 }
 0x37d   :  { %v1335_v57 = vpop.f32.mrf.mxu2 }
 0x37f   :  { %v1392_v35 = vpop.f32.mrf.mxu1 }
 0x380   :  { %v1354_v10 = vpop.f32.mrf.mxu3  ;;  %v1474_v55 = vpack.c.bf16 %v1392_v35, %v1373_v37  ;;  %v1449_v43 = vpop.f32.mrf.mxu0  ;;  %v1576_v37 = vmul.f32 32.0, %v4102_v50 }
 0x381   :  { %v1472_v15 = vpack.c.bf16 %v1354_v10, %v1335_v57  ;;  %v3929_v57 = vunpack.c.h.bf16 %v3931_v20  ;;  %v1905_v10 = vadd.f32 %v3928_v54, %v3920_v6 }
 0x382   :  { %3811 = vmatmul.msk.bf16.vlgmr.msra.gmra.mxu2 %vm1062_vm2, %v1474_v55  ;;  %v1577_v35 = vsub.f32 1.0, %v1576_v37 }
 0x383   :  { %3812 = vmatmul.msk.bf16.vlgmr.msra.gmra.mxu3 %vm1062_vm2, %v1472_v15  ;;  %v1906_v55 = vadd.f32 %v3929_v57, %v3921_v34 }
 0x384   :  { %v1578_v15 = vmul.f32 %v4102_v50, %v1577_v35 }
 0x385   :  { %v1337_v36 = vpop.f32.mrf.mxu2 }
 0x386   :  { %v1579_v36 = vadd.f32 %v4102_v50, %v1578_v15 }
 0x387   :  { %v1394_v12 = vpop.f32.mrf.mxu1 }
 0x388   :  { %v1356_v47 = vpop.f32.mrf.mxu3  ;;  %v1451_v24 = vpop.f32.mrf.mxu0  ;;  %v5136_v12 = vsel %vm1580_vm4, %v4102_v50, %v1579_v36  ;;  %v3899_v36 = vld [vmem:[#allocation13 + $0x8] sm:$0xff] }
 0x389   :  { %2462 = vmatpush.bf16.msra.mxu0 %v3899_v36 }
 0x38d   :  { %v1411_v56 = vpop.f32.mrf.mxu2 }
 0x390   :  { %v1430_v41 = vpop.f32.mrf.mxu3  ;;  %v1468_v38 = vpop.f32.mrf.mxu1 }
 0x391   :  { %v1516_v39 = vpack.c.bf16 %v1430_v41, %v1411_v56  ;;  %v1540_v59 = vpack.c.bf16 %v1468_v38, %v1449_v43  ;;  %v1908_v43 = vpack.c.bf16 %v1906_v55, %v1905_v10 }
 0x393   :  { %3813 = vmatmul.msk.bf16.vlgmr.msrb.gmra.mxu0 %vm1062_vm2, %v1516_v39  ;;  %3814 = vmatmul.msk.bf16.vlgmr.msrb.gmra.mxu1 %vm1062_vm2, %v1540_v59 }
 0x395   :  { %v1413_v61 = vpop.f32.mrf.mxu2 }
 0x398   :  { %v1432_v33 = vpop.f32.mrf.mxu3  ;;  %v1470_v58 = vpop.f32.mrf.mxu1 }
 0x405   :  { %v1491_v13 = vpop.f32.mrf.mxu2 }
 0x406   :  { %v1511_v16 = vpop.f32.mrf.mxu3 }
 0x407   :  { %v1512_v23 = vadd.f32 %v1511_v16, %v1491_v13 }
 0x40d   :  { %v1493_v22 = vpop.f32.mrf.mxu2 }
 0x40e   :  { %v1513_v45 = vpop.f32.mrf.mxu3 }
 0x40f   :  { %v1514_v27 = vadd.f32 %v1513_v45, %v1493_v22 }
 0x410   :  { %v1533_v62 = vpop.f32.mrf.mxu0  ;;  %v1557_v25 = vpop.f32.mrf.mxu1 }
 0x411   :  { %v1538_v26 = vadd.f32 %v1533_v62, %v1512_v23 }
 0x413   :  { %v1562_v32 = vadd.f32 %v1557_v25, %v1538_v26  ;;  %v1913_v25 = vperm.slane %v5105_v5, 5  ;;  %v3895_v26 = vld [vmem:[#allocation10 + $0x8] sm:$0xff] }
 0x414   :  { %1655 = vmatpush.bf16.msrb.mxu2 %v3895_v26 }
 0x415   :  { %v1565_v40 = vadd.f32 %v1564_v14, %v1562_v32  ;;  %v3894_v32 = vld [vmem:[#allocation10] sm:$0xff] }
 0x417   :  { %v1567_v28 = vadd.f32 %v3908_v2, %v1565_v40  ;;  %v3923_v2 = vld [vmem:[%s5848_s3] sm:$0xff]  }
 0x418   :  { %v1535_v44 = vpop.f32.mrf.mxu0  ;;  %v1559_v30 = vpop.f32.mrf.mxu1  ;;  %v3924_v18 = vunpack.c.l.bf16 %v3923_v2  ;;  %v3925_v21 = vunpack.c.h.bf16 %v3923_v2  ;;  %1656 = vmatpush.bf16.msrb.mxu2 %v3894_v32 }
 0x419   :  { %v1539_v51 = vadd.f32 %v1535_v44, %v1514_v27  ;;  %v1569_v46 = vsel %vm239_vm0, %v1567_v28, 0.0 }
 0x41a   :  { %1570 = vadd.xlane.f32.xlu0 %v1569_v46  ;;  %v1904_v49 = vadd.f32 %v3925_v21, %v3917_v42 }
 0x41b   :  { %v1563_v31 = vadd.f32 %v1559_v30, %v1539_v51 }
 0x41d   :  { %v1566_v53 = vadd.f32 %v1564_v14, %v1563_v31 }
 0x41f   :  { %v1568_v17 = vadd.f32 %v3909_v3, %v1566_v53  ;;  %v1903_v3 = vadd.f32 %v3924_v18, %v3916_v48  ;;  %v233_v18 = vld [vmem:[#allocation17 + $0x8] sm:$0xff] }
 0x420   :  { %v1623_v20 = vperm.slane %v233_v18, 2 }
 0x421   :  { %v1572_v60 = vsel %vm239_vm0, %v1568_v17, 0.0  ;;  %v1907_v0 = vpack.c.bf16 %v1904_v49, %v1903_v3  ;;  %v1620_v49 = vperm.slane %v233_v18, 1 }
 0x422   :  { %1573 = vadd.xlane.f32.xlu2 %v1572_v60 }
 0x423   :  { %3832 = vmatmul.msk.bf16.vlgmr.msrb.gmra.mxu3 %vm239_vm0, %v1907_v0 }
 0x433   :  { %3833 = vmatmul.msk.bf16.gmra.mxu3 %vm239_vm0, %v1908_v43 }
 0x48d   :  { %v1571_v47 = vpop.xlane.xlu0 %1570 }
 0x48e   :  { %v1582_v24 = vmul.f32 %v5136_v12, %v1571_v47  ;;  %v3898_v47 = vld [vmem:[#allocation13] sm:$0xff] }
 0x48f   :  { %2463 = vmatpush.bf16.msra.mxu0 %v3898_v47 }
 0x490   :  { %v1584_v56 = vsub.f32 %v1567_v28, %v1582_v24 }
 0x492   :  { %v1586_v41 = vmul.f32 %v1584_v56, %v1584_v56  ;;  %3842 = vmatmul.msk.bf16.vlgmr.msra.gmra.mxu0 %vm239_vm0, %v5117_v9 }
 0x494   :  { %v1588_v38 = vsel %vm239_vm0, %v1586_v41, 0.0 }
 0x495   :  { %1589 = vadd.xlane.f32.xlu1 %v1588_v38  ;;  %v1574_v39 = vpop.xlane.xlu2 %1573 }
 0x496   :  { %v1583_v59 = vmul.f32 %v5136_v12, %v1574_v39 }
 0x498   :  { %v1585_v61 = vsub.f32 %v1568_v17, %v1583_v59 }
 0x49a   :  { %v1587_v33 = vmul.f32 %v1585_v61, %v1585_v61 }
 0x49c   :  { %v1591_v58 = vsel %vm239_vm0, %v1587_v33, 0.0 }
 0x49d   :  { %1592 = vadd.xlane.f32.xlu0 %v1591_v58 }
 0x4a2   :  { %3843 = vmatmul.msk.bf16.gmra.mxu0 %vm239_vm0, %v5128_v19 }
 0x4a6   :  { %v1941_v63 = vpop.f32.mrf.mxu3 }
 0x4a7   :  { %v5144_v14 = vadd.f32 %v1941_v63, %v1913_v25 }
 0x4ae   :  { %v1943_v11 = vpop.f32.mrf.mxu3 }
 0x4af   :  { %v5156_v60 = vadd.f32 %v1943_v11, %v1913_v25 }
 0x4b6   :  { %v1946_v23 = vpop.f32.mrf.mxu3 }
 0x4b7   :  { %v5146_v40 = vadd.f32 %v1946_v23, %v1913_v25 }
 0x4b9   :  { %v2105_v38 = vrot.slane %v5146_v40, 4 }
 0x4be   :  { %v1948_v27 = vpop.f32.mrf.mxu3 }
 0x4bf   :  { %v5149_v28 = vadd.f32 %v1948_v27, %v1913_v25 }
 0x4c1   :  { %v4013_v46 = vpack.i.bf16 %v5149_v28, %v5146_v40 }
 0x4c3   :  { %4014 = vrot.lane.b32.xlu1 %v4013_v46, %s4443_s4  ;;  %4019 = vrot.lane.b32.xlu0 %v4013_v46, %s4444_s17 }
 0x4c4   :  { %4009 = vrot.lane.b32.xlu2 %v4013_v46, %s4445_s5 }
 0x4cb   :  { %1957 = vrot.lane.b32.xlu1 %v5156_v60, %s4445_s5 }
 0x4d3   :  { %1981 = vrot.lane.b32.xlu1 %v5156_v60, %s4444_s17 }
 0x508   :  { %v1590_v13 = vpop.xlane.xlu1 %1589 }
 0x509   :  { %v1594_v16 = vmul.f32 %v1590_v13, %v5136_v12 }
 0x50b   :  { %v1596_v62 = vadd.f32 1e-05, %v1594_v16 }
 0x50d   :  { %4103 = vrsqrt.f32 %v1596_v62  ;;  %vm1604_vm6 = vweird.f32 %v1596_v62 }
 0x510   :  { %v1593_v22 = vpop.xlane.xlu0 %1592 }
 0x511   :  { %v1595_v45 = vmul.f32 %v1593_v22, %v5136_v12 }
 0x513   :  { %v4104_v44 = vpop.eup %4103  ;;  %v1597_v30 = vadd.f32 1e-05, %v1595_v45 }
 0x514   :  { %v1599_v51 = vmul.f32 %v4104_v44, %v1596_v62  ;;  %vm1605_vm5 = vweird.f32 %v4104_v44 }
 0x515   :  { %4105 = vrsqrt.f32 %v1597_v30  ;;  %vm1606_vm7 = vmor %vm1604_vm6, %vm1605_vm5  ;;  %vm1614_vm9 = vweird.f32 %v1597_v30 }
 0x516   :  { %v1600_v31 = vmul.f32 %v4104_v44, %v1599_v51 }
 0x518   :  { %v1601_v53 = vmul.f32 0.5, %v1600_v31 }
 0x51a   :  { %v1602_v17 = vsub.f32 1.5, %v1601_v53 }
 0x51b   :  { %v4106_v2 = vpop.eup %4105 }
 0x51c   :  { %v1603_v48 = vmul.f32 %v4104_v44, %v1602_v17  ;;  %v1609_v42 = vmul.f32 %v4106_v2, %v1597_v30  ;;  %vm1615_vm8 = vweird.f32 %v4106_v2 }
 0x51d   :  { %vm1616_vm10 = vmor %vm1614_vm9, %vm1615_vm8 }
 0x51e   :  { %v1607_v21 = vsel %vm1606_vm7, %v4104_v44, %v1603_v48  ;;  %v1610_v1 = vmul.f32 %v4106_v2, %v1609_v42  ;;  %v4010_v24 = vpop.permute.xlu2 %4009 }
 0x51f   :  { %v1618_v0 = vmul.f32 %v1607_v21, %v1584_v56  ;;  %v4012_v56 = vunpack.i.h.bf16 %v4010_v24  ;;  %v4011_v41 = vunpack.i.l.bf16 %v4010_v24 }
 0x520   :  { %v1611_v3 = vmul.f32 0.5, %v1610_v1 }
 0x521   :  { %v1621_v6 = vmul.f32 %v1620_v49, %v1618_v0  ;;  %v2173_v4 = vrot.slane %v4012_v56, 4 }
 0x522   :  { %v1612_v50 = vsub.f32 1.5, %v1611_v3 }
 0x523   :  { %v5162_v57 = vadd.f32 %v1623_v20, %v1621_v6 }
 0x524   :  { %v1613_v37 = vmul.f32 %v4106_v2, %v1612_v50 }
 0x525   :  { %v1626_v55 = vadd.f32 %v3912_v7, %v5162_v57  ;;  %v2161_v7 = vrot.slane %v5149_v28, 4 }
 0x526   :  { %v1617_v34 = vsel %vm1616_vm10, %v4106_v2, %v1613_v37 }
 0x527   :  { %v1619_v54 = vmul.f32 %v1617_v34, %v1585_v61 }
 0x529   :  { %v1622_v35 = vmul.f32 %v1620_v49, %v1619_v54 }
 0x52b   :  { %v5164_v10 = vadd.f32 %v1623_v20, %v1622_v35 }
 0x52d   :  { %v1627_v43 = vadd.f32 %v3913_v8, %v5164_v10  ;;  %v2117_v8 = vrot.slane %v4011_v41, 4 }
 0x52f   :  { %v1628_v15 = vpack.c.bf16 %v1627_v43, %v1626_v55 }
 0x531   :  { %3823 = vmatmul.msk.bf16.vlgmr.msrb.gmra.mxu2 %vm239_vm0, %v1628_v15 }
 0x535   :  { %v4015_v39 = vpop.permute.xlu1 %4014  ;;  %v4020_v59 = vpop.permute.xlu0 %4019 }
 0x536   :  { %v4017_v61 = vunpack.i.h.bf16 %v4015_v39  ;;  %v4016_v33 = vunpack.i.l.bf16 %v4015_v39  ;;  %v4022_v58 = vunpack.i.h.bf16 %v4020_v59  ;;  %v4021_v63 = vunpack.i.l.bf16 %v4020_v59 }
 0x538   :  { %v2159_v11 = vrot.slane %v4017_v61, 4  ;;  %v2162_v13 = vsel %vm323_vm1, %v4017_v61, %v2161_v7  ;;  %v2103_v16 = vrot.slane %v4016_v33, 4  ;;  %v2106_v9 = vsel %vm323_vm1, %v4016_v33, %v2105_v38 }
 0x539   :  { %v2170_v23 = vperm.slane %v2162_v13, %v4625_v29  ;;  %v2114_v62 = vperm.slane %v2106_v9, %v4625_v29  ;;  %v2171_v25 = vrot.slane %v4022_v58, 4  ;;  %v2115_v26 = vrot.slane %v4021_v63, 4 }
 0x53a   :  { %v2160_v32 = vsel %vm323_vm1, %v2159_v11, %v5149_v28  ;;  %v2104_v22 = vsel %vm323_vm1, %v2103_v16, %v5146_v40  ;;  %v2118_v45 = vsel %vm323_vm1, %v4021_v63, %v2117_v8  ;;  %v2174_v27 = vsel %vm323_vm1, %v4022_v58, %v2173_v4 }
 0x53b   :  { %v2166_v44 = vperm.slane %v2160_v32, %v4625_v29  ;;  %v2197_v30 = vrot.slane %v2170_v23, 4  ;;  %v2110_v51 = vperm.slane %v2104_v22, %v4625_v29  ;;  %v2141_v46 = vrot.slane %v2114_v62, 4 }
 0x53c   :  { %v2116_v31 = vsel %vm323_vm1, %v2115_v26, %v4011_v41  ;;  %v2126_v28 = vperm.slane %v2118_v45, %v4625_v29  ;;  %v2172_v53 = vsel %vm323_vm1, %v2171_v25, %v4012_v56  ;;  %v2182_v40 = vperm.slane %v2174_v27, %v4625_v29 }
 0x53d   :  { %v2185_v17 = vrot.slane %v2166_v44, 4  ;;  %v2129_v2 = vrot.slane %v2110_v51, 4  ;;  %v2122_v48 = vperm.slane %v2116_v31, %v4625_v29  ;;  %v2178_v19 = vperm.slane %v2172_v53, %v4625_v29 }
 0x53e   :  { %v2139_v42 = vrot.slane %v2126_v28, 4  ;;  %v2142_v18 = vsel %vm323_vm1, %v2126_v28, %v2141_v46  ;;  %v2195_v21 = vrot.slane %v2182_v40, 4  ;;  %v2198_v1 = vsel %vm323_vm1, %v2182_v40, %v2197_v30 }
 0x53f   :  { %v2127_v3 = vrot.slane %v2122_v48, 4  ;;  %v2130_v49 = vsel %vm323_vm1, %v2122_v48, %v2129_v2  ;;  %v2150_v0 = vperm.slane %v2142_v18, %v4637_v52  ;;  %v2183_v50 = vrot.slane %v2178_v19, 4 }
 0x540   :  { %v2138_v37 = vperm.slane %v2130_v49, %v4637_v52  ;;  %v2140_v20 = vsel %vm323_vm1, %v2139_v42, %v2114_v62  ;;  %v2186_v6 = vsel %vm323_vm1, %v2178_v19, %v2185_v17  ;;  %v2196_v34 = vsel %vm323_vm1, %v2195_v21, %v2170_v23 }
 0x541   :  { %v2128_v54 = vsel %vm323_vm1, %v2127_v3, %v2110_v51  ;;  %v2146_v35 = vperm.slane %v2140_v20, %v4637_v52  ;;  %v2157_v55 = vrot.slane %v2150_v0, 4  ;;  %v2184_v43 = vsel %vm323_vm1, %v2183_v50, %v2166_v44 }
 0x542   :  { %v2134_v15 = vperm.slane %v2128_v54, %v4637_v52  ;;  %v2153_v36 = vrot.slane %v2138_v37, 4  ;;  %v2190_v47 = vperm.slane %v2184_v43, %v4637_v52  ;;  %v2194_v24 = vperm.slane %v2186_v6, %v4637_v52 }
 0x543   :  { %v2155_v56 = vrot.slane %v2146_v35, 4  ;;  %v2158_v41 = vsel %vm323_vm1, 0.0, %v2157_v55  ;;  %v2202_v38 = vperm.slane %v2196_v34, %v4637_v52  ;;  %v2206_v7 = vperm.slane %v2198_v1, %v4637_v52 }
 0x544   :  { %v2151_v39 = vrot.slane %v2134_v15, 4  ;;  %v2154_v4 = vsel %vm323_vm1, 0.0, %v2153_v36  ;;  %v2207_v8 = vrot.slane %v2190_v47, 4  ;;  %v2209_v59 = vrot.slane %v2194_v24, 4 }
 0x545   :  { %v2156_v61 = vsel %vm323_vm1, 0.0, %v2155_v56  ;;  %v2211_v33 = vrot.slane %v2202_v38, 4  ;;  %v2213_v58 = vrot.slane %v2206_v7, 4  ;;  %v2328_v63 = vrot.slane %v2154_v4, 4 }
 0x546   :  { %v2152_v11 = vsel %vm323_vm1, 0.0, %v2151_v39  ;;  %v2208_v13 = vsel %vm323_vm1, 0.0, %v2207_v8  ;;  %v2210_v16 = vsel %vm323_vm1, 0.0, %v2209_v59  ;;  %v2334_v9 = vsel %vm323_vm1, %v2157_v55, %v2146_v35 }
 0x547   :  { %v2212_v23 = vsel %vm323_vm1, 0.0, %v2211_v33  ;;  %v2214_v62 = vsel %vm323_vm1, 0.0, %v2213_v58  ;;  %v2338_v25 = vperm.slane %v2334_v9, %v4625_v29  ;;  %v2339_v26 = vrot.slane %v2158_v41, 4 }
 0x548   :  { %v2382_v32 = vrot.slane %v2210_v16, 4  ;;  %v2388_v22 = vsel %vm323_vm1, %v2213_v58, %v2202_v38  ;;  %v2393_v45 = vrot.slane %v2214_v62, 4  ;;  %v2329_v27 = vsel %vm323_vm1, %v2328_v63, %v2152_v11 }
 0x549   :  { %v2340_v44 = vsel %vm323_vm1, %v2339_v26, %v2156_v61  ;;  %v2392_v30 = vperm.slane %v2388_v22, %v4625_v29  ;;  %v2323_v51 = vsel %vm323_vm1, %v2153_v36, %v2134_v15  ;;  %v2333_v46 = vperm.slane %v2329_v27, %v4625_v29 }
 0x54a   :  { %v2344_v31 = vperm.slane %v2340_v44, %v4625_v29  ;;  %v2394_v28 = vsel %vm323_vm1, %v2393_v45, %v2212_v23  ;;  %v2327_v53 = vperm.slane %v2323_v51, %v4625_v29  ;;  %v2377_v40 = vsel %vm323_vm1, %v2209_v59, %v2190_v47 }
 0x54b   :  { %v2398_v17 = vperm.slane %v2394_v28, %v4625_v29  ;;  %v2345_v2 = vrot.slane %v2333_v46, 4  ;;  %v2381_v48 = vperm.slane %v2377_v40, %v4625_v29  ;;  %v2383_v19 = vsel %vm323_vm1, %v2382_v32, %v2208_v13 }
 0x54c   :  { %v2357_v42 = vrot.slane %v2344_v31, 4  ;;  %v2387_v18 = vperm.slane %v2383_v19, %v4625_v29  ;;  %v2347_v21 = vrot.slane %v2327_v53, 4  ;;  %v2359_v1 = vrot.slane %v2338_v25, 4 }
 0x54d   :  { %v2346_v3 = vsel %vm323_vm1, %v2345_v2, %v2327_v53  ;;  %v2411_v49 = vrot.slane %v2398_v17, 4  ;;  %v2401_v0 = vrot.slane %v2381_v48, 4  ;;  %v2413_v50 = vrot.slane %v2392_v30, 4 }
 0x54e   :  { %v2352_v37 = vperm.slane %v2346_v3, %v4637_v52  ;;  %v2358_v20 = vsel %vm323_vm1, %v2357_v42, %v2338_v25  ;;  %v2399_v6 = vrot.slane %v2387_v18, 4  ;;  %v2348_v34 = vsel %vm323_vm1, %v2333_v46, %v2347_v21 }
 0x54f   :  { %v2364_v54 = vperm.slane %v2358_v20, %v4637_v52  ;;  %v2412_v35 = vsel %vm323_vm1, %v2411_v49, %v2392_v30  ;;  %v2356_v55 = vperm.slane %v2348_v34, %v4637_v52  ;;  %v2360_v43 = vsel %vm323_vm1, %v2344_v31, %v2359_v1 }
 0x550   :  { %v2400_v15 = vsel %vm323_vm1, %v2399_v6, %v2381_v48  ;;  %v2418_v36 = vperm.slane %v2412_v35, %v4637_v52  ;;  %v2371_v47 = vrot.slane %v2352_v37, 4  ;;  %v2368_v24 = vperm.slane %v2360_v43, %v4637_v52  ;;  %v2465_v35 = vpop.f32.mrf.mxu0 }
 0x551   :  { %v2369_v56 = vrot.slane %v2364_v54, 4  ;;  %v2406_v41 = vperm.slane %v2400_v15, %v4637_v52  ;;  %v2402_v38 = vsel %vm323_vm1, %v2387_v18, %v2401_v0  ;;  %v2414_v7 = vsel %vm323_vm1, %v2398_v17, %v2413_v50  ;;  %v1958_v15 = vpop.permute.xlu1 %1957 }
 0x552   :  { %v2423_v39 = vrot.slane %v2418_v36, 4  ;;  %v2372_v4 = vsel %vm323_vm1, %v2364_v54, %v2371_v47  ;;  %v2373_v8 = vrot.slane %v2368_v24, 4  ;;  %v2410_v59 = vperm.slane %v2402_v38, %v4637_v52 }
 0x553   :  { %v2370_v61 = vsel %vm323_vm1, %v2369_v56, %v2352_v37  ;;  %v2425_v33 = vrot.slane %v2406_v41, 4  ;;  %v2969_v58 = vpack.c.bf16 %v2372_v4, %v2372_v4  ;;  %v2422_v63 = vperm.slane %v2414_v7, %v4637_v52 }
 0x554   :  { %v2424_v11 = vsel %vm323_vm1, %v2423_v39, %v2406_v41  ;;  %v2965_v13 = vpack.c.bf16 %v2370_v61, %v2370_v61  ;;  %v2374_v16 = vsel %vm323_vm1, %v2373_v8, %v2356_v55  ;;  %v2375_v45 = vrot.slane %v2356_v55, 4 }
 0x555   :  { %v2966_v9 = vpack.c.bf16 %v2424_v11, %v2424_v11  ;;  %v2426_v23 = vsel %vm323_vm1, %v2418_v36, %v2425_v33  ;;  %v3053_v62 = vunpack.c.l.b16 %v2969_v58  ;;  %v2427_v25 = vrot.slane %v2422_v63, 4 }
 0x556   :  { %v3005_v26 = vunpack.c.l.b16 %v2965_v13  ;;  %v2970_v32 = vpack.c.bf16 %v2426_v23, %v2426_v23  ;;  %v2973_v22 = vpack.c.bf16 %v2374_v16, %v2374_v16  ;;  %v2429_v30 = vrot.slane %v2410_v59, 4 }
 0x557   :  { %v3006_v27 = vunpack.c.l.b16 %v2966_v9  ;;  %v2428_v44 = vsel %vm323_vm1, %v2427_v25, %v2410_v59  ;;  %v2376_v28 = vsel %vm323_vm1, %v2368_v24, %v2375_v45  ;;  %v1633_v49 = vperm.slane %v5105_v5, 4 }
 0x558   :  { %v3054_v51 = vunpack.c.l.b16 %v2970_v32  ;;  %v2974_v46 = vpack.c.bf16 %v2428_v44, %v2428_v44  ;;  %v3101_v31 = vunpack.c.l.b16 %v2973_v22  ;;  %v2430_v40 = vsel %vm323_vm1, %v2422_v63, %v2429_v30  ;;  %v2467_v55 = vpop.f32.mrf.mxu0 }
 0x559   :  { %v3007_v53 = vpack.c.b16 %v3006_v27, %v3005_v26  ;;  %v2977_v17 = vpack.c.bf16 %v2376_v28, %v2376_v28  ;;  %v2978_v19 = vpack.c.bf16 %v2430_v40, %v2430_v40  ;;  %v2437_v36 = vperm.slane %v5105_v5, 6  ;;  %v1982_v7 = vpop.permute.xlu1 %1981 }
 0x55a   :  { %v3055_v2 = vpack.c.b16 %v3054_v51, %v3053_v62  ;;  %v3102_v48 = vunpack.c.l.b16 %v2974_v46  ;;  %v2061_v4 = vrot.slane %v1958_v15, 4  ;;  %v2059_v5 = vrot.slane %v1982_v7, 4 }
 0x55b   :  { %v3012_v42 = vsel %vm1062_vm2, %v3007_v53, 0  ;;  %v5262_v18 = vunpack.c.l.b16 %v2977_v17  ;;  %v5265_v3 = vunpack.c.l.b16 %v2978_v19  ;;  %v5289_v24 = vadd.f32 %v2465_v35, %v2437_v36 }
 0x55c   :  { %3021 = vmatpush.bf16.xpose.msra.mxu2 %v3012_v42  ;;  %v3060_v21 = vsel %vm1062_vm2, %v3055_v2, 0  ;;  %v3103_v1 = vpack.c.b16 %v3102_v48, %v3101_v31  ;;  %v5291_v56 = vadd.f32 %v2467_v55, %v2437_v36  ;;  %v2062_v59 = vsel %vm323_vm1, %v1982_v7, %v2061_v4 }
 0x55d   :  { %v3151_v50 = vpack.c.b16 %v5265_v3, %v5262_v18  ;;  %v2060_v61 = vsel %vm323_vm1, %v2059_v5, %v1958_v15  ;;  %v2070_v33 = vperm.slane %v2062_v59, %v4625_v29  ;;  %v2049_v58 = vrot.slane %v5156_v60, 4 }
 0x55e   :  { %v3108_v0 = vsel %vm1062_vm2, %v3103_v1, 0  ;;  %v2066_v63 = vperm.slane %v2060_v61, %v4625_v29  ;;  %v1993_v7 = vrot.slane %v5144_v14, 4 }
 0x55f   :  { %3117 = vmatpush.bf16.xpose.msrb.mxu0 %v3108_v0  ;;  %v2083_v9 = vrot.slane %v2070_v33, 4 }
 0x560   :  { %v2470_v43 = vpop.f32.mrf.mxu0  ;;  %v2071_v25 = vrot.slane %v2066_v63, 4 }
 0x561   :  { %v5293_v41 = vadd.f32 %v2470_v43, %v2437_v36 }
 0x564   :  { %3069 = vmatpush.bf16.xpose.msrb.mxu2 %v3060_v21 }
 0x568   :  { %v2472_v47 = vpop.f32.mrf.mxu0 }
 0x569   :  { %v5295_v38 = vadd.f32 %v2472_v47, %v2437_v36 }
 0x56b   :  { %v5299_v39 = vpack.i.bf16 %v5295_v38, %v5293_v41 }
 0x5b4   :  { %v1658_v37 = vpop.f32.mrf.mxu2 }
 0x5b5   :  { %v5271_v20 = vadd.f32 %v1658_v37, %v1633_v49 }
 0x5b7   :  { %1677 = vrot.lane.b32.xlu1 %v5271_v20, %s4444_s17 }
 0x5bc   :  { %v1660_v6 = vpop.f32.mrf.mxu2 }
 0x5bd   :  { %v5275_v34 = vadd.f32 %v1660_v6, %v1633_v49 }
 0x5bf   :  { %v4028_v54 = vpack.i.bf16 %v5144_v14, %v5275_v34  ;;  %4039 = vrot.lane.b32.xlu1 %v5299_v39, %s4443_s4  ;;  %v1741_v59 = vrot.slane %v5275_v34, 4 }
 0x5c1   :  { %4029 = vrot.lane.b32.xlu0 %v4028_v54, %s4443_s4  ;;  %4024 = vrot.lane.b32.xlu2 %v4028_v54, %s4445_s5 }
 0x5c9   :  { %4034 = vrot.lane.b32.xlu0 %v4028_v54, %s4444_s17  ;;  %1969 = vrot.lane.b32.xlu2 %v5156_v60, %s4443_s4 }
 0x5d1   :  { %1671 = vrot.lane.b32.xlu0 %v5271_v20, %s4443_s4  ;;  %1665 = vrot.lane.b32.xlu2 %v5271_v20, %s4445_s5 }
 0x5d9   :  { %4049 = vrot.lane.b32.xlu0 %v5299_v39, %s4445_s5  ;;  %4044 = vrot.lane.b32.xlu2 %v5299_v39, %s4444_s17 }
 0x61b   :  { %v5301_v8 = vpop.permute.xlu2 %4024 }
 0x623   :  { %v1970_v11 = vpop.permute.xlu2 %1969 }
 0x624   :  { %v2047_v13 = vrot.slane %v1970_v11, 4  ;;  %v2050_v16 = vsel %vm323_vm1, %v1970_v11, %v2049_v58 }
 0x625   :  { %v2058_v23 = vperm.slane %v2050_v16, %v4625_v29  ;;  %v4027_v16 = vunpack.i.h.bf16 %v5301_v8 }
 0x626   :  { %v2048_v62 = vsel %vm323_vm1, %v2047_v13, %v5156_v60 }
 0x627   :  { %v2054_v26 = vperm.slane %v2048_v62, %v4625_v29  ;;  %v2084_v32 = vsel %vm323_vm1, %v2083_v9, %v2058_v23  ;;  %v2085_v22 = vrot.slane %v2058_v23, 4  ;;  %v4026_v9 = vunpack.i.l.bf16 %v5301_v8 }
 0x628   :  { %v2090_v45 = vperm.slane %v2084_v32, %v4637_v52 }
 0x629   :  { %v2072_v27 = vsel %vm323_vm1, %v2071_v25, %v2054_v26  ;;  %v2073_v44 = vrot.slane %v2054_v26, 4  ;;  %v2086_v30 = vsel %vm323_vm1, %v2070_v33, %v2085_v22  ;;  %v1678_v40 = vpop.permute.xlu1 %1677 }
 0x62a   :  { %v2078_v51 = vperm.slane %v2072_v27, %v4637_v52  ;;  %v2094_v46 = vperm.slane %v2086_v30, %v4637_v52  ;;  %v2099_v28 = vrot.slane %v2090_v45, 4  ;;  %v1695_v49 = vrot.slane %v1678_v40, 4 }
 0x62b   :  { %v2074_v31 = vsel %vm323_vm1, %v2066_v63, %v2073_v44  ;;  %v1666_v17 = vpop.permute.xlu2 %1665 }
 0x62c   :  { %v2082_v60 = vperm.slane %v2074_v31, %v4637_v52  ;;  %v2101_v53 = vrot.slane %v2094_v46, 4  ;;  %v2095_v2 = vrot.slane %v2078_v51, 4  ;;  %v2100_v37 = vsel %vm323_vm1, 0.0, %v2099_v28 }
 0x62d   :  { %v1697_v54 = vrot.slane %v1666_v17, 4  ;;  %v1696_v5 = vsel %vm323_vm1, %v1695_v49, %v1666_v17  ;;  %v1685_v17 = vrot.slane %v5271_v20, 4 }
 0x62e   :  { %v2097_v48 = vrot.slane %v2082_v60, 4  ;;  %v2102_v19 = vsel %vm323_vm1, 0.0, %v2101_v53  ;;  %v2280_v42 = vsel %vm323_vm1, %v2101_v53, %v2090_v45  ;;  %v2096_v36 = vsel %vm323_vm1, 0.0, %v2095_v2 }
 0x62f   :  { %v2284_v21 = vperm.slane %v2280_v42, %v4625_v29  ;;  %v2285_v1 = vrot.slane %v2102_v19, 4  ;;  %v1698_v58 = vsel %vm323_vm1, %v1678_v40, %v1697_v54  ;;  %v5347_v22 = vperm.slane %v1696_v5, %v4625_v29 }
 0x630   :  { %v2098_v0 = vsel %vm323_vm1, 0.0, %v2097_v48  ;;  %v2269_v6 = vsel %vm323_vm1, %v2097_v48, %v2078_v51  ;;  %v5350_v45 = vperm.slane %v1698_v58, %v4625_v29  ;;  %v2005_v53 = vrot.slane %v4027_v16, 4 }
 0x631   :  { %v2273_v35 = vperm.slane %v2269_v6, %v4625_v29  ;;  %v2274_v55 = vrot.slane %v2098_v0, 4  ;;  %v2286_v43 = vsel %vm323_vm1, %v2285_v1, %v2100_v37  ;;  %v2305_v15 = vrot.slane %v2284_v21, 4 }
 0x632   :  { %v2290_v47 = vperm.slane %v2286_v43, %v4625_v29  ;;  %v1753_v40 = vrot.slane %v4026_v9, 4  ;;  %v1719_v2 = vrot.slane %v5350_v45, 4 }
 0x633   :  { %v2275_v4 = vsel %vm323_vm1, %v2274_v55, %v2096_v36  ;;  %v4030_v61 = vpop.permute.xlu0 %4029  ;;  %v2293_v33 = vrot.slane %v2273_v35, 4 }
 0x634   :  { %v4032_v63 = vunpack.i.h.bf16 %v4030_v61  ;;  %v4031_v11 = vunpack.i.l.bf16 %v4030_v61  ;;  %v2279_v13 = vperm.slane %v2275_v4, %v4625_v29  ;;  %v2306_v23 = vsel %vm323_vm1, %v2290_v47, %v2305_v15 }
 0x635   :  { %v2303_v46 = vrot.slane %v2290_v47, 4  ;;  %v5363_v60 = vperm.slane %v2306_v23, %v4637_v52 }
 0x636   :  { %v1991_v62 = vrot.slane %v4032_v63, 4  ;;  %v1994_v25 = vsel %vm323_vm1, %v4032_v63, %v1993_v7  ;;  %v1739_v26 = vrot.slane %v4031_v11, 4  ;;  %v1742_v32 = vsel %vm323_vm1, %v4031_v11, %v1741_v59 }
 0x637   :  { %v2294_v27 = vsel %vm323_vm1, %v2279_v13, %v2293_v33  ;;  %v2002_v8 = vperm.slane %v1994_v25, %v4625_v29  ;;  %v1750_v51 = vperm.slane %v1742_v32, %v4625_v29  ;;  %v2291_v28 = vrot.slane %v2279_v13, 4 }
 0x638   :  { %v1992_v44 = vsel %vm323_vm1, %v1991_v62, %v5144_v14  ;;  %v1740_v30 = vsel %vm323_vm1, %v1739_v26, %v5275_v34  ;;  %v5360_v31 = vperm.slane %v2294_v27, %v4637_v52  ;;  %v5370_v14 = vsel %vm1062_vm2, %v3151_v50, 0 }
 0x639   :  { %v1707_v34 = vrot.slane %v5347_v22, 4  ;;  %v1998_v48 = vperm.slane %v1992_v44, %v4625_v29  ;;  %v1746_v19 = vperm.slane %v1740_v30, %v4625_v29  ;;  %v2029_v1 = vrot.slane %v2002_v8, 4 }
 0x63a   :  { %v1777_v49 = vrot.slane %v1750_v51, 4  ;;  %v2319_v6 = vrot.slane %v5363_v60, 4  ;;  %v2292_v18 = vsel %vm323_vm1, %v2291_v28, %v2273_v35  ;;  %v2304_v3 = vsel %vm323_vm1, %v2303_v46, %v2284_v21 }
 0x63b   :  { %v4035_v42 = vpop.permute.xlu0 %4034  ;;  %v2321_v50 = vrot.slane %v5360_v31, 4  ;;  %v2017_v36 = vrot.slane %v1998_v48, 4  ;;  %v1765_v47 = vrot.slane %v1746_v19, 4  ;;  %v5387_v21 = vperm.slane %v2292_v18, %v4637_v52 }
 0x63c   :  { %v4037_v0 = vunpack.i.h.bf16 %v4035_v42  ;;  %v4036_v37 = vunpack.i.l.bf16 %v4035_v42  ;;  %v5390_v59 = vperm.slane %v2304_v3, %v4637_v52 }
 0x63e   :  { %v2003_v54 = vrot.slane %v4037_v0, 4  ;;  %v1751_v55 = vrot.slane %v4036_v37, 4  ;;  %v1754_v43 = vsel %vm323_vm1, %v4036_v37, %v1753_v40  ;;  %v2006_v15 = vsel %vm323_vm1, %v4037_v0, %v2005_v53 }
 0x63f   :  { %v1762_v7 = vperm.slane %v1754_v43, %v4625_v29  ;;  %v2014_v4 = vperm.slane %v2006_v15, %v4625_v29 }
 0x640   :  { %v1752_v5 = vsel %vm323_vm1, %v1751_v55, %v4026_v9  ;;  %v2004_v35 = vsel %vm323_vm1, %v2003_v54, %v4027_v16  ;;  %v5399_v16 = vsel %vm323_vm1, %v2319_v6, %v5360_v31 }
 0x641   :  { %v1758_v61 = vperm.slane %v1752_v5, %v4625_v29  ;;  %v1775_v33 = vrot.slane %v1762_v7, 4  ;;  %v1778_v58 = vsel %vm323_vm1, %v1762_v7, %v1777_v49  ;;  %v2010_v63 = vperm.slane %v2004_v35, %v4625_v29 }
 0x642   :  { %v1786_v11 = vperm.slane %v1778_v58, %v4637_v52  ;;  %v2027_v13 = vrot.slane %v2014_v4, 4  ;;  %v2030_v9 = vsel %vm323_vm1, %v2014_v4, %v2029_v1  ;;  %v2317_v58 = vrot.slane %v5387_v21, 4 }
 0x643   :  { %v1763_v23 = vrot.slane %v1758_v61, 4  ;;  %v1766_v62 = vsel %vm323_vm1, %v1758_v61, %v1765_v47  ;;  %v1776_v25 = vsel %vm323_vm1, %v1775_v33, %v1750_v51  ;;  %v2015_v26 = vrot.slane %v2010_v63, 4  ;;  %v1672_v15 = vpop.permute.xlu0 %1671 }
 0x644   :  { %v1774_v32 = vperm.slane %v1766_v62, %v4637_v52  ;;  %v1782_v27 = vperm.slane %v1776_v25, %v4637_v52  ;;  %v1793_v44 = vrot.slane %v1786_v11, 4  ;;  %v2018_v30 = vsel %vm323_vm1, %v2010_v63, %v2017_v36 }
 0x645   :  { %v1764_v46 = vsel %vm323_vm1, %v1763_v23, %v1746_v19  ;;  %v2016_v28 = vsel %vm323_vm1, %v2015_v26, %v1998_v48  ;;  %v2026_v53 = vperm.slane %v2018_v30, %v4637_v52  ;;  %v2028_v40 = vsel %vm323_vm1, %v2027_v13, %v2002_v8 }
 0x646   :  { %v1770_v42 = vperm.slane %v1764_v46, %v4637_v52  ;;  %v1789_v1 = vrot.slane %v1774_v32, 4  ;;  %v1791_v51 = vrot.slane %v1782_v27, 4  ;;  %v1794_v49 = vsel %vm323_vm1, 0.0, %v1793_v44 }
 0x647   :  { %v1860_v0 = vsel %vm323_vm1, %v1793_v44, %v1782_v27  ;;  %v1865_v37 = vrot.slane %v1794_v49, 4  ;;  %v2022_v6 = vperm.slane %v2016_v28, %v4637_v52  ;;  %v2034_v18 = vperm.slane %v2028_v40, %v4637_v52 }
 0x648   :  { %v1787_v19 = vrot.slane %v1770_v42, 4  ;;  %v1790_v48 = vsel %vm323_vm1, 0.0, %v1789_v1  ;;  %v1792_v3 = vsel %vm323_vm1, 0.0, %v1791_v51  ;;  %v1849_v8 = vsel %vm323_vm1, %v1789_v1, %v1770_v42 }
 0x649   :  { %v1854_v54 = vrot.slane %v1790_v48, 4  ;;  %v1864_v55 = vperm.slane %v1860_v0, %v4625_v29  ;;  %v1866_v43 = vsel %vm323_vm1, %v1865_v37, %v1792_v3  ;;  %v2972_v36 = vpack.c.bf16 %v5399_v16, %v5399_v16 }
 0x64a   :  { %v1788_v47 = vsel %vm323_vm1, 0.0, %v1787_v19  ;;  %v1870_v7 = vperm.slane %v1866_v43, %v4625_v29  ;;  %v2038_v4 = vperm.slane %v2030_v9, %v4637_v52  ;;  %v2039_v5 = vrot.slane %v2022_v6, 4 }
 0x64b   :  { %v1853_v35 = vperm.slane %v1849_v8, %v4625_v29  ;;  %v2041_v61 = vrot.slane %v2026_v53, 4  ;;  %v2043_v33 = vrot.slane %v2034_v18, 4  ;;  %v1855_v63 = vsel %vm323_vm1, %v1854_v54, %v1788_v47 }
 0x64c   :  { %v1885_v11 = vrot.slane %v1864_v55, 4  ;;  %v2045_v13 = vrot.slane %v2038_v4, 4  ;;  %v1683_v23 = vrot.slane %v1672_v15, 4  ;;  %v1883_v62 = vrot.slane %v1870_v7, 4 }
 0x64d   :  { %v2040_v25 = vsel %vm323_vm1, 0.0, %v2039_v5  ;;  %v2042_v26 = vsel %vm323_vm1, 0.0, %v2041_v61  ;;  %v1686_v9 = vsel %vm323_vm1, %v1672_v15, %v1685_v17  ;;  %v2044_v32 = vsel %vm323_vm1, 0.0, %v2043_v33 }
 0x64e   :  { %v2046_v27 = vsel %vm323_vm1, 0.0, %v2045_v13  ;;  %v2215_v44 = vsel %vm323_vm1, %v2041_v61, %v2022_v6  ;;  %v1684_v30 = vsel %vm323_vm1, %v1683_v23, %v5271_v20  ;;  %v2220_v46 = vrot.slane %v2042_v26, 4 }
 0x64f   :  { %v2226_v28 = vsel %vm323_vm1, %v2045_v13, %v2034_v18  ;;  %v1690_v53 = vperm.slane %v1684_v30, %v4625_v29  ;;  %v1694_v40 = vperm.slane %v1686_v9, %v4625_v29  ;;  %v2231_v42 = vrot.slane %v2046_v27, 4 }
 0x650   :  { %v1859_v1 = vperm.slane %v1855_v63, %v4625_v29  ;;  %v1873_v17 = vrot.slane %v1853_v35, 4  ;;  %v1886_v51 = vsel %vm323_vm1, %v1870_v7, %v1885_v11  ;;  %v1884_v37 = vsel %vm323_vm1, %v1883_v62, %v1864_v55 }
 0x651   :  { %v1708_v49 = vsel %vm323_vm1, %v1707_v34, %v1690_v53  ;;  %v1709_v0 = vrot.slane %v1690_v53, 4  ;;  %v1720_v20 = vsel %vm323_vm1, %v1719_v2, %v1694_v40  ;;  %v1721_v18 = vrot.slane %v1694_v40, 4 }
 0x652   :  { %v1714_v6 = vperm.slane %v1708_v49, %v4637_v52  ;;  %v1726_v19 = vperm.slane %v1720_v20, %v4637_v52  ;;  %v1874_v48 = vsel %vm323_vm1, %v1859_v1, %v1873_v17  ;;  %v5459_v34 = vperm.slane %v1886_v51, %v4637_v52 }
 0x653   :  { %v1710_v3 = vsel %vm323_vm1, %v5347_v22, %v1709_v0  ;;  %v5456_v8 = vperm.slane %v1874_v48, %v4637_v52  ;;  %v1871_v54 = vrot.slane %v1859_v1, 4  ;;  %v1722_v55 = vsel %vm323_vm1, %v5350_v45, %v1721_v18 }
 0x654   :  { %v1718_v2 = vperm.slane %v1710_v3, %v4637_v52  ;;  %v1731_v43 = vrot.slane %v1714_v6, 4  ;;  %v1735_v15 = vrot.slane %v1726_v19, 4  ;;  %v1730_v47 = vperm.slane %v1722_v55, %v4637_v52 }
 0x655   :  { %v1899_v7 = vrot.slane %v5459_v34, 4  ;;  %v1872_v22 = vsel %vm323_vm1, %v1871_v54, %v1853_v35  ;;  %v5468_v4 = vperm.slane %v1884_v37, %v4637_v52  ;;  %v2230_v5 = vperm.slane %v2226_v28, %v4625_v29 }
 0x656   :  { %v2232_v61 = vsel %vm323_vm1, %v2231_v42, %v2044_v32  ;;  %v1733_v33 = vrot.slane %v1718_v2, 4  ;;  %v5473_v63 = vperm.slane %v1872_v22, %v4637_v52  ;;  %v1732_v45 = vsel %vm323_vm1, 0.0, %v1731_v43 }
 0x657   :  { %v1737_v11 = vrot.slane %v1730_v47, 4  ;;  %v1900_v13 = vsel %vm323_vm1, %v1899_v7, %v5456_v8  ;;  %v1895_v23 = vrot.slane %v5468_v4, 4  ;;  %v2219_v26 = vperm.slane %v2215_v44, %v4625_v29 }
 0x658   :  { %v1734_v35 = vsel %vm323_vm1, 0.0, %v1733_v33  ;;  %v2960_v62 = vpack.c.bf16 %v1900_v13, %v1900_v13  ;;  %v2221_v9 = vsel %vm323_vm1, %v2220_v46, %v2040_v25  ;;  %v1736_v32 = vsel %vm323_vm1, 0.0, %v1735_v15 }
 0x659   :  { %v1738_v27 = vsel %vm323_vm1, 0.0, %v1737_v11  ;;  %v1800_v30 = vrot.slane %v1734_v35, 4  ;;  %v1806_v28 = vsel %vm323_vm1, %v1737_v11, %v1726_v19  ;;  %v1795_v53 = vsel %vm323_vm1, %v1733_v33, %v1714_v6 }
 0x65a   :  { %v1811_v40 = vrot.slane %v1738_v27, 4  ;;  %3849 = vmatmul.msk.bf16.vlgmr.msrb.gmra.mxu0 %vm1062_vm2, %v2960_v62  ;;  %v1896_v42 = vsel %vm323_vm1, %v1895_v23, %v5473_v63  ;;  %v2225_v1 = vperm.slane %v2221_v9, %v4625_v29  ;;  %v1810_v25 = vperm.slane %v1806_v28, %v4625_v29 }
 0x65b   :  { %v1801_v44 = vsel %vm323_vm1, %v1800_v30, %v1732_v45  ;;  %v2956_v46 = vpack.c.bf16 %v1896_v42, %v1896_v42  ;;  %v2236_v17 = vperm.slane %v2232_v61, %v4625_v29  ;;  %v2239_v49 = vrot.slane %v2219_v26, 4 }
 0x65c   :  { %v1812_v51 = vsel %vm323_vm1, %v1811_v40, %v1736_v32  ;;  %v2315_v0 = vrot.slane %v5390_v59, 4  ;;  %v2318_v20 = vsel %vm323_vm1, %v5390_v59, %v2317_v58  ;;  %v2251_v6 = vrot.slane %v2230_v5, 4 }
 0x65d   :  { %v1816_v37 = vperm.slane %v1812_v51, %v4625_v29  ;;  %3845 = vmatmul.msk.bf16.vlgmr.msra.gmra.mxu2 %vm1062_vm2, %v2956_v46  ;;  %v2237_v18 = vrot.slane %v2225_v1, 4  ;;  %v2249_v19 = vrot.slane %v2236_v17, 4  ;;  %v1799_v48 = vperm.slane %v1795_v53, %v4625_v29 }
 0x65e   :  { %v1805_v3 = vperm.slane %v1801_v44, %v4625_v29  ;;  %3165 = vmatpush.bf16.xpose.msra.mxu2 %v5370_v14  ;;  %v2240_v54 = vsel %vm323_vm1, %v2225_v1, %v2239_v49  ;;  %v1831_v2 = vrot.slane %v1810_v25, 4  ;;  %v2252_v59 = vsel %vm323_vm1, %v2236_v17, %v2251_v6 }
 0x65f   :  { %v2248_v55 = vperm.slane %v2240_v54, %v4637_v52  ;;  %v2238_v58 = vsel %vm323_vm1, %v2237_v18, %v2219_v26  ;;  %v1829_v43 = vrot.slane %v1816_v37, 4  ;;  %v2260_v15 = vperm.slane %v2252_v59, %v4637_v52 }
 0x660   :  { %v2244_v47 = vperm.slane %v2238_v58, %v4637_v52  ;;  %v2250_v7 = vsel %vm323_vm1, %v2249_v19, %v2230_v5  ;;  %v2316_v22 = vsel %vm323_vm1, %v2315_v0, %v5387_v21  ;;  %v2968_v61 = vpack.c.bf16 %v2318_v20, %v2318_v20 }
 0x661   :  { %v2256_v14 = vperm.slane %v2250_v7, %v4637_v52  ;;  %v2322_v33 = vsel %vm323_vm1, %v5363_v60, %v2321_v50  ;;  %v1819_v45 = vrot.slane %v1799_v48, 4  ;;  %v2265_v11 = vrot.slane %v2260_v15, 4 }
 0x662   :  { %v3078_v5 = vunpack.c.l.b16 %v2972_v36  ;;  %v2263_v13 = vrot.slane %v2244_v47, 4  ;;  %v1817_v23 = vrot.slane %v1805_v3, 4  ;;  %v1832_v35 = vsel %vm323_vm1, %v1816_v37, %v1831_v2 }
 0x663   :  { %v2261_v39 = vrot.slane %v2256_v14, 4  ;;  %v2267_v62 = vrot.slane %v2248_v55, 4  ;;  %v1830_v21 = vsel %vm323_vm1, %v1829_v43, %v1810_v25  ;;  %v2266_v26 = vsel %vm323_vm1, %v2265_v11, %v2248_v55 }
 0x664   :  { %v2964_v31 = vpack.c.bf16 %v2316_v22, %v2316_v22  ;;  %v2264_v9 = vsel %vm323_vm1, %v2256_v14, %v2263_v13  ;;  %v2971_v60 = vpack.c.bf16 %v2266_v26, %v2266_v26  ;;  %v3030_v27 = vunpack.c.l.b16 %v2968_v61 }
 0x665   :  { %v2262_v50 = vsel %vm323_vm1, %v2261_v39, %v2244_v47  ;;  %v2967_v32 = vpack.c.bf16 %v2264_v9, %v2264_v9  ;;  %v1820_v36 = vsel %vm323_vm1, %v1805_v3, %v1819_v45  ;;  %v1840_v30 = vperm.slane %v1832_v35, %v4637_v52 }
 0x666   :  { %v2963_v16 = vpack.c.bf16 %v2262_v50, %v2262_v50  ;;  %v2268_v28 = vsel %vm323_vm1, %v2260_v15, %v2267_v62  ;;  %v3077_v53 = vunpack.c.l.b16 %v2971_v60  ;;  %v1818_v42 = vsel %vm323_vm1, %v1817_v23, %v1799_v48 }
 0x667   :  { %v3029_v40 = vunpack.c.l.b16 %v2967_v32  ;;  %v1836_v1 = vperm.slane %v1830_v21, %v4637_v52  ;;  %v2982_v25 = vunpack.c.l.b16 %v2964_v31  ;;  %v2975_v46 = vpack.c.bf16 %v2268_v28, %v2268_v28  ;;  %v4050_v21 = vpop.permute.xlu0 %4049 }
 0x668   :  { %v2981_v44 = vunpack.c.l.b16 %v2963_v16  ;;  %v1897_v17 = vrot.slane %v5473_v63, 4  ;;  %v3079_v51 = vpack.c.b16 %v3078_v5, %v3077_v53  ;;  %v1828_v0 = vperm.slane %v1820_v36, %v4637_v52 }
 0x669   :  { %v3031_v49 = vpack.c.b16 %v3030_v27, %v3029_v40  ;;  %v2976_v20 = vpack.c.bf16 %v2322_v33, %v2322_v33  ;;  %v1845_v6 = vrot.slane %v1840_v30, 4  ;;  %v1824_v18 = vperm.slane %v1818_v42, %v4637_v52  ;;  %v4045_v42 = vpop.permute.xlu2 %4044 }
 0x66a   :  { %v2983_v37 = vpack.c.b16 %v2982_v25, %v2981_v44  ;;  %v1898_v19 = vsel %vm323_vm1, %v5468_v4, %v1897_v17  ;;  %v3084_v48 = vsel %vm1062_vm2, %v3079_v51, 0  ;;  %v1841_v54 = vrot.slane %v1836_v1, 4 }
 0x66b   :  { %v3036_v3 = vsel %vm1062_vm2, %v3031_v49, 0  ;;  %v2958_v2 = vpack.c.bf16 %v1898_v19, %v1898_v19  ;;  %3093 = vmatpush.bf16.xpose.msra.mxu3 %v3084_v48  ;;  %v3125_v55 = vunpack.c.l.b16 %v2975_v46  ;;  %v1846_v59 = vsel %vm323_vm1, %v1845_v6, %v1828_v0 }
 0x66c   :  { %v2988_v63 = vsel %vm1062_vm2, %v2983_v37, 0  ;;  %v3126_v58 = vunpack.c.l.b16 %v2976_v20  ;;  %v1842_v43 = vsel %vm323_vm1, %v1841_v54, %v1824_v18  ;;  %v2959_v15 = vpack.c.bf16 %v1846_v59, %v1846_v59 }
 0x66d   :  { %2997 = vmatpush.bf16.xpose.msra.mxu1 %v2988_v63  ;;  %3847 = vmatmul.msk.bf16.vlgmr.msrb.gmra.mxu2 %vm1062_vm2, %v2958_v2  ;;  %v2955_v47 = vpack.c.bf16 %v1842_v43, %v1842_v43  ;;  %v1901_v14 = vrot.slane %v5456_v8, 4  ;;  %v1843_v61 = vrot.slane %v1824_v18, 4  ;;  %v1847_v5 = vrot.slane %v1828_v0, 4  ;;  %v4040_v8 = vpop.permute.xlu1 %4039 }
 0x66e   :  { %v3127_v4 = vpack.c.b16 %v3126_v58, %v3125_v55  ;;  %v4042_v39 = vunpack.i.h.bf16 %v4040_v8  ;;  %v4041_v35 = vunpack.i.l.bf16 %v4040_v8  ;;  %v2685_v62 = vrot.slane %v5295_v38, 4 }
 0x66f   :  { %v1902_v22 = vsel %vm323_vm1, %v5459_v34, %v1901_v14  ;;  %v1844_v45 = vsel %vm323_vm1, %v1836_v1, %v1843_v61  ;;  %v1848_v13 = vsel %vm323_vm1, %v1840_v30, %v1847_v5  ;;  %v2629_v34 = vrot.slane %v5293_v41, 4 }
 0x670   :  { %v3132_v7 = vsel %vm1062_vm2, %v3127_v4, 0  ;;  %v2962_v33 = vpack.c.bf16 %v1902_v22, %v1902_v22  ;;  %v2957_v11 = vpack.c.bf16 %v1844_v45, %v1844_v45  ;;  %v2961_v23 = vpack.c.bf16 %v1848_v13, %v1848_v13 }
 0x671   :  { %v2683_v26 = vrot.slane %v4042_v39, 4  ;;  %v2627_v31 = vrot.slane %v4041_v35, 4  ;;  %v2686_v9 = vsel %vm323_vm1, %v4042_v39, %v2685_v62  ;;  %v2630_v60 = vsel %vm323_vm1, %v4041_v35, %v2629_v34 }
 0x672   :  { %3848 = vmatmul.msk.bf16.vlgmr.msra.gmra.mxu3 %vm1062_vm2, %v2959_v15  ;;  %v4052_v50 = vunpack.i.h.bf16 %v4050_v21  ;;  %v4051_v32 = vunpack.i.l.bf16 %v4050_v21  ;;  %v2694_v16 = vperm.slane %v2686_v9, %v4625_v29  ;;  %v2638_v30 = vperm.slane %v2630_v60, %v4625_v29 }
 0x673   :  { %v2684_v27 = vsel %vm323_vm1, %v2683_v26, %v5295_v38  ;;  %v2628_v36 = vsel %vm323_vm1, %v2627_v31, %v5293_v41  ;;  %v4047_v44 = vunpack.i.h.bf16 %v4045_v42  ;;  %v4046_v25 = vunpack.i.l.bf16 %v4045_v42 }
 0x674   :  { %3844 = vmatmul.msk.bf16.vlgmr.msra.gmra.mxu1 %vm1062_vm2, %v2955_v47  ;;  %v2697_v28 = vrot.slane %v4052_v50, 4  ;;  %v2641_v53 = vrot.slane %v4051_v32, 4  ;;  %v2690_v40 = vperm.slane %v2684_v27, %v4625_v29  ;;  %v2634_v1 = vperm.slane %v2628_v36, %v4625_v29 }
 0x675   :  { %3045 = vmatpush.bf16.xpose.msrb.mxu1 %v3036_v3  ;;  %v2721_v46 = vrot.slane %v2694_v16, 4  ;;  %v2665_v17 = vrot.slane %v2638_v30, 4  ;;  %v2695_v51 = vrot.slane %v4047_v44, 4  ;;  %v2639_v49 = vrot.slane %v4046_v25, 4 }
 0x676   :  { %v2698_v38 = vsel %vm323_vm1, %v4047_v44, %v2697_v28  ;;  %v2642_v0 = vsel %vm323_vm1, %v4046_v25, %v2641_v53  ;;  %v2709_v41 = vrot.slane %v2690_v40, 4  ;;  %v2653_v6 = vrot.slane %v2634_v1, 4 }
 0x677   :  { %v2706_v20 = vperm.slane %v2698_v38, %v4625_v29  ;;  %v2650_v37 = vperm.slane %v2642_v0, %v4625_v29  ;;  %v2696_v18 = vsel %vm323_vm1, %v2695_v51, %v4052_v50  ;;  %v2640_v19 = vsel %vm323_vm1, %v2639_v49, %v4051_v32 }
 0x678   :  { %v2702_v48 = vperm.slane %v2696_v18, %v4625_v29  ;;  %v2646_v2 = vperm.slane %v2640_v19, %v4625_v29 }
 0x679   :  { %v2719_v3 = vrot.slane %v2706_v20, 4  ;;  %v2722_v54 = vsel %vm323_vm1, %v2706_v20, %v2721_v46  ;;  %v2663_v55 = vrot.slane %v2650_v37, 4  ;;  %v2666_v59 = vsel %vm323_vm1, %v2650_v37, %v2665_v17 }
 0x67a   :  { %v2730_v63 = vperm.slane %v2722_v54, %v4637_v52  ;;  %v2707_v58 = vrot.slane %v2702_v48, 4  ;;  %v2710_v43 = vsel %vm323_vm1, %v2702_v48, %v2709_v41  ;;  %v2651_v15 = vrot.slane %v2646_v2, 4 }
 0x67b   :  { %v2720_v4 = vsel %vm323_vm1, %v2719_v3, %v2694_v16  ;;  %v2718_v47 = vperm.slane %v2710_v43, %v4637_v52  ;;  %v2654_v22 = vsel %vm323_vm1, %v2646_v2, %v2653_v6  ;;  %v2674_v27 = vperm.slane %v2666_v59, %v4637_v52 }
 0x67c   :  { %v2737_v14 = vrot.slane %v2730_v63, 4  ;;  %v2708_v61 = vsel %vm323_vm1, %v2707_v58, %v2690_v40  ;;  %v2662_v45 = vperm.slane %v2654_v22, %v4637_v52 }
 0x67d   :  { %3141 = vmatpush.bf16.xpose.msra.mxu1 %v3132_v7  ;;  %3851 = vmatmul.msk.bf16.vlgmr.msra.gmra.mxu2 %vm1062_vm2, %v2962_v33  ;;  %v2726_v7 = vperm.slane %v2720_v4, %v4637_v52  ;;  %v2652_v33 = vsel %vm323_vm1, %v2651_v15, %v2634_v1  ;;  %v2714_v5 = vperm.slane %v2708_v61, %v4637_v52  ;;  %v2733_v13 = vrot.slane %v2718_v47, 4 }
 0x67e   :  { %v2738_v8 = vsel %vm323_vm1, 0.0, %v2737_v14  ;;  %v2658_v34 = vperm.slane %v2652_v33, %v4637_v52  ;;  %v2677_v28 = vrot.slane %v2662_v45, 4  ;;  %v2681_v1 = vrot.slane %v2674_v27, 4 }
 0x67f   :  { %v2912_v39 = vsel %vm323_vm1, %v2737_v14, %v2726_v7  ;;  %v2917_v35 = vrot.slane %v2738_v8, 4  ;;  %v2731_v21 = vrot.slane %v2714_v5, 4  ;;  %v2734_v26 = vsel %vm323_vm1, 0.0, %v2733_v13 }
 0x680   :  { %v2901_v9 = vsel %vm323_vm1, %v2733_v13, %v2714_v5  ;;  %v2906_v60 = vrot.slane %v2734_v26, 4  ;;  %v2916_v50 = vperm.slane %v2912_v39, %v4625_v29  ;;  %v2678_v25 = vsel %vm323_vm1, 0.0, %v2677_v28 }
 0x681   :  { %v2732_v16 = vsel %vm323_vm1, 0.0, %v2731_v21  ;;  %v2847_v46 = vsel %vm323_vm1, %v2677_v28, %v2658_v34  ;;  %v2905_v17 = vperm.slane %v2901_v9, %v4625_v29  ;;  %v2682_v38 = vsel %vm323_vm1, 0.0, %v2681_v1 }
 0x682   :  { %v2907_v53 = vsel %vm323_vm1, %v2906_v60, %v2732_v16  ;;  %v2937_v40 = vrot.slane %v2916_v50, 4  ;;  %v2852_v49 = vrot.slane %v2678_v25, 4  ;;  %v2863_v20 = vrot.slane %v2682_v38, 4 }
 0x683   :  { %v2851_v37 = vperm.slane %v2847_v46, %v4625_v29  ;;  %v2911_v6 = vperm.slane %v2907_v53, %v4625_v29  ;;  %v2925_v48 = vrot.slane %v2905_v17, 4 }
 0x684   :  { %3846 = vmatmul.msk.bf16.vlgmr.msrb.gmra.mxu1 %vm1062_vm2, %v2957_v11  ;;  %v2664_v11 = vsel %vm323_vm1, %v2663_v55, %v2638_v30  ;;  %v2675_v30 = vrot.slane %v2658_v34, 4 }
 0x685   :  { %v2670_v62 = vperm.slane %v2664_v11, %v4637_v52  ;;  %v2923_v55 = vrot.slane %v2911_v6, 4  ;;  %v2871_v43 = vrot.slane %v2851_v37, 4  ;;  %v2926_v4 = vsel %vm323_vm1, %v2911_v6, %v2925_v48 }
 0x686   :  { %v2676_v44 = vsel %vm323_vm1, 0.0, %v2675_v30  ;;  %v2934_v14 = vperm.slane %v2926_v4, %v4637_v52 }
 0x687   :  { %v2679_v42 = vrot.slane %v2670_v62, 4  ;;  %v2858_v0 = vsel %vm323_vm1, %v2681_v1, %v2670_v62  ;;  %v2853_v18 = vsel %vm323_vm1, %v2852_v49, %v2676_v44  ;;  %v2924_v47 = vsel %vm323_vm1, %v2923_v55, %v2905_v17 }
 0x688   :  { %v2862_v41 = vperm.slane %v2858_v0, %v4625_v29  ;;  %v2857_v63 = vperm.slane %v2853_v18, %v4625_v29  ;;  %v2930_v61 = vperm.slane %v2924_v47, %v4637_v52  ;;  %v2953_v49 = vrot.slane %v2934_v14, 4 }
 0x689   :  { %v2680_v51 = vsel %vm323_vm1, 0.0, %v2679_v42 }
 0x68a   :  { %v2864_v54 = vsel %vm323_vm1, %v2863_v20, %v2680_v51  ;;  %v2883_v2 = vrot.slane %v2862_v41, 4  ;;  %v2869_v15 = vrot.slane %v2857_v63, 4  ;;  %v2872_v33 = vsel %vm323_vm1, %v2857_v63, %v2871_v43 }
 0x68b   :  { %v2868_v59 = vperm.slane %v2864_v54, %v4625_v29  ;;  %v2880_v13 = vperm.slane %v2872_v33, %v4637_v52 }
 0x68c   :  { %v2870_v11 = vsel %vm323_vm1, %v2869_v15, %v2851_v37 }
 0x68d   :  { %v2881_v22 = vrot.slane %v2868_v59, 4  ;;  %v2884_v45 = vsel %vm323_vm1, %v2868_v59, %v2883_v2  ;;  %v2876_v8 = vperm.slane %v2870_v11, %v4637_v52 }
 0x68f   :  { %v2882_v39 = vsel %vm323_vm1, %v2881_v22, %v2862_v41  ;;  %v2895_v60 = vrot.slane %v2876_v8, 4 }
 0x690   :  { %v2888_v62 = vperm.slane %v2882_v39, %v4637_v52 }
 0x692   :  { %v2893_v16 = vrot.slane %v2888_v62, 4 }
 0x694   :  { %3850 = vmatmul.msk.bf16.vlgmr.msra.gmra.mxu1 %vm1062_vm2, %v2961_v23  ;;  %v2735_v23 = vrot.slane %v2726_v7, 4  ;;  %v2894_v44 = vsel %vm323_vm1, %v2893_v16, %v2876_v8 }
 0x695   :  { %v3270_v51 = vpack.c.bf16 %v2894_v44, %v2894_v44 }
 0x696   :  { %v2736_v31 = vsel %vm323_vm1, 0.0, %v2735_v23  ;;  %v2892_v23 = vperm.slane %v2884_v45, %v4637_v52 }
 0x697   :  { %v2918_v32 = vsel %vm323_vm1, %v2917_v35, %v2736_v31  ;;  %v2949_v35 = vrot.slane %v2930_v61, 4  ;;  %v2899_v31 = vrot.slane %v2880_v13, 4  ;;  %v3308_v37 = vunpack.c.l.b16 %v3270_v51 }
 0x698   :  { %v2922_v36 = vperm.slane %v2918_v32, %v4625_v29  ;;  %v2897_v26 = vrot.slane %v2892_v23, 4 }
 0x699   :  { %v2900_v28 = vsel %vm323_vm1, %v2892_v23, %v2899_v31 }
 0x69a   :  { %v2935_v19 = vrot.slane %v2922_v36, 4  ;;  %v2938_v3 = vsel %vm323_vm1, %v2922_v36, %v2937_v40  ;;  %v2898_v30 = vsel %vm323_vm1, %v2897_v26, %v2880_v13  ;;  %v2896_v40 = vsel %vm323_vm1, %v2888_v62, %v2895_v60 }
 0x69b   :  { %v2946_v34 = vperm.slane %v2938_v3, %v4637_v52  ;;  %v3278_v1 = vpack.c.bf16 %v2898_v30, %v2898_v30  ;;  %v3274_v25 = vpack.c.bf16 %v2896_v40, %v2896_v40  ;;  %v3282_v0 = vpack.c.bf16 %v2900_v28, %v2900_v28 }
 0x69c   :  { %v2936_v58 = vsel %vm323_vm1, %v2935_v19, %v2916_v50 }
 0x69d   :  { %v2942_v7 = vperm.slane %v2936_v58, %v4637_v52  ;;  %v2951_v32 = vrot.slane %v2946_v34, 4  ;;  %v3396_v38 = vunpack.c.l.b16 %v3278_v1  ;;  %v3352_v41 = vunpack.c.l.b16 %v3274_v25 }
 0x69e   :  { %v2954_v6 = vsel %vm323_vm1, %v2946_v34, %v2953_v49  ;;  %v3440_v3 = vunpack.c.l.b16 %v3282_v0 }
 0x69f   :  { %v2947_v5 = vrot.slane %v2942_v7, 4  ;;  %v2950_v50 = vsel %vm323_vm1, %v2942_v7, %v2949_v35  ;;  %v2952_v42 = vsel %vm323_vm1, %v2951_v32, %v2934_v14  ;;  %v3283_v48 = vpack.c.bf16 %v2954_v6, %v2954_v6 }
 0x6a0   :  { %v3275_v36 = vpack.c.bf16 %v2950_v50, %v2950_v50  ;;  %v3279_v17 = vpack.c.bf16 %v2952_v42, %v2952_v42 }
 0x6a1   :  { %v2948_v21 = vsel %vm323_vm1, %v2947_v5, %v2930_v61  ;;  %v3441_v63 = vunpack.c.l.b16 %v3283_v48 }
 0x6a2   :  { %v3271_v9 = vpack.c.bf16 %v2948_v21, %v2948_v21  ;;  %v3353_v46 = vunpack.c.l.b16 %v3275_v36  ;;  %v3397_v20 = vunpack.c.l.b16 %v3279_v17  ;;  %v4058_v21 = vpack.i.bf16 %v5291_v56, %v5289_v24 }
 0x6a3   :  { %v3442_v58 = vpack.c.b16 %v3441_v63, %v3440_v3 }
 0x6a4   :  { %v3309_v53 = vunpack.c.l.b16 %v3271_v9  ;;  %v3354_v18 = vpack.c.b16 %v3353_v46, %v3352_v41  ;;  %v3398_v19 = vpack.c.b16 %v3397_v20, %v3396_v38 }
 0x6a6   :  { %v3310_v54 = vpack.c.b16 %v3309_v53, %v3308_v37  ;;  %3366 = vmatpush.bf16.msrb.mxu2 %v3354_v18 }
 0x6a8   :  { %3322 = vmatpush.bf16.msra.mxu0 %v3310_v54 }
 0x6aa   :  { %3454 = vmatpush.bf16.msra.mxu2 %v3442_v58 }
 0x6ac   :  { %3410 = vmatpush.bf16.msrb.mxu0 %v3398_v19 }
 0x6d7   :  { %v5633_v27 = vpop.f32.mrf.mxu0 }
 0x6d8   :  { %v3187_v45 = vsel %vm3171_vm11, %v5633_v27, -inf }
 0x6df   :  { %v3121_v2 = vpop.f32.mrf.mxu0 }
 0x6e0   :  { %v3023_v55 = vpop.f32.mrf.mxu2 }
 0x6e1   :  { %v3175_v59 = vsel %vm3171_vm11, %v3023_v55, -inf }
 0x6e2   :  { %3176 = vmax.xlane.f32.xlu2 %v3175_v59 }
 0x6e8   :  { %v3025_v43 = vpop.f32.mrf.mxu2 }
 0x6e9   :  { %v2517_v43 = vrot.slane %v5289_v24, 4 }
 0x6f0   :  { %v3071_v4 = vpop.f32.mrf.mxu2 }
 0x6f1   :  { %v2999_v15 = vpop.f32.mrf.mxu1  ;;  %v3181_v47 = vsel %vm3171_vm11, %v3071_v4, -inf }
 0x6f2   :  { %v3172_v7 = vsel %vm3171_vm11, %v2999_v15, -inf  ;;  %3182 = vmax.xlane.f32.xlu2 %v3181_v47  ;;  %v2573_v47 = vrot.slane %v5291_v56, 4 }
 0x6f3   :  { %3173 = vmax.xlane.f32.xlu0 %v3172_v7 }
 0x6f5   :  { %v3095_v14 = vpop.f32.mrf.mxu3 }
 0x6f6   :  { %v3184_v22 = vsel %vm3171_vm11, %v3095_v14, -inf }
 0x6f7   :  { %3185 = vmax.xlane.f32.xlu1 %v3184_v22 }
 0x6f8   :  { %v3073_v61 = vpop.f32.mrf.mxu2 }
 0x6f9   :  { %v3001_v33 = vpop.f32.mrf.mxu1 }
 0x6fb   :  { %3188 = vmax.xlane.f32.xlu0 %v3187_v45 }
 0x6fd   :  { %v3097_v11 = vpop.f32.mrf.mxu3 }
 0x700   :  { %v3167_v5 = vpop.f32.mrf.mxu2 }
 0x701   :  { %v3047_v13 = vpop.f32.mrf.mxu1  ;;  %v3193_v23 = vsel %vm3171_vm11, %v3167_v5, -inf }
 0x702   :  { %v3178_v8 = vsel %vm3171_vm11, %v3047_v13, -inf }
 0x703   :  { %3179 = vmax.xlane.f32.xlu1 %v3178_v8  ;;  %3194 = vmax.xlane.f32.xlu0 %v3193_v23 }
 0x708   :  { %v3169_v39 = vpop.f32.mrf.mxu2 }
 0x709   :  { %v3049_v35 = vpop.f32.mrf.mxu1 }
 0x711   :  { %v3143_v34 = vpop.f32.mrf.mxu1 }
 0x712   :  { %v3190_v62 = vsel %vm3171_vm11, %v3143_v34, -inf }
 0x713   :  { %3191 = vmax.xlane.f32.xlu2 %v3190_v62 }
 0x717   :  { %4059 = vrot.lane.b32.xlu0 %v4058_v21, %s4443_s4 }
 0x719   :  { %v3145_v26 = vpop.f32.mrf.mxu1 }
 0x71c   :  { %4054 = vrot.lane.b32.xlu1 %v4058_v21, %s4445_s5 }
 0x72b   :  { %4064 = vrot.lane.b32.xlu2 %v4058_v21, %s4444_s17  ;;  %s3759_s17 = sshll.u32 %s5860_s15, 4  ;;  %s3760_s17 = int_to_ptr.hbm [resolvable:$true] %s3759_s17 }
 0x755   :  { %v3177_v31 = vpop.xlane.xlu2 %3176 }
 0x756   :  { %v3197_v16 = vsub.f32 %v3023_v55, %v3177_v31 }
 0x758   :  { %v3206_v28 = vmul.f32 1.442695, %v3197_v16 }
 0x765   :  { %v3183_v9 = vpop.xlane.xlu2 %3182 }
 0x766   :  { %v3174_v60 = vpop.xlane.xlu0 %3173  ;;  %v3199_v50 = vsub.f32 %v3071_v4, %v3183_v9 }
 0x767   :  { %v3196_v32 = vsub.f32 %v2999_v15, %v3174_v60 }
 0x768   :  { %v3210_v36 = vmul.f32 1.442695, %v3199_v50 }
 0x769   :  { %v3204_v30 = vmul.f32 1.442695, %v3196_v32 }
 0x76a   :  { %4107 = vpow2.f32 %v3210_v36  ;;  %v3186_v53 = vpop.xlane.xlu1 %3185 }
 0x76b   :  { %4109 = vpow2.f32 %v3204_v30  ;;  %v3200_v0 = vsub.f32 %v3095_v14, %v3186_v53 }
 0x76c   :  { %4111 = vpow2.f32 %v3206_v28 }
 0x76d   :  { %v3212_v18 = vmul.f32 1.442695, %v3200_v0 }
 0x76e   :  { %v3189_v40 = vpop.xlane.xlu0 %3188 }
 0x76f   :  { %v3201_v6 = vsub.f32 %v5633_v27, %v3189_v40 }
 0x770   :  { %v5655_v42 = vpop.eup %4107 }
 0x771   :  { %v5657_v1 = vpop.eup %4109  ;;  %v3229_v44 = vsel %vm3171_vm11, %v5655_v42, 0.0  ;;  %v3214_v19 = vmul.f32 1.442695, %v3201_v6 }
 0x772   :  { %v3220_v25 = vsel %vm3171_vm11, %v5657_v1, 0.0  ;;  %3230 = vadd.xlane.f32.xlu1 %v3229_v44  ;;  %v5663_v46 = vpop.eup %4111 }
 0x773   :  { %3221 = vadd.xlane.f32.xlu0 %v3220_v25  ;;  %v3223_v37 = vsel %vm3171_vm11, %v5663_v46, 0.0 }
 0x776   :  { %v3180_v17 = vpop.xlane.xlu1 %3179  ;;  %v3195_v51 = vpop.xlane.xlu0 %3194 }
 0x777   :  { %v3198_v38 = vsub.f32 %v3047_v13, %v3180_v17  ;;  %v3203_v49 = vsub.f32 %v3167_v5, %v3195_v51 }
 0x779   :  { %v3208_v41 = vmul.f32 1.442695, %v3198_v38  ;;  %v3218_v20 = vmul.f32 1.442695, %v3203_v49 }
 0x77a   :  { %3224 = vadd.xlane.f32.xlu1 %v3223_v37 }
 0x77b   :  { %4113 = vpow2.f32 %v3208_v41 }
 0x77c   :  { %4115 = vpow2.f32 %v3218_v20 }
 0x77d   :  { %4117 = vpow2.f32 %v3212_v18 }
 0x77e   :  { %4119 = vpow2.f32 %v3214_v19 }
 0x781   :  { %v5668_v48 = vpop.eup %4113 }
 0x782   :  { %v5670_v3 = vpop.eup %4115  ;;  %v3226_v54 = vsel %vm3171_vm11, %v5668_v48, 0.0 }
 0x783   :  { %3227 = vadd.xlane.f32.xlu2 %v3226_v54  ;;  %v3241_v2 = vsel %vm3171_vm11, %v5670_v3, 0.0  ;;  %v5676_v63 = vpop.eup %4117 }
 0x784   :  { %3242 = vadd.xlane.f32.xlu0 %v3241_v2  ;;  %v5678_v59 = vpop.eup %4119  ;;  %v3232_v15 = vsel %vm3171_vm11, %v5676_v63, 0.0 }
 0x785   :  { %v3235_v22 = vsel %vm3171_vm11, %v5678_v59, 0.0 }
 0x786   :  { %v3192_v27 = vpop.xlane.xlu2 %3191 }
 0x787   :  { %v3202_v55 = vsub.f32 %v3143_v34, %v3192_v27 }
 0x789   :  { %v3216_v58 = vmul.f32 1.442695, %v3202_v55  ;;  %v4060_v4 = vpop.permute.xlu0 %4059 }
 0x78a   :  { %v4062_v7 = vunpack.i.h.bf16 %v4060_v4  ;;  %v4061_v14 = vunpack.i.l.bf16 %v4060_v4 }
 0x78b   :  { %4121 = vpow2.f32 %v3216_v58  ;;  %3233 = vadd.xlane.f32.xlu2 %v3232_v15 }
 0x78c   :  { %v2571_v61 = vrot.slane %v4062_v7, 4  ;;  %v2574_v33 = vsel %vm323_vm1, %v4062_v7, %v2573_v47  ;;  %v2515_v45 = vrot.slane %v4061_v14, 4  ;;  %v2518_v11 = vsel %vm323_vm1, %v4061_v14, %v2517_v43  ;;  %3236 = vadd.xlane.f32.xlu0 %v3235_v22 }
 0x78d   :  { %v2582_v5 = vperm.slane %v2574_v33, %v4625_v29  ;;  %v2526_v35 = vperm.slane %v2518_v11, %v4625_v29 }
 0x78e   :  { %v4055_v13 = vpop.permute.xlu1 %4054  ;;  %v4065_v23 = vpop.permute.xlu2 %4064  ;;  %v2572_v8 = vsel %vm323_vm1, %v2571_v61, %v5291_v56  ;;  %v2516_v39 = vsel %vm323_vm1, %v2515_v45, %v5289_v24 }
 0x78f   :  { %v4057_v34 = vunpack.i.h.bf16 %v4055_v13  ;;  %v4056_v62 = vunpack.i.l.bf16 %v4055_v13  ;;  %v4067_v21 = vunpack.i.h.bf16 %v4065_v23  ;;  %v4066_v26 = vunpack.i.l.bf16 %v4065_v23 }
 0x790   :  { %v2578_v31 = vperm.slane %v2572_v8, %v4625_v29  ;;  %v2609_v9 = vrot.slane %v2582_v5, 4  ;;  %v2522_v60 = vperm.slane %v2516_v39, %v4625_v29  ;;  %v2553_v53 = vrot.slane %v2526_v35, 4 }
 0x791   :  { %v5696_v50 = vpop.eup %4121  ;;  %v2585_v32 = vrot.slane %v4057_v34, 4  ;;  %v2529_v16 = vrot.slane %v4056_v62, 4  ;;  %v2583_v36 = vrot.slane %v4067_v21, 4  ;;  %v2527_v56 = vrot.slane %v4066_v26, 4 }
 0x792   :  { %v3238_v24 = vsel %vm3171_vm11, %v5696_v50, 0.0  ;;  %v2597_v30 = vrot.slane %v2578_v31, 4  ;;  %v2541_v28 = vrot.slane %v2522_v60, 4 }
 0x793   :  { %v2584_v40 = vsel %vm323_vm1, %v2583_v36, %v4057_v34  ;;  %v2586_v44 = vsel %vm323_vm1, %v4067_v21, %v2585_v32  ;;  %v2528_v25 = vsel %vm323_vm1, %v2527_v56, %v4056_v62  ;;  %v2530_v17 = vsel %vm323_vm1, %v4066_v26, %v2529_v16  ;;  %3239 = vadd.xlane.f32.xlu1 %v3238_v24 }
 0x794   :  { %v2590_v51 = vperm.slane %v2584_v40, %v4625_v29  ;;  %v2594_v38 = vperm.slane %v2586_v44, %v4625_v29  ;;  %v2534_v49 = vperm.slane %v2528_v25, %v4625_v29  ;;  %v2538_v0 = vperm.slane %v2530_v17, %v4625_v29 }
 0x796   :  { %v2595_v41 = vrot.slane %v2590_v51, 4  ;;  %v2607_v20 = vrot.slane %v2594_v38, 4  ;;  %v2539_v37 = vrot.slane %v2534_v49, 4  ;;  %v2551_v6 = vrot.slane %v2538_v0, 4 }
 0x797   :  { %v2598_v18 = vsel %vm323_vm1, %v2590_v51, %v2597_v30  ;;  %v2610_v19 = vsel %vm323_vm1, %v2594_v38, %v2609_v9  ;;  %v2542_v54 = vsel %vm323_vm1, %v2534_v49, %v2541_v28  ;;  %v2554_v2 = vsel %vm323_vm1, %v2538_v0, %v2553_v53 }
 0x798   :  { %v2596_v27 = vsel %vm323_vm1, %v2595_v41, %v2578_v31  ;;  %v2606_v55 = vperm.slane %v2598_v18, %v4637_v52  ;;  %v2608_v58 = vsel %vm323_vm1, %v2607_v20, %v2582_v5  ;;  %v2618_v43 = vperm.slane %v2610_v19, %v4637_v52 }
 0x799   :  { %v2602_v4 = vperm.slane %v2596_v27, %v4637_v52  ;;  %v2614_v15 = vperm.slane %v2608_v58, %v4637_v52  ;;  %v2540_v47 = vsel %vm323_vm1, %v2539_v37, %v2522_v60  ;;  %v2550_v7 = vperm.slane %v2542_v54, %v4637_v52 }
 0x79a   :  { %v2621_v14 = vrot.slane %v2606_v55, 4  ;;  %v2625_v22 = vrot.slane %v2618_v43, 4  ;;  %v2546_v61 = vperm.slane %v2540_v47, %v4637_v52  ;;  %v2552_v33 = vsel %vm323_vm1, %v2551_v6, %v2526_v35 }
 0x79b   :  { %v2619_v45 = vrot.slane %v2602_v4, 4  ;;  %v2623_v11 = vrot.slane %v2614_v15, 4  ;;  %v2558_v5 = vperm.slane %v2552_v33, %v4637_v52  ;;  %v2562_v13 = vperm.slane %v2554_v2, %v4637_v52 }
 0x79c   :  { %v2622_v23 = vsel %vm323_vm1, 0.0, %v2621_v14  ;;  %v2626_v8 = vsel %vm323_vm1, 0.0, %v2625_v22  ;;  %v2793_v39 = vsel %vm323_vm1, %v2621_v14, %v2602_v4  ;;  %v2804_v34 = vsel %vm323_vm1, %v2625_v22, %v2614_v15 }
 0x79d   :  { %v2620_v62 = vsel %vm323_vm1, 0.0, %v2619_v45  ;;  %v2624_v21 = vsel %vm323_vm1, 0.0, %v2623_v11  ;;  %v2798_v26 = vrot.slane %v2622_v23, 4  ;;  %v2808_v35 = vperm.slane %v2804_v34, %v4625_v29 }
 0x79e   :  { %v2809_v31 = vrot.slane %v2626_v8, 4  ;;  %v2563_v9 = vrot.slane %v2546_v61, 4  ;;  %v2565_v60 = vrot.slane %v2550_v7, 4  ;;  %v2567_v32 = vrot.slane %v2558_v5, 4 }
 0x79f   :  { %v2799_v16 = vsel %vm323_vm1, %v2798_v26, %v2620_v62  ;;  %v2829_v36 = vrot.slane %v2808_v35, 4  ;;  %v2569_v56 = vrot.slane %v2562_v13, 4  ;;  %v2797_v24 = vperm.slane %v2793_v39, %v4625_v29 }
 0x7a0   :  { %v2803_v30 = vperm.slane %v2799_v16, %v4625_v29  ;;  %v2810_v28 = vsel %vm323_vm1, %v2809_v31, %v2624_v21  ;;  %v2564_v53 = vsel %vm323_vm1, 0.0, %v2563_v9  ;;  %v2566_v40 = vsel %vm323_vm1, 0.0, %v2565_v60 }
 0x7a1   :  { %v2814_v44 = vperm.slane %v2810_v28, %v4625_v29  ;;  %v2568_v25 = vsel %vm323_vm1, 0.0, %v2567_v32  ;;  %v2570_v17 = vsel %vm323_vm1, 0.0, %v2569_v56  ;;  %v2739_v51 = vsel %vm323_vm1, %v2565_v60, %v2546_v61 }
 0x7a2   :  { %v2744_v38 = vrot.slane %v2566_v40, 4  ;;  %v2750_v49 = vsel %vm323_vm1, %v2569_v56, %v2558_v5  ;;  %v2755_v0 = vrot.slane %v2570_v17, 4  ;;  %v2743_v41 = vperm.slane %v2739_v51, %v4625_v29 }
 0x7a3   :  { %v2827_v20 = vrot.slane %v2814_v44, 4  ;;  %v2754_v37 = vperm.slane %v2750_v49, %v4625_v29  ;;  %v2815_v6 = vrot.slane %v2803_v30, 4  ;;  %v2817_v18 = vrot.slane %v2797_v24, 4 }
 0x7a4   :  { %v2745_v19 = vsel %vm323_vm1, %v2744_v38, %v2564_v53  ;;  %v2756_v54 = vsel %vm323_vm1, %v2755_v0, %v2568_v25  ;;  %v2763_v2 = vrot.slane %v2743_v41, 4  ;;  %v2830_v27 = vsel %vm323_vm1, %v2814_v44, %v2829_v36 }
 0x7a5   :  { %v2749_v55 = vperm.slane %v2745_v19, %v4625_v29  ;;  %v2760_v58 = vperm.slane %v2756_v54, %v4625_v29  ;;  %v2775_v43 = vrot.slane %v2754_v37, 4  ;;  %v2816_v4 = vsel %vm323_vm1, %v2815_v6, %v2797_v24 }
 0x7a6   :  { %v2822_v15 = vperm.slane %v2816_v4, %v4637_v52  ;;  %v2828_v47 = vsel %vm323_vm1, %v2827_v20, %v2808_v35  ;;  %v2818_v7 = vsel %vm323_vm1, %v2803_v30, %v2817_v18  ;;  %v2838_v14 = vperm.slane %v2830_v27, %v4637_v52 }
 0x7a7   :  { %v2773_v22 = vrot.slane %v2760_v58, 4  ;;  %v2761_v61 = vrot.slane %v2749_v55, 4  ;;  %v2834_v33 = vperm.slane %v2828_v47, %v4637_v52  ;;  %v2764_v45 = vsel %vm323_vm1, %v2749_v55, %v2763_v2 }
 0x7a8   :  { %v2772_v11 = vperm.slane %v2764_v45, %v4637_v52  ;;  %v2776_v29 = vsel %vm323_vm1, %v2760_v58, %v2775_v43  ;;  %v2826_v5 = vperm.slane %v2818_v7, %v4637_v52  ;;  %v2843_v13 = vrot.slane %v2838_v14, 4 }
 0x7a9   :  { %v2762_v23 = vsel %vm323_vm1, %v2761_v61, %v2743_v41  ;;  %v2774_v8 = vsel %vm323_vm1, %v2773_v22, %v2754_v37  ;;  %v2839_v39 = vrot.slane %v2834_v33, 4  ;;  %v2784_v34 = vperm.slane %v2776_v29, %v4637_v52 }
 0x7aa   :  { %v2768_v62 = vperm.slane %v2762_v23, %v4637_v52  ;;  %v2780_v21 = vperm.slane %v2774_v8, %v4637_v52  ;;  %v2844_v26 = vsel %vm323_vm1, %v2843_v13, %v2826_v5  ;;  %v2841_v35 = vrot.slane %v2822_v15, 4 }
 0x7ab   :  { %v2840_v31 = vsel %vm323_vm1, %v2839_v39, %v2822_v15  ;;  %v2789_v9 = vrot.slane %v2784_v34, 4  ;;  %v3277_v60 = vpack.c.bf16 %v2844_v26, %v2844_v26  ;;  %v2791_v32 = vrot.slane %v2772_v11, 4 }
 0x7ac   :  { %v2785_v16 = vrot.slane %v2780_v21, 4  ;;  %v3269_v36 = vpack.c.bf16 %v2840_v31, %v2840_v31  ;;  %v2787_v56 = vrot.slane %v2768_v62, 4  ;;  %v2842_v24 = vsel %vm323_vm1, %v2834_v33, %v2841_v35 }
 0x7ad   :  { %v2790_v30 = vsel %vm323_vm1, %v2789_v9, %v2772_v11  ;;  %v3273_v28 = vpack.c.bf16 %v2842_v24, %v2842_v24  ;;  %v2792_v53 = vsel %vm323_vm1, %v2784_v34, %v2791_v32  ;;  %v2845_v49 = vrot.slane %v2826_v5, 4  ;;  %v3461_v24 = vld [vmem:[#allocation14] sm:$0xf] }
 0x7ae   :  { %v2786_v52 = vsel %vm323_vm1, %v2785_v16, %v2768_v62  ;;  %v3287_v40 = vunpack.c.l.b16 %v3269_v36  ;;  %v3276_v44 = vpack.c.bf16 %v2790_v30, %v2790_v30  ;;  %v2788_v25 = vsel %vm323_vm1, %v2780_v21, %v2787_v56  ;;  %v3463_v56 = vld [vmem:[#allocation14 + $0x4] sm:$0xf] }
 0x7af   :  { %v3268_v17 = vpack.c.bf16 %v2786_v52, %v2786_v52  ;;  %v3272_v51 = vpack.c.bf16 %v2788_v25, %v2788_v25  ;;  %v3331_v38 = vunpack.c.l.b16 %v3273_v28  ;;  %v3375_v41 = vunpack.c.l.b16 %v3277_v60  ;;  %v3505_v28 = vld [vmem:[#allocation14 + $0x8] sm:$0xf] }
 0x7b0   :  { %v3374_v0 = vunpack.c.l.b16 %v3276_v44  ;;  %v3280_v20 = vpack.c.bf16 %v2792_v53, %v2792_v53  ;;  %v2846_v18 = vsel %vm323_vm1, %v2838_v14, %v2845_v49  ;;  %v3488_v30 = vsel %vm1322_vm3, %v3461_v24, 0  ;;  %v3900_v24 = vld [vmem:[#allocation16] sm:$0xff] }
 0x7b1   :  { %v3286_v37 = vunpack.c.l.b16 %v3268_v17  ;;  %v3330_v6 = vunpack.c.l.b16 %v3272_v51  ;;  %v3281_v19 = vpack.c.bf16 %v2846_v18, %v2846_v18  ;;  %v3510_v52 = vsel %vm1322_vm3, %v3505_v28, 0 }
 0x7b2   :  { %v3418_v54 = vunpack.c.l.b16 %v3280_v20  ;;  %v3376_v55 = vpack.c.b16 %v3375_v41, %v3374_v0 }
 0x7b3   :  { %v3288_v2 = vpack.c.b16 %v3287_v40, %v3286_v37  ;;  %v3332_v27 = vpack.c.b16 %v3331_v38, %v3330_v6  ;;  %v3419_v58 = vunpack.c.l.b16 %v3281_v19 }
 0x7b5   :  { %3300 = vmatpush.bf16.msrb.mxu3 %v3288_v2  ;;  %3344 = vmatpush.bf16.msrb.mxu1 %v3332_v27  ;;  %v3420_v43 = vpack.c.b16 %v3419_v58, %v3418_v54 }
 0x7b9   :  { %3388 = vmatpush.bf16.msra.mxu3 %v3376_v55  ;;  %3432 = vmatpush.bf16.msra.mxu1 %v3420_v43 }
 0x7e5   :  { %v3231_v4 = vpop.xlane.xlu1 %3230 }
 0x7e6   :  { %v3222_v15 = vpop.xlane.xlu0 %3221  ;;  %4123 = vrcp.f32 %v3231_v4 }
 0x7e7   :  { %4125 = vrcp.f32 %v3222_v15 }
 0x7ec   :  { %v4124_v47 = vpop.eup %4123 }
 0x7ed   :  { %v4126_v7 = vpop.eup %4125  ;;  %v3255_v22 = vmul.f32 %v4124_v47, %v5655_v42  ;;  %v3225_v14 = vpop.xlane.xlu1 %3224 }
 0x7ee   :  { %v3252_v61 = vmul.f32 %v4126_v7, %v5657_v1  ;;  %4127 = vrcp.f32 %v3225_v14 }
 0x7ef   :  { %v3263_v33 = vpack.c.bf16 %v3255_v22, %v3255_v22  ;;  %v4148_v22 = vld [vmem:[#allocation17] sm:$0xff] }
 0x7f0   :  { %v3260_v45 = vpack.c.bf16 %v3252_v61, %v3252_v61  ;;  %v3552_v14 = vperm.slane %v4148_v22, 7 }
 0x7f1   :  { %3855 = vmatmul.msk.bf16.vlgmr.msrb.gmra.mxu2 %vm3171_vm11, %v3263_v33 }
 0x7f2   :  { %3852 = vmatmul.msk.bf16.vlgmr.msrb.gmra.mxu3 %vm3171_vm11, %v3260_v45 }
 0x7f4   :  { %v4128_v11 = vpop.eup %4127 }
 0x7f5   :  { %v3253_v29 = vmul.f32 %v4128_v11, %v5663_v46 }
 0x7f6   :  { %v3228_v5 = vpop.xlane.xlu2 %3227 }
 0x7f7   :  { %4129 = vrcp.f32 %v3228_v5  ;;  %v3261_v13 = vpack.c.bf16 %v3253_v29, %v3253_v29  ;;  %v3243_v23 = vpop.xlane.xlu0 %3242 }
 0x7f8   :  { %4131 = vrcp.f32 %v3243_v23 }
 0x7f9   :  { %3853 = vmatmul.msk.bf16.vlgmr.msra.gmra.mxu0 %vm3171_vm11, %v3261_v13 }
 0x7fa   :  { %3497 = vmatpush.bf16.msra.mxu0 %v3488_v30 }
 0x7fd   :  { %v4130_v42 = vpop.eup %4129 }
 0x7fe   :  { %v4132_v8 = vpop.eup %4131  ;;  %v3254_v1 = vmul.f32 %v4130_v42, %v5668_v48  ;;  %v3234_v39 = vpop.xlane.xlu2 %3233 }
 0x7ff   :  { %4133 = vrcp.f32 %v3234_v39  ;;  %v3259_v34 = vmul.f32 %v4132_v8, %v5670_v3  ;;  %v3237_v62 = vpop.xlane.xlu0 %3236 }
 0x800   :  { %v3262_v21 = vpack.c.bf16 %v3254_v1, %v3254_v1  ;;  %4135 = vrcp.f32 %v3237_v62 }
 0x801   :  { %v3267_v26 = vpack.c.bf16 %v3259_v34, %v3259_v34 }
 0x802   :  { %3854 = vmatmul.msk.bf16.vlgmr.msrb.gmra.mxu1 %vm3171_vm11, %v3262_v21 }
 0x803   :  { %3859 = vmatmul.msk.bf16.vlgmr.msra.gmra.mxu2 %vm3171_vm11, %v3267_v26  ;;  %3519 = vmatpush.bf16.msrb.mxu1 %v3510_v52 }
 0x805   :  { %v4134_v46 = vpop.eup %4133 }
 0x806   :  { %v4136_v35 = vpop.eup %4135  ;;  %v3256_v31 = vmul.f32 %v4134_v46, %v5676_v63  ;;  %v3240_v9 = vpop.xlane.xlu1 %3239  ;;  %v3468_v63 = vsel %vm1322_vm3, %v3463_v56, 0  ;;  %v3901_v56 = vld [vmem:[#allocation16 + $0x8] sm:$0xff] }
 0x807   :  { %4137 = vrcp.f32 %v3240_v9  ;;  %v3257_v48 = vmul.f32 %v4136_v35, %v5678_v59  ;;  %3477 = vmatpush.bf16.msrb.mxu3 %v3468_v63  ;;  %v3529_v59 = vld [vmem:[#allocation14 + $0xc] sm:$0xf] }
 0x808   :  { %v3264_v60 = vpack.c.bf16 %v3256_v31, %v3256_v31  ;;  %v3534_v53 = vsel %vm1322_vm3, %v3529_v59, 0  ;;  %vm3681_vm3 = vcmask 523264  }
 0x809   :  { %v3265_v32 = vpack.c.bf16 %v3257_v48, %v3257_v48  ;;  %3543 = vmatpush.bf16.msrb.mxu2 %v3534_v53 }
 0x80a   :  { %3856 = vmatmul.msk.bf16.vlgmr.msra.gmra.mxu3 %vm3171_vm11, %v3264_v60 }
 0x80b   :  { %3857 = vmatmul.msk.bf16.vlgmr.msrb.gmra.mxu0 %vm3171_vm11, %v3265_v32  ;;  %3637 = vmatpush.bf16.msra.mxu3 %v3901_v56 }
 0x80d   :  { %v4138_v3 = vpop.eup %4137 }
 0x80e   :  { %v3258_v16 = vmul.f32 %v4138_v3, %v5696_v50 }
 0x80f   :  { %3638 = vmatpush.bf16.msra.mxu3 %v3900_v24 }
 0x810   :  { %v3266_v36 = vpack.c.bf16 %v3258_v16, %v3258_v16 }
 0x812   :  { %3858 = vmatmul.msk.bf16.vlgmr.msra.gmra.mxu1 %vm3171_vm11, %v3266_v36 }
 0x874   :  { %v3368_v50 = vpop.f32.mrf.mxu2 }
 0x875   :  { %v3302_v40 = vpop.f32.mrf.mxu3 }
 0x876   :  { %v3324_v44 = vpop.f32.mrf.mxu0 }
 0x877   :  { %v3460_v25 = vpack.c.bf16 %v3324_v44, %v3302_v40 }
 0x879   :  { %3861 = vmatmul.msk.bf16.vlgmr.msra.gmra.mxu0 %vm1062_vm2, %v3460_v25 }
 0x87c   :  { %v3370_v17 = vpop.f32.mrf.mxu2 }
 0x87d   :  { %v3304_v51 = vpop.f32.mrf.mxu3 }
 0x87e   :  { %v3326_v38 = vpop.f32.mrf.mxu0 }
 0x87f   :  { %v3346_v49 = vpop.f32.mrf.mxu1 }
 0x880   :  { %v3462_v0 = vpack.c.bf16 %v3368_v50, %v3346_v49 }
 0x882   :  { %3860 = vmatmul.msk.bf16.vlgmr.msrb.gmra.mxu3 %vm1062_vm2, %v3462_v0 }
 0x886   :  { %v3456_v41 = vpop.f32.mrf.mxu2 }
 0x887   :  { %v3348_v20 = vpop.f32.mrf.mxu1 }
 0x888   :  { %v3412_v37 = vpop.f32.mrf.mxu0 }
 0x88d   :  { %v3390_v6 = vpop.f32.mrf.mxu3 }
 0x88e   :  { %v3504_v18 = vpack.c.bf16 %v3412_v37, %v3390_v6  ;;  %v3458_v19 = vpop.f32.mrf.mxu2 }
 0x88f   :  { %v3434_v54 = vpop.f32.mrf.mxu1 }
 0x890   :  { %v3528_v2 = vpack.c.bf16 %v3456_v41, %v3434_v54  ;;  %3862 = vmatmul.msk.bf16.vlgmr.msrb.gmra.mxu1 %vm1062_vm2, %v3504_v18  ;;  %v3414_v27 = vpop.f32.mrf.mxu0  ;;  %v5806_v41 = vld [vmem:[#allocation17 + $0x8] sm:$0xff] }
 0x891   :  { %v3601_v20 = vperm.slane %v5806_v41, 3  ;;  %v3604_v19 = vperm.slane %v5806_v41, 4 }
 0x892   :  { %3863 = vmatmul.msk.bf16.vlgmr.msrb.gmra.mxu2 %vm1062_vm2, %v3528_v2 }
 0x895   :  { %v3392_v55 = vpop.f32.mrf.mxu3 }
 0x897   :  { %v3436_v58 = vpop.f32.mrf.mxu1 }
 0x8f6   :  { %v3499_v4 = vpop.f32.mrf.mxu0 }
 0x8fe   :  { %v3501_v29 = vpop.f32.mrf.mxu0 }
 0x905   :  { %v3479_v43 = vpop.f32.mrf.mxu3 }
 0x906   :  { %v3500_v47 = vadd.f32 %v3499_v4, %v3479_v43  ;;  %v3905_v4 = vld [vmem:[%s5857_s12 + $0x18] sm:$0xff] }
 0x907   :  { %3689 = vmatpush.bf16.msrb.mxu0 %v3905_v4 }
 0x90d   :  { %v3521_v15 = vpop.f32.mrf.mxu1  ;;  %v3481_v45 = vpop.f32.mrf.mxu3 }
 0x90e   :  { %v3526_v7 = vadd.f32 %v3521_v15, %v3500_v47  ;;  %v3502_v13 = vadd.f32 %v3501_v29, %v3481_v45  ;;  %v3904_v15 = vld [vmem:[%s5857_s12 + $0x10] sm:$0xff]  ;;  %v3903_v47 = vld [vmem:[%s5857_s12 + $0x8] sm:$0xff] }
 0x90f   :  { %3690 = vmatpush.bf16.msrb.mxu0 %v3904_v15 }
 0x913   :  { %3691 = vmatpush.bf16.msrb.mxu0 %v3903_v47 }
 0x915   :  { %v3545_v61 = vpop.f32.mrf.mxu2  ;;  %v3523_v5 = vpop.f32.mrf.mxu1 }
 0x916   :  { %v3550_v33 = vadd.f32 %v3545_v61, %v3526_v7  ;;  %v3527_v42 = vadd.f32 %v3523_v5, %v3502_v13  ;;  %v3902_v7 = vld [vmem:[%s5857_s12] sm:$0xff]  ;;  %v3656_v13 = vperm.slane %v5806_v41, 0  ;;  %s4453_s12 = smov [#allocation19]  }
 0x917   :  { %3692 = vmatpush.bf16.msrb.mxu0 %v3902_v7 }
 0x918   :  { %v3553_v11 = vadd.f32 %v3552_v14, %v3550_v33 }
 0x91a   :  { %v3555_v23 = vadd.f32 %v3553_v11, %v5162_v57 }
 0x91c   :  { %v3557_v8 = vsel %vm239_vm0, %v3555_v23, 0.0 }
 0x91d   :  { %3558 = vadd.xlane.f32.xlu2 %v3557_v8  ;;  %v3547_v1 = vpop.f32.mrf.mxu2 }
 0x91e   :  { %v3551_v39 = vadd.f32 %v3547_v1, %v3527_v42 }
 0x920   :  { %v3554_v34 = vadd.f32 %v3552_v14, %v3551_v39  ;;  %v4068_v14 = vld [vmem:[%s5859_s14] ss:$0 sm:$0xff]  ;;  %s3757_s14 = sshll.u32 %s4453_s12, 4  ;;  %s3758_s14 = int_to_ptr.vmem [resolvable:$true] %s3757_s14 }
 0x922   :  { %v3556_v62 = vadd.f32 %v3554_v34, %v5164_v10 }
 0x924   :  { %v3560_v21 = vsel %vm239_vm0, %v3556_v62, 0.0 }
 0x925   :  { %3561 = vadd.xlane.f32.xlu1 %v3560_v21 }
 0x990   :  { %v3559_v26 = vpop.xlane.xlu2 %3558 }
 0x991   :  { %v3563_v46 = vmul.f32 %v3559_v26, %v5136_v12 }
 0x993   :  { %v3565_v35 = vsub.f32 %v3555_v23, %v3563_v46 }
 0x995   :  { %v3567_v31 = vmul.f32 %v3565_v35, %v3565_v35 }
 0x997   :  { %v3569_v9 = vsel %vm239_vm0, %v3567_v31, 0.0 }
 0x998   :  { %3570 = vadd.xlane.f32.xlu0 %v3569_v9  ;;  %v3562_v57 = vpop.xlane.xlu1 %3561 }
 0x999   :  { %v3564_v48 = vmul.f32 %v3562_v57, %v5136_v12 }
 0x99b   :  { %v3566_v60 = vsub.f32 %v3556_v62, %v3564_v48 }
 0x99d   :  { %v3568_v32 = vmul.f32 %v3566_v60, %v3566_v60 }
 0x99f   :  { %v3572_v3 = vsel %vm239_vm0, %v3568_v32, 0.0 }
 0x9a0   :  { %3573 = vadd.xlane.f32.xlu2 %v3572_v3 }
 0xa0b   :  { %v3571_v10 = vpop.xlane.xlu0 %3570 }
 0xa0c   :  { %v3575_v16 = vmul.f32 %v3571_v10, %v5136_v12 }
 0xa0e   :  { %v3577_v36 = vadd.f32 1e-05, %v3575_v16 }
 0xa10   :  { %4139 = vrsqrt.f32 %v3577_v36  ;;  %vm3585_vm13 = vweird.f32 %v3577_v36 }
 0xa13   :  { %v3574_v63 = vpop.xlane.xlu2 %3573 }
 0xa14   :  { %v3576_v30 = vmul.f32 %v3574_v63, %v5136_v12 }
 0xa16   :  { %v4140_v59 = vpop.eup %4139  ;;  %v3578_v28 = vadd.f32 1e-05, %v3576_v30 }
 0xa17   :  { %v3580_v53 = vmul.f32 %v4140_v59, %v3577_v36  ;;  %vm3586_vm12 = vweird.f32 %v4140_v59 }
 0xa18   :  { %4141 = vrsqrt.f32 %v3578_v28  ;;  %vm3587_vm14 = vmor %vm3585_vm13, %vm3586_vm12  ;;  %vm3595_vm1 = vweird.f32 %v3578_v28 }
 0xa19   :  { %v3581_v52 = vmul.f32 %v4140_v59, %v3580_v53 }
 0xa1b   :  { %v3582_v50 = vmul.f32 0.5, %v3581_v52 }
 0xa1d   :  { %v3583_v40 = vsub.f32 1.5, %v3582_v50 }
 0xa1e   :  { %v4142_v44 = vpop.eup %4141 }
 0xa1f   :  { %v3584_v25 = vmul.f32 %v4140_v59, %v3583_v40  ;;  %v3590_v17 = vmul.f32 %v4142_v44, %v3578_v28  ;;  %vm3596_vm15 = vweird.f32 %v4142_v44 }
 0xa20   :  { %vm3597_vm2 = vmor %vm3595_vm1, %vm3596_vm15 }
 0xa21   :  { %v3591_v51 = vmul.f32 %v4142_v44, %v3590_v17  ;;  %v3588_v38 = vsel %vm3587_vm14, %v4140_v59, %v3584_v25  ;;  %v3745_v25 = vperm.slane %v5806_v41, 5 }
 0xa22   :  { %v3599_v37 = vmul.f32 %v3588_v38, %v3565_v35 }
 0xa23   :  { %v3592_v49 = vmul.f32 0.5, %v3591_v51 }
 0xa24   :  { %v3602_v54 = vmul.f32 %v3601_v20, %v3599_v37 }
 0xa25   :  { %v3593_v0 = vsub.f32 1.5, %v3592_v49 }
 0xa26   :  { %v3605_v55 = vadd.f32 %v3604_v19, %v3602_v54 }
 0xa27   :  { %v3594_v6 = vmul.f32 %v4142_v44, %v3593_v0 }
 0xa29   :  { %v3598_v18 = vsel %vm3597_vm2, %v4142_v44, %v3594_v6 }
 0xa2a   :  { %v3600_v2 = vmul.f32 %v3598_v18, %v3566_v60 }
 0xa2c   :  { %v3603_v27 = vmul.f32 %v3601_v20, %v3600_v2 }
 0xa2e   :  { %v3606_v58 = vadd.f32 %v3604_v19, %v3603_v27 }
 0xa30   :  { %v3608_v43 = vpack.c.bf16 %v3606_v58, %v3605_v55 }
 0xa32   :  { %3872 = vmatmul.msk.bf16.vlgmr.msra.gmra.mxu3 %vm239_vm0, %v3608_v43 }
 0xab5   :  { %v3640_v22 = vpop.f32.mrf.mxu3 }
 0xab6   :  { %v3641_v61 = vadd.f32 %v4068_v14, %v3640_v22 }
 0xab8   :  { %v3645_v11 = vmax.f32 %v3641_v61, 0.0 }
 0xabd   :  { %v3642_v33 = vpop.f32.mrf.mxu3 }
 0xabe   :  { %v3643_v45 = vadd.f32 %v4068_v14, %v3642_v33 }
 0xac0   :  { %v3646_v29 = vmax.f32 %v3643_v45, 0.0 }
 0xac2   :  { %v3647_v5 = vpack.c.bf16 %v3646_v29, %v3645_v11 }
 0xac4   :  { %3889 = vmatmul.msk.bf16.vlgmr.msrb.gmra.mxu0 %vm3681_vm3, %v3647_v5 }
 0xb41   :  { %v3694_v23 = vpop.f32.mrf.mxu0 }
 0xb42   :  { %v3695_v42 = vadd.f32 %v3694_v23, %v3656_v13 }
 0xb44   :  { %v3699_v8 = vadd.f32 %v3695_v42, %v3605_v55 }
 0xb46   :  { %v3701_v1 = vsel %vm239_vm0, %v3699_v8, 0.0 }
 0xb47   :  { %3702 = vadd.xlane.f32.xlu1 %v3701_v1 }
 0xb49   :  { %v3696_v39 = vpop.f32.mrf.mxu0 }
 0xb4a   :  { %v3697_v34 = vadd.f32 %v3696_v39, %v3656_v13 }
 0xb4c   :  { %v3700_v62 = vadd.f32 %v3697_v34, %v3606_v58 }
 0xb4e   :  { %v3704_v21 = vsel %vm239_vm0, %v3700_v62, 0.0 }
 0xb4f   :  { %3705 = vadd.xlane.f32.xlu0 %v3704_v21 }
 0xbba   :  { %v3703_v26 = vpop.xlane.xlu1 %3702 }
 0xbbb   :  { %v3707_v46 = vmul.f32 %v3703_v26, %v5136_v12 }
 0xbbd   :  { %v3709_v35 = vsub.f32 %v3699_v8, %v3707_v46 }
 0xbbf   :  { %v3711_v31 = vmul.f32 %v3709_v35, %v3709_v35 }
 0xbc1   :  { %v3713_v9 = vsel %vm239_vm0, %v3711_v31, 0.0 }
 0xbc2   :  { %v3706_v57 = vpop.xlane.xlu0 %3705  ;;  %3714 = vadd.xlane.f32.xlu2 %v3713_v9 }
 0xbc3   :  { %v3708_v48 = vmul.f32 %v3706_v57, %v5136_v12 }
 0xbc5   :  { %v3710_v60 = vsub.f32 %v3700_v62, %v3708_v48 }
 0xbc7   :  { %v3712_v32 = vmul.f32 %v3710_v60, %v3710_v60 }
 0xbc9   :  { %v3716_v3 = vsel %vm239_vm0, %v3712_v32, 0.0 }
 0xbca   :  { %3717 = vadd.xlane.f32.xlu1 %v3716_v3 }
 0xc35   :  { %v3715_v10 = vpop.xlane.xlu2 %3714 }
 0xc36   :  { %v3719_v16 = vmul.f32 %v3715_v10, %v5136_v12 }
 0xc38   :  { %v3721_v36 = vadd.f32 1e-05, %v3719_v16 }
 0xc3a   :  { %4143 = vrsqrt.f32 %v3721_v36  ;;  %vm3729_vm5 = vweird.f32 %v3721_v36 }
 0xc3d   :  { %v3718_v56 = vpop.xlane.xlu1 %3717 }
 0xc3e   :  { %v3720_v24 = vmul.f32 %v3718_v56, %v5136_v12  ;;  %v3748_v12 = vperm.slane %v5806_v41, 6 }
 0xc40   :  { %v4144_v63 = vpop.eup %4143  ;;  %v3722_v30 = vadd.f32 1e-05, %v3720_v24 }
 0xc41   :  { %v3724_v59 = vmul.f32 %v4144_v63, %v3721_v36  ;;  %vm3730_vm4 = vweird.f32 %v4144_v63 }
 0xc42   :  { %4145 = vrsqrt.f32 %v3722_v30  ;;  %vm3731_vm6 = vmor %vm3729_vm5, %vm3730_vm4  ;;  %vm3739_vm8 = vweird.f32 %v3722_v30 }
 0xc43   :  { %v3725_v28 = vmul.f32 %v4144_v63, %v3724_v59 }
 0xc45   :  { %v3726_v53 = vmul.f32 0.5, %v3725_v28 }
 0xc47   :  { %v3727_v52 = vsub.f32 1.5, %v3726_v53 }
 0xc48   :  { %v4146_v50 = vpop.eup %4145 }
 0xc49   :  { %v3728_v40 = vmul.f32 %v4144_v63, %v3727_v52  ;;  %v3734_v44 = vmul.f32 %v4146_v50, %v3722_v30  ;;  %vm3740_vm7 = vweird.f32 %v4146_v50 }
 0xc4a   :  { %vm3741_vm9 = vmor %vm3739_vm8, %vm3740_vm7 }
 0xc4b   :  { %v3732_v17 = vsel %vm3731_vm6, %v4144_v63, %v3728_v40  ;;  %v3735_v51 = vmul.f32 %v4146_v50, %v3734_v44 }
 0xc4c   :  { %v3743_v38 = vmul.f32 %v3732_v17, %v3709_v35 }
 0xc4d   :  { %v3736_v49 = vmul.f32 0.5, %v3735_v51 }
 0xc4e   :  { %v3746_v0 = vmul.f32 %v3745_v25, %v3743_v38 }
 0xc4f   :  { %v3737_v20 = vsub.f32 1.5, %v3736_v49 }
 0xc50   :  { %v3749_v37 = vadd.f32 %v3748_v12, %v3746_v0 }
 0xc51   :  { %v3738_v6 = vmul.f32 %v4146_v50, %v3737_v20 }
 0xc52   :  { %3751 = vst.msk [vmem:[#allocation19] sm:$0xff] %vm239_vm0, %v3749_v37 }
 0xc53   :  { %v3742_v18 = vsel %vm3741_vm9, %v4146_v50, %v3738_v6 }
 0xc54   :  { %v3744_v19 = vmul.f32 %v3742_v18, %v3710_v60 }
 0xc56   :  { %v3747_v54 = vmul.f32 %v3745_v25, %v3744_v19 }
 0xc58   :  { %v3750_v41 = vadd.f32 %v3748_v12, %v3747_v54 }
 0xc5a   :  { %3752 = vst.msk [vmem:[#allocation19 + $0x8] sm:$0xff] %vm239_vm0, %v3750_v41 }
 0xc5b   :  { %3765 = dma.vmem_to_hbm [thread:$0]  %s3758_s14, 256, %s3760_s17, [#allocation4], %s4440_s16, %s4440_s16, %s4441_s0  }
 0xc5c   :  { %4426 = dma.done.wait [#allocation4], 256  }
 0xc5d   :  { %4427 = vsyncadd [#allocation4], 4294967040 }
 0xc5e   :  { %3770 = vsyncpa [#allocation3], 1 }
 0xc5f   :  { %3771 = vsyncpa [#allocation6], 1 }
 0xc60   :  { %3772 = vsyncpa [#allocation9], 1 }
 0xc61   :  { %3773 = vsyncpa [#allocation12], 1 }
 0xc62   :  { %3774 = vsyncpa [#allocation15], 1 }
 0xc63   :  { %3775 = vsyncpa [#allocation18], 1 }
 0xc64   :  { %3776 = vsyncpa [#allocation4], 1 }

// kernel: tpu_custom_call.1
= control target key start
LH: loop header
LB: loop body
LE: loop exit
PB: predicated region body
PF: predicated region fallthrough
CT: control target
= control target key end

     0   :  { %20 = vsyncpa [#allocation3], 0  ;;  %s5845_s0 = inlined_call_operand.hbm [shape: bf16[2,8,32], index: 0, kind: input, shape index: {}]   ;;  %s5846_s1 = inlined_call_operand.vmem [shape: bf16[2,16,32], index: 1, kind: input, shape index: {}]   ;;  %s5847_s2 = inlined_call_operand.hbm [shape: bf16[2,8,32], index: 2, kind: input, shape index: {}]   ;;  %s5848_s3 = inlined_call_operand.vmem [shape: bf16[2,16,32], index: 3, kind: input, shape index: {}]   ;;  %s5849_s4 = inlined_call_operand.vmem [shape: bf16[32,64], index: 4, kind: input, shape index: {}]   ;;  %s5850_s5 = inlined_call_operand.hbm [shape: bf16[32,32], index: 5, kind: input, shape index: {}]   ;;  %s5851_s6 = inlined_call_operand.hbm [shape: bf16[32,32], index: 6, kind: input, shape index: {}]   ;;  %s5852_s7 = inlined_call_operand.hbm [shape: bf16[32,32], index: 7, kind: input, shape index: {}]   ;;  %s5853_s8 = inlined_call_operand.hbm [shape: bf16[32,32], index: 8, kind: input, shape index: {}]   ;;  %s5854_s9 = inlined_call_operand.hbm [shape: bf16[32,32], index: 9, kind: input, shape index: {}]   ;;  %s5855_s10 = inlined_call_operand.hbm [shape: bf16[32,32], index: 10, kind: input, shape index: {}]   ;;  %s5856_s11 = inlined_call_operand.hbm [shape: bf16[32,64], index: 11, kind: input, shape index: {}]   ;;  %s5857_s12 = inlined_call_operand.vmem [shape: bf16[64,32], index: 12, kind: input, shape index: {}]   ;;  %s5858_s13 = inlined_call_operand.hbm [shape: f32[16,32], index: 13, kind: input, shape index: {}]   ;;  %s5859_s14 = inlined_call_operand.vmem [shape: f32[1,64], index: 14, kind: input, shape index: {}]   ;;  %s5860_s15 = inlined_call_operand.hbm [shape: f32[2,8,32], index: 15, kind: output, shape index: {}]  }
   0x1   :  { %21 = vsyncpa [#allocation6], 0 }
   0x2   :  { %22 = vsyncpa [#allocation9], 0 }
   0x3   :  { %23 = vsyncpa [#allocation12], 0 }
   0x4   :  { %24 = vsyncpa [#allocation15], 0 }
   0x5   :  { %25 = vsyncpa [#allocation18], 0 }
   0x6   :  { %26 = vsyncpa [#allocation4], 0  ;;  %s46_s20 = sshll.u32 %s5847_s2, 4  ;;  %s4428_s21 = smov [#allocation5]   ;;  %s47_s20 = int_to_ptr.hbm [resolvable:$true] %s46_s20 }
   0x7   :  { %s48_s22 = sshll.u32 %s4428_s21, 4  ;;  %s76_s25 = sshll.u32 %s5851_s6, 4  ;;  %s49_s22 = int_to_ptr.vmem [resolvable:$true] %s48_s22  ;;  %s77_s25 = int_to_ptr.hbm [resolvable:$true] %s76_s25 }
   0x8   :  { %s4429_s26 = smov 64   ;;  %s4430_s27 = smov 4  }
   0x9   :  { %54 = dma.hbm_to_vmem [thread:$0]  %s47_s20, 128, %s49_s22, [#allocation6], %s4429_s26, %s4429_s26, %s4430_s27  }
   0xa   :  { %s4431_s28 = smov [#allocation8]   ;;  %s102_s2 = sshll.u32 %s5853_s8, 4  ;;  %s103_s2 = int_to_ptr.hbm [resolvable:$true] %s102_s2 }
   0xb   :  { %s78_s29 = sshll.u32 %s4431_s28, 4  ;;  %s128_s18 = sshll.u32 %s5855_s10, 4  ;;  %s79_s29 = int_to_ptr.vmem [resolvable:$true] %s78_s29  ;;  %s129_s18 = int_to_ptr.hbm [resolvable:$true] %s128_s18 }
   0xc   :  { %84 = dma.hbm_to_vmem [thread:$0]  %s77_s25, 256, %s79_s29, [#allocation9], %s4429_s26, %s4429_s26, %s4430_s27  }
   0xd   :  { %s4432_s19 = smov [#allocation11]   ;;  %s4433_s20 = smov [#allocation14]  }
   0xe   :  { %s104_s21 = sshll.u32 %s4432_s19, 4  ;;  %s130_s8 = sshll.u32 %s4433_s20, 4  ;;  %s105_s21 = int_to_ptr.vmem [resolvable:$true] %s104_s21  ;;  %s131_s8 = int_to_ptr.vmem [resolvable:$true] %s130_s8 }
   0xf   :  { %110 = dma.hbm_to_vmem [thread:$0]  %s103_s2, 256, %s105_s21, [#allocation12], %s4429_s26, %s4429_s26, %s4430_s27  }
  0x10   :  { %s31_s24 = sshll.u32 %s5845_s0, 4  ;;  %s63_s28 = sshll.u32 %s5850_s5, 4  ;;  %s32_s24 = int_to_ptr.hbm [resolvable:$true] %s31_s24  ;;  %s64_s28 = int_to_ptr.hbm [resolvable:$true] %s63_s28 }
  0x11   :  { %136 = dma.hbm_to_vmem [thread:$0]  %s129_s18, 256, %s131_s8, [#allocation15], %s4429_s26, %s4429_s26, %s4430_s27  }
  0x12   :  { %s4434_s29 = smov [#allocation2]   ;;  %s4435_s16 = smov [#allocation7]  }
  0x13   :  { %s33_s30 = sshll.u32 %s4434_s29, 4  ;;  %s65_s0 = sshll.u32 %s4435_s16, 4  ;;  %s34_s30 = int_to_ptr.vmem [resolvable:$true] %s33_s30  ;;  %s66_s0 = int_to_ptr.vmem [resolvable:$true] %s65_s0 }
  0x14   :  { %39 = dma.hbm_to_vmem [thread:$0]  %s32_s24, 128, %s34_s30, [#allocation3], %s4429_s26, %s4429_s26, %s4430_s27  }
  0x15   :  { %s89_s17 = sshll.u32 %s5852_s7, 4  ;;  %s115_s19 = sshll.u32 %s5854_s9, 4  ;;  %s90_s17 = int_to_ptr.hbm [resolvable:$true] %s89_s17  ;;  %s116_s19 = int_to_ptr.hbm [resolvable:$true] %s115_s19 }
  0x16   :  { %71 = dma.hbm_to_vmem [thread:$0]  %s64_s28, 256, %s66_s0, [#allocation6], %s4429_s26, %s4429_s26, %s4430_s27  }
  0x17   :  { %s4436_s21 = smov [#allocation10]   ;;  %s4437_s8 = smov [#allocation13]  }
  0x18   :  { %s91_s20 = sshll.u32 %s4436_s21, 4  ;;  %s117_s7 = sshll.u32 %s4437_s8, 4  ;;  %s92_s20 = int_to_ptr.vmem [resolvable:$true] %s91_s20  ;;  %s118_s7 = int_to_ptr.vmem [resolvable:$true] %s117_s7 }
  0x19   :  { %97 = dma.hbm_to_vmem [thread:$0]  %s90_s17, 256, %s92_s20, [#allocation9], %s4429_s26, %s4429_s26, %s4430_s27  }
  0x1a   :  { %s141_s24 = sshll.u32 %s5856_s11, 4  ;;  %s156_s25 = sshll.u32 %s5858_s13, 4  ;;  %s142_s24 = int_to_ptr.hbm [resolvable:$true] %s141_s24  ;;  %s157_s25 = int_to_ptr.hbm [resolvable:$true] %s156_s25 }
  0x1b   :  { %123 = dma.hbm_to_vmem [thread:$0]  %s116_s19, 256, %s118_s7, [#allocation12], %s4429_s26, %s4429_s26, %s4430_s27  }
  0x1c   :  { %s4438_s28 = smov [#allocation16]   ;;  %s4439_s30 = smov [#allocation17]  }
  0x1d   :  { %s143_s29 = sshll.u32 %s4438_s28, 4  ;;  %s158_s11 = sshll.u32 %s4439_s30, 4  ;;  %s144_s29 = int_to_ptr.vmem [resolvable:$true] %s143_s29  ;;  %s159_s11 = int_to_ptr.vmem [resolvable:$true] %s158_s11 }
  0x1e   :  { %149 = dma.hbm_to_vmem [thread:$0]  %s142_s24, 256, %s144_s29, [#allocation15], %s4429_s26, %s4429_s26, %s4430_s27  }
  0x1f   :  { %s4440_s16 = smov 128   ;;  %s4441_s0 = smov 8  }
  0x20   :  { %164 = dma.hbm_to_vmem [thread:$0]  %s157_s25, 256, %s159_s11, [#allocation18], %s4440_s16, %s4440_s16, %s4441_s0  }
  0x21   :  { %4414 = dma.done.wait [#allocation3], 128  }
  0x22   :  { %4415 = vsyncadd [#allocation3], 4294967168 }
  0x23   :  { %4416 = dma.done.wait [#allocation6], 384  }
  0x24   :  { %4417 = vsyncadd [#allocation6], 4294966912 }
  0x25   :  { %4418 = dma.done.wait [#allocation9], 512  }
  0x26   :  { %4419 = vsyncadd [#allocation9], 4294966784 }
  0x27   :  { %4420 = dma.done.wait [#allocation12], 512  }
  0x28   :  { %4421 = vsyncadd [#allocation12], 4294966784 }
  0x29   :  { %4422 = dma.done.wait [#allocation15], 512  }
  0x2a   :  { %4423 = vsyncadd [#allocation15], 4294966784 }
  0x2b   :  { %4424 = dma.done.wait [#allocation18], 256  }
  0x2c   :  { %4425 = vsyncadd [#allocation18], 4294967040  ;;  %v3891_v0 = vld [vmem:[%s5849_s4 + $0x8] sm:$0xff]  ;;  %v4597_v1 = vld [vmem:[#allocation2] sm:$0xff]   ;;  %s4442_s6 = smov 32   ;;  %vm239_vm0 = vcmask 261120  }
  0x2d   :  { %v3908_v2 = vunpack.c.l.bf16 %v4597_v1  ;;  %v3909_v3 = vunpack.c.h.bf16 %v4597_v1  ;;  %v4601_v4 = vld [vmem:[#allocation5] sm:$0xff]   ;;  %v4603_v5 = vld [vmem:[#allocation17] sm:$0xff]  ;;  %270 = vmatpush.bf16.msra.mxu0 %v3891_v0  ;;  %s4444_s17 = smov 104   ;;  %s4445_s5 = smov 120   ;;  %v4450_v24 = vmov 1983009808  }
  0x2e   :  { %v3890_v6 = vld [vmem:[%s5849_s4] sm:$0xff]  ;;  %v3912_v7 = vunpack.c.l.bf16 %v4601_v4  ;;  %v3913_v8 = vunpack.c.h.bf16 %v4601_v4  ;;  %v235_v9 = vrot.slane %v4603_v5, 1  ;;  %s4443_s4 = smov 112   ;;  %s4446_s18 = smov 96   ;;  %v328_v25 = vunpack.c.l.s4 %v4450_v24  ;;  %v3893_v43 = vld [vmem:[#allocation7 + $0x8] sm:$0xff]  ;;  %v3892_v49 = vld [vmem:[#allocation7] sm:$0xff] }
  0x2f   :  { %s4447_s19 = smov 88   ;;  %s4448_s21 = smov 72   ;;  %vm323_vm1 = vcmask 1047556   ;;  %v4451_v36 = vmov 1934713408   ;;  %798 = vmatpush.bf16.msra.mxu1 %v3893_v43  ;;  %vm1062_vm2 = vcmask 64512  }
  0x30   :  { %v241_v10 = vadd.f32 %v3912_v7, %v3908_v2  ;;  %v242_v11 = vadd.f32 %v3913_v8, %v3909_v3  ;;  %236 = vrot.lane.b32.xlu0 %v235_v9, %s4442_s6  ;;  %s4449_s20 = smov 80   ;;  %v4625_v29 = vunpack.c.0.s8 %v328_v25  ;;  %v376_v37 = vunpack.c.l.s4 %v4451_v36 }
  0x31   :  { %271 = vmatpush.bf16.msra.mxu0 %v3890_v6  ;;  %vm1322_vm3 = vcmask 1043456   ;;  %vm3171_vm11 = vcmask 130048  }
  0x32   :  { %v243_v12 = vpack.c.bf16 %v242_v11, %v241_v10  ;;  %v4637_v52 = vunpack.c.0.s8 %v376_v37 }
  0x33   :  { %799 = vmatpush.bf16.msra.mxu1 %v3892_v49 }
  0x34   :  { %3785 = vmatmul.msk.bf16.vlgmr.msra.gmra.mxu0 %vm239_vm0, %v243_v12 }
  0x36   :  { %3794 = vmatmul.msk.bf16.vlgmr.msra.gmra.mxu1 %vm239_vm0, %v4597_v1  ;;  %v4452_v1 = vmov 32.0  }
  0xa2   :  { %v237_v13 = vpop.permute.xlu0 %236 }
  0xa3   :  { %v240_v15 = vsel %vm239_vm0, %v4603_v5, %v237_v13 }
  0xa4   :  { %v248_v16 = vperm.slane %v240_v15, 0 }
  0xb1   :  { %v273_v14 = vpop.f32.mrf.mxu0 }
  0xb2   :  { %v274_v18 = vadd.f32 %v273_v14, %v248_v16 }
  0xb4   :  { %v325_v32 = vrot.slane %v274_v18, 4 }
  0xb9   :  { %v275_v17 = vpop.f32.mrf.mxu0 }
  0xba   :  { %v276_v19 = vadd.f32 %v275_v17, %v248_v16 }
  0xbc   :  { %v3973_v20 = vpack.i.bf16 %v276_v19, %v274_v18  ;;  %v437_v27 = vrot.slane %v276_v19, 4 }
  0xbe   :  { %3974 = vrot.lane.b32.xlu2 %v3973_v20, %s4443_s4  ;;  %3964 = vrot.lane.b32.xlu1 %v3973_v20, %s4444_s17 }
  0xbf   :  { %3959 = vrot.lane.b32.xlu0 %v3973_v20, %s4445_s5 }
  0xc6   :  { %3979 = vrot.lane.b32.xlu2 %v3973_v20, %s4446_s18  ;;  %3969 = vrot.lane.b32.xlu1 %v3973_v20, %s4447_s19 }
  0xc7   :  { %3984 = vrot.lane.b32.xlu0 %v3973_v20, %s4448_s21 }
  0xce   :  { %3989 = vrot.lane.b32.xlu1 %v3973_v20, %s4449_s20 }
 0x118   :  { %v3975_v21 = vpop.permute.xlu2 %3974 }
 0x119   :  { %v3977_v22 = vunpack.i.h.bf16 %v3975_v21  ;;  %v3976_v23 = vunpack.i.l.bf16 %v3975_v21 }
 0x11b   :  { %v435_v26 = vrot.slane %v3977_v22, 4  ;;  %v322_v28 = vrot.slane %v3976_v23, 4  ;;  %v438_v31 = vsel %vm323_vm1, %v3977_v22, %v437_v27  ;;  %v326_v34 = vsel %vm323_vm1, %v3976_v23, %v325_v32 }
 0x11c   :  { %v446_v39 = vperm.slane %v438_v31, %v4625_v29  ;;  %v334_v50 = vperm.slane %v326_v34, %v4625_v29 }
 0x11d   :  { %v436_v30 = vsel %vm323_vm1, %v435_v26, %v276_v19  ;;  %v324_v33 = vsel %vm323_vm1, %v322_v28, %v274_v18 }
 0x11e   :  { %v442_v38 = vperm.slane %v436_v30, %v4625_v29  ;;  %v330_v46 = vperm.slane %v324_v33, %v4625_v29  ;;  %v497_v56 = vrot.slane %v446_v39, 4  ;;  %v385_v18 = vrot.slane %v334_v50, 4 }
 0x120   :  { %v4635_v51 = vpop.permute.xlu2 %3979  ;;  %v485_v55 = vrot.slane %v442_v38, 4  ;;  %v373_v63 = vrot.slane %v330_v46, 4 }
 0x121   :  { %v3982_v0 = vunpack.i.h.bf16 %v4635_v51  ;;  %v3981_v10 = vunpack.i.l.bf16 %v4635_v51 }
 0x123   :  { %v461_v26 = vrot.slane %v3982_v0, 4  ;;  %v349_v27 = vrot.slane %v3981_v10, 4 }
 0x130   :  { %v3965_v35 = vpop.permute.xlu1 %3964 }
 0x131   :  { %v3967_v40 = vunpack.i.h.bf16 %v3965_v35  ;;  %v3966_v41 = vunpack.i.l.bf16 %v3965_v35  ;;  %v3960_v42 = vpop.permute.xlu0 %3959 }
 0x132   :  { %v3962_v44 = vunpack.i.h.bf16 %v3960_v42  ;;  %v3961_v45 = vunpack.i.l.bf16 %v3960_v42 }
 0x133   :  { %v447_v47 = vrot.slane %v3967_v40, 4  ;;  %v335_v48 = vrot.slane %v3966_v41, 4 }
 0x134   :  { %v449_v53 = vrot.slane %v3962_v44, 4  ;;  %v337_v54 = vrot.slane %v3961_v45, 4 }
 0x135   :  { %v448_v57 = vsel %vm323_vm1, %v447_v47, %v3962_v44  ;;  %v336_v58 = vsel %vm323_vm1, %v335_v48, %v3961_v45 }
 0x136   :  { %v450_v59 = vsel %vm323_vm1, %v3967_v40, %v449_v53  ;;  %v454_v60 = vperm.slane %v448_v57, %v4625_v29  ;;  %v338_v61 = vsel %vm323_vm1, %v3966_v41, %v337_v54  ;;  %v342_v62 = vperm.slane %v336_v58, %v4625_v29 }
 0x137   :  { %v458_v6 = vperm.slane %v450_v59, %v4625_v29  ;;  %v346_v9 = vperm.slane %v338_v61, %v4625_v29 }
 0x138   :  { %v483_v11 = vrot.slane %v454_v60, 4  ;;  %v486_v12 = vsel %vm323_vm1, %v454_v60, %v485_v55  ;;  %v371_v13 = vrot.slane %v342_v62, 4  ;;  %v3970_v14 = vpop.permute.xlu1 %3969  ;;  %v374_v20 = vsel %vm323_vm1, %v342_v62, %v373_v63 }
 0x139   :  { %v4651_v15 = vperm.slane %v486_v12, %v4637_v52  ;;  %v495_v16 = vrot.slane %v458_v6, 4  ;;  %v498_v17 = vsel %vm323_vm1, %v458_v6, %v497_v56  ;;  %v383_v21 = vrot.slane %v346_v9, 4  ;;  %v3985_v28 = vpop.permute.xlu0 %3984 }
 0x13a   :  { %v484_v19 = vsel %vm323_vm1, %v483_v11, %v442_v38  ;;  %v4663_v24 = vperm.slane %v498_v17, %v4637_v52  ;;  %v372_v25 = vsel %vm323_vm1, %v371_v13, %v330_v46  ;;  %v4672_v31 = vperm.slane %v374_v20, %v4637_v52 }
 0x13b   :  { %v4659_v22 = vperm.slane %v484_v19, %v4637_v52  ;;  %v496_v23 = vsel %vm323_vm1, %v495_v16, %v446_v39  ;;  %v537_v30 = vrot.slane %v4651_v15, 4  ;;  %v384_v32 = vsel %vm323_vm1, %v383_v21, %v334_v50 }
 0x13c   :  { %v386_v33 = vsel %vm323_vm1, %v346_v9, %v385_v18  ;;  %v4677_v34 = vperm.slane %v496_v23, %v4637_v52  ;;  %v4680_v35 = vperm.slane %v372_v25, %v4637_v52  ;;  %v3972_v36 = vunpack.i.h.bf16 %v3970_v14 }
 0x13d   :  { %v3971_v37 = vunpack.i.l.bf16 %v3970_v14  ;;  %v533_v38 = vrot.slane %v4659_v22, 4  ;;  %v545_v39 = vrot.slane %v4663_v24, 4  ;;  %v3987_v40 = vunpack.i.h.bf16 %v3985_v28 }
 0x13e   :  { %v3986_v41 = vunpack.i.l.bf16 %v3985_v28  ;;  %v4685_v42 = vperm.slane %v384_v32, %v4637_v52  ;;  %v4688_v43 = vperm.slane %v386_v33, %v4637_v52  ;;  %v473_v44 = vrot.slane %v3972_v36, 4 }
 0x13f   :  { %v361_v45 = vrot.slane %v3971_v37, 4  ;;  %v471_v47 = vrot.slane %v3987_v40, 4  ;;  %v541_v53 = vrot.slane %v4677_v34, 4  ;;  %v421_v54 = vrot.slane %v4680_v35, 4 }
 0x140   :  { %v3990_v46 = vpop.permute.xlu1 %3989  ;;  %v359_v48 = vrot.slane %v3986_v41, 4  ;;  %v474_v55 = vsel %vm323_vm1, %v3987_v40, %v473_v44  ;;  %v425_v9 = vrot.slane %v4672_v31, 4  ;;  %v429_v25 = vrot.slane %v4685_v42, 4 }
 0x141   :  { %v3992_v49 = vunpack.i.h.bf16 %v3990_v46  ;;  %v3991_v50 = vunpack.i.l.bf16 %v3990_v46  ;;  %v362_v56 = vsel %vm323_vm1, %v3986_v41, %v361_v45  ;;  %v472_v57 = vsel %vm323_vm1, %v471_v47, %v3972_v36 }
 0x142   :  { %v482_v58 = vperm.slane %v474_v55, %v4625_v29  ;;  %v360_v59 = vsel %vm323_vm1, %v359_v48, %v3971_v37  ;;  %v370_v60 = vperm.slane %v362_v56, %v4625_v29  ;;  %v478_v61 = vperm.slane %v472_v57, %v4625_v29 }
 0x143   :  { %v366_v62 = vperm.slane %v360_v59, %v4625_v29  ;;  %v459_v63 = vrot.slane %v3992_v49, 4  ;;  %v462_v6 = vsel %vm323_vm1, %v3992_v49, %v461_v26  ;;  %v347_v13 = vrot.slane %v3991_v50, 4 }
 0x144   :  { %v519_v11 = vrot.slane %v482_v58, 4  ;;  %v470_v12 = vperm.slane %v462_v6, %v4625_v29  ;;  %v507_v14 = vrot.slane %v478_v61, 4  ;;  %v407_v16 = vrot.slane %v370_v60, 4 }
 0x145   :  { %v460_v17 = vsel %vm323_vm1, %v459_v63, %v3982_v0  ;;  %v350_v18 = vsel %vm323_vm1, %v3991_v50, %v349_v27  ;;  %v348_v21 = vsel %vm323_vm1, %v347_v13, %v3981_v10  ;;  %v395_v26 = vrot.slane %v366_v62, 4 }
 0x146   :  { %v466_v19 = vperm.slane %v460_v17, %v4625_v29  ;;  %v521_v20 = vrot.slane %v470_v12, 4  ;;  %v358_v23 = vperm.slane %v350_v18, %v4625_v29  ;;  %v354_v28 = vperm.slane %v348_v21, %v4625_v29 }
 0x147   :  { %v520_v32 = vsel %vm323_vm1, %v519_v11, %v470_v12  ;;  %v433_v47 = vrot.slane %v4688_v43, 4 }
 0x148   :  { %v509_v33 = vrot.slane %v466_v19, 4  ;;  %v408_v0 = vsel %vm323_vm1, %v407_v16, %v358_v23  ;;  %v409_v27 = vrot.slane %v358_v23, 4  ;;  %v508_v36 = vsel %vm323_vm1, %v507_v14, %v466_v19 }
 0x149   :  { %v396_v37 = vsel %vm323_vm1, %v395_v26, %v354_v28  ;;  %v397_v51 = vrot.slane %v354_v28, 4  ;;  %v414_v10 = vperm.slane %v408_v0, %v4637_v52  ;;  %v514_v40 = vperm.slane %v508_v36, %v4637_v52 }
 0x14a   :  { %v402_v41 = vperm.slane %v396_v37, %v4637_v52  ;;  %v410_v44 = vsel %vm323_vm1, %v370_v60, %v409_v27  ;;  %v510_v45 = vsel %vm323_vm1, %v478_v61, %v509_v33  ;;  %v522_v46 = vsel %vm323_vm1, %v482_v58, %v521_v20 }
 0x14b   :  { %v398_v48 = vsel %vm323_vm1, %v366_v62, %v397_v51  ;;  %v418_v49 = vperm.slane %v410_v44, %v4637_v52  ;;  %v427_v50 = vrot.slane %v414_v10, 4  ;;  %v4729_v57 = vsel %vm323_vm1, %v414_v10, %v429_v25 }
 0x14c   :  { %v406_v55 = vperm.slane %v398_v48, %v4637_v52  ;;  %v419_v56 = vrot.slane %v402_v41, 4  ;;  %v518_v59 = vperm.slane %v510_v45, %v4637_v52  ;;  %v4733_v60 = vsel %vm323_vm1, %v402_v41, %v421_v54 }
 0x14d   :  { %v431_v61 = vrot.slane %v418_v49, 4  ;;  %v526_v58 = vperm.slane %v520_v32, %v4637_v52  ;;  %v530_v63 = vperm.slane %v522_v46, %v4637_v52  ;;  %v4739_v6 = vsel %vm323_vm1, %v427_v50, %v4685_v42 }
 0x14e   :  { %v423_v62 = vrot.slane %v406_v55, 4  ;;  %v531_v11 = vrot.slane %v514_v40, 4  ;;  %v4744_v12 = vsel %vm323_vm1, %v514_v40, %v533_v38  ;;  %v535_v13 = vrot.slane %v518_v59, 4 }
 0x14f   :  { %v539_v14 = vrot.slane %v526_v58, 4  ;;  %v4747_v54 = vsel %vm323_vm1, %v526_v58, %v541_v53  ;;  %v585_v16 = vrot.slane %v4729_v57, 4  ;;  %v543_v17 = vrot.slane %v530_v63, 4 }
 0x150   :  { %v4752_v18 = vsel %vm323_vm1, %v419_v56, %v4680_v35  ;;  %v4756_v42 = vsel %vm323_vm1, %v423_v62, %v4672_v31  ;;  %v4759_v19 = vsel %vm323_vm1, %v406_v55, %v425_v9  ;;  %v697_v53 = vrot.slane %v4747_v54, 4 }
 0x151   :  { %v4763_v38 = vsel %vm323_vm1, %v539_v14, %v4677_v34  ;;  %v4768_v20 = vsel %vm323_vm1, %v431_v61, %v4688_v43  ;;  %v4771_v35 = vsel %vm323_vm1, %v418_v49, %v433_v47  ;;  %v547_v21 = vrot.slane %v4756_v42, 4 }
 0x152   :  { %v549_v31 = vrot.slane %v4752_v18, 4  ;;  %v559_v9 = vrot.slane %v4759_v19, 4  ;;  %v561_v23 = vrot.slane %v4733_v60, 4  ;;  %v571_v34 = vrot.slane %v4768_v20, 4 }
 0x153   :  { %v573_v25 = vrot.slane %v4739_v6, 4  ;;  %v586_v26 = vsel %vm323_vm1, %v4771_v35, %v585_v16  ;;  %v4783_v43 = vsel %vm323_vm1, %v531_v11, %v4659_v22  ;;  %v4792_v0 = vsel %vm323_vm1, %v535_v13, %v4651_v15 }
 0x154   :  { %v550_v28 = vsel %vm323_vm1, %v4756_v42, %v549_v31  ;;  %v562_v32 = vsel %vm323_vm1, %v4759_v19, %v561_v23  ;;  %v594_v33 = vperm.slane %v586_v26, %v4625_v29  ;;  %v4801_v37 = vsel %vm323_vm1, %v518_v59, %v537_v30 }
 0x155   :  { %v558_v27 = vperm.slane %v550_v28, %v4625_v29  ;;  %v570_v36 = vperm.slane %v562_v32, %v4625_v29  ;;  %v574_v22 = vsel %vm323_vm1, %v4768_v20, %v573_v25  ;;  %v583_v10 = vrot.slane %v4771_v35, 4 }
 0x156   :  { %v582_v51 = vperm.slane %v574_v22, %v4625_v29  ;;  %v631_v40 = vrot.slane %v594_v33, 4  ;;  %v4807_v41 = vsel %vm323_vm1, %v543_v17, %v4663_v24  ;;  %v4812_v45 = vsel %vm323_vm1, %v530_v63, %v545_v39 }
 0x157   :  { %v607_v44 = vrot.slane %v570_v36, 4  ;;  %v659_v15 = vrot.slane %v4792_v0, 4  ;;  %v661_v30 = vrot.slane %v4783_v43, 4  ;;  %v671_v47 = vrot.slane %v4801_v37, 4 }
 0x158   :  { %v632_v46 = vsel %vm323_vm1, %v631_v40, %v582_v51  ;;  %v673_v48 = vrot.slane %v4744_v12, 4  ;;  %v685_v49 = vrot.slane %v4763_v38, 4  ;;  %v683_v39 = vrot.slane %v4807_v41, 4 }
 0x159   :  { %v608_v50 = vsel %vm323_vm1, %v607_v44, %v558_v27  ;;  %v638_v55 = vperm.slane %v632_v46, %v4637_v52  ;;  %v662_v24 = vsel %vm323_vm1, %v4792_v0, %v661_v30  ;;  %v698_v13 = vsel %vm323_vm1, %v4812_v45, %v697_v53 }
 0x15a   :  { %v614_v56 = vperm.slane %v608_v50, %v4637_v52  ;;  %v670_v59 = vperm.slane %v662_v24, %v4625_v29  ;;  %v674_v61 = vsel %vm323_vm1, %v4801_v37, %v673_v48  ;;  %v686_v58 = vsel %vm323_vm1, %v4807_v41, %v685_v49 }
 0x15b   :  { %v651_v63 = vrot.slane %v638_v55, 4  ;;  %v682_v62 = vperm.slane %v674_v61, %v4625_v29  ;;  %v694_v11 = vperm.slane %v686_v58, %v4625_v29  ;;  %v706_v14 = vperm.slane %v698_v13, %v4625_v29 }
 0x15c   :  { %v653_v16 = vrot.slane %v614_v56, 4  ;;  %v609_v17 = vrot.slane %v558_v27, 4  ;;  %v633_v31 = vrot.slane %v582_v51, 4  ;;  %v721_v26 = vrot.slane %v670_v59, 4 }
 0x15d   :  { %v652_v23 = vsel %vm323_vm1, %v651_v63, %v614_v56  ;;  %v719_v25 = vrot.slane %v682_v62, 4  ;;  %v745_v28 = vrot.slane %v694_v11, 4  ;;  %v743_v22 = vrot.slane %v706_v14, 4 }
 0x15e   :  { %v1054_v32 = vpack.c.bf16 %v652_v23, %v652_v23  ;;  %v654_v40 = vsel %vm323_vm1, %v638_v55, %v653_v16  ;;  %v610_v44 = vsel %vm323_vm1, %v570_v36, %v609_v17  ;;  %v634_v48 = vsel %vm323_vm1, %v594_v33, %v633_v31 }
 0x15f   :  { %v720_v30 = vsel %vm323_vm1, %v719_v25, %v670_v59  ;;  %v1056_v46 = vpack.c.bf16 %v654_v40, %v654_v40  ;;  %v618_v53 = vperm.slane %v610_v44, %v4637_v52  ;;  %v744_v49 = vsel %vm323_vm1, %v743_v22, %v694_v11 }
 0x160   :  { %v1067_v27 = vsel %vm1062_vm2, %v1054_v32, 0  ;;  %v726_v51 = vperm.slane %v720_v30, %v4637_v52  ;;  %v642_v50 = vperm.slane %v634_v48, %v4637_v52  ;;  %v750_v55 = vperm.slane %v744_v49, %v4637_v52 }
 0x161   :  { %1076 = vmatpush.bf16.xpose.msra.mxu2 %v1067_v27  ;;  %v1105_v36 = vsel %vm1062_vm2, %v1056_v46, 0  ;;  %v657_v24 = vrot.slane %v618_v53, 4  ;;  %v722_v56 = vsel %vm323_vm1, %v682_v62, %v721_v26  ;;  %v746_v58 = vsel %vm323_vm1, %v706_v14, %v745_v28 }
 0x162   :  { %1114 = vmatpush.bf16.xpose.msrb.mxu0 %v1105_v36  ;;  %v765_v59 = vrot.slane %v726_v51, 4  ;;  %v655_v61 = vrot.slane %v642_v50, 4  ;;  %v730_v33 = vperm.slane %v722_v56, %v4637_v52  ;;  %v695_v63 = vrot.slane %v4812_v45, 4 }
 0x163   :  { %v763_v11 = vrot.slane %v750_v55, 4  ;;  %v754_v13 = vperm.slane %v746_v58, %v4637_v52  ;;  %v658_v16 = vsel %vm323_vm1, %v642_v50, %v657_v24  ;;  %v548_v28 = vsel %vm323_vm1, %v547_v21, %v4752_v18 }
 0x164   :  { %v766_v17 = vsel %vm323_vm1, %v750_v55, %v765_v59  ;;  %v656_v31 = vsel %vm323_vm1, %v655_v61, %v618_v53  ;;  %v769_v23 = vrot.slane %v730_v33, 4  ;;  %v1060_v62 = vpack.c.bf16 %v658_v16, %v658_v16 }
 0x165   :  { %v764_v25 = vsel %vm323_vm1, %v763_v11, %v726_v51  ;;  %v1057_v26 = vpack.c.bf16 %v766_v17, %v766_v17  ;;  %v1058_v32 = vpack.c.bf16 %v656_v31, %v656_v31  ;;  %v767_v22 = vrot.slane %v754_v13, 4 }
 0x166   :  { %v1055_v40 = vpack.c.bf16 %v764_v25, %v764_v25  ;;  %v1181_v14 = vsel %vm1062_vm2, %v1060_v62, 0  ;;  %v770_v45 = vsel %vm323_vm1, %v754_v13, %v769_v23  ;;  %v560_v42 = vsel %vm323_vm1, %v559_v9, %v4733_v60 }
 0x167   :  { %v1124_v44 = vsel %vm1062_vm2, %v1057_v26, 0  ;;  %v1143_v30 = vsel %vm1062_vm2, %v1058_v32, 0  ;;  %v768_v46 = vsel %vm323_vm1, %v767_v22, %v730_v33  ;;  %v1061_v53 = vpack.c.bf16 %v770_v45, %v770_v45 }
 0x168   :  { %v1086_v48 = vsel %vm1062_vm2, %v1055_v40, 0  ;;  %1133 = vmatpush.bf16.xpose.msrb.mxu1 %v1124_v44  ;;  %v1059_v27 = vpack.c.bf16 %v768_v46, %v768_v46  ;;  %v572_v18 = vsel %vm323_vm1, %v571_v34, %v4739_v6  ;;  %v554_v51 = vperm.slane %v548_v28, %v4625_v29 }
 0x169   :  { %1152 = vmatpush.bf16.xpose.msrb.mxu2 %v1143_v30  ;;  %1095 = vmatpush.bf16.xpose.msra.mxu3 %v1086_v48  ;;  %v1200_v21 = vsel %vm1062_vm2, %v1061_v53, 0  ;;  %v566_v49 = vperm.slane %v560_v42, %v4625_v29  ;;  %v584_v50 = vsel %vm323_vm1, %v583_v10, %v4729_v57  ;;  %v578_v60 = vperm.slane %v572_v18, %v4625_v29 }
 0x16a   :  { %1190 = vmatpush.bf16.xpose.msra.mxu0 %v1181_v14  ;;  %v1162_v19 = vsel %vm1062_vm2, %v1059_v27, 0  ;;  %v590_v20 = vperm.slane %v584_v50, %v4625_v29  ;;  %v660_v6 = vsel %vm323_vm1, %v659_v15, %v4783_v43  ;;  %v672_v57 = vsel %vm323_vm1, %v671_v47, %v4744_v12 }
 0x16b   :  { %v595_v9 = vrot.slane %v566_v49, 4  ;;  %v666_v34 = vperm.slane %v660_v6, %v4625_v29  ;;  %v678_v10 = vperm.slane %v672_v57, %v4625_v29  ;;  %v684_v55 = vsel %vm323_vm1, %v683_v39, %v4763_v38 }
 0x16c   :  { %v619_v35 = vrot.slane %v590_v20, 4  ;;  %v696_v43 = vsel %vm323_vm1, %v695_v63, %v4747_v54  ;;  %v690_v15 = vperm.slane %v684_v55, %v4625_v29  ;;  %v597_v39 = vrot.slane %v554_v51, 4 }
 0x16d   :  { %v596_v0 = vsel %vm323_vm1, %v595_v9, %v554_v51  ;;  %v702_v36 = vperm.slane %v696_v43, %v4625_v29  ;;  %v707_v47 = vrot.slane %v678_v10, 4  ;;  %v621_v33 = vrot.slane %v578_v60, 4  ;;  %v801_v9 = vpop.f32.mrf.mxu1 }
 0x16e   :  { %v602_v37 = vperm.slane %v596_v0, %v4637_v52  ;;  %v620_v12 = vsel %vm323_vm1, %v619_v35, %v578_v60  ;;  %v709_v31 = vrot.slane %v666_v34, 4  ;;  %v733_v62 = vrot.slane %v690_v15, 4 }
 0x16f   :  { %v626_v24 = vperm.slane %v620_v12, %v4637_v52  ;;  %v731_v56 = vrot.slane %v702_v36, 4  ;;  %v708_v38 = vsel %vm323_vm1, %v707_v47, %v666_v34  ;;  %v598_v26 = vsel %vm323_vm1, %v566_v49, %v597_v39 }
 0x170   :  { %1209 = vmatpush.bf16.xpose.msra.mxu1 %v1200_v21  ;;  %v645_v41 = vrot.slane %v602_v37, 4  ;;  %v714_v54 = vperm.slane %v708_v38, %v4637_v52  ;;  %v622_v40 = vsel %vm323_vm1, %v590_v20, %v621_v33  ;;  %v606_v45 = vperm.slane %v598_v26, %v4637_v52 }
 0x171   :  { %1171 = vmatpush.bf16.xpose.msrb.mxu3 %v1162_v19  ;;  %v643_v59 = vrot.slane %v626_v24, 4  ;;  %v732_v61 = vsel %vm323_vm1, %v731_v56, %v690_v15  ;;  %v710_v28 = vsel %vm323_vm1, %v678_v10, %v709_v31  ;;  %v630_v44 = vperm.slane %v622_v40, %v4637_v52 }
 0x172   :  { %v738_v58 = vperm.slane %v732_v61, %v4637_v52  ;;  %v646_v63 = vsel %vm323_vm1, %v626_v24, %v645_v41  ;;  %v757_v13 = vrot.slane %v714_v54, 4  ;;  %v734_v30 = vsel %vm323_vm1, %v702_v36, %v733_v62 }
 0x173   :  { %v644_v11 = vsel %vm323_vm1, %v643_v59, %v602_v37  ;;  %v1048_v16 = vpack.c.bf16 %v646_v63, %v646_v63  ;;  %v718_v46 = vperm.slane %v710_v28, %v4637_v52  ;;  %v649_v53 = vrot.slane %v606_v45, 4 }
 0x174   :  { %v1046_v17 = vpack.c.bf16 %v644_v11, %v644_v11  ;;  %v755_v23 = vrot.slane %v738_v58, 4  ;;  %v758_v25 = vsel %vm323_vm1, %v738_v58, %v757_v13  ;;  %v742_v48 = vperm.slane %v734_v30, %v4637_v52 }
 0x175   :  { %3797 = vmatmul.msk.bf16.vlgmr.msrb.gmra.mxu0 %vm1062_vm2, %v1048_v16  ;;  %v1049_v22 = vpack.c.bf16 %v758_v25, %v758_v25  ;;  %v647_v27 = vrot.slane %v630_v44, 4  ;;  %v761_v42 = vrot.slane %v718_v46, 4  ;;  %v650_v21 = vsel %vm323_vm1, %v630_v44, %v649_v53  ;;  %v803_v34 = vpop.f32.mrf.mxu1 }
 0x176   :  { %3795 = vmatmul.msk.bf16.vlgmr.msra.gmra.mxu2 %vm1062_vm2, %v1046_v17  ;;  %v756_v32 = vsel %vm323_vm1, %v755_v23, %v714_v54  ;;  %v759_v18 = vrot.slane %v742_v48, 4  ;;  %v1052_v49 = vpack.c.bf16 %v650_v21, %v650_v21  ;;  %v776_v13 = vperm.slane %v4603_v5, 2 }
 0x177   :  { %v1047_v14 = vpack.c.bf16 %v756_v32, %v756_v32  ;;  %3798 = vmatmul.msk.bf16.vlgmr.msrb.gmra.mxu1 %vm1062_vm2, %v1049_v22  ;;  %v648_v51 = vsel %vm323_vm1, %v647_v27, %v606_v45  ;;  %v762_v50 = vsel %vm323_vm1, %v742_v48, %v761_v42 }
 0x178   :  { %v1050_v19 = vpack.c.bf16 %v648_v51, %v648_v51  ;;  %v760_v60 = vsel %vm323_vm1, %v759_v18, %v718_v46  ;;  %v1053_v20 = vpack.c.bf16 %v762_v50, %v762_v50  ;;  %v4947_v17 = vadd.f32 %v801_v9, %v776_v13 }
 0x179   :  { %3796 = vmatmul.msk.bf16.vlgmr.msra.gmra.mxu3 %vm1062_vm2, %v1047_v14  ;;  %v1051_v6 = vpack.c.bf16 %v760_v60, %v760_v60  ;;  %v4949_v31 = vadd.f32 %v803_v34, %v776_v13 }
 0x17b   :  { %v3998_v23 = vpack.i.bf16 %v4949_v31, %v4947_v17 }
 0x185   :  { %3801 = vmatmul.msk.bf16.vlgmr.msra.gmra.mxu0 %vm1062_vm2, %v1052_v49 }
 0x186   :  { %3799 = vmatmul.msk.bf16.vlgmr.msrb.gmra.mxu2 %vm1062_vm2, %v1050_v19 }
 0x187   :  { %3802 = vmatmul.msk.bf16.vlgmr.msra.gmra.mxu1 %vm1062_vm2, %v1053_v20 }
 0x189   :  { %3800 = vmatmul.msk.bf16.vlgmr.msrb.gmra.mxu3 %vm1062_vm2, %v1051_v6 }
 0x1f2   :  { %v1116_v57 = vpop.f32.mrf.mxu0 }
 0x1f3   :  { %v1221_v35 = vsel %vm1062_vm2, %v1116_v57, -inf }
 0x1f4   :  { %1222 = vmax.xlane.f32.xlu1 %v1221_v35  ;;  %v1135_v10 = vpop.f32.mrf.mxu1 }
 0x1f5   :  { %v1224_v47 = vsel %vm1062_vm2, %v1135_v10, -inf }
 0x1f9   :  { %v1078_v55 = vpop.f32.mrf.mxu2 }
 0x1fa   :  { %v1215_v43 = vsel %vm1062_vm2, %v1078_v55, -inf  ;;  %v1118_v0 = vpop.f32.mrf.mxu0 }
 0x1fb   :  { %1216 = vmax.xlane.f32.xlu2 %v1215_v43 }
 0x1fc   :  { %v1097_v15 = vpop.f32.mrf.mxu3  ;;  %v1137_v37 = vpop.f32.mrf.mxu1 }
 0x1fd   :  { %v1218_v36 = vsel %vm1062_vm2, %v1097_v15, -inf }
 0x1fe   :  { %1219 = vmax.xlane.f32.xlu0 %v1218_v36 }
 0x201   :  { %v1080_v12 = vpop.f32.mrf.mxu2 }
 0x202   :  { %v1192_v24 = vpop.f32.mrf.mxu0 }
 0x203   :  { %1225 = vmax.xlane.f32.xlu2 %v1224_v47  ;;  %v1233_v56 = vsel %vm1062_vm2, %v1192_v24, -inf }
 0x204   :  { %v1099_v41 = vpop.f32.mrf.mxu3  ;;  %1234 = vmax.xlane.f32.xlu1 %v1233_v56  ;;  %v4940_v38 = vpop.f32.mrf.mxu1 }
 0x205   :  { %v1236_v11 = vsel %vm1062_vm2, %v4940_v38, -inf }
 0x209   :  { %v1154_v39 = vpop.f32.mrf.mxu2 }
 0x20a   :  { %v1227_v59 = vsel %vm1062_vm2, %v1154_v39, -inf  ;;  %v1194_v54 = vpop.f32.mrf.mxu0 }
 0x20b   :  { %1228 = vmax.xlane.f32.xlu2 %v1227_v59 }
 0x20c   :  { %v1173_v61 = vpop.f32.mrf.mxu3  ;;  %v1213_v58 = vpop.f32.mrf.mxu1 }
 0x20d   :  { %v1230_v33 = vsel %vm1062_vm2, %v1173_v61, -inf }
 0x20e   :  { %1231 = vmax.xlane.f32.xlu0 %v1230_v33 }
 0x211   :  { %v1156_v63 = vpop.f32.mrf.mxu2 }
 0x213   :  { %1237 = vmax.xlane.f32.xlu2 %v1236_v11 }
 0x214   :  { %v1175_v16 = vpop.f32.mrf.mxu3 }
 0x21d   :  { %3999 = vrot.lane.b32.xlu1 %v3998_v23, %s4443_s4 }
 0x222   :  { %3994 = vrot.lane.b32.xlu0 %v3998_v23, %s4445_s5 }
 0x22b   :  { %4004 = vrot.lane.b32.xlu2 %v3998_v23, %s4444_s17 }
 0x267   :  { %v1223_v62 = vpop.xlane.xlu1 %1222 }
 0x268   :  { %v1241_v25 = vsub.f32 %v1116_v57, %v1223_v62 }
 0x26a   :  { %v1251_v26 = vmul.f32 1.442695, %v1241_v25 }
 0x26c   :  { %4069 = vpow2.f32 %v1251_v26 }
 0x26e   :  { %v1217_v5 = vpop.xlane.xlu2 %1216 }
 0x26f   :  { %v1239_v32 = vsub.f32 %v1078_v55, %v1217_v5 }
 0x271   :  { %v1220_v22 = vpop.xlane.xlu0 %1219  ;;  %v1247_v40 = vmul.f32 1.442695, %v1239_v32 }
 0x272   :  { %v4956_v14 = vpop.eup %4069  ;;  %v1240_v45 = vsub.f32 %v1097_v15, %v1220_v22 }
 0x273   :  { %4071 = vpow2.f32 %v1247_v40  ;;  %v1269_v28 = vsel %vm1062_vm2, %v4956_v14, 0.0 }
 0x274   :  { %v1249_v44 = vmul.f32 1.442695, %v1240_v45  ;;  %1270 = vadd.xlane.f32.xlu2 %v1269_v28 }
 0x276   :  { %4073 = vpow2.f32 %v1249_v44  ;;  %v1226_v30 = vpop.xlane.xlu2 %1225 }
 0x277   :  { %v1242_v46 = vsub.f32 %v1135_v10, %v1226_v30  ;;  %v1235_v53 = vpop.xlane.xlu1 %1234 }
 0x278   :  { %v1245_v48 = vsub.f32 %v1192_v24, %v1235_v53 }
 0x279   :  { %v4960_v27 = vpop.eup %4071  ;;  %v1253_v42 = vmul.f32 1.442695, %v1242_v46 }
 0x27a   :  { %v1259_v18 = vmul.f32 1.442695, %v1245_v48  ;;  %v1263_v21 = vsel %vm1062_vm2, %v4960_v27, 0.0 }
 0x27b   :  { %4075 = vpow2.f32 %v1253_v42  ;;  %1264 = vadd.xlane.f32.xlu0 %v1263_v21 }
 0x27c   :  { %v4964_v51 = vpop.eup %4073  ;;  %4077 = vpow2.f32 %v1259_v18 }
 0x27d   :  { %v1266_v49 = vsel %vm1062_vm2, %v4964_v51, 0.0 }
 0x27e   :  { %1267 = vadd.xlane.f32.xlu1 %v1266_v49  ;;  %v1229_v50 = vpop.xlane.xlu2 %1228 }
 0x27f   :  { %v1243_v19 = vsub.f32 %v1154_v39, %v1229_v50 }
 0x281   :  { %v4968_v60 = vpop.eup %4075  ;;  %v1232_v20 = vpop.xlane.xlu0 %1231  ;;  %v1255_v6 = vmul.f32 1.442695, %v1243_v19 }
 0x282   :  { %v4970_v9 = vpop.eup %4077  ;;  %v1244_v34 = vsub.f32 %v1173_v61, %v1232_v20  ;;  %v1272_v57 = vsel %vm1062_vm2, %v4968_v60, 0.0  ;;  %v884_v61 = vrot.slane %v4949_v31, 4 }
 0x283   :  { %4079 = vpow2.f32 %v1255_v6  ;;  %1273 = vadd.xlane.f32.xlu0 %v1272_v57  ;;  %v1281_v35 = vsel %vm1062_vm2, %v4970_v9, 0.0 }
 0x284   :  { %v1257_v10 = vmul.f32 1.442695, %v1244_v34  ;;  %1282 = vadd.xlane.f32.xlu2 %v1281_v35 }
 0x286   :  { %4081 = vpow2.f32 %v1257_v10  ;;  %v1238_v55 = vpop.xlane.xlu2 %1237 }
 0x287   :  { %v1246_v43 = vsub.f32 %v4940_v38, %v1238_v55  ;;  %v828_v38 = vrot.slane %v4947_v17, 4 }
 0x289   :  { %v4977_v0 = vpop.eup %4079  ;;  %v1261_v15 = vmul.f32 1.442695, %v1246_v43 }
 0x28a   :  { %v1275_v36 = vsel %vm1062_vm2, %v4977_v0, 0.0 }
 0x28b   :  { %4083 = vpow2.f32 %v1261_v15  ;;  %1276 = vadd.xlane.f32.xlu1 %v1275_v36 }
 0x28c   :  { %v4981_v37 = vpop.eup %4081 }
 0x28d   :  { %v1278_v12 = vsel %vm1062_vm2, %v4981_v37, 0.0 }
 0x28e   :  { %1279 = vadd.xlane.f32.xlu0 %v1278_v12  ;;  %v4005_v47 = vpop.permute.xlu2 %4004 }
 0x28f   :  { %v4007_v24 = vunpack.i.h.bf16 %v4005_v47  ;;  %v4006_v56 = vunpack.i.l.bf16 %v4005_v47  ;;  %v4000_v41 = vpop.permute.xlu1 %3999 }
 0x290   :  { %v4002_v39 = vunpack.i.h.bf16 %v4000_v41  ;;  %v4001_v59 = vunpack.i.l.bf16 %v4000_v41 }
 0x291   :  { %v4986_v54 = vpop.eup %4083  ;;  %v894_v11 = vrot.slane %v4007_v24, 4  ;;  %v838_v13 = vrot.slane %v4006_v56, 4 }
 0x292   :  { %v882_v33 = vrot.slane %v4002_v39, 4  ;;  %v826_v58 = vrot.slane %v4001_v59, 4  ;;  %v829_v63 = vsel %vm323_vm1, %v4001_v59, %v828_v38  ;;  %v885_v16 = vsel %vm323_vm1, %v4002_v39, %v884_v61 }
 0x293   :  { %v1284_v23 = vsel %vm1062_vm2, %v4986_v54, 0.0  ;;  %v837_v40 = vperm.slane %v829_v63, %v4625_v29  ;;  %v893_v45 = vperm.slane %v885_v16, %v4625_v29 }
 0x294   :  { %v3995_v62 = vpop.permute.xlu0 %3994  ;;  %v883_v25 = vsel %vm323_vm1, %v882_v33, %v4949_v31  ;;  %v827_v26 = vsel %vm323_vm1, %v826_v58, %v4947_v17  ;;  %1285 = vadd.xlane.f32.xlu1 %v1284_v23 }
 0x295   :  { %v3997_v5 = vunpack.i.h.bf16 %v3995_v62  ;;  %v3996_v32 = vunpack.i.l.bf16 %v3995_v62  ;;  %v889_v22 = vperm.slane %v883_v25, %v4625_v29  ;;  %v833_v28 = vperm.slane %v827_v26, %v4625_v29 }
 0x296   :  { %v864_v49 = vrot.slane %v837_v40, 4  ;;  %v920_v34 = vrot.slane %v893_v45, 4 }
 0x297   :  { %v896_v44 = vrot.slane %v3997_v5, 4  ;;  %v839_v30 = vsel %vm323_vm1, %v838_v13, %v3996_v32  ;;  %v840_v46 = vrot.slane %v3996_v32, 4  ;;  %v895_v31 = vsel %vm323_vm1, %v894_v11, %v3997_v5 }
 0x298   :  { %v845_v53 = vperm.slane %v839_v30, %v4625_v29  ;;  %v901_v17 = vperm.slane %v895_v31, %v4625_v29  ;;  %v908_v48 = vrot.slane %v889_v22, 4  ;;  %v852_v42 = vrot.slane %v833_v28, 4 }
 0x299   :  { %v841_v18 = vsel %vm323_vm1, %v4006_v56, %v840_v46  ;;  %v897_v21 = vsel %vm323_vm1, %v4007_v24, %v896_v44 }
 0x29a   :  { %v849_v50 = vperm.slane %v841_v18, %v4625_v29  ;;  %v850_v19 = vrot.slane %v845_v53, 4  ;;  %v905_v20 = vperm.slane %v897_v21, %v4625_v29  ;;  %v906_v6 = vrot.slane %v901_v17, 4 }
 0x29b   :  { %v853_v57 = vsel %vm323_vm1, %v845_v53, %v852_v42  ;;  %v909_v35 = vsel %vm323_vm1, %v901_v17, %v908_v48 }
 0x29c   :  { %v862_v10 = vrot.slane %v849_v50, 4  ;;  %v918_v55 = vrot.slane %v905_v20, 4  ;;  %v851_v43 = vsel %vm323_vm1, %v850_v19, %v833_v28  ;;  %v861_v15 = vperm.slane %v853_v57, %v4637_v52 }
 0x29d   :  { %v857_v36 = vperm.slane %v851_v43, %v4637_v52  ;;  %v865_v12 = vsel %vm323_vm1, %v849_v50, %v864_v49  ;;  %v907_v47 = vsel %vm323_vm1, %v906_v6, %v889_v22  ;;  %v917_v24 = vperm.slane %v909_v35, %v4637_v52 }
 0x29e   :  { %v863_v56 = vsel %vm323_vm1, %v862_v10, %v837_v40  ;;  %v873_v41 = vperm.slane %v865_v12, %v4637_v52  ;;  %v876_v38 = vrot.slane %v861_v15, 4  ;;  %v913_v39 = vperm.slane %v907_v47, %v4637_v52 }
 0x29f   :  { %v869_v59 = vperm.slane %v863_v56, %v4637_v52  ;;  %v874_v61 = vrot.slane %v857_v36, 4  ;;  %v919_v33 = vsel %vm323_vm1, %v918_v55, %v893_v45  ;;  %v921_v58 = vsel %vm323_vm1, %v905_v20, %v920_v34 }
 0x2a0   :  { %v877_v63 = vsel %vm323_vm1, 0.0, %v876_v38  ;;  %v880_v11 = vrot.slane %v873_v41, 4  ;;  %v925_v13 = vperm.slane %v919_v33, %v4637_v52  ;;  %v929_v16 = vperm.slane %v921_v58, %v4637_v52 }
 0x2a1   :  { %v875_v23 = vsel %vm323_vm1, 0.0, %v874_v61  ;;  %v878_v62 = vrot.slane %v869_v59, 4  ;;  %v930_v25 = vrot.slane %v913_v39, 4  ;;  %v932_v26 = vrot.slane %v917_v24, 4 }
 0x2a2   :  { %v881_v5 = vsel %vm323_vm1, 0.0, %v880_v11  ;;  %v934_v32 = vrot.slane %v925_v13, 4  ;;  %v936_v22 = vrot.slane %v929_v16, 4  ;;  %v943_v40 = vrot.slane %v877_v63, 4 }
 0x2a3   :  { %v879_v45 = vsel %vm323_vm1, 0.0, %v878_v62  ;;  %v931_v28 = vsel %vm323_vm1, 0.0, %v930_v25  ;;  %v933_v44 = vsel %vm323_vm1, 0.0, %v932_v26  ;;  %v949_v30 = vsel %vm323_vm1, %v880_v11, %v869_v59 }
 0x2a4   :  { %v935_v46 = vsel %vm323_vm1, 0.0, %v934_v32  ;;  %v937_v31 = vsel %vm323_vm1, 0.0, %v936_v22  ;;  %v954_v53 = vrot.slane %v881_v5, 4  ;;  %v997_v17 = vrot.slane %v933_v44, 4 }
 0x2a5   :  { %v1003_v48 = vsel %vm323_vm1, %v936_v22, %v925_v13  ;;  %v1008_v42 = vrot.slane %v937_v31, 4  ;;  %v938_v18 = vsel %vm323_vm1, %v876_v38, %v857_v36  ;;  %v944_v21 = vsel %vm323_vm1, %v943_v40, %v875_v23 }
 0x2a6   :  { %v955_v49 = vsel %vm323_vm1, %v954_v53, %v879_v45  ;;  %v942_v50 = vperm.slane %v938_v18, %v4625_v29  ;;  %v948_v19 = vperm.slane %v944_v21, %v4625_v29  ;;  %v953_v20 = vperm.slane %v949_v30, %v4625_v29 }
 0x2a7   :  { %v1009_v6 = vsel %vm323_vm1, %v1008_v42, %v935_v46  ;;  %v959_v34 = vperm.slane %v955_v49, %v4625_v29  ;;  %v992_v57 = vsel %vm323_vm1, %v932_v26, %v913_v39  ;;  %v998_v35 = vsel %vm323_vm1, %v997_v17, %v931_v28 }
 0x2a8   :  { %v960_v10 = vrot.slane %v948_v19, 4  ;;  %v996_v55 = vperm.slane %v992_v57, %v4625_v29  ;;  %v1002_v43 = vperm.slane %v998_v35, %v4625_v29  ;;  %v1007_v15 = vperm.slane %v1003_v48, %v4625_v29 }
 0x2a9   :  { %v972_v36 = vrot.slane %v959_v34, 4  ;;  %v1013_v12 = vperm.slane %v1009_v6, %v4625_v29  ;;  %v962_v47 = vrot.slane %v942_v50, 4  ;;  %v974_v24 = vrot.slane %v953_v20, 4 }
 0x2aa   :  { %v961_v56 = vsel %vm323_vm1, %v960_v10, %v942_v50  ;;  %v1014_v41 = vrot.slane %v1002_v43, 4  ;;  %v1016_v38 = vrot.slane %v996_v55, 4  ;;  %v1028_v39 = vrot.slane %v1007_v15, 4 }
 0x2ab   :  { %v967_v59 = vperm.slane %v961_v56, %v4637_v52  ;;  %v973_v61 = vsel %vm323_vm1, %v972_v36, %v953_v20  ;;  %v1026_v33 = vrot.slane %v1013_v12, 4  ;;  %v963_v58 = vsel %vm323_vm1, %v948_v19, %v962_v47 }
 0x2ac   :  { %v979_v63 = vperm.slane %v973_v61, %v4637_v52  ;;  %v1015_v11 = vsel %vm323_vm1, %v1014_v41, %v996_v55  ;;  %v971_v13 = vperm.slane %v963_v58, %v4637_v52  ;;  %v975_v16 = vsel %vm323_vm1, %v959_v34, %v974_v24 }
 0x2ad   :  { %v1021_v23 = vperm.slane %v1015_v11, %v4637_v52  ;;  %v1027_v62 = vsel %vm323_vm1, %v1026_v33, %v1007_v15  ;;  %v983_v25 = vperm.slane %v975_v16, %v4637_v52  ;;  %v1017_v26 = vsel %vm323_vm1, %v1002_v43, %v1016_v38 }
 0x2ae   :  { %v984_v5 = vrot.slane %v979_v63, 4  ;;  %v1033_v32 = vperm.slane %v1027_v62, %v4637_v52  ;;  %v1025_v22 = vperm.slane %v1017_v26, %v4637_v52  ;;  %v1029_v40 = vsel %vm323_vm1, %v1013_v12, %v1028_v39 }
 0x2af   :  { %v988_v45 = vrot.slane %v983_v25, 4  ;;  %v1037_v28 = vperm.slane %v1029_v40, %v4637_v52  ;;  %v986_v44 = vrot.slane %v967_v59, 4  ;;  %v1040_v30 = vrot.slane %v1021_v23, 4 }
 0x2b0   :  { %v985_v46 = vsel %vm323_vm1, %v984_v5, %v967_v59  ;;  %v1038_v31 = vrot.slane %v1033_v32, 4  ;;  %v990_v53 = vrot.slane %v971_v13, 4  ;;  %v1044_v17 = vrot.slane %v1025_v22, 4 }
 0x2b1   :  { %v1311_v48 = vpack.c.bf16 %v985_v46, %v985_v46  ;;  %v989_v42 = vsel %vm323_vm1, %v988_v45, %v971_v13  ;;  %v1042_v18 = vrot.slane %v1037_v28, 4  ;;  %v987_v21 = vsel %vm323_vm1, %v979_v63, %v986_v44 }
 0x2b2   :  { %v1039_v49 = vsel %vm323_vm1, %v1038_v31, %v1021_v23  ;;  %v1315_v50 = vpack.c.bf16 %v989_v42, %v989_v42  ;;  %v1313_v19 = vpack.c.bf16 %v987_v21, %v987_v21  ;;  %v1041_v20 = vsel %vm323_vm1, %v1033_v32, %v1040_v30  ;;  %v1473_v21 = vld [vmem:[#allocation8] sm:$0xf] }
 0x2b3   :  { %v1324_v6 = vsel %vm1322_vm3, %v1311_v48, 0  ;;  %v1312_v34 = vpack.c.bf16 %v1039_v49, %v1039_v49  ;;  %v1043_v57 = vsel %vm323_vm1, %v1042_v18, %v1025_v22  ;;  %v1314_v35 = vpack.c.bf16 %v1041_v20, %v1041_v20  ;;  %v1475_v49 = vld [vmem:[#allocation8 + $0x4] sm:$0xf]  ;;  %v1541_v20 = vld [vmem:[#allocation8 + $0xc] sm:$0xf] }
 0x2b4   :  { %1333 = vmatpush.bf16.msra.mxu2 %v1324_v6  ;;  %v1400_v10 = vsel %vm1322_vm3, %v1315_v50, 0  ;;  %v1316_v55 = vpack.c.bf16 %v1043_v57, %v1043_v57  ;;  %v1362_v43 = vsel %vm1322_vm3, %v1313_v19, 0  ;;  %v991_v15 = vsel %vm323_vm1, %v983_v25, %v990_v53  ;;  %v1517_v19 = vld [vmem:[#allocation8 + $0x8] sm:$0xf] }
 0x2b5   :  { %v1343_v36 = vsel %vm1322_vm3, %v1312_v34, 0  ;;  %1371 = vmatpush.bf16.msrb.mxu0 %v1362_v43  ;;  %v1381_v12 = vsel %vm1322_vm3, %v1314_v35, 0  ;;  %v1317_v47 = vpack.c.bf16 %v991_v15, %v991_v15  ;;  %v1045_v24 = vsel %vm323_vm1, %v1037_v28, %v1044_v17 }
 0x2b6   :  { %1352 = vmatpush.bf16.msra.mxu3 %v1343_v36  ;;  %v1419_v56 = vsel %vm1322_vm3, %v1316_v55, 0  ;;  %1390 = vmatpush.bf16.msrb.mxu1 %v1381_v12  ;;  %v1318_v41 = vpack.c.bf16 %v1045_v24, %v1045_v24  ;;  %v1480_v50 = vsel %vm1322_vm3, %v1475_v49, 0  ;;  %v1522_v6 = vsel %vm1322_vm3, %v1517_v19, 0  ;;  %v5128_v19 = vld [vmem:[%s5846_s1 + $0x8] sm:$0xff]  }
 0x2b7   :  { %v1438_v38 = vsel %vm1322_vm3, %v1317_v47, 0  ;;  %v1546_v34 = vsel %vm1322_vm3, %v1541_v20, 0  ;;  %v3931_v20 = vld [vmem:[%s5848_s3 + $0x8] sm:$0xff]  }
 0x2b8   :  { %1409 = vmatpush.bf16.msrb.mxu2 %v1400_v10  ;;  %v1457_v39 = vsel %vm1322_vm3, %v1318_v41, 0 }
 0x2b9   :  { %1447 = vmatpush.bf16.msra.mxu0 %v1438_v38 }
 0x2ba   :  { %1428 = vmatpush.bf16.msrb.mxu3 %v1419_v56  ;;  %1466 = vmatpush.bf16.msra.mxu1 %v1457_v39 }
 0x2e7   :  { %v1271_v59 = vpop.xlane.xlu2 %1270 }
 0x2e8   :  { %4085 = vrcp.f32 %v1271_v59 }
 0x2ee   :  { %v4086_v61 = vpop.eup %4085  ;;  %v1265_v33 = vpop.xlane.xlu0 %1264 }
 0x2ef   :  { %v1297_v58 = vmul.f32 %v4086_v61, %v4956_v14  ;;  %4087 = vrcp.f32 %v1265_v33 }
 0x2f1   :  { %v1305_v63 = vpack.c.bf16 %v1297_v58, %v1297_v58  ;;  %v1268_v11 = vpop.xlane.xlu1 %1267 }
 0x2f2   :  { %4089 = vrcp.f32 %v1268_v11  ;;  %v3896_v11 = vld [vmem:[#allocation11] sm:$0xff] }
 0x2f3   :  { %3805 = vmatmul.msk.bf16.vlgmr.msrb.gmra.mxu0 %vm1062_vm2, %v1305_v63  ;;  %v3897_v63 = vld [vmem:[#allocation11 + $0x8] sm:$0xff] }
 0x2f4   :  { %1531 = vmatpush.bf16.msrb.mxu0 %v1522_v6  ;;  %v3920_v6 = vunpack.c.l.bf16 %v5128_v19 }
 0x2f5   :  { %v4088_v13 = vpop.eup %4087 }
 0x2f6   :  { %v1295_v16 = vmul.f32 %v4088_v13, %v4960_v27  ;;  %v1274_v23 = vpop.xlane.xlu0 %1273 }
 0x2f7   :  { %4091 = vrcp.f32 %v1274_v23  ;;  %v1283_v62 = vpop.xlane.xlu2 %1282 }
 0x2f8   :  { %v4090_v25 = vpop.eup %4089  ;;  %v1303_v26 = vpack.c.bf16 %v1295_v16, %v1295_v16  ;;  %4093 = vrcp.f32 %v1283_v62 }
 0x2f9   :  { %v1296_v5 = vmul.f32 %v4090_v25, %v4964_v51 }
 0x2fa   :  { %3803 = vmatmul.msk.bf16.vlgmr.msra.gmra.mxu2 %vm1062_vm2, %v1303_v26 }
 0x2fb   :  { %v1304_v14 = vpack.c.bf16 %v1296_v5, %v1296_v5  ;;  %1489 = vmatpush.bf16.msra.mxu2 %v1480_v50  ;;  %v5105_v5 = vld [vmem:[#allocation17] sm:$0xff] }
 0x2fd   :  { %v4092_v32 = vpop.eup %4091  ;;  %3804 = vmatmul.msk.bf16.vlgmr.msra.gmra.mxu3 %vm1062_vm2, %v1304_v14  ;;  %v1564_v14 = vperm.slane %v5105_v5, 3 }
 0x2fe   :  { %v4094_v22 = vpop.eup %4093  ;;  %v1298_v40 = vmul.f32 %v4092_v32, %v4968_v60  ;;  %v1277_v45 = vpop.xlane.xlu1 %1276 }
 0x2ff   :  { %v1301_v27 = vmul.f32 %v4094_v22, %v4970_v9  ;;  %4095 = vrcp.f32 %v1277_v45 }
 0x300   :  { %v1306_v28 = vpack.c.bf16 %v1298_v40, %v1298_v40 }
 0x301   :  { %v1309_v44 = vpack.c.bf16 %v1301_v27, %v1301_v27  ;;  %v1280_v30 = vpop.xlane.xlu0 %1279 }
 0x302   :  { %4097 = vrcp.f32 %v1280_v30  ;;  %3806 = vmatmul.msk.bf16.vlgmr.msrb.gmra.mxu1 %vm1062_vm2, %v1306_v28 }
 0x303   :  { %3809 = vmatmul.msk.bf16.vlgmr.msra.gmra.mxu0 %vm1062_vm2, %v1309_v44  ;;  %1555 = vmatpush.bf16.msrb.mxu1 %v1546_v34  ;;  %v3921_v34 = vunpack.c.h.bf16 %v5128_v19 }
 0x305   :  { %v4096_v51 = vpop.eup %4095 }
 0x306   :  { %v1299_v46 = vmul.f32 %v4096_v51, %v4977_v0  ;;  %v1500_v0 = vsel %vm1322_vm3, %v1473_v21, 0 }
 0x307   :  { %v1286_v31 = vpop.xlane.xlu1 %1285  ;;  %1509 = vmatpush.bf16.msra.mxu3 %v1500_v0 }
 0x308   :  { %v4098_v53 = vpop.eup %4097  ;;  %v1307_v17 = vpack.c.bf16 %v1299_v46, %v1299_v46  ;;  %4099 = vrcp.f32 %v1286_v31 }
 0x309   :  { %v1300_v60 = vmul.f32 %v4098_v53, %v4981_v37  ;;  %4101 = vrcp.f32 %v4452_v1 }
 0x30a   :  { %3807 = vmatmul.msk.bf16.vlgmr.msrb.gmra.mxu2 %vm1062_vm2, %v1307_v17 }
 0x30b   :  { %v1308_v9 = vpack.c.bf16 %v1300_v60, %v1300_v60 }
 0x30d   :  { %3808 = vmatmul.msk.bf16.vlgmr.msrb.gmra.mxu3 %vm1062_vm2, %v1308_v9  ;;  %v5117_v9 = vld [vmem:[%s5846_s1] sm:$0xff]  }
 0x30e   :  { %v4100_v48 = vpop.eup %4099  ;;  %1938 = vmatpush.bf16.msrb.mxu3 %v3897_v63 }
 0x30f   :  { %v1302_v42 = vmul.f32 %v4100_v48, %v4986_v54  ;;  %v3916_v48 = vunpack.c.l.bf16 %v5117_v9  ;;  %v4102_v50 = vpop.eup %4101 }
 0x310   :  { %vm1580_vm4 = vweird.f32 %v4102_v50 }
 0x311   :  { %v1310_v18 = vpack.c.bf16 %v1302_v42, %v1302_v42  ;;  %v3917_v42 = vunpack.c.h.bf16 %v5117_v9 }
 0x312   :  { %1939 = vmatpush.bf16.msrb.mxu3 %v3896_v11 }
 0x313   :  { %3810 = vmatmul.msk.bf16.vlgmr.msra.gmra.mxu1 %vm1062_vm2, %v1310_v18 }
 0x370   :  { %v1373_v37 = vpop.f32.mrf.mxu0 }
 0x378   :  { %v1375_v54 = vpop.f32.mrf.mxu0 }
 0x379   :  { %v3928_v54 = vunpack.c.l.bf16 %v3931_v20 }
 0x37d   :  { %v1335_v57 = vpop.f32.mrf.mxu2 }
 0x37f   :  { %v1392_v35 = vpop.f32.mrf.mxu1 }
 0x380   :  { %v1354_v10 = vpop.f32.mrf.mxu3  ;;  %v1474_v55 = vpack.c.bf16 %v1392_v35, %v1373_v37  ;;  %v1449_v43 = vpop.f32.mrf.mxu0  ;;  %v1576_v37 = vmul.f32 32.0, %v4102_v50 }
 0x381   :  { %v1472_v15 = vpack.c.bf16 %v1354_v10, %v1335_v57  ;;  %v3929_v57 = vunpack.c.h.bf16 %v3931_v20  ;;  %v1905_v10 = vadd.f32 %v3928_v54, %v3920_v6 }
 0x382   :  { %3811 = vmatmul.msk.bf16.vlgmr.msra.gmra.mxu2 %vm1062_vm2, %v1474_v55  ;;  %v1577_v35 = vsub.f32 1.0, %v1576_v37 }
 0x383   :  { %3812 = vmatmul.msk.bf16.vlgmr.msra.gmra.mxu3 %vm1062_vm2, %v1472_v15  ;;  %v1906_v55 = vadd.f32 %v3929_v57, %v3921_v34 }
 0x384   :  { %v1578_v15 = vmul.f32 %v4102_v50, %v1577_v35 }
 0x385   :  { %v1337_v36 = vpop.f32.mrf.mxu2 }
 0x386   :  { %v1579_v36 = vadd.f32 %v4102_v50, %v1578_v15 }
 0x387   :  { %v1394_v12 = vpop.f32.mrf.mxu1 }
 0x388   :  { %v1356_v47 = vpop.f32.mrf.mxu3  ;;  %v1451_v24 = vpop.f32.mrf.mxu0  ;;  %v5136_v12 = vsel %vm1580_vm4, %v4102_v50, %v1579_v36  ;;  %v3899_v36 = vld [vmem:[#allocation13 + $0x8] sm:$0xff] }
 0x389   :  { %2462 = vmatpush.bf16.msra.mxu0 %v3899_v36 }
 0x38d   :  { %v1411_v56 = vpop.f32.mrf.mxu2 }
 0x390   :  { %v1430_v41 = vpop.f32.mrf.mxu3  ;;  %v1468_v38 = vpop.f32.mrf.mxu1 }
 0x391   :  { %v1516_v39 = vpack.c.bf16 %v1430_v41, %v1411_v56  ;;  %v1540_v59 = vpack.c.bf16 %v1468_v38, %v1449_v43  ;;  %v1908_v43 = vpack.c.bf16 %v1906_v55, %v1905_v10 }
 0x393   :  { %3813 = vmatmul.msk.bf16.vlgmr.msrb.gmra.mxu0 %vm1062_vm2, %v1516_v39  ;;  %3814 = vmatmul.msk.bf16.vlgmr.msrb.gmra.mxu1 %vm1062_vm2, %v1540_v59 }
 0x395   :  { %v1413_v61 = vpop.f32.mrf.mxu2 }
 0x398   :  { %v1432_v33 = vpop.f32.mrf.mxu3  ;;  %v1470_v58 = vpop.f32.mrf.mxu1 }
 0x405   :  { %v1491_v13 = vpop.f32.mrf.mxu2 }
 0x406   :  { %v1511_v16 = vpop.f32.mrf.mxu3 }
 0x407   :  { %v1512_v23 = vadd.f32 %v1511_v16, %v1491_v13 }
 0x40d   :  { %v1493_v22 = vpop.f32.mrf.mxu2 }
 0x40e   :  { %v1513_v45 = vpop.f32.mrf.mxu3 }
 0x40f   :  { %v1514_v27 = vadd.f32 %v1513_v45, %v1493_v22 }
 0x410   :  { %v1533_v62 = vpop.f32.mrf.mxu0  ;;  %v1557_v25 = vpop.f32.mrf.mxu1 }
 0x411   :  { %v1538_v26 = vadd.f32 %v1533_v62, %v1512_v23 }
 0x413   :  { %v1562_v32 = vadd.f32 %v1557_v25, %v1538_v26  ;;  %v1913_v25 = vperm.slane %v5105_v5, 5  ;;  %v3895_v26 = vld [vmem:[#allocation10 + $0x8] sm:$0xff] }
 0x414   :  { %1655 = vmatpush.bf16.msrb.mxu2 %v3895_v26 }
 0x415   :  { %v1565_v40 = vadd.f32 %v1564_v14, %v1562_v32  ;;  %v3894_v32 = vld [vmem:[#allocation10] sm:$0xff] }
 0x417   :  { %v1567_v28 = vadd.f32 %v3908_v2, %v1565_v40  ;;  %v3923_v2 = vld [vmem:[%s5848_s3] sm:$0xff]  }
 0x418   :  { %v1535_v44 = vpop.f32.mrf.mxu0  ;;  %v1559_v30 = vpop.f32.mrf.mxu1  ;;  %v3924_v18 = vunpack.c.l.bf16 %v3923_v2  ;;  %v3925_v21 = vunpack.c.h.bf16 %v3923_v2  ;;  %1656 = vmatpush.bf16.msrb.mxu2 %v3894_v32 }
 0x419   :  { %v1539_v51 = vadd.f32 %v1535_v44, %v1514_v27  ;;  %v1569_v46 = vsel %vm239_vm0, %v1567_v28, 0.0 }
 0x41a   :  { %1570 = vadd.xlane.f32.xlu0 %v1569_v46  ;;  %v1904_v49 = vadd.f32 %v3925_v21, %v3917_v42 }
 0x41b   :  { %v1563_v31 = vadd.f32 %v1559_v30, %v1539_v51 }
 0x41d   :  { %v1566_v53 = vadd.f32 %v1564_v14, %v1563_v31 }
 0x41f   :  { %v1568_v17 = vadd.f32 %v3909_v3, %v1566_v53  ;;  %v1903_v3 = vadd.f32 %v3924_v18, %v3916_v48  ;;  %v233_v18 = vld [vmem:[#allocation17 + $0x8] sm:$0xff] }
 0x420   :  { %v1623_v20 = vperm.slane %v233_v18, 2 }
 0x421   :  { %v1572_v60 = vsel %vm239_vm0, %v1568_v17, 0.0  ;;  %v1907_v0 = vpack.c.bf16 %v1904_v49, %v1903_v3  ;;  %v1620_v49 = vperm.slane %v233_v18, 1 }
 0x422   :  { %1573 = vadd.xlane.f32.xlu2 %v1572_v60 }
 0x423   :  { %3832 = vmatmul.msk.bf16.vlgmr.msrb.gmra.mxu3 %vm239_vm0, %v1907_v0 }
 0x433   :  { %3833 = vmatmul.msk.bf16.gmra.mxu3 %vm239_vm0, %v1908_v43 }
 0x48d   :  { %v1571_v47 = vpop.xlane.xlu0 %1570 }
 0x48e   :  { %v1582_v24 = vmul.f32 %v5136_v12, %v1571_v47  ;;  %v3898_v47 = vld [vmem:[#allocation13] sm:$0xff] }
 0x48f   :  { %2463 = vmatpush.bf16.msra.mxu0 %v3898_v47 }
 0x490   :  { %v1584_v56 = vsub.f32 %v1567_v28, %v1582_v24 }
 0x492   :  { %v1586_v41 = vmul.f32 %v1584_v56, %v1584_v56  ;;  %3842 = vmatmul.msk.bf16.vlgmr.msra.gmra.mxu0 %vm239_vm0, %v5117_v9 }
 0x494   :  { %v1588_v38 = vsel %vm239_vm0, %v1586_v41, 0.0 }
 0x495   :  { %1589 = vadd.xlane.f32.xlu1 %v1588_v38  ;;  %v1574_v39 = vpop.xlane.xlu2 %1573 }
 0x496   :  { %v1583_v59 = vmul.f32 %v5136_v12, %v1574_v39 }
 0x498   :  { %v1585_v61 = vsub.f32 %v1568_v17, %v1583_v59 }
 0x49a   :  { %v1587_v33 = vmul.f32 %v1585_v61, %v1585_v61 }
 0x49c   :  { %v1591_v58 = vsel %vm239_vm0, %v1587_v33, 0.0 }
 0x49d   :  { %1592 = vadd.xlane.f32.xlu0 %v1591_v58 }
 0x4a2   :  { %3843 = vmatmul.msk.bf16.gmra.mxu0 %vm239_vm0, %v5128_v19 }
 0x4a6   :  { %v1941_v63 = vpop.f32.mrf.mxu3 }
 0x4a7   :  { %v5144_v14 = vadd.f32 %v1941_v63, %v1913_v25 }
 0x4ae   :  { %v1943_v11 = vpop.f32.mrf.mxu3 }
 0x4af   :  { %v5156_v60 = vadd.f32 %v1943_v11, %v1913_v25 }
 0x4b6   :  { %v1946_v23 = vpop.f32.mrf.mxu3 }
 0x4b7   :  { %v5146_v40 = vadd.f32 %v1946_v23, %v1913_v25 }
 0x4b9   :  { %v2105_v38 = vrot.slane %v5146_v40, 4 }
 0x4be   :  { %v1948_v27 = vpop.f32.mrf.mxu3 }
 0x4bf   :  { %v5149_v28 = vadd.f32 %v1948_v27, %v1913_v25 }
 0x4c1   :  { %v4013_v46 = vpack.i.bf16 %v5149_v28, %v5146_v40 }
 0x4c3   :  { %4014 = vrot.lane.b32.xlu1 %v4013_v46, %s4443_s4  ;;  %4019 = vrot.lane.b32.xlu0 %v4013_v46, %s4444_s17 }
 0x4c4   :  { %4009 = vrot.lane.b32.xlu2 %v4013_v46, %s4445_s5 }
 0x4cb   :  { %1957 = vrot.lane.b32.xlu1 %v5156_v60, %s4445_s5 }
 0x4d3   :  { %1981 = vrot.lane.b32.xlu1 %v5156_v60, %s4444_s17 }
 0x508   :  { %v1590_v13 = vpop.xlane.xlu1 %1589 }
 0x509   :  { %v1594_v16 = vmul.f32 %v1590_v13, %v5136_v12 }
 0x50b   :  { %v1596_v62 = vadd.f32 1e-05, %v1594_v16 }
 0x50d   :  { %4103 = vrsqrt.f32 %v1596_v62  ;;  %vm1604_vm6 = vweird.f32 %v1596_v62 }
 0x510   :  { %v1593_v22 = vpop.xlane.xlu0 %1592 }
 0x511   :  { %v1595_v45 = vmul.f32 %v1593_v22, %v5136_v12 }
 0x513   :  { %v4104_v44 = vpop.eup %4103  ;;  %v1597_v30 = vadd.f32 1e-05, %v1595_v45 }
 0x514   :  { %v1599_v51 = vmul.f32 %v4104_v44, %v1596_v62  ;;  %vm1605_vm5 = vweird.f32 %v4104_v44 }
 0x515   :  { %4105 = vrsqrt.f32 %v1597_v30  ;;  %vm1606_vm7 = vmor %vm1604_vm6, %vm1605_vm5  ;;  %vm1614_vm9 = vweird.f32 %v1597_v30 }
 0x516   :  { %v1600_v31 = vmul.f32 %v4104_v44, %v1599_v51 }
 0x518   :  { %v1601_v53 = vmul.f32 0.5, %v1600_v31 }
 0x51a   :  { %v1602_v17 = vsub.f32 1.5, %v1601_v53 }
 0x51b   :  { %v4106_v2 = vpop.eup %4105 }
 0x51c   :  { %v1603_v48 = vmul.f32 %v4104_v44, %v1602_v17  ;;  %v1609_v42 = vmul.f32 %v4106_v2, %v1597_v30  ;;  %vm1615_vm8 = vweird.f32 %v4106_v2 }
 0x51d   :  { %vm1616_vm10 = vmor %vm1614_vm9, %vm1615_vm8 }
 0x51e   :  { %v1607_v21 = vsel %vm1606_vm7, %v4104_v44, %v1603_v48  ;;  %v1610_v1 = vmul.f32 %v4106_v2, %v1609_v42  ;;  %v4010_v24 = vpop.permute.xlu2 %4009 }
 0x51f   :  { %v1618_v0 = vmul.f32 %v1607_v21, %v1584_v56  ;;  %v4012_v56 = vunpack.i.h.bf16 %v4010_v24  ;;  %v4011_v41 = vunpack.i.l.bf16 %v4010_v24 }
 0x520   :  { %v1611_v3 = vmul.f32 0.5, %v1610_v1 }
 0x521   :  { %v1621_v6 = vmul.f32 %v1620_v49, %v1618_v0  ;;  %v2173_v4 = vrot.slane %v4012_v56, 4 }
 0x522   :  { %v1612_v50 = vsub.f32 1.5, %v1611_v3 }
 0x523   :  { %v5162_v57 = vadd.f32 %v1623_v20, %v1621_v6 }
 0x524   :  { %v1613_v37 = vmul.f32 %v4106_v2, %v1612_v50 }
 0x525   :  { %v1626_v55 = vadd.f32 %v3912_v7, %v5162_v57  ;;  %v2161_v7 = vrot.slane %v5149_v28, 4 }
 0x526   :  { %v1617_v34 = vsel %vm1616_vm10, %v4106_v2, %v1613_v37 }
 0x527   :  { %v1619_v54 = vmul.f32 %v1617_v34, %v1585_v61 }
 0x529   :  { %v1622_v35 = vmul.f32 %v1620_v49, %v1619_v54 }
 0x52b   :  { %v5164_v10 = vadd.f32 %v1623_v20, %v1622_v35 }
 0x52d   :  { %v1627_v43 = vadd.f32 %v3913_v8, %v5164_v10  ;;  %v2117_v8 = vrot.slane %v4011_v41, 4 }
 0x52f   :  { %v1628_v15 = vpack.c.bf16 %v1627_v43, %v1626_v55 }
 0x531   :  { %3823 = vmatmul.msk.bf16.vlgmr.msrb.gmra.mxu2 %vm239_vm0, %v1628_v15 }
 0x535   :  { %v4015_v39 = vpop.permute.xlu1 %4014  ;;  %v4020_v59 = vpop.permute.xlu0 %4019 }
 0x536   :  { %v4017_v61 = vunpack.i.h.bf16 %v4015_v39  ;;  %v4016_v33 = vunpack.i.l.bf16 %v4015_v39  ;;  %v4022_v58 = vunpack.i.h.bf16 %v4020_v59  ;;  %v4021_v63 = vunpack.i.l.bf16 %v4020_v59 }
 0x538   :  { %v2159_v11 = vrot.slane %v4017_v61, 4  ;;  %v2162_v13 = vsel %vm323_vm1, %v4017_v61, %v2161_v7  ;;  %v2103_v16 = vrot.slane %v4016_v33, 4  ;;  %v2106_v9 = vsel %vm323_vm1, %v4016_v33, %v2105_v38 }
 0x539   :  { %v2170_v23 = vperm.slane %v2162_v13, %v4625_v29  ;;  %v2114_v62 = vperm.slane %v2106_v9, %v4625_v29  ;;  %v2171_v25 = vrot.slane %v4022_v58, 4  ;;  %v2115_v26 = vrot.slane %v4021_v63, 4 }
 0x53a   :  { %v2160_v32 = vsel %vm323_vm1, %v2159_v11, %v5149_v28  ;;  %v2104_v22 = vsel %vm323_vm1, %v2103_v16, %v5146_v40  ;;  %v2118_v45 = vsel %vm323_vm1, %v4021_v63, %v2117_v8  ;;  %v2174_v27 = vsel %vm323_vm1, %v4022_v58, %v2173_v4 }
 0x53b   :  { %v2166_v44 = vperm.slane %v2160_v32, %v4625_v29  ;;  %v2197_v30 = vrot.slane %v2170_v23, 4  ;;  %v2110_v51 = vperm.slane %v2104_v22, %v4625_v29  ;;  %v2141_v46 = vrot.slane %v2114_v62, 4 }
 0x53c   :  { %v2116_v31 = vsel %vm323_vm1, %v2115_v26, %v4011_v41  ;;  %v2126_v28 = vperm.slane %v2118_v45, %v4625_v29  ;;  %v2172_v53 = vsel %vm323_vm1, %v2171_v25, %v4012_v56  ;;  %v2182_v40 = vperm.slane %v2174_v27, %v4625_v29 }
 0x53d   :  { %v2185_v17 = vrot.slane %v2166_v44, 4  ;;  %v2129_v2 = vrot.slane %v2110_v51, 4  ;;  %v2122_v48 = vperm.slane %v2116_v31, %v4625_v29  ;;  %v2178_v19 = vperm.slane %v2172_v53, %v4625_v29 }
 0x53e   :  { %v2139_v42 = vrot.slane %v2126_v28, 4  ;;  %v2142_v18 = vsel %vm323_vm1, %v2126_v28, %v2141_v46  ;;  %v2195_v21 = vrot.slane %v2182_v40, 4  ;;  %v2198_v1 = vsel %vm323_vm1, %v2182_v40, %v2197_v30 }
 0x53f   :  { %v2127_v3 = vrot.slane %v2122_v48, 4  ;;  %v2130_v49 = vsel %vm323_vm1, %v2122_v48, %v2129_v2  ;;  %v2150_v0 = vperm.slane %v2142_v18, %v4637_v52  ;;  %v2183_v50 = vrot.slane %v2178_v19, 4 }
 0x540   :  { %v2138_v37 = vperm.slane %v2130_v49, %v4637_v52  ;;  %v2140_v20 = vsel %vm323_vm1, %v2139_v42, %v2114_v62  ;;  %v2186_v6 = vsel %vm323_vm1, %v2178_v19, %v2185_v17  ;;  %v2196_v34 = vsel %vm323_vm1, %v2195_v21, %v2170_v23 }
 0x541   :  { %v2128_v54 = vsel %vm323_vm1, %v2127_v3, %v2110_v51  ;;  %v2146_v35 = vperm.slane %v2140_v20, %v4637_v52  ;;  %v2157_v55 = vrot.slane %v2150_v0, 4  ;;  %v2184_v43 = vsel %vm323_vm1, %v2183_v50, %v2166_v44 }
 0x542   :  { %v2134_v15 = vperm.slane %v2128_v54, %v4637_v52  ;;  %v2153_v36 = vrot.slane %v2138_v37, 4  ;;  %v2190_v47 = vperm.slane %v2184_v43, %v4637_v52  ;;  %v2194_v24 = vperm.slane %v2186_v6, %v4637_v52 }
 0x543   :  { %v2155_v56 = vrot.slane %v2146_v35, 4  ;;  %v2158_v41 = vsel %vm323_vm1, 0.0, %v2157_v55  ;;  %v2202_v38 = vperm.slane %v2196_v34, %v4637_v52  ;;  %v2206_v7 = vperm.slane %v2198_v1, %v4637_v52 }
 0x544   :  { %v2151_v39 = vrot.slane %v2134_v15, 4  ;;  %v2154_v4 = vsel %vm323_vm1, 0.0, %v2153_v36  ;;  %v2207_v8 = vrot.slane %v2190_v47, 4  ;;  %v2209_v59 = vrot.slane %v2194_v24, 4 }
 0x545   :  { %v2156_v61 = vsel %vm323_vm1, 0.0, %v2155_v56  ;;  %v2211_v33 = vrot.slane %v2202_v38, 4  ;;  %v2213_v58 = vrot.slane %v2206_v7, 4  ;;  %v2328_v63 = vrot.slane %v2154_v4, 4 }
 0x546   :  { %v2152_v11 = vsel %vm323_vm1, 0.0, %v2151_v39  ;;  %v2208_v13 = vsel %vm323_vm1, 0.0, %v2207_v8  ;;  %v2210_v16 = vsel %vm323_vm1, 0.0, %v2209_v59  ;;  %v2334_v9 = vsel %vm323_vm1, %v2157_v55, %v2146_v35 }
 0x547   :  { %v2212_v23 = vsel %vm323_vm1, 0.0, %v2211_v33  ;;  %v2214_v62 = vsel %vm323_vm1, 0.0, %v2213_v58  ;;  %v2338_v25 = vperm.slane %v2334_v9, %v4625_v29  ;;  %v2339_v26 = vrot.slane %v2158_v41, 4 }
 0x548   :  { %v2382_v32 = vrot.slane %v2210_v16, 4  ;;  %v2388_v22 = vsel %vm323_vm1, %v2213_v58, %v2202_v38  ;;  %v2393_v45 = vrot.slane %v2214_v62, 4  ;;  %v2329_v27 = vsel %vm323_vm1, %v2328_v63, %v2152_v11 }
 0x549   :  { %v2340_v44 = vsel %vm323_vm1, %v2339_v26, %v2156_v61  ;;  %v2392_v30 = vperm.slane %v2388_v22, %v4625_v29  ;;  %v2323_v51 = vsel %vm323_vm1, %v2153_v36, %v2134_v15  ;;  %v2333_v46 = vperm.slane %v2329_v27, %v4625_v29 }
 0x54a   :  { %v2344_v31 = vperm.slane %v2340_v44, %v4625_v29  ;;  %v2394_v28 = vsel %vm323_vm1, %v2393_v45, %v2212_v23  ;;  %v2327_v53 = vperm.slane %v2323_v51, %v4625_v29  ;;  %v2377_v40 = vsel %vm323_vm1, %v2209_v59, %v2190_v47 }
 0x54b   :  { %v2398_v17 = vperm.slane %v2394_v28, %v4625_v29  ;;  %v2345_v2 = vrot.slane %v2333_v46, 4  ;;  %v2381_v48 = vperm.slane %v2377_v40, %v4625_v29  ;;  %v2383_v19 = vsel %vm323_vm1, %v2382_v32, %v2208_v13 }
 0x54c   :  { %v2357_v42 = vrot.slane %v2344_v31, 4  ;;  %v2387_v18 = vperm.slane %v2383_v19, %v4625_v29  ;;  %v2347_v21 = vrot.slane %v2327_v53, 4  ;;  %v2359_v1 = vrot.slane %v2338_v25, 4 }
 0x54d   :  { %v2346_v3 = vsel %vm323_vm1, %v2345_v2, %v2327_v53  ;;  %v2411_v49 = vrot.slane %v2398_v17, 4  ;;  %v2401_v0 = vrot.slane %v2381_v48, 4  ;;  %v2413_v50 = vrot.slane %v2392_v30, 4 }
 0x54e   :  { %v2352_v37 = vperm.slane %v2346_v3, %v4637_v52  ;;  %v2358_v20 = vsel %vm323_vm1, %v2357_v42, %v2338_v25  ;;  %v2399_v6 = vrot.slane %v2387_v18, 4  ;;  %v2348_v34 = vsel %vm323_vm1, %v2333_v46, %v2347_v21 }
 0x54f   :  { %v2364_v54 = vperm.slane %v2358_v20, %v4637_v52  ;;  %v2412_v35 = vsel %vm323_vm1, %v2411_v49, %v2392_v30  ;;  %v2356_v55 = vperm.slane %v2348_v34, %v4637_v52  ;;  %v2360_v43 = vsel %vm323_vm1, %v2344_v31, %v2359_v1 }
 0x550   :  { %v2400_v15 = vsel %vm323_vm1, %v2399_v6, %v2381_v48  ;;  %v2418_v36 = vperm.slane %v2412_v35, %v4637_v52  ;;  %v2371_v47 = vrot.slane %v2352_v37, 4  ;;  %v2368_v24 = vperm.slane %v2360_v43, %v4637_v52  ;;  %v2465_v35 = vpop.f32.mrf.mxu0 }
 0x551   :  { %v2369_v56 = vrot.slane %v2364_v54, 4  ;;  %v2406_v41 = vperm.slane %v2400_v15, %v4637_v52  ;;  %v2402_v38 = vsel %vm323_vm1, %v2387_v18, %v2401_v0  ;;  %v2414_v7 = vsel %vm323_vm1, %v2398_v17, %v2413_v50  ;;  %v1958_v15 = vpop.permute.xlu1 %1957 }
 0x552   :  { %v2423_v39 = vrot.slane %v2418_v36, 4  ;;  %v2372_v4 = vsel %vm323_vm1, %v2364_v54, %v2371_v47  ;;  %v2373_v8 = vrot.slane %v2368_v24, 4  ;;  %v2410_v59 = vperm.slane %v2402_v38, %v4637_v52 }
 0x553   :  { %v2370_v61 = vsel %vm323_vm1, %v2369_v56, %v2352_v37  ;;  %v2425_v33 = vrot.slane %v2406_v41, 4  ;;  %v2969_v58 = vpack.c.bf16 %v2372_v4, %v2372_v4  ;;  %v2422_v63 = vperm.slane %v2414_v7, %v4637_v52 }
 0x554   :  { %v2424_v11 = vsel %vm323_vm1, %v2423_v39, %v2406_v41  ;;  %v2965_v13 = vpack.c.bf16 %v2370_v61, %v2370_v61  ;;  %v2374_v16 = vsel %vm323_vm1, %v2373_v8, %v2356_v55  ;;  %v2375_v45 = vrot.slane %v2356_v55, 4 }
 0x555   :  { %v2966_v9 = vpack.c.bf16 %v2424_v11, %v2424_v11  ;;  %v2426_v23 = vsel %vm323_vm1, %v2418_v36, %v2425_v33  ;;  %v3053_v62 = vunpack.c.l.b16 %v2969_v58  ;;  %v2427_v25 = vrot.slane %v2422_v63, 4 }
 0x556   :  { %v3005_v26 = vunpack.c.l.b16 %v2965_v13  ;;  %v2970_v32 = vpack.c.bf16 %v2426_v23, %v2426_v23  ;;  %v2973_v22 = vpack.c.bf16 %v2374_v16, %v2374_v16  ;;  %v2429_v30 = vrot.slane %v2410_v59, 4 }
 0x557   :  { %v3006_v27 = vunpack.c.l.b16 %v2966_v9  ;;  %v2428_v44 = vsel %vm323_vm1, %v2427_v25, %v2410_v59  ;;  %v2376_v28 = vsel %vm323_vm1, %v2368_v24, %v2375_v45  ;;  %v1633_v49 = vperm.slane %v5105_v5, 4 }
 0x558   :  { %v3054_v51 = vunpack.c.l.b16 %v2970_v32  ;;  %v2974_v46 = vpack.c.bf16 %v2428_v44, %v2428_v44  ;;  %v3101_v31 = vunpack.c.l.b16 %v2973_v22  ;;  %v2430_v40 = vsel %vm323_vm1, %v2422_v63, %v2429_v30  ;;  %v2467_v55 = vpop.f32.mrf.mxu0 }
 0x559   :  { %v3007_v53 = vpack.c.b16 %v3006_v27, %v3005_v26  ;;  %v2977_v17 = vpack.c.bf16 %v2376_v28, %v2376_v28  ;;  %v2978_v19 = vpack.c.bf16 %v2430_v40, %v2430_v40  ;;  %v2437_v36 = vperm.slane %v5105_v5, 6  ;;  %v1982_v7 = vpop.permute.xlu1 %1981 }
 0x55a   :  { %v3055_v2 = vpack.c.b16 %v3054_v51, %v3053_v62  ;;  %v3102_v48 = vunpack.c.l.b16 %v2974_v46  ;;  %v2061_v4 = vrot.slane %v1958_v15, 4  ;;  %v2059_v5 = vrot.slane %v1982_v7, 4 }
 0x55b   :  { %v3012_v42 = vsel %vm1062_vm2, %v3007_v53, 0  ;;  %v5262_v18 = vunpack.c.l.b16 %v2977_v17  ;;  %v5265_v3 = vunpack.c.l.b16 %v2978_v19  ;;  %v5289_v24 = vadd.f32 %v2465_v35, %v2437_v36 }
 0x55c   :  { %3021 = vmatpush.bf16.xpose.msra.mxu2 %v3012_v42  ;;  %v3060_v21 = vsel %vm1062_vm2, %v3055_v2, 0  ;;  %v3103_v1 = vpack.c.b16 %v3102_v48, %v3101_v31  ;;  %v5291_v56 = vadd.f32 %v2467_v55, %v2437_v36  ;;  %v2062_v59 = vsel %vm323_vm1, %v1982_v7, %v2061_v4 }
 0x55d   :  { %v3151_v50 = vpack.c.b16 %v5265_v3, %v5262_v18  ;;  %v2060_v61 = vsel %vm323_vm1, %v2059_v5, %v1958_v15  ;;  %v2070_v33 = vperm.slane %v2062_v59, %v4625_v29  ;;  %v2049_v58 = vrot.slane %v5156_v60, 4 }
 0x55e   :  { %v3108_v0 = vsel %vm1062_vm2, %v3103_v1, 0  ;;  %v2066_v63 = vperm.slane %v2060_v61, %v4625_v29  ;;  %v1993_v7 = vrot.slane %v5144_v14, 4 }
 0x55f   :  { %3117 = vmatpush.bf16.xpose.msrb.mxu0 %v3108_v0  ;;  %v2083_v9 = vrot.slane %v2070_v33, 4 }
 0x560   :  { %v2470_v43 = vpop.f32.mrf.mxu0  ;;  %v2071_v25 = vrot.slane %v2066_v63, 4 }
 0x561   :  { %v5293_v41 = vadd.f32 %v2470_v43, %v2437_v36 }
 0x564   :  { %3069 = vmatpush.bf16.xpose.msrb.mxu2 %v3060_v21 }
 0x568   :  { %v2472_v47 = vpop.f32.mrf.mxu0 }
 0x569   :  { %v5295_v38 = vadd.f32 %v2472_v47, %v2437_v36 }
 0x56b   :  { %v5299_v39 = vpack.i.bf16 %v5295_v38, %v5293_v41 }
 0x5b4   :  { %v1658_v37 = vpop.f32.mrf.mxu2 }
 0x5b5   :  { %v5271_v20 = vadd.f32 %v1658_v37, %v1633_v49 }
 0x5b7   :  { %1677 = vrot.lane.b32.xlu1 %v5271_v20, %s4444_s17 }
 0x5bc   :  { %v1660_v6 = vpop.f32.mrf.mxu2 }
 0x5bd   :  { %v5275_v34 = vadd.f32 %v1660_v6, %v1633_v49 }
 0x5bf   :  { %v4028_v54 = vpack.i.bf16 %v5144_v14, %v5275_v34  ;;  %4039 = vrot.lane.b32.xlu1 %v5299_v39, %s4443_s4  ;;  %v1741_v59 = vrot.slane %v5275_v34, 4 }
 0x5c1   :  { %4029 = vrot.lane.b32.xlu0 %v4028_v54, %s4443_s4  ;;  %4024 = vrot.lane.b32.xlu2 %v4028_v54, %s4445_s5 }
 0x5c9   :  { %4034 = vrot.lane.b32.xlu0 %v4028_v54, %s4444_s17  ;;  %1969 = vrot.lane.b32.xlu2 %v5156_v60, %s4443_s4 }
 0x5d1   :  { %1671 = vrot.lane.b32.xlu0 %v5271_v20, %s4443_s4  ;;  %1665 = vrot.lane.b32.xlu2 %v5271_v20, %s4445_s5 }
 0x5d9   :  { %4049 = vrot.lane.b32.xlu0 %v5299_v39, %s4445_s5  ;;  %4044 = vrot.lane.b32.xlu2 %v5299_v39, %s4444_s17 }
 0x61b   :  { %v5301_v8 = vpop.permute.xlu2 %4024 }
 0x623   :  { %v1970_v11 = vpop.permute.xlu2 %1969 }
 0x624   :  { %v2047_v13 = vrot.slane %v1970_v11, 4  ;;  %v2050_v16 = vsel %vm323_vm1, %v1970_v11, %v2049_v58 }
 0x625   :  { %v2058_v23 = vperm.slane %v2050_v16, %v4625_v29  ;;  %v4027_v16 = vunpack.i.h.bf16 %v5301_v8 }
 0x626   :  { %v2048_v62 = vsel %vm323_vm1, %v2047_v13, %v5156_v60 }
 0x627   :  { %v2054_v26 = vperm.slane %v2048_v62, %v4625_v29  ;;  %v2084_v32 = vsel %vm323_vm1, %v2083_v9, %v2058_v23  ;;  %v2085_v22 = vrot.slane %v2058_v23, 4  ;;  %v4026_v9 = vunpack.i.l.bf16 %v5301_v8 }
 0x628   :  { %v2090_v45 = vperm.slane %v2084_v32, %v4637_v52 }
 0x629   :  { %v2072_v27 = vsel %vm323_vm1, %v2071_v25, %v2054_v26  ;;  %v2073_v44 = vrot.slane %v2054_v26, 4  ;;  %v2086_v30 = vsel %vm323_vm1, %v2070_v33, %v2085_v22  ;;  %v1678_v40 = vpop.permute.xlu1 %1677 }
 0x62a   :  { %v2078_v51 = vperm.slane %v2072_v27, %v4637_v52  ;;  %v2094_v46 = vperm.slane %v2086_v30, %v4637_v52  ;;  %v2099_v28 = vrot.slane %v2090_v45, 4  ;;  %v1695_v49 = vrot.slane %v1678_v40, 4 }
 0x62b   :  { %v2074_v31 = vsel %vm323_vm1, %v2066_v63, %v2073_v44  ;;  %v1666_v17 = vpop.permute.xlu2 %1665 }
 0x62c   :  { %v2082_v60 = vperm.slane %v2074_v31, %v4637_v52  ;;  %v2101_v53 = vrot.slane %v2094_v46, 4  ;;  %v2095_v2 = vrot.slane %v2078_v51, 4  ;;  %v2100_v37 = vsel %vm323_vm1, 0.0, %v2099_v28 }
 0x62d   :  { %v1697_v54 = vrot.slane %v1666_v17, 4  ;;  %v1696_v5 = vsel %vm323_vm1, %v1695_v49, %v1666_v17  ;;  %v1685_v17 = vrot.slane %v5271_v20, 4 }
 0x62e   :  { %v2097_v48 = vrot.slane %v2082_v60, 4  ;;  %v2102_v19 = vsel %vm323_vm1, 0.0, %v2101_v53  ;;  %v2280_v42 = vsel %vm323_vm1, %v2101_v53, %v2090_v45  ;;  %v2096_v36 = vsel %vm323_vm1, 0.0, %v2095_v2 }
 0x62f   :  { %v2284_v21 = vperm.slane %v2280_v42, %v4625_v29  ;;  %v2285_v1 = vrot.slane %v2102_v19, 4  ;;  %v1698_v58 = vsel %vm323_vm1, %v1678_v40, %v1697_v54  ;;  %v5347_v22 = vperm.slane %v1696_v5, %v4625_v29 }
 0x630   :  { %v2098_v0 = vsel %vm323_vm1, 0.0, %v2097_v48  ;;  %v2269_v6 = vsel %vm323_vm1, %v2097_v48, %v2078_v51  ;;  %v5350_v45 = vperm.slane %v1698_v58, %v4625_v29  ;;  %v2005_v53 = vrot.slane %v4027_v16, 4 }
 0x631   :  { %v2273_v35 = vperm.slane %v2269_v6, %v4625_v29  ;;  %v2274_v55 = vrot.slane %v2098_v0, 4  ;;  %v2286_v43 = vsel %vm323_vm1, %v2285_v1, %v2100_v37  ;;  %v2305_v15 = vrot.slane %v2284_v21, 4 }
 0x632   :  { %v2290_v47 = vperm.slane %v2286_v43, %v4625_v29  ;;  %v1753_v40 = vrot.slane %v4026_v9, 4  ;;  %v1719_v2 = vrot.slane %v5350_v45, 4 }
 0x633   :  { %v2275_v4 = vsel %vm323_vm1, %v2274_v55, %v2096_v36  ;;  %v4030_v61 = vpop.permute.xlu0 %4029  ;;  %v2293_v33 = vrot.slane %v2273_v35, 4 }
 0x634   :  { %v4032_v63 = vunpack.i.h.bf16 %v4030_v61  ;;  %v4031_v11 = vunpack.i.l.bf16 %v4030_v61  ;;  %v2279_v13 = vperm.slane %v2275_v4, %v4625_v29  ;;  %v2306_v23 = vsel %vm323_vm1, %v2290_v47, %v2305_v15 }
 0x635   :  { %v2303_v46 = vrot.slane %v2290_v47, 4  ;;  %v5363_v60 = vperm.slane %v2306_v23, %v4637_v52 }
 0x636   :  { %v1991_v62 = vrot.slane %v4032_v63, 4  ;;  %v1994_v25 = vsel %vm323_vm1, %v4032_v63, %v1993_v7  ;;  %v1739_v26 = vrot.slane %v4031_v11, 4  ;;  %v1742_v32 = vsel %vm323_vm1, %v4031_v11, %v1741_v59 }
 0x637   :  { %v2294_v27 = vsel %vm323_vm1, %v2279_v13, %v2293_v33  ;;  %v2002_v8 = vperm.slane %v1994_v25, %v4625_v29  ;;  %v1750_v51 = vperm.slane %v1742_v32, %v4625_v29  ;;  %v2291_v28 = vrot.slane %v2279_v13, 4 }
 0x638   :  { %v1992_v44 = vsel %vm323_vm1, %v1991_v62, %v5144_v14  ;;  %v1740_v30 = vsel %vm323_vm1, %v1739_v26, %v5275_v34  ;;  %v5360_v31 = vperm.slane %v2294_v27, %v4637_v52  ;;  %v5370_v14 = vsel %vm1062_vm2, %v3151_v50, 0 }
 0x639   :  { %v1707_v34 = vrot.slane %v5347_v22, 4  ;;  %v1998_v48 = vperm.slane %v1992_v44, %v4625_v29  ;;  %v1746_v19 = vperm.slane %v1740_v30, %v4625_v29  ;;  %v2029_v1 = vrot.slane %v2002_v8, 4 }
 0x63a   :  { %v1777_v49 = vrot.slane %v1750_v51, 4  ;;  %v2319_v6 = vrot.slane %v5363_v60, 4  ;;  %v2292_v18 = vsel %vm323_vm1, %v2291_v28, %v2273_v35  ;;  %v2304_v3 = vsel %vm323_vm1, %v2303_v46, %v2284_v21 }
 0x63b   :  { %v4035_v42 = vpop.permute.xlu0 %4034  ;;  %v2321_v50 = vrot.slane %v5360_v31, 4  ;;  %v2017_v36 = vrot.slane %v1998_v48, 4  ;;  %v1765_v47 = vrot.slane %v1746_v19, 4  ;;  %v5387_v21 = vperm.slane %v2292_v18, %v4637_v52 }
 0x63c   :  { %v4037_v0 = vunpack.i.h.bf16 %v4035_v42  ;;  %v4036_v37 = vunpack.i.l.bf16 %v4035_v42  ;;  %v5390_v59 = vperm.slane %v2304_v3, %v4637_v52 }
 0x63e   :  { %v2003_v54 = vrot.slane %v4037_v0, 4  ;;  %v1751_v55 = vrot.slane %v4036_v37, 4  ;;  %v1754_v43 = vsel %vm323_vm1, %v4036_v37, %v1753_v40  ;;  %v2006_v15 = vsel %vm323_vm1, %v4037_v0, %v2005_v53 }
 0x63f   :  { %v1762_v7 = vperm.slane %v1754_v43, %v4625_v29  ;;  %v2014_v4 = vperm.slane %v2006_v15, %v4625_v29 }
 0x640   :  { %v1752_v5 = vsel %vm323_vm1, %v1751_v55, %v4026_v9  ;;  %v2004_v35 = vsel %vm323_vm1, %v2003_v54, %v4027_v16  ;;  %v5399_v16 = vsel %vm323_vm1, %v2319_v6, %v5360_v31 }
 0x641   :  { %v1758_v61 = vperm.slane %v1752_v5, %v4625_v29  ;;  %v1775_v33 = vrot.slane %v1762_v7, 4  ;;  %v1778_v58 = vsel %vm323_vm1, %v1762_v7, %v1777_v49  ;;  %v2010_v63 = vperm.slane %v2004_v35, %v4625_v29 }
 0x642   :  { %v1786_v11 = vperm.slane %v1778_v58, %v4637_v52  ;;  %v2027_v13 = vrot.slane %v2014_v4, 4  ;;  %v2030_v9 = vsel %vm323_vm1, %v2014_v4, %v2029_v1  ;;  %v2317_v58 = vrot.slane %v5387_v21, 4 }
 0x643   :  { %v1763_v23 = vrot.slane %v1758_v61, 4  ;;  %v1766_v62 = vsel %vm323_vm1, %v1758_v61, %v1765_v47  ;;  %v1776_v25 = vsel %vm323_vm1, %v1775_v33, %v1750_v51  ;;  %v2015_v26 = vrot.slane %v2010_v63, 4  ;;  %v1672_v15 = vpop.permute.xlu0 %1671 }
 0x644   :  { %v1774_v32 = vperm.slane %v1766_v62, %v4637_v52  ;;  %v1782_v27 = vperm.slane %v1776_v25, %v4637_v52  ;;  %v1793_v44 = vrot.slane %v1786_v11, 4  ;;  %v2018_v30 = vsel %vm323_vm1, %v2010_v63, %v2017_v36 }
 0x645   :  { %v1764_v46 = vsel %vm323_vm1, %v1763_v23, %v1746_v19  ;;  %v2016_v28 = vsel %vm323_vm1, %v2015_v26, %v1998_v48  ;;  %v2026_v53 = vperm.slane %v2018_v30, %v4637_v52  ;;  %v2028_v40 = vsel %vm323_vm1, %v2027_v13, %v2002_v8 }
 0x646   :  { %v1770_v42 = vperm.slane %v1764_v46, %v4637_v52  ;;  %v1789_v1 = vrot.slane %v1774_v32, 4  ;;  %v1791_v51 = vrot.slane %v1782_v27, 4  ;;  %v1794_v49 = vsel %vm323_vm1, 0.0, %v1793_v44 }
 0x647   :  { %v1860_v0 = vsel %vm323_vm1, %v1793_v44, %v1782_v27  ;;  %v1865_v37 = vrot.slane %v1794_v49, 4  ;;  %v2022_v6 = vperm.slane %v2016_v28, %v4637_v52  ;;  %v2034_v18 = vperm.slane %v2028_v40, %v4637_v52 }
 0x648   :  { %v1787_v19 = vrot.slane %v1770_v42, 4  ;;  %v1790_v48 = vsel %vm323_vm1, 0.0, %v1789_v1  ;;  %v1792_v3 = vsel %vm323_vm1, 0.0, %v1791_v51  ;;  %v1849_v8 = vsel %vm323_vm1, %v1789_v1, %v1770_v42 }
 0x649   :  { %v1854_v54 = vrot.slane %v1790_v48, 4  ;;  %v1864_v55 = vperm.slane %v1860_v0, %v4625_v29  ;;  %v1866_v43 = vsel %vm323_vm1, %v1865_v37, %v1792_v3  ;;  %v2972_v36 = vpack.c.bf16 %v5399_v16, %v5399_v16 }
 0x64a   :  { %v1788_v47 = vsel %vm323_vm1, 0.0, %v1787_v19  ;;  %v1870_v7 = vperm.slane %v1866_v43, %v4625_v29  ;;  %v2038_v4 = vperm.slane %v2030_v9, %v4637_v52  ;;  %v2039_v5 = vrot.slane %v2022_v6, 4 }
 0x64b   :  { %v1853_v35 = vperm.slane %v1849_v8, %v4625_v29  ;;  %v2041_v61 = vrot.slane %v2026_v53, 4  ;;  %v2043_v33 = vrot.slane %v2034_v18, 4  ;;  %v1855_v63 = vsel %vm323_vm1, %v1854_v54, %v1788_v47 }
 0x64c   :  { %v1885_v11 = vrot.slane %v1864_v55, 4  ;;  %v2045_v13 = vrot.slane %v2038_v4, 4  ;;  %v1683_v23 = vrot.slane %v1672_v15, 4  ;;  %v1883_v62 = vrot.slane %v1870_v7, 4 }
 0x64d   :  { %v2040_v25 = vsel %vm323_vm1, 0.0, %v2039_v5  ;;  %v2042_v26 = vsel %vm323_vm1, 0.0, %v2041_v61  ;;  %v1686_v9 = vsel %vm323_vm1, %v1672_v15, %v1685_v17  ;;  %v2044_v32 = vsel %vm323_vm1, 0.0, %v2043_v33 }
 0x64e   :  { %v2046_v27 = vsel %vm323_vm1, 0.0, %v2045_v13  ;;  %v2215_v44 = vsel %vm323_vm1, %v2041_v61, %v2022_v6  ;;  %v1684_v30 = vsel %vm323_vm1, %v1683_v23, %v5271_v20  ;;  %v2220_v46 = vrot.slane %v2042_v26, 4 }
 0x64f   :  { %v2226_v28 = vsel %vm323_vm1, %v2045_v13, %v2034_v18  ;;  %v1690_v53 = vperm.slane %v1684_v30, %v4625_v29  ;;  %v1694_v40 = vperm.slane %v1686_v9, %v4625_v29  ;;  %v2231_v42 = vrot.slane %v2046_v27, 4 }
 0x650   :  { %v1859_v1 = vperm.slane %v1855_v63, %v4625_v29  ;;  %v1873_v17 = vrot.slane %v1853_v35, 4  ;;  %v1886_v51 = vsel %vm323_vm1, %v1870_v7, %v1885_v11  ;;  %v1884_v37 = vsel %vm323_vm1, %v1883_v62, %v1864_v55 }
 0x651   :  { %v1708_v49 = vsel %vm323_vm1, %v1707_v34, %v1690_v53  ;;  %v1709_v0 = vrot.slane %v1690_v53, 4  ;;  %v1720_v20 = vsel %vm323_vm1, %v1719_v2, %v1694_v40  ;;  %v1721_v18 = vrot.slane %v1694_v40, 4 }
 0x652   :  { %v1714_v6 = vperm.slane %v1708_v49, %v4637_v52  ;;  %v1726_v19 = vperm.slane %v1720_v20, %v4637_v52  ;;  %v1874_v48 = vsel %vm323_vm1, %v1859_v1, %v1873_v17  ;;  %v5459_v34 = vperm.slane %v1886_v51, %v4637_v52 }
 0x653   :  { %v1710_v3 = vsel %vm323_vm1, %v5347_v22, %v1709_v0  ;;  %v5456_v8 = vperm.slane %v1874_v48, %v4637_v52  ;;  %v1871_v54 = vrot.slane %v1859_v1, 4  ;;  %v1722_v55 = vsel %vm323_vm1, %v5350_v45, %v1721_v18 }
 0x654   :  { %v1718_v2 = vperm.slane %v1710_v3, %v4637_v52  ;;  %v1731_v43 = vrot.slane %v1714_v6, 4  ;;  %v1735_v15 = vrot.slane %v1726_v19, 4  ;;  %v1730_v47 = vperm.slane %v1722_v55, %v4637_v52 }
 0x655   :  { %v1899_v7 = vrot.slane %v5459_v34, 4  ;;  %v1872_v22 = vsel %vm323_vm1, %v1871_v54, %v1853_v35  ;;  %v5468_v4 = vperm.slane %v1884_v37, %v4637_v52  ;;  %v2230_v5 = vperm.slane %v2226_v28, %v4625_v29 }
 0x656   :  { %v2232_v61 = vsel %vm323_vm1, %v2231_v42, %v2044_v32  ;;  %v1733_v33 = vrot.slane %v1718_v2, 4  ;;  %v5473_v63 = vperm.slane %v1872_v22, %v4637_v52  ;;  %v1732_v45 = vsel %vm323_vm1, 0.0, %v1731_v43 }
 0x657   :  { %v1737_v11 = vrot.slane %v1730_v47, 4  ;;  %v1900_v13 = vsel %vm323_vm1, %v1899_v7, %v5456_v8  ;;  %v1895_v23 = vrot.slane %v5468_v4, 4  ;;  %v2219_v26 = vperm.slane %v2215_v44, %v4625_v29 }
 0x658   :  { %v1734_v35 = vsel %vm323_vm1, 0.0, %v1733_v33  ;;  %v2960_v62 = vpack.c.bf16 %v1900_v13, %v1900_v13  ;;  %v2221_v9 = vsel %vm323_vm1, %v2220_v46, %v2040_v25  ;;  %v1736_v32 = vsel %vm323_vm1, 0.0, %v1735_v15 }
 0x659   :  { %v1738_v27 = vsel %vm323_vm1, 0.0, %v1737_v11  ;;  %v1800_v30 = vrot.slane %v1734_v35, 4  ;;  %v1806_v28 = vsel %vm323_vm1, %v1737_v11, %v1726_v19  ;;  %v1795_v53 = vsel %vm323_vm1, %v1733_v33, %v1714_v6 }
 0x65a   :  { %v1811_v40 = vrot.slane %v1738_v27, 4  ;;  %3849 = vmatmul.msk.bf16.vlgmr.msrb.gmra.mxu0 %vm1062_vm2, %v2960_v62  ;;  %v1896_v42 = vsel %vm323_vm1, %v1895_v23, %v5473_v63  ;;  %v2225_v1 = vperm.slane %v2221_v9, %v4625_v29  ;;  %v1810_v25 = vperm.slane %v1806_v28, %v4625_v29 }
 0x65b   :  { %v1801_v44 = vsel %vm323_vm1, %v1800_v30, %v1732_v45  ;;  %v2956_v46 = vpack.c.bf16 %v1896_v42, %v1896_v42  ;;  %v2236_v17 = vperm.slane %v2232_v61, %v4625_v29  ;;  %v2239_v49 = vrot.slane %v2219_v26, 4 }
 0x65c   :  { %v1812_v51 = vsel %vm323_vm1, %v1811_v40, %v1736_v32  ;;  %v2315_v0 = vrot.slane %v5390_v59, 4  ;;  %v2318_v20 = vsel %vm323_vm1, %v5390_v59, %v2317_v58  ;;  %v2251_v6 = vrot.slane %v2230_v5, 4 }
 0x65d   :  { %v1816_v37 = vperm.slane %v1812_v51, %v4625_v29  ;;  %3845 = vmatmul.msk.bf16.vlgmr.msra.gmra.mxu2 %vm1062_vm2, %v2956_v46  ;;  %v2237_v18 = vrot.slane %v2225_v1, 4  ;;  %v2249_v19 = vrot.slane %v2236_v17, 4  ;;  %v1799_v48 = vperm.slane %v1795_v53, %v4625_v29 }
 0x65e   :  { %v1805_v3 = vperm.slane %v1801_v44, %v4625_v29  ;;  %3165 = vmatpush.bf16.xpose.msra.mxu2 %v5370_v14  ;;  %v2240_v54 = vsel %vm323_vm1, %v2225_v1, %v2239_v49  ;;  %v1831_v2 = vrot.slane %v1810_v25, 4  ;;  %v2252_v59 = vsel %vm323_vm1, %v2236_v17, %v2251_v6 }
 0x65f   :  { %v2248_v55 = vperm.slane %v2240_v54, %v4637_v52  ;;  %v2238_v58 = vsel %vm323_vm1, %v2237_v18, %v2219_v26  ;;  %v1829_v43 = vrot.slane %v1816_v37, 4  ;;  %v2260_v15 = vperm.slane %v2252_v59, %v4637_v52 }
 0x660   :  { %v2244_v47 = vperm.slane %v2238_v58, %v4637_v52  ;;  %v2250_v7 = vsel %vm323_vm1, %v2249_v19, %v2230_v5  ;;  %v2316_v22 = vsel %vm323_vm1, %v2315_v0, %v5387_v21  ;;  %v2968_v61 = vpack.c.bf16 %v2318_v20, %v2318_v20 }
 0x661   :  { %v2256_v14 = vperm.slane %v2250_v7, %v4637_v52  ;;  %v2322_v33 = vsel %vm323_vm1, %v5363_v60, %v2321_v50  ;;  %v1819_v45 = vrot.slane %v1799_v48, 4  ;;  %v2265_v11 = vrot.slane %v2260_v15, 4 }
 0x662   :  { %v3078_v5 = vunpack.c.l.b16 %v2972_v36  ;;  %v2263_v13 = vrot.slane %v2244_v47, 4  ;;  %v1817_v23 = vrot.slane %v1805_v3, 4  ;;  %v1832_v35 = vsel %vm323_vm1, %v1816_v37, %v1831_v2 }
 0x663   :  { %v2261_v39 = vrot.slane %v2256_v14, 4  ;;  %v2267_v62 = vrot.slane %v2248_v55, 4  ;;  %v1830_v21 = vsel %vm323_vm1, %v1829_v43, %v1810_v25  ;;  %v2266_v26 = vsel %vm323_vm1, %v2265_v11, %v2248_v55 }
 0x664   :  { %v2964_v31 = vpack.c.bf16 %v2316_v22, %v2316_v22  ;;  %v2264_v9 = vsel %vm323_vm1, %v2256_v14, %v2263_v13  ;;  %v2971_v60 = vpack.c.bf16 %v2266_v26, %v2266_v26  ;;  %v3030_v27 = vunpack.c.l.b16 %v2968_v61 }
 0x665   :  { %v2262_v50 = vsel %vm323_vm1, %v2261_v39, %v2244_v47  ;;  %v2967_v32 = vpack.c.bf16 %v2264_v9, %v2264_v9  ;;  %v1820_v36 = vsel %vm323_vm1, %v1805_v3, %v1819_v45  ;;  %v1840_v30 = vperm.slane %v1832_v35, %v4637_v52 }
 0x666   :  { %v2963_v16 = vpack.c.bf16 %v2262_v50, %v2262_v50  ;;  %v2268_v28 = vsel %vm323_vm1, %v2260_v15, %v2267_v62  ;;  %v3077_v53 = vunpack.c.l.b16 %v2971_v60  ;;  %v1818_v42 = vsel %vm323_vm1, %v1817_v23, %v1799_v48 }
 0x667   :  { %v3029_v40 = vunpack.c.l.b16 %v2967_v32  ;;  %v1836_v1 = vperm.slane %v1830_v21, %v4637_v52  ;;  %v2982_v25 = vunpack.c.l.b16 %v2964_v31  ;;  %v2975_v46 = vpack.c.bf16 %v2268_v28, %v2268_v28  ;;  %v4050_v21 = vpop.permute.xlu0 %4049 }
 0x668   :  { %v2981_v44 = vunpack.c.l.b16 %v2963_v16  ;;  %v1897_v17 = vrot.slane %v5473_v63, 4  ;;  %v3079_v51 = vpack.c.b16 %v3078_v5, %v3077_v53  ;;  %v1828_v0 = vperm.slane %v1820_v36, %v4637_v52 }
 0x669   :  { %v3031_v49 = vpack.c.b16 %v3030_v27, %v3029_v40  ;;  %v2976_v20 = vpack.c.bf16 %v2322_v33, %v2322_v33  ;;  %v1845_v6 = vrot.slane %v1840_v30, 4  ;;  %v1824_v18 = vperm.slane %v1818_v42, %v4637_v52  ;;  %v4045_v42 = vpop.permute.xlu2 %4044 }
 0x66a   :  { %v2983_v37 = vpack.c.b16 %v2982_v25, %v2981_v44  ;;  %v1898_v19 = vsel %vm323_vm1, %v5468_v4, %v1897_v17  ;;  %v3084_v48 = vsel %vm1062_vm2, %v3079_v51, 0  ;;  %v1841_v54 = vrot.slane %v1836_v1, 4 }
 0x66b   :  { %v3036_v3 = vsel %vm1062_vm2, %v3031_v49, 0  ;;  %v2958_v2 = vpack.c.bf16 %v1898_v19, %v1898_v19  ;;  %3093 = vmatpush.bf16.xpose.msra.mxu3 %v3084_v48  ;;  %v3125_v55 = vunpack.c.l.b16 %v2975_v46  ;;  %v1846_v59 = vsel %vm323_vm1, %v1845_v6, %v1828_v0 }
 0x66c   :  { %v2988_v63 = vsel %vm1062_vm2, %v2983_v37, 0  ;;  %v3126_v58 = vunpack.c.l.b16 %v2976_v20  ;;  %v1842_v43 = vsel %vm323_vm1, %v1841_v54, %v1824_v18  ;;  %v2959_v15 = vpack.c.bf16 %v1846_v59, %v1846_v59 }
 0x66d   :  { %2997 = vmatpush.bf16.xpose.msra.mxu1 %v2988_v63  ;;  %3847 = vmatmul.msk.bf16.vlgmr.msrb.gmra.mxu2 %vm1062_vm2, %v2958_v2  ;;  %v2955_v47 = vpack.c.bf16 %v1842_v43, %v1842_v43  ;;  %v1901_v14 = vrot.slane %v5456_v8, 4  ;;  %v1843_v61 = vrot.slane %v1824_v18, 4  ;;  %v1847_v5 = vrot.slane %v1828_v0, 4  ;;  %v4040_v8 = vpop.permute.xlu1 %4039 }
 0x66e   :  { %v3127_v4 = vpack.c.b16 %v3126_v58, %v3125_v55  ;;  %v4042_v39 = vunpack.i.h.bf16 %v4040_v8  ;;  %v4041_v35 = vunpack.i.l.bf16 %v4040_v8  ;;  %v2685_v62 = vrot.slane %v5295_v38, 4 }
 0x66f   :  { %v1902_v22 = vsel %vm323_vm1, %v5459_v34, %v1901_v14  ;;  %v1844_v45 = vsel %vm323_vm1, %v1836_v1, %v1843_v61  ;;  %v1848_v13 = vsel %vm323_vm1, %v1840_v30, %v1847_v5  ;;  %v2629_v34 = vrot.slane %v5293_v41, 4 }
 0x670   :  { %v3132_v7 = vsel %vm1062_vm2, %v3127_v4, 0  ;;  %v2962_v33 = vpack.c.bf16 %v1902_v22, %v1902_v22  ;;  %v2957_v11 = vpack.c.bf16 %v1844_v45, %v1844_v45  ;;  %v2961_v23 = vpack.c.bf16 %v1848_v13, %v1848_v13 }
 0x671   :  { %v2683_v26 = vrot.slane %v4042_v39, 4  ;;  %v2627_v31 = vrot.slane %v4041_v35, 4  ;;  %v2686_v9 = vsel %vm323_vm1, %v4042_v39, %v2685_v62  ;;  %v2630_v60 = vsel %vm323_vm1, %v4041_v35, %v2629_v34 }
 0x672   :  { %3848 = vmatmul.msk.bf16.vlgmr.msra.gmra.mxu3 %vm1062_vm2, %v2959_v15  ;;  %v4052_v50 = vunpack.i.h.bf16 %v4050_v21  ;;  %v4051_v32 = vunpack.i.l.bf16 %v4050_v21  ;;  %v2694_v16 = vperm.slane %v2686_v9, %v4625_v29  ;;  %v2638_v30 = vperm.slane %v2630_v60, %v4625_v29 }
 0x673   :  { %v2684_v27 = vsel %vm323_vm1, %v2683_v26, %v5295_v38  ;;  %v2628_v36 = vsel %vm323_vm1, %v2627_v31, %v5293_v41  ;;  %v4047_v44 = vunpack.i.h.bf16 %v4045_v42  ;;  %v4046_v25 = vunpack.i.l.bf16 %v4045_v42 }
 0x674   :  { %3844 = vmatmul.msk.bf16.vlgmr.msra.gmra.mxu1 %vm1062_vm2, %v2955_v47  ;;  %v2697_v28 = vrot.slane %v4052_v50, 4  ;;  %v2641_v53 = vrot.slane %v4051_v32, 4  ;;  %v2690_v40 = vperm.slane %v2684_v27, %v4625_v29  ;;  %v2634_v1 = vperm.slane %v2628_v36, %v4625_v29 }
 0x675   :  { %3045 = vmatpush.bf16.xpose.msrb.mxu1 %v3036_v3  ;;  %v2721_v46 = vrot.slane %v2694_v16, 4  ;;  %v2665_v17 = vrot.slane %v2638_v30, 4  ;;  %v2695_v51 = vrot.slane %v4047_v44, 4  ;;  %v2639_v49 = vrot.slane %v4046_v25, 4 }
 0x676   :  { %v2698_v38 = vsel %vm323_vm1, %v4047_v44, %v2697_v28  ;;  %v2642_v0 = vsel %vm323_vm1, %v4046_v25, %v2641_v53  ;;  %v2709_v41 = vrot.slane %v2690_v40, 4  ;;  %v2653_v6 = vrot.slane %v2634_v1, 4 }
 0x677   :  { %v2706_v20 = vperm.slane %v2698_v38, %v4625_v29  ;;  %v2650_v37 = vperm.slane %v2642_v0, %v4625_v29  ;;  %v2696_v18 = vsel %vm323_vm1, %v2695_v51, %v4052_v50  ;;  %v2640_v19 = vsel %vm323_vm1, %v2639_v49, %v4051_v32 }
 0x678   :  { %v2702_v48 = vperm.slane %v2696_v18, %v4625_v29  ;;  %v2646_v2 = vperm.slane %v2640_v19, %v4625_v29 }
 0x679   :  { %v2719_v3 = vrot.slane %v2706_v20, 4  ;;  %v2722_v54 = vsel %vm323_vm1, %v2706_v20, %v2721_v46  ;;  %v2663_v55 = vrot.slane %v2650_v37, 4  ;;  %v2666_v59 = vsel %vm323_vm1, %v2650_v37, %v2665_v17 }
 0x67a   :  { %v2730_v63 = vperm.slane %v2722_v54, %v4637_v52  ;;  %v2707_v58 = vrot.slane %v2702_v48, 4  ;;  %v2710_v43 = vsel %vm323_vm1, %v2702_v48, %v2709_v41  ;;  %v2651_v15 = vrot.slane %v2646_v2, 4 }
 0x67b   :  { %v2720_v4 = vsel %vm323_vm1, %v2719_v3, %v2694_v16  ;;  %v2718_v47 = vperm.slane %v2710_v43, %v4637_v52  ;;  %v2654_v22 = vsel %vm323_vm1, %v2646_v2, %v2653_v6  ;;  %v2674_v27 = vperm.slane %v2666_v59, %v4637_v52 }
 0x67c   :  { %v2737_v14 = vrot.slane %v2730_v63, 4  ;;  %v2708_v61 = vsel %vm323_vm1, %v2707_v58, %v2690_v40  ;;  %v2662_v45 = vperm.slane %v2654_v22, %v4637_v52 }
 0x67d   :  { %3141 = vmatpush.bf16.xpose.msra.mxu1 %v3132_v7  ;;  %3851 = vmatmul.msk.bf16.vlgmr.msra.gmra.mxu2 %vm1062_vm2, %v2962_v33  ;;  %v2726_v7 = vperm.slane %v2720_v4, %v4637_v52  ;;  %v2652_v33 = vsel %vm323_vm1, %v2651_v15, %v2634_v1  ;;  %v2714_v5 = vperm.slane %v2708_v61, %v4637_v52  ;;  %v2733_v13 = vrot.slane %v2718_v47, 4 }
 0x67e   :  { %v2738_v8 = vsel %vm323_vm1, 0.0, %v2737_v14  ;;  %v2658_v34 = vperm.slane %v2652_v33, %v4637_v52  ;;  %v2677_v28 = vrot.slane %v2662_v45, 4  ;;  %v2681_v1 = vrot.slane %v2674_v27, 4 }
 0x67f   :  { %v2912_v39 = vsel %vm323_vm1, %v2737_v14, %v2726_v7  ;;  %v2917_v35 = vrot.slane %v2738_v8, 4  ;;  %v2731_v21 = vrot.slane %v2714_v5, 4  ;;  %v2734_v26 = vsel %vm323_vm1, 0.0, %v2733_v13 }
 0x680   :  { %v2901_v9 = vsel %vm323_vm1, %v2733_v13, %v2714_v5  ;;  %v2906_v60 = vrot.slane %v2734_v26, 4  ;;  %v2916_v50 = vperm.slane %v2912_v39, %v4625_v29  ;;  %v2678_v25 = vsel %vm323_vm1, 0.0, %v2677_v28 }
 0x681   :  { %v2732_v16 = vsel %vm323_vm1, 0.0, %v2731_v21  ;;  %v2847_v46 = vsel %vm323_vm1, %v2677_v28, %v2658_v34  ;;  %v2905_v17 = vperm.slane %v2901_v9, %v4625_v29  ;;  %v2682_v38 = vsel %vm323_vm1, 0.0, %v2681_v1 }
 0x682   :  { %v2907_v53 = vsel %vm323_vm1, %v2906_v60, %v2732_v16  ;;  %v2937_v40 = vrot.slane %v2916_v50, 4  ;;  %v2852_v49 = vrot.slane %v2678_v25, 4  ;;  %v2863_v20 = vrot.slane %v2682_v38, 4 }
 0x683   :  { %v2851_v37 = vperm.slane %v2847_v46, %v4625_v29  ;;  %v2911_v6 = vperm.slane %v2907_v53, %v4625_v29  ;;  %v2925_v48 = vrot.slane %v2905_v17, 4 }
 0x684   :  { %3846 = vmatmul.msk.bf16.vlgmr.msrb.gmra.mxu1 %vm1062_vm2, %v2957_v11  ;;  %v2664_v11 = vsel %vm323_vm1, %v2663_v55, %v2638_v30  ;;  %v2675_v30 = vrot.slane %v2658_v34, 4 }
 0x685   :  { %v2670_v62 = vperm.slane %v2664_v11, %v4637_v52  ;;  %v2923_v55 = vrot.slane %v2911_v6, 4  ;;  %v2871_v43 = vrot.slane %v2851_v37, 4  ;;  %v2926_v4 = vsel %vm323_vm1, %v2911_v6, %v2925_v48 }
 0x686   :  { %v2676_v44 = vsel %vm323_vm1, 0.0, %v2675_v30  ;;  %v2934_v14 = vperm.slane %v2926_v4, %v4637_v52 }
 0x687   :  { %v2679_v42 = vrot.slane %v2670_v62, 4  ;;  %v2858_v0 = vsel %vm323_vm1, %v2681_v1, %v2670_v62  ;;  %v2853_v18 = vsel %vm323_vm1, %v2852_v49, %v2676_v44  ;;  %v2924_v47 = vsel %vm323_vm1, %v2923_v55, %v2905_v17 }
 0x688   :  { %v2862_v41 = vperm.slane %v2858_v0, %v4625_v29  ;;  %v2857_v63 = vperm.slane %v2853_v18, %v4625_v29  ;;  %v2930_v61 = vperm.slane %v2924_v47, %v4637_v52  ;;  %v2953_v49 = vrot.slane %v2934_v14, 4 }
 0x689   :  { %v2680_v51 = vsel %vm323_vm1, 0.0, %v2679_v42 }
 0x68a   :  { %v2864_v54 = vsel %vm323_vm1, %v2863_v20, %v2680_v51  ;;  %v2883_v2 = vrot.slane %v2862_v41, 4  ;;  %v2869_v15 = vrot.slane %v2857_v63, 4  ;;  %v2872_v33 = vsel %vm323_vm1, %v2857_v63, %v2871_v43 }
 0x68b   :  { %v2868_v59 = vperm.slane %v2864_v54, %v4625_v29  ;;  %v2880_v13 = vperm.slane %v2872_v33, %v4637_v52 }
 0x68c   :  { %v2870_v11 = vsel %vm323_vm1, %v2869_v15, %v2851_v37 }
 0x68d   :  { %v2881_v22 = vrot.slane %v2868_v59, 4  ;;  %v2884_v45 = vsel %vm323_vm1, %v2868_v59, %v2883_v2  ;;  %v2876_v8 = vperm.slane %v2870_v11, %v4637_v52 }
 0x68f   :  { %v2882_v39 = vsel %vm323_vm1, %v2881_v22, %v2862_v41  ;;  %v2895_v60 = vrot.slane %v2876_v8, 4 }
 0x690   :  { %v2888_v62 = vperm.slane %v2882_v39, %v4637_v52 }
 0x692   :  { %v2893_v16 = vrot.slane %v2888_v62, 4 }
 0x694   :  { %3850 = vmatmul.msk.bf16.vlgmr.msra.gmra.mxu1 %vm1062_vm2, %v2961_v23  ;;  %v2735_v23 = vrot.slane %v2726_v7, 4  ;;  %v2894_v44 = vsel %vm323_vm1, %v2893_v16, %v2876_v8 }
 0x695   :  { %v3270_v51 = vpack.c.bf16 %v2894_v44, %v2894_v44 }
 0x696   :  { %v2736_v31 = vsel %vm323_vm1, 0.0, %v2735_v23  ;;  %v2892_v23 = vperm.slane %v2884_v45, %v4637_v52 }
 0x697   :  { %v2918_v32 = vsel %vm323_vm1, %v2917_v35, %v2736_v31  ;;  %v2949_v35 = vrot.slane %v2930_v61, 4  ;;  %v2899_v31 = vrot.slane %v2880_v13, 4  ;;  %v3308_v37 = vunpack.c.l.b16 %v3270_v51 }
 0x698   :  { %v2922_v36 = vperm.slane %v2918_v32, %v4625_v29  ;;  %v2897_v26 = vrot.slane %v2892_v23, 4 }
 0x699   :  { %v2900_v28 = vsel %vm323_vm1, %v2892_v23, %v2899_v31 }
 0x69a   :  { %v2935_v19 = vrot.slane %v2922_v36, 4  ;;  %v2938_v3 = vsel %vm323_vm1, %v2922_v36, %v2937_v40  ;;  %v2898_v30 = vsel %vm323_vm1, %v2897_v26, %v2880_v13  ;;  %v2896_v40 = vsel %vm323_vm1, %v2888_v62, %v2895_v60 }
 0x69b   :  { %v2946_v34 = vperm.slane %v2938_v3, %v4637_v52  ;;  %v3278_v1 = vpack.c.bf16 %v2898_v30, %v2898_v30  ;;  %v3274_v25 = vpack.c.bf16 %v2896_v40, %v2896_v40  ;;  %v3282_v0 = vpack.c.bf16 %v2900_v28, %v2900_v28 }
 0x69c   :  { %v2936_v58 = vsel %vm323_vm1, %v2935_v19, %v2916_v50 }
 0x69d   :  { %v2942_v7 = vperm.slane %v2936_v58, %v4637_v52  ;;  %v2951_v32 = vrot.slane %v2946_v34, 4  ;;  %v3396_v38 = vunpack.c.l.b16 %v3278_v1  ;;  %v3352_v41 = vunpack.c.l.b16 %v3274_v25 }
 0x69e   :  { %v2954_v6 = vsel %vm323_vm1, %v2946_v34, %v2953_v49  ;;  %v3440_v3 = vunpack.c.l.b16 %v3282_v0 }
 0x69f   :  { %v2947_v5 = vrot.slane %v2942_v7, 4  ;;  %v2950_v50 = vsel %vm323_vm1, %v2942_v7, %v2949_v35  ;;  %v2952_v42 = vsel %vm323_vm1, %v2951_v32, %v2934_v14  ;;  %v3283_v48 = vpack.c.bf16 %v2954_v6, %v2954_v6 }
 0x6a0   :  { %v3275_v36 = vpack.c.bf16 %v2950_v50, %v2950_v50  ;;  %v3279_v17 = vpack.c.bf16 %v2952_v42, %v2952_v42 }
 0x6a1   :  { %v2948_v21 = vsel %vm323_vm1, %v2947_v5, %v2930_v61  ;;  %v3441_v63 = vunpack.c.l.b16 %v3283_v48 }
 0x6a2   :  { %v3271_v9 = vpack.c.bf16 %v2948_v21, %v2948_v21  ;;  %v3353_v46 = vunpack.c.l.b16 %v3275_v36  ;;  %v3397_v20 = vunpack.c.l.b16 %v3279_v17  ;;  %v4058_v21 = vpack.i.bf16 %v5291_v56, %v5289_v24 }
 0x6a3   :  { %v3442_v58 = vpack.c.b16 %v3441_v63, %v3440_v3 }
 0x6a4   :  { %v3309_v53 = vunpack.c.l.b16 %v3271_v9  ;;  %v3354_v18 = vpack.c.b16 %v3353_v46, %v3352_v41  ;;  %v3398_v19 = vpack.c.b16 %v3397_v20, %v3396_v38 }
 0x6a6   :  { %v3310_v54 = vpack.c.b16 %v3309_v53, %v3308_v37  ;;  %3366 = vmatpush.bf16.msrb.mxu2 %v3354_v18 }
 0x6a8   :  { %3322 = vmatpush.bf16.msra.mxu0 %v3310_v54 }
 0x6aa   :  { %3454 = vmatpush.bf16.msra.mxu2 %v3442_v58 }
 0x6ac   :  { %3410 = vmatpush.bf16.msrb.mxu0 %v3398_v19 }
 0x6d7   :  { %v5633_v27 = vpop.f32.mrf.mxu0 }
 0x6d8   :  { %v3187_v45 = vsel %vm3171_vm11, %v5633_v27, -inf }
 0x6df   :  { %v3121_v2 = vpop.f32.mrf.mxu0 }
 0x6e0   :  { %v3023_v55 = vpop.f32.mrf.mxu2 }
 0x6e1   :  { %v3175_v59 = vsel %vm3171_vm11, %v3023_v55, -inf }
 0x6e2   :  { %3176 = vmax.xlane.f32.xlu2 %v3175_v59 }
 0x6e8   :  { %v3025_v43 = vpop.f32.mrf.mxu2 }
 0x6e9   :  { %v2517_v43 = vrot.slane %v5289_v24, 4 }
 0x6f0   :  { %v3071_v4 = vpop.f32.mrf.mxu2 }
 0x6f1   :  { %v2999_v15 = vpop.f32.mrf.mxu1  ;;  %v3181_v47 = vsel %vm3171_vm11, %v3071_v4, -inf }
 0x6f2   :  { %v3172_v7 = vsel %vm3171_vm11, %v2999_v15, -inf  ;;  %3182 = vmax.xlane.f32.xlu2 %v3181_v47  ;;  %v2573_v47 = vrot.slane %v5291_v56, 4 }
 0x6f3   :  { %3173 = vmax.xlane.f32.xlu0 %v3172_v7 }
 0x6f5   :  { %v3095_v14 = vpop.f32.mrf.mxu3 }
 0x6f6   :  { %v3184_v22 = vsel %vm3171_vm11, %v3095_v14, -inf }
 0x6f7   :  { %3185 = vmax.xlane.f32.xlu1 %v3184_v22 }
 0x6f8   :  { %v3073_v61 = vpop.f32.mrf.mxu2 }
 0x6f9   :  { %v3001_v33 = vpop.f32.mrf.mxu1 }
 0x6fb   :  { %3188 = vmax.xlane.f32.xlu0 %v3187_v45 }
 0x6fd   :  { %v3097_v11 = vpop.f32.mrf.mxu3 }
 0x700   :  { %v3167_v5 = vpop.f32.mrf.mxu2 }
 0x701   :  { %v3047_v13 = vpop.f32.mrf.mxu1  ;;  %v3193_v23 = vsel %vm3171_vm11, %v3167_v5, -inf }
 0x702   :  { %v3178_v8 = vsel %vm3171_vm11, %v3047_v13, -inf }
 0x703   :  { %3179 = vmax.xlane.f32.xlu1 %v3178_v8  ;;  %3194 = vmax.xlane.f32.xlu0 %v3193_v23 }
 0x708   :  { %v3169_v39 = vpop.f32.mrf.mxu2 }
 0x709   :  { %v3049_v35 = vpop.f32.mrf.mxu1 }
 0x711   :  { %v3143_v34 = vpop.f32.mrf.mxu1 }
 0x712   :  { %v3190_v62 = vsel %vm3171_vm11, %v3143_v34, -inf }
 0x713   :  { %3191 = vmax.xlane.f32.xlu2 %v3190_v62 }
 0x717   :  { %4059 = vrot.lane.b32.xlu0 %v4058_v21, %s4443_s4 }
 0x719   :  { %v3145_v26 = vpop.f32.mrf.mxu1 }
 0x71c   :  { %4054 = vrot.lane.b32.xlu1 %v4058_v21, %s4445_s5 }
 0x72b   :  { %4064 = vrot.lane.b32.xlu2 %v4058_v21, %s4444_s17  ;;  %s3759_s17 = sshll.u32 %s5860_s15, 4  ;;  %s3760_s17 = int_to_ptr.hbm [resolvable:$true] %s3759_s17 }
 0x755   :  { %v3177_v31 = vpop.xlane.xlu2 %3176 }
 0x756   :  { %v3197_v16 = vsub.f32 %v3023_v55, %v3177_v31 }
 0x758   :  { %v3206_v28 = vmul.f32 1.442695, %v3197_v16 }
 0x765   :  { %v3183_v9 = vpop.xlane.xlu2 %3182 }
 0x766   :  { %v3174_v60 = vpop.xlane.xlu0 %3173  ;;  %v3199_v50 = vsub.f32 %v3071_v4, %v3183_v9 }
 0x767   :  { %v3196_v32 = vsub.f32 %v2999_v15, %v3174_v60 }
 0x768   :  { %v3210_v36 = vmul.f32 1.442695, %v3199_v50 }
 0x769   :  { %v3204_v30 = vmul.f32 1.442695, %v3196_v32 }
 0x76a   :  { %4107 = vpow2.f32 %v3210_v36  ;;  %v3186_v53 = vpop.xlane.xlu1 %3185 }
 0x76b   :  { %4109 = vpow2.f32 %v3204_v30  ;;  %v3200_v0 = vsub.f32 %v3095_v14, %v3186_v53 }
 0x76c   :  { %4111 = vpow2.f32 %v3206_v28 }
 0x76d   :  { %v3212_v18 = vmul.f32 1.442695, %v3200_v0 }
 0x76e   :  { %v3189_v40 = vpop.xlane.xlu0 %3188 }
 0x76f   :  { %v3201_v6 = vsub.f32 %v5633_v27, %v3189_v40 }
 0x770   :  { %v5655_v42 = vpop.eup %4107 }
 0x771   :  { %v5657_v1 = vpop.eup %4109  ;;  %v3229_v44 = vsel %vm3171_vm11, %v5655_v42, 0.0  ;;  %v3214_v19 = vmul.f32 1.442695, %v3201_v6 }
 0x772   :  { %v3220_v25 = vsel %vm3171_vm11, %v5657_v1, 0.0  ;;  %3230 = vadd.xlane.f32.xlu1 %v3229_v44  ;;  %v5663_v46 = vpop.eup %4111 }
 0x773   :  { %3221 = vadd.xlane.f32.xlu0 %v3220_v25  ;;  %v3223_v37 = vsel %vm3171_vm11, %v5663_v46, 0.0 }
 0x776   :  { %v3180_v17 = vpop.xlane.xlu1 %3179  ;;  %v3195_v51 = vpop.xlane.xlu0 %3194 }
 0x777   :  { %v3198_v38 = vsub.f32 %v3047_v13, %v3180_v17  ;;  %v3203_v49 = vsub.f32 %v3167_v5, %v3195_v51 }
 0x779   :  { %v3208_v41 = vmul.f32 1.442695, %v3198_v38  ;;  %v3218_v20 = vmul.f32 1.442695, %v3203_v49 }
 0x77a   :  { %3224 = vadd.xlane.f32.xlu1 %v3223_v37 }
 0x77b   :  { %4113 = vpow2.f32 %v3208_v41 }
 0x77c   :  { %4115 = vpow2.f32 %v3218_v20 }
 0x77d   :  { %4117 = vpow2.f32 %v3212_v18 }
 0x77e   :  { %4119 = vpow2.f32 %v3214_v19 }
 0x781   :  { %v5668_v48 = vpop.eup %4113 }
 0x782   :  { %v5670_v3 = vpop.eup %4115  ;;  %v3226_v54 = vsel %vm3171_vm11, %v5668_v48, 0.0 }
 0x783   :  { %3227 = vadd.xlane.f32.xlu2 %v3226_v54  ;;  %v3241_v2 = vsel %vm3171_vm11, %v5670_v3, 0.0  ;;  %v5676_v63 = vpop.eup %4117 }
 0x784   :  { %3242 = vadd.xlane.f32.xlu0 %v3241_v2  ;;  %v5678_v59 = vpop.eup %4119  ;;  %v3232_v15 = vsel %vm3171_vm11, %v5676_v63, 0.0 }
 0x785   :  { %v3235_v22 = vsel %vm3171_vm11, %v5678_v59, 0.0 }
 0x786   :  { %v3192_v27 = vpop.xlane.xlu2 %3191 }
 0x787   :  { %v3202_v55 = vsub.f32 %v3143_v34, %v3192_v27 }
 0x789   :  { %v3216_v58 = vmul.f32 1.442695, %v3202_v55  ;;  %v4060_v4 = vpop.permute.xlu0 %4059 }
 0x78a   :  { %v4062_v7 = vunpack.i.h.bf16 %v4060_v4  ;;  %v4061_v14 = vunpack.i.l.bf16 %v4060_v4 }
 0x78b   :  { %4121 = vpow2.f32 %v3216_v58  ;;  %3233 = vadd.xlane.f32.xlu2 %v3232_v15 }
 0x78c   :  { %v2571_v61 = vrot.slane %v4062_v7, 4  ;;  %v2574_v33 = vsel %vm323_vm1, %v4062_v7, %v2573_v47  ;;  %v2515_v45 = vrot.slane %v4061_v14, 4  ;;  %v2518_v11 = vsel %vm323_vm1, %v4061_v14, %v2517_v43  ;;  %3236 = vadd.xlane.f32.xlu0 %v3235_v22 }
 0x78d   :  { %v2582_v5 = vperm.slane %v2574_v33, %v4625_v29  ;;  %v2526_v35 = vperm.slane %v2518_v11, %v4625_v29 }
 0x78e   :  { %v4055_v13 = vpop.permute.xlu1 %4054  ;;  %v4065_v23 = vpop.permute.xlu2 %4064  ;;  %v2572_v8 = vsel %vm323_vm1, %v2571_v61, %v5291_v56  ;;  %v2516_v39 = vsel %vm323_vm1, %v2515_v45, %v5289_v24 }
 0x78f   :  { %v4057_v34 = vunpack.i.h.bf16 %v4055_v13  ;;  %v4056_v62 = vunpack.i.l.bf16 %v4055_v13  ;;  %v4067_v21 = vunpack.i.h.bf16 %v4065_v23  ;;  %v4066_v26 = vunpack.i.l.bf16 %v4065_v23 }
 0x790   :  { %v2578_v31 = vperm.slane %v2572_v8, %v4625_v29  ;;  %v2609_v9 = vrot.slane %v2582_v5, 4  ;;  %v2522_v60 = vperm.slane %v2516_v39, %v4625_v29  ;;  %v2553_v53 = vrot.slane %v2526_v35, 4 }
 0x791   :  { %v5696_v50 = vpop.eup %4121  ;;  %v2585_v32 = vrot.slane %v4057_v34, 4  ;;  %v2529_v16 = vrot.slane %v4056_v62, 4  ;;  %v2583_v36 = vrot.slane %v4067_v21, 4  ;;  %v2527_v56 = vrot.slane %v4066_v26, 4 }
 0x792   :  { %v3238_v24 = vsel %vm3171_vm11, %v5696_v50, 0.0  ;;  %v2597_v30 = vrot.slane %v2578_v31, 4  ;;  %v2541_v28 = vrot.slane %v2522_v60, 4 }
 0x793   :  { %v2584_v40 = vsel %vm323_vm1, %v2583_v36, %v4057_v34  ;;  %v2586_v44 = vsel %vm323_vm1, %v4067_v21, %v2585_v32  ;;  %v2528_v25 = vsel %vm323_vm1, %v2527_v56, %v4056_v62  ;;  %v2530_v17 = vsel %vm323_vm1, %v4066_v26, %v2529_v16  ;;  %3239 = vadd.xlane.f32.xlu1 %v3238_v24 }
 0x794   :  { %v2590_v51 = vperm.slane %v2584_v40, %v4625_v29  ;;  %v2594_v38 = vperm.slane %v2586_v44, %v4625_v29  ;;  %v2534_v49 = vperm.slane %v2528_v25, %v4625_v29  ;;  %v2538_v0 = vperm.slane %v2530_v17, %v4625_v29 }
 0x796   :  { %v2595_v41 = vrot.slane %v2590_v51, 4  ;;  %v2607_v20 = vrot.slane %v2594_v38, 4  ;;  %v2539_v37 = vrot.slane %v2534_v49, 4  ;;  %v2551_v6 = vrot.slane %v2538_v0, 4 }
 0x797   :  { %v2598_v18 = vsel %vm323_vm1, %v2590_v51, %v2597_v30  ;;  %v2610_v19 = vsel %vm323_vm1, %v2594_v38, %v2609_v9  ;;  %v2542_v54 = vsel %vm323_vm1, %v2534_v49, %v2541_v28  ;;  %v2554_v2 = vsel %vm323_vm1, %v2538_v0, %v2553_v53 }
 0x798   :  { %v2596_v27 = vsel %vm323_vm1, %v2595_v41, %v2578_v31  ;;  %v2606_v55 = vperm.slane %v2598_v18, %v4637_v52  ;;  %v2608_v58 = vsel %vm323_vm1, %v2607_v20, %v2582_v5  ;;  %v2618_v43 = vperm.slane %v2610_v19, %v4637_v52 }
 0x799   :  { %v2602_v4 = vperm.slane %v2596_v27, %v4637_v52  ;;  %v2614_v15 = vperm.slane %v2608_v58, %v4637_v52  ;;  %v2540_v47 = vsel %vm323_vm1, %v2539_v37, %v2522_v60  ;;  %v2550_v7 = vperm.slane %v2542_v54, %v4637_v52 }
 0x79a   :  { %v2621_v14 = vrot.slane %v2606_v55, 4  ;;  %v2625_v22 = vrot.slane %v2618_v43, 4  ;;  %v2546_v61 = vperm.slane %v2540_v47, %v4637_v52  ;;  %v2552_v33 = vsel %vm323_vm1, %v2551_v6, %v2526_v35 }
 0x79b   :  { %v2619_v45 = vrot.slane %v2602_v4, 4  ;;  %v2623_v11 = vrot.slane %v2614_v15, 4  ;;  %v2558_v5 = vperm.slane %v2552_v33, %v4637_v52  ;;  %v2562_v13 = vperm.slane %v2554_v2, %v4637_v52 }
 0x79c   :  { %v2622_v23 = vsel %vm323_vm1, 0.0, %v2621_v14  ;;  %v2626_v8 = vsel %vm323_vm1, 0.0, %v2625_v22  ;;  %v2793_v39 = vsel %vm323_vm1, %v2621_v14, %v2602_v4  ;;  %v2804_v34 = vsel %vm323_vm1, %v2625_v22, %v2614_v15 }
 0x79d   :  { %v2620_v62 = vsel %vm323_vm1, 0.0, %v2619_v45  ;;  %v2624_v21 = vsel %vm323_vm1, 0.0, %v2623_v11  ;;  %v2798_v26 = vrot.slane %v2622_v23, 4  ;;  %v2808_v35 = vperm.slane %v2804_v34, %v4625_v29 }
 0x79e   :  { %v2809_v31 = vrot.slane %v2626_v8, 4  ;;  %v2563_v9 = vrot.slane %v2546_v61, 4  ;;  %v2565_v60 = vrot.slane %v2550_v7, 4  ;;  %v2567_v32 = vrot.slane %v2558_v5, 4 }
 0x79f   :  { %v2799_v16 = vsel %vm323_vm1, %v2798_v26, %v2620_v62  ;;  %v2829_v36 = vrot.slane %v2808_v35, 4  ;;  %v2569_v56 = vrot.slane %v2562_v13, 4  ;;  %v2797_v24 = vperm.slane %v2793_v39, %v4625_v29 }
 0x7a0   :  { %v2803_v30 = vperm.slane %v2799_v16, %v4625_v29  ;;  %v2810_v28 = vsel %vm323_vm1, %v2809_v31, %v2624_v21  ;;  %v2564_v53 = vsel %vm323_vm1, 0.0, %v2563_v9  ;;  %v2566_v40 = vsel %vm323_vm1, 0.0, %v2565_v60 }
 0x7a1   :  { %v2814_v44 = vperm.slane %v2810_v28, %v4625_v29  ;;  %v2568_v25 = vsel %vm323_vm1, 0.0, %v2567_v32  ;;  %v2570_v17 = vsel %vm323_vm1, 0.0, %v2569_v56  ;;  %v2739_v51 = vsel %vm323_vm1, %v2565_v60, %v2546_v61 }
 0x7a2   :  { %v2744_v38 = vrot.slane %v2566_v40, 4  ;;  %v2750_v49 = vsel %vm323_vm1, %v2569_v56, %v2558_v5  ;;  %v2755_v0 = vrot.slane %v2570_v17, 4  ;;  %v2743_v41 = vperm.slane %v2739_v51, %v4625_v29 }
 0x7a3   :  { %v2827_v20 = vrot.slane %v2814_v44, 4  ;;  %v2754_v37 = vperm.slane %v2750_v49, %v4625_v29  ;;  %v2815_v6 = vrot.slane %v2803_v30, 4  ;;  %v2817_v18 = vrot.slane %v2797_v24, 4 }
 0x7a4   :  { %v2745_v19 = vsel %vm323_vm1, %v2744_v38, %v2564_v53  ;;  %v2756_v54 = vsel %vm323_vm1, %v2755_v0, %v2568_v25  ;;  %v2763_v2 = vrot.slane %v2743_v41, 4  ;;  %v2830_v27 = vsel %vm323_vm1, %v2814_v44, %v2829_v36 }
 0x7a5   :  { %v2749_v55 = vperm.slane %v2745_v19, %v4625_v29  ;;  %v2760_v58 = vperm.slane %v2756_v54, %v4625_v29  ;;  %v2775_v43 = vrot.slane %v2754_v37, 4  ;;  %v2816_v4 = vsel %vm323_vm1, %v2815_v6, %v2797_v24 }
 0x7a6   :  { %v2822_v15 = vperm.slane %v2816_v4, %v4637_v52  ;;  %v2828_v47 = vsel %vm323_vm1, %v2827_v20, %v2808_v35  ;;  %v2818_v7 = vsel %vm323_vm1, %v2803_v30, %v2817_v18  ;;  %v2838_v14 = vperm.slane %v2830_v27, %v4637_v52 }
 0x7a7   :  { %v2773_v22 = vrot.slane %v2760_v58, 4  ;;  %v2761_v61 = vrot.slane %v2749_v55, 4  ;;  %v2834_v33 = vperm.slane %v2828_v47, %v4637_v52  ;;  %v2764_v45 = vsel %vm323_vm1, %v2749_v55, %v2763_v2 }
 0x7a8   :  { %v2772_v11 = vperm.slane %v2764_v45, %v4637_v52  ;;  %v2776_v29 = vsel %vm323_vm1, %v2760_v58, %v2775_v43  ;;  %v2826_v5 = vperm.slane %v2818_v7, %v4637_v52  ;;  %v2843_v13 = vrot.slane %v2838_v14, 4 }
 0x7a9   :  { %v2762_v23 = vsel %vm323_vm1, %v2761_v61, %v2743_v41  ;;  %v2774_v8 = vsel %vm323_vm1, %v2773_v22, %v2754_v37  ;;  %v2839_v39 = vrot.slane %v2834_v33, 4  ;;  %v2784_v34 = vperm.slane %v2776_v29, %v4637_v52 }
 0x7aa   :  { %v2768_v62 = vperm.slane %v2762_v23, %v4637_v52  ;;  %v2780_v21 = vperm.slane %v2774_v8, %v4637_v52  ;;  %v2844_v26 = vsel %vm323_vm1, %v2843_v13, %v2826_v5  ;;  %v2841_v35 = vrot.slane %v2822_v15, 4 }
 0x7ab   :  { %v2840_v31 = vsel %vm323_vm1, %v2839_v39, %v2822_v15  ;;  %v2789_v9 = vrot.slane %v2784_v34, 4  ;;  %v3277_v60 = vpack.c.bf16 %v2844_v26, %v2844_v26  ;;  %v2791_v32 = vrot.slane %v2772_v11, 4 }
 0x7ac   :  { %v2785_v16 = vrot.slane %v2780_v21, 4  ;;  %v3269_v36 = vpack.c.bf16 %v2840_v31, %v2840_v31  ;;  %v2787_v56 = vrot.slane %v2768_v62, 4  ;;  %v2842_v24 = vsel %vm323_vm1, %v2834_v33, %v2841_v35 }
 0x7ad   :  { %v2790_v30 = vsel %vm323_vm1, %v2789_v9, %v2772_v11  ;;  %v3273_v28 = vpack.c.bf16 %v2842_v24, %v2842_v24  ;;  %v2792_v53 = vsel %vm323_vm1, %v2784_v34, %v2791_v32  ;;  %v2845_v49 = vrot.slane %v2826_v5, 4  ;;  %v3461_v24 = vld [vmem:[#allocation14] sm:$0xf] }
 0x7ae   :  { %v2786_v52 = vsel %vm323_vm1, %v2785_v16, %v2768_v62  ;;  %v3287_v40 = vunpack.c.l.b16 %v3269_v36  ;;  %v3276_v44 = vpack.c.bf16 %v2790_v30, %v2790_v30  ;;  %v2788_v25 = vsel %vm323_vm1, %v2780_v21, %v2787_v56  ;;  %v3463_v56 = vld [vmem:[#allocation14 + $0x4] sm:$0xf] }
 0x7af   :  { %v3268_v17 = vpack.c.bf16 %v2786_v52, %v2786_v52  ;;  %v3272_v51 = vpack.c.bf16 %v2788_v25, %v2788_v25  ;;  %v3331_v38 = vunpack.c.l.b16 %v3273_v28  ;;  %v3375_v41 = vunpack.c.l.b16 %v3277_v60  ;;  %v3505_v28 = vld [vmem:[#allocation14 + $0x8] sm:$0xf] }
 0x7b0   :  { %v3374_v0 = vunpack.c.l.b16 %v3276_v44  ;;  %v3280_v20 = vpack.c.bf16 %v2792_v53, %v2792_v53  ;;  %v2846_v18 = vsel %vm323_vm1, %v2838_v14, %v2845_v49  ;;  %v3488_v30 = vsel %vm1322_vm3, %v3461_v24, 0  ;;  %v3900_v24 = vld [vmem:[#allocation16] sm:$0xff] }
 0x7b1   :  { %v3286_v37 = vunpack.c.l.b16 %v3268_v17  ;;  %v3330_v6 = vunpack.c.l.b16 %v3272_v51  ;;  %v3281_v19 = vpack.c.bf16 %v2846_v18, %v2846_v18  ;;  %v3510_v52 = vsel %vm1322_vm3, %v3505_v28, 0 }
 0x7b2   :  { %v3418_v54 = vunpack.c.l.b16 %v3280_v20  ;;  %v3376_v55 = vpack.c.b16 %v3375_v41, %v3374_v0 }
 0x7b3   :  { %v3288_v2 = vpack.c.b16 %v3287_v40, %v3286_v37  ;;  %v3332_v27 = vpack.c.b16 %v3331_v38, %v3330_v6  ;;  %v3419_v58 = vunpack.c.l.b16 %v3281_v19 }
 0x7b5   :  { %3300 = vmatpush.bf16.msrb.mxu3 %v3288_v2  ;;  %3344 = vmatpush.bf16.msrb.mxu1 %v3332_v27  ;;  %v3420_v43 = vpack.c.b16 %v3419_v58, %v3418_v54 }
 0x7b9   :  { %3388 = vmatpush.bf16.msra.mxu3 %v3376_v55  ;;  %3432 = vmatpush.bf16.msra.mxu1 %v3420_v43 }
 0x7e5   :  { %v3231_v4 = vpop.xlane.xlu1 %3230 }
 0x7e6   :  { %v3222_v15 = vpop.xlane.xlu0 %3221  ;;  %4123 = vrcp.f32 %v3231_v4 }
 0x7e7   :  { %4125 = vrcp.f32 %v3222_v15 }
 0x7ec   :  { %v4124_v47 = vpop.eup %4123 }
 0x7ed   :  { %v4126_v7 = vpop.eup %4125  ;;  %v3255_v22 = vmul.f32 %v4124_v47, %v5655_v42  ;;  %v3225_v14 = vpop.xlane.xlu1 %3224 }
 0x7ee   :  { %v3252_v61 = vmul.f32 %v4126_v7, %v5657_v1  ;;  %4127 = vrcp.f32 %v3225_v14 }
 0x7ef   :  { %v3263_v33 = vpack.c.bf16 %v3255_v22, %v3255_v22  ;;  %v4148_v22 = vld [vmem:[#allocation17] sm:$0xff] }
 0x7f0   :  { %v3260_v45 = vpack.c.bf16 %v3252_v61, %v3252_v61  ;;  %v3552_v14 = vperm.slane %v4148_v22, 7 }
 0x7f1   :  { %3855 = vmatmul.msk.bf16.vlgmr.msrb.gmra.mxu2 %vm3171_vm11, %v3263_v33 }
 0x7f2   :  { %3852 = vmatmul.msk.bf16.vlgmr.msrb.gmra.mxu3 %vm3171_vm11, %v3260_v45 }
 0x7f4   :  { %v4128_v11 = vpop.eup %4127 }
 0x7f5   :  { %v3253_v29 = vmul.f32 %v4128_v11, %v5663_v46 }
 0x7f6   :  { %v3228_v5 = vpop.xlane.xlu2 %3227 }
 0x7f7   :  { %4129 = vrcp.f32 %v3228_v5  ;;  %v3261_v13 = vpack.c.bf16 %v3253_v29, %v3253_v29  ;;  %v3243_v23 = vpop.xlane.xlu0 %3242 }
 0x7f8   :  { %4131 = vrcp.f32 %v3243_v23 }
 0x7f9   :  { %3853 = vmatmul.msk.bf16.vlgmr.msra.gmra.mxu0 %vm3171_vm11, %v3261_v13 }
 0x7fa   :  { %3497 = vmatpush.bf16.msra.mxu0 %v3488_v30 }
 0x7fd   :  { %v4130_v42 = vpop.eup %4129 }
 0x7fe   :  { %v4132_v8 = vpop.eup %4131  ;;  %v3254_v1 = vmul.f32 %v4130_v42, %v5668_v48  ;;  %v3234_v39 = vpop.xlane.xlu2 %3233 }
 0x7ff   :  { %4133 = vrcp.f32 %v3234_v39  ;;  %v3259_v34 = vmul.f32 %v4132_v8, %v5670_v3  ;;  %v3237_v62 = vpop.xlane.xlu0 %3236 }
 0x800   :  { %v3262_v21 = vpack.c.bf16 %v3254_v1, %v3254_v1  ;;  %4135 = vrcp.f32 %v3237_v62 }
 0x801   :  { %v3267_v26 = vpack.c.bf16 %v3259_v34, %v3259_v34 }
 0x802   :  { %3854 = vmatmul.msk.bf16.vlgmr.msrb.gmra.mxu1 %vm3171_vm11, %v3262_v21 }
 0x803   :  { %3859 = vmatmul.msk.bf16.vlgmr.msra.gmra.mxu2 %vm3171_vm11, %v3267_v26  ;;  %3519 = vmatpush.bf16.msrb.mxu1 %v3510_v52 }
 0x805   :  { %v4134_v46 = vpop.eup %4133 }
 0x806   :  { %v4136_v35 = vpop.eup %4135  ;;  %v3256_v31 = vmul.f32 %v4134_v46, %v5676_v63  ;;  %v3240_v9 = vpop.xlane.xlu1 %3239  ;;  %v3468_v63 = vsel %vm1322_vm3, %v3463_v56, 0  ;;  %v3901_v56 = vld [vmem:[#allocation16 + $0x8] sm:$0xff] }
 0x807   :  { %4137 = vrcp.f32 %v3240_v9  ;;  %v3257_v48 = vmul.f32 %v4136_v35, %v5678_v59  ;;  %3477 = vmatpush.bf16.msrb.mxu3 %v3468_v63  ;;  %v3529_v59 = vld [vmem:[#allocation14 + $0xc] sm:$0xf] }
 0x808   :  { %v3264_v60 = vpack.c.bf16 %v3256_v31, %v3256_v31  ;;  %v3534_v53 = vsel %vm1322_vm3, %v3529_v59, 0  ;;  %vm3681_vm3 = vcmask 523264  }
 0x809   :  { %v3265_v32 = vpack.c.bf16 %v3257_v48, %v3257_v48  ;;  %3543 = vmatpush.bf16.msrb.mxu2 %v3534_v53 }
 0x80a   :  { %3856 = vmatmul.msk.bf16.vlgmr.msra.gmra.mxu3 %vm3171_vm11, %v3264_v60 }
 0x80b   :  { %3857 = vmatmul.msk.bf16.vlgmr.msrb.gmra.mxu0 %vm3171_vm11, %v3265_v32  ;;  %3637 = vmatpush.bf16.msra.mxu3 %v3901_v56 }
 0x80d   :  { %v4138_v3 = vpop.eup %4137 }
 0x80e   :  { %v3258_v16 = vmul.f32 %v4138_v3, %v5696_v50 }
 0x80f   :  { %3638 = vmatpush.bf16.msra.mxu3 %v3900_v24 }
 0x810   :  { %v3266_v36 = vpack.c.bf16 %v3258_v16, %v3258_v16 }
 0x812   :  { %3858 = vmatmul.msk.bf16.vlgmr.msra.gmra.mxu1 %vm3171_vm11, %v3266_v36 }
 0x874   :  { %v3368_v50 = vpop.f32.mrf.mxu2 }
 0x875   :  { %v3302_v40 = vpop.f32.mrf.mxu3 }
 0x876   :  { %v3324_v44 = vpop.f32.mrf.mxu0 }
 0x877   :  { %v3460_v25 = vpack.c.bf16 %v3324_v44, %v3302_v40 }
 0x879   :  { %3861 = vmatmul.msk.bf16.vlgmr.msra.gmra.mxu0 %vm1062_vm2, %v3460_v25 }
 0x87c   :  { %v3370_v17 = vpop.f32.mrf.mxu2 }
 0x87d   :  { %v3304_v51 = vpop.f32.mrf.mxu3 }
 0x87e   :  { %v3326_v38 = vpop.f32.mrf.mxu0 }
 0x87f   :  { %v3346_v49 = vpop.f32.mrf.mxu1 }
 0x880   :  { %v3462_v0 = vpack.c.bf16 %v3368_v50, %v3346_v49 }
 0x882   :  { %3860 = vmatmul.msk.bf16.vlgmr.msrb.gmra.mxu3 %vm1062_vm2, %v3462_v0 }
 0x886   :  { %v3456_v41 = vpop.f32.mrf.mxu2 }
 0x887   :  { %v3348_v20 = vpop.f32.mrf.mxu1 }
 0x888   :  { %v3412_v37 = vpop.f32.mrf.mxu0 }
 0x88d   :  { %v3390_v6 = vpop.f32.mrf.mxu3 }
 0x88e   :  { %v3504_v18 = vpack.c.bf16 %v3412_v37, %v3390_v6  ;;  %v3458_v19 = vpop.f32.mrf.mxu2 }
 0x88f   :  { %v3434_v54 = vpop.f32.mrf.mxu1 }
 0x890   :  { %v3528_v2 = vpack.c.bf16 %v3456_v41, %v3434_v54  ;;  %3862 = vmatmul.msk.bf16.vlgmr.msrb.gmra.mxu1 %vm1062_vm2, %v3504_v18  ;;  %v3414_v27 = vpop.f32.mrf.mxu0  ;;  %v5806_v41 = vld [vmem:[#allocation17 + $0x8] sm:$0xff] }
 0x891   :  { %v3601_v20 = vperm.slane %v5806_v41, 3  ;;  %v3604_v19 = vperm.slane %v5806_v41, 4 }
 0x892   :  { %3863 = vmatmul.msk.bf16.vlgmr.msrb.gmra.mxu2 %vm1062_vm2, %v3528_v2 }
 0x895   :  { %v3392_v55 = vpop.f32.mrf.mxu3 }
 0x897   :  { %v3436_v58 = vpop.f32.mrf.mxu1 }
 0x8f6   :  { %v3499_v4 = vpop.f32.mrf.mxu0 }
 0x8fe   :  { %v3501_v29 = vpop.f32.mrf.mxu0 }
 0x905   :  { %v3479_v43 = vpop.f32.mrf.mxu3 }
 0x906   :  { %v3500_v47 = vadd.f32 %v3499_v4, %v3479_v43  ;;  %v3905_v4 = vld [vmem:[%s5857_s12 + $0x18] sm:$0xff] }
 0x907   :  { %3689 = vmatpush.bf16.msrb.mxu0 %v3905_v4 }
 0x90d   :  { %v3521_v15 = vpop.f32.mrf.mxu1  ;;  %v3481_v45 = vpop.f32.mrf.mxu3 }
 0x90e   :  { %v3526_v7 = vadd.f32 %v3521_v15, %v3500_v47  ;;  %v3502_v13 = vadd.f32 %v3501_v29, %v3481_v45  ;;  %v3904_v15 = vld [vmem:[%s5857_s12 + $0x10] sm:$0xff]  ;;  %v3903_v47 = vld [vmem:[%s5857_s12 + $0x8] sm:$0xff] }
 0x90f   :  { %3690 = vmatpush.bf16.msrb.mxu0 %v3904_v15 }
 0x913   :  { %3691 = vmatpush.bf16.msrb.mxu0 %v3903_v47 }
 0x915   :  { %v3545_v61 = vpop.f32.mrf.mxu2  ;;  %v3523_v5 = vpop.f32.mrf.mxu1 }
 0x916   :  { %v3550_v33 = vadd.f32 %v3545_v61, %v3526_v7  ;;  %v3527_v42 = vadd.f32 %v3523_v5, %v3502_v13  ;;  %v3902_v7 = vld [vmem:[%s5857_s12] sm:$0xff]  ;;  %v3656_v13 = vperm.slane %v5806_v41, 0  ;;  %s4453_s12 = smov [#allocation19]  }
 0x917   :  { %3692 = vmatpush.bf16.msrb.mxu0 %v3902_v7 }
 0x918   :  { %v3553_v11 = vadd.f32 %v3552_v14, %v3550_v33 }
 0x91a   :  { %v3555_v23 = vadd.f32 %v3553_v11, %v5162_v57 }
 0x91c   :  { %v3557_v8 = vsel %vm239_vm0, %v3555_v23, 0.0 }
 0x91d   :  { %3558 = vadd.xlane.f32.xlu2 %v3557_v8  ;;  %v3547_v1 = vpop.f32.mrf.mxu2 }
 0x91e   :  { %v3551_v39 = vadd.f32 %v3547_v1, %v3527_v42 }
 0x920   :  { %v3554_v34 = vadd.f32 %v3552_v14, %v3551_v39  ;;  %v4068_v14 = vld [vmem:[%s5859_s14] ss:$0 sm:$0xff]  ;;  %s3757_s14 = sshll.u32 %s4453_s12, 4  ;;  %s3758_s14 = int_to_ptr.vmem [resolvable:$true] %s3757_s14 }
 0x922   :  { %v3556_v62 = vadd.f32 %v3554_v34, %v5164_v10 }
 0x924   :  { %v3560_v21 = vsel %vm239_vm0, %v3556_v62, 0.0 }
 0x925   :  { %3561 = vadd.xlane.f32.xlu1 %v3560_v21 }
 0x990   :  { %v3559_v26 = vpop.xlane.xlu2 %3558 }
 0x991   :  { %v3563_v46 = vmul.f32 %v3559_v26, %v5136_v12 }
 0x993   :  { %v3565_v35 = vsub.f32 %v3555_v23, %v3563_v46 }
 0x995   :  { %v3567_v31 = vmul.f32 %v3565_v35, %v3565_v35 }
 0x997   :  { %v3569_v9 = vsel %vm239_vm0, %v3567_v31, 0.0 }
 0x998   :  { %3570 = vadd.xlane.f32.xlu0 %v3569_v9  ;;  %v3562_v57 = vpop.xlane.xlu1 %3561 }
 0x999   :  { %v3564_v48 = vmul.f32 %v3562_v57, %v5136_v12 }
 0x99b   :  { %v3566_v60 = vsub.f32 %v3556_v62, %v3564_v48 }
 0x99d   :  { %v3568_v32 = vmul.f32 %v3566_v60, %v3566_v60 }
 0x99f   :  { %v3572_v3 = vsel %vm239_vm0, %v3568_v32, 0.0 }
 0x9a0   :  { %3573 = vadd.xlane.f32.xlu2 %v3572_v3 }
 0xa0b   :  { %v3571_v10 = vpop.xlane.xlu0 %3570 }
 0xa0c   :  { %v3575_v16 = vmul.f32 %v3571_v10, %v5136_v12 }
 0xa0e   :  { %v3577_v36 = vadd.f32 1e-05, %v3575_v16 }
 0xa10   :  { %4139 = vrsqrt.f32 %v3577_v36  ;;  %vm3585_vm13 = vweird.f32 %v3577_v36 }
 0xa13   :  { %v3574_v63 = vpop.xlane.xlu2 %3573 }
 0xa14   :  { %v3576_v30 = vmul.f32 %v3574_v63, %v5136_v12 }
 0xa16   :  { %v4140_v59 = vpop.eup %4139  ;;  %v3578_v28 = vadd.f32 1e-05, %v3576_v30 }
 0xa17   :  { %v3580_v53 = vmul.f32 %v4140_v59, %v3577_v36  ;;  %vm3586_vm12 = vweird.f32 %v4140_v59 }
 0xa18   :  { %4141 = vrsqrt.f32 %v3578_v28  ;;  %vm3587_vm14 = vmor %vm3585_vm13, %vm3586_vm12  ;;  %vm3595_vm1 = vweird.f32 %v3578_v28 }
 0xa19   :  { %v3581_v52 = vmul.f32 %v4140_v59, %v3580_v53 }
 0xa1b   :  { %v3582_v50 = vmul.f32 0.5, %v3581_v52 }
 0xa1d   :  { %v3583_v40 = vsub.f32 1.5, %v3582_v50 }
 0xa1e   :  { %v4142_v44 = vpop.eup %4141 }
 0xa1f   :  { %v3584_v25 = vmul.f32 %v4140_v59, %v3583_v40  ;;  %v3590_v17 = vmul.f32 %v4142_v44, %v3578_v28  ;;  %vm3596_vm15 = vweird.f32 %v4142_v44 }
 0xa20   :  { %vm3597_vm2 = vmor %vm3595_vm1, %vm3596_vm15 }
 0xa21   :  { %v3591_v51 = vmul.f32 %v4142_v44, %v3590_v17  ;;  %v3588_v38 = vsel %vm3587_vm14, %v4140_v59, %v3584_v25  ;;  %v3745_v25 = vperm.slane %v5806_v41, 5 }
 0xa22   :  { %v3599_v37 = vmul.f32 %v3588_v38, %v3565_v35 }
 0xa23   :  { %v3592_v49 = vmul.f32 0.5, %v3591_v51 }
 0xa24   :  { %v3602_v54 = vmul.f32 %v3601_v20, %v3599_v37 }
 0xa25   :  { %v3593_v0 = vsub.f32 1.5, %v3592_v49 }
 0xa26   :  { %v3605_v55 = vadd.f32 %v3604_v19, %v3602_v54 }
 0xa27   :  { %v3594_v6 = vmul.f32 %v4142_v44, %v3593_v0 }
 0xa29   :  { %v3598_v18 = vsel %vm3597_vm2, %v4142_v44, %v3594_v6 }
 0xa2a   :  { %v3600_v2 = vmul.f32 %v3598_v18, %v3566_v60 }
 0xa2c   :  { %v3603_v27 = vmul.f32 %v3601_v20, %v3600_v2 }
 0xa2e   :  { %v3606_v58 = vadd.f32 %v3604_v19, %v3603_v27 }
 0xa30   :  { %v3608_v43 = vpack.c.bf16 %v3606_v58, %v3605_v55 }
 0xa32   :  { %3872 = vmatmul.msk.bf16.vlgmr.msra.gmra.mxu3 %vm239_vm0, %v3608_v43 }
 0xab5   :  { %v3640_v22 = vpop.f32.mrf.mxu3 }
 0xab6   :  { %v3641_v61 = vadd.f32 %v4068_v14, %v3640_v22 }
 0xab8   :  { %v3645_v11 = vmax.f32 %v3641_v61, 0.0 }
 0xabd   :  { %v3642_v33 = vpop.f32.mrf.mxu3 }
 0xabe   :  { %v3643_v45 = vadd.f32 %v4068_v14, %v3642_v33 }
 0xac0   :  { %v3646_v29 = vmax.f32 %v3643_v45, 0.0 }
 0xac2   :  { %v3647_v5 = vpack.c.bf16 %v3646_v29, %v3645_v11 }
 0xac4   :  { %3889 = vmatmul.msk.bf16.vlgmr.msrb.gmra.mxu0 %vm3681_vm3, %v3647_v5 }
 0xb41   :  { %v3694_v23 = vpop.f32.mrf.mxu0 }
 0xb42   :  { %v3695_v42 = vadd.f32 %v3694_v23, %v3656_v13 }
 0xb44   :  { %v3699_v8 = vadd.f32 %v3695_v42, %v3605_v55 }
 0xb46   :  { %v3701_v1 = vsel %vm239_vm0, %v3699_v8, 0.0 }
 0xb47   :  { %3702 = vadd.xlane.f32.xlu1 %v3701_v1 }
 0xb49   :  { %v3696_v39 = vpop.f32.mrf.mxu0 }
 0xb4a   :  { %v3697_v34 = vadd.f32 %v3696_v39, %v3656_v13 }
 0xb4c   :  { %v3700_v62 = vadd.f32 %v3697_v34, %v3606_v58 }
 0xb4e   :  { %v3704_v21 = vsel %vm239_vm0, %v3700_v62, 0.0 }
 0xb4f   :  { %3705 = vadd.xlane.f32.xlu0 %v3704_v21 }
 0xbba   :  { %v3703_v26 = vpop.xlane.xlu1 %3702 }
 0xbbb   :  { %v3707_v46 = vmul.f32 %v3703_v26, %v5136_v12 }
 0xbbd   :  { %v3709_v35 = vsub.f32 %v3699_v8, %v3707_v46 }
 0xbbf   :  { %v3711_v31 = vmul.f32 %v3709_v35, %v3709_v35 }
 0xbc1   :  { %v3713_v9 = vsel %vm239_vm0, %v3711_v31, 0.0 }
 0xbc2   :  { %v3706_v57 = vpop.xlane.xlu0 %3705  ;;  %3714 = vadd.xlane.f32.xlu2 %v3713_v9 }
 0xbc3   :  { %v3708_v48 = vmul.f32 %v3706_v57, %v5136_v12 }
 0xbc5   :  { %v3710_v60 = vsub.f32 %v3700_v62, %v3708_v48 }
 0xbc7   :  { %v3712_v32 = vmul.f32 %v3710_v60, %v3710_v60 }
 0xbc9   :  { %v3716_v3 = vsel %vm239_vm0, %v3712_v32, 0.0 }
 0xbca   :  { %3717 = vadd.xlane.f32.xlu1 %v3716_v3 }
 0xc35   :  { %v3715_v10 = vpop.xlane.xlu2 %3714 }
 0xc36   :  { %v3719_v16 = vmul.f32 %v3715_v10, %v5136_v12 }
 0xc38   :  { %v3721_v36 = vadd.f32 1e-05, %v3719_v16 }
 0xc3a   :  { %4143 = vrsqrt.f32 %v3721_v36  ;;  %vm3729_vm5 = vweird.f32 %v3721_v36 }
 0xc3d   :  { %v3718_v56 = vpop.xlane.xlu1 %3717 }
 0xc3e   :  { %v3720_v24 = vmul.f32 %v3718_v56, %v5136_v12  ;;  %v3748_v12 = vperm.slane %v5806_v41, 6 }
 0xc40   :  { %v4144_v63 = vpop.eup %4143  ;;  %v3722_v30 = vadd.f32 1e-05, %v3720_v24 }
 0xc41   :  { %v3724_v59 = vmul.f32 %v4144_v63, %v3721_v36  ;;  %vm3730_vm4 = vweird.f32 %v4144_v63 }
 0xc42   :  { %4145 = vrsqrt.f32 %v3722_v30  ;;  %vm3731_vm6 = vmor %vm3729_vm5, %vm3730_vm4  ;;  %vm3739_vm8 = vweird.f32 %v3722_v30 }
 0xc43   :  { %v3725_v28 = vmul.f32 %v4144_v63, %v3724_v59 }
 0xc45   :  { %v3726_v53 = vmul.f32 0.5, %v3725_v28 }
 0xc47   :  { %v3727_v52 = vsub.f32 1.5, %v3726_v53 }
 0xc48   :  { %v4146_v50 = vpop.eup %4145 }
 0xc49   :  { %v3728_v40 = vmul.f32 %v4144_v63, %v3727_v52  ;;  %v3734_v44 = vmul.f32 %v4146_v50, %v3722_v30  ;;  %vm3740_vm7 = vweird.f32 %v4146_v50 }
 0xc4a   :  { %vm3741_vm9 = vmor %vm3739_vm8, %vm3740_vm7 }
 0xc4b   :  { %v3732_v17 = vsel %vm3731_vm6, %v4144_v63, %v3728_v40  ;;  %v3735_v51 = vmul.f32 %v4146_v50, %v3734_v44 }
 0xc4c   :  { %v3743_v38 = vmul.f32 %v3732_v17, %v3709_v35 }
 0xc4d   :  { %v3736_v49 = vmul.f32 0.5, %v3735_v51 }
 0xc4e   :  { %v3746_v0 = vmul.f32 %v3745_v25, %v3743_v38 }
 0xc4f   :  { %v3737_v20 = vsub.f32 1.5, %v3736_v49 }
 0xc50   :  { %v3749_v37 = vadd.f32 %v3748_v12, %v3746_v0 }
 0xc51   :  { %v3738_v6 = vmul.f32 %v4146_v50, %v3737_v20 }
 0xc52   :  { %3751 = vst.msk [vmem:[#allocation19] sm:$0xff] %vm239_vm0, %v3749_v37 }
 0xc53   :  { %v3742_v18 = vsel %vm3741_vm9, %v4146_v50, %v3738_v6 }
 0xc54   :  { %v3744_v19 = vmul.f32 %v3742_v18, %v3710_v60 }
 0xc56   :  { %v3747_v54 = vmul.f32 %v3745_v25, %v3744_v19 }
 0xc58   :  { %v3750_v41 = vadd.f32 %v3748_v12, %v3747_v54 }
 0xc5a   :  { %3752 = vst.msk [vmem:[#allocation19 + $0x8] sm:$0xff] %vm239_vm0, %v3750_v41 }
 0xc5b   :  { %3765 = dma.vmem_to_hbm [thread:$0]  %s3758_s14, 256, %s3760_s17, [#allocation4], %s4440_s16, %s4440_s16, %s4441_s0  }
 0xc5c   :  { %4426 = dma.done.wait [#allocation4], 256  }
 0xc5d   :  { %4427 = vsyncadd [#allocation4], 4294967040 }
 0xc5e   :  { %3770 = vsyncpa [#allocation3], 1 }
 0xc5f   :  { %3771 = vsyncpa [#allocation6], 1 }
 0xc60   :  { %3772 = vsyncpa [#allocation9], 1 }
 0xc61   :  { %3773 = vsyncpa [#allocation12], 1 }
 0xc62   :  { %3774 = vsyncpa [#allocation15], 1 }
 0xc63   :  { %3775 = vsyncpa [#allocation18], 1 }
 0xc64   :  { %3776 = vsyncpa [#allocation4], 1 }

</bundles_post_ra>
